<compile_context>
chip_gen: v7x
topology: tpu7x:2x2x1
jax: 0.10.0
libtpu: 0.0.40
codegen_flags: <defaults>
</compile_context>

<pallas_src>
import functools

import jax
import jax.numpy as jnp
from jax.experimental import pallas as pl
from jax.experimental.pallas import tpu as pltpu

D_IN = 1024        # size_dict['small'][0]
D_HID = 512        # size_dict['small'][1]
N_CLASSES = 3      # must be > 2 for MIL_fc_mc
C_PAD = 128        # lane-pad the class dimension (>= 128 for dense vst)
TN = 512           # instance tile (256-aligned M for the MXU)
NEG_MASK = -1e30   # baked into padded bias columns -> exp() underflows to 0


def _mil_kernel(h_ref, w1_ref, b1_ref, w2_ref, b2_ref, probs_ref):
    # h_ref:  (TN, D_IN)    bf16
    # w1_ref: (D_IN, D_HID) bf16     b1_ref: (1, D_HID) f32
    # w2_ref: (D_HID, C_PAD) bf16    b2_ref: (1, C_PAD) f32 (mask baked in)
    x = h_ref[...]

    # fc: Linear(1024, 512) + ReLU   (bf16 MXU inputs, f32 accumulation)
    h1 = jnp.dot(x, w1_ref[...], preferred_element_type=jnp.float32) + b1_ref[...]
    h1 = jnp.maximum(h1, 0.0)

    # fused n_classes Linear(512, 1) heads; padded class columns get NEG_MASK bias
    logits = jnp.dot(h1.astype(jnp.bfloat16), w2_ref[...],
                     preferred_element_type=jnp.float32) + b2_ref[...]

    # softmax over the class dim (f32); padded columns exp() to exactly 0
    m = jnp.max(logits, axis=-1, keepdims=True)
    e = jnp.exp(logits - m)
    s = jnp.sum(e, axis=-1, keepdims=True)
    probs_ref[...] = e * pl.reciprocal(s, approx=True)


@functools.partial(jax.jit, static_argnames=("n_classes", "return_features"))
def mil_fc_mc_forward(h, w1, b1, w2, b2, n_classes=N_CLASSES,
                      return_features=False):
    """Pallas implementation of MIL_fc_mc.forward.

    h:  [N, 1024] float32 instance features (the bag)
    w1: [1024, 512], b1: [512]
    w2: [512, n_classes] (fused classifier heads), b2: [n_classes]
    Returns (top_instance, Y_prob, Y_hat, y_probs, results_dict).
    """
    N = h.shape[0]
    num_tiles = (N + TN - 1) // TN
    n_pad = num_tiles * TN

    # pad the bag to a TN multiple; padded rows are sliced off after the call.
    h_p = jnp.pad(h.astype(jnp.bfloat16), ((0, n_pad - N), (0, 0)))

    w1_b = w1.astype(jnp.bfloat16)
    b1_p = b1.reshape(1, D_HID).astype(jnp.float32)
    # fused classifier heads, lane-padded to C_PAD; class mask baked into bias
    w2_p = jnp.pad(w2.astype(jnp.bfloat16), ((0, 0), (0, C_PAD - n_classes)))
    b2_p = jnp.pad(b2.astype(jnp.float32), (0, C_PAD - n_classes),
                   constant_values=NEG_MASK).reshape(1, C_PAD)

    flops = 2 * n_pad * (D_IN * D_HID + D_HID * C_PAD)
    bytes_accessed = (h_p.size * 2 + w1_b.size * 2 + w2_p.size * 2
                      + b1_p.size * 4 + b2_p.size * 4 + n_pad * C_PAD * 4)

    probs_p = pl.pallas_call(
        _mil_kernel,
        out_shape=jax.ShapeDtypeStruct((n_pad, C_PAD), jnp.float32),
        grid_spec=pltpu.PrefetchScalarGridSpec(
            num_scalar_prefetch=0,
            grid=(num_tiles,),
            in_specs=[
                pl.BlockSpec((TN, D_IN), lambda i: (i, 0)),        # streamed h
                pl.BlockSpec((D_IN, D_HID), lambda i: (0, 0)),     # resident W1
                pl.BlockSpec((1, D_HID), lambda i: (0, 0)),        # resident b1
                pl.BlockSpec((D_HID, C_PAD), lambda i: (0, 0)),    # resident W2
                pl.BlockSpec((1, C_PAD), lambda i: (0, 0)),        # resident b2
            ],
            out_specs=pl.BlockSpec((TN, C_PAD), lambda i: (i, 0)),
        ),
        compiler_params=pltpu.CompilerParams(
            dimension_semantics=("parallel",)),
        cost_estimate=pl.CostEstimate(
            flops=flops,
            transcendentals=n_pad * C_PAD,
            bytes_accessed=bytes_accessed,
        ),
    )(h_p, w1_b, b1_p, w2_p, b2_p)

    y_probs = probs_p[:N, :n_classes]                        # [N, C]

    # --- selection glue (matches torch semantics, top_k == 1) ---
    m = jnp.argmax(y_probs.reshape(1, -1), axis=1)           # flat argmax
    top_row = m // n_classes                                 # instance index (1,)
    Y_hat = m % n_classes                                    # class index    (1,)
    Y_prob = y_probs[top_row]                                # (1, C)

    # recompute logits (and hidden features) for the single selected instance
    # in f32 plain JAX -- one 1x1024 matvec, avoids a second full [N, C_PAD]
    # writeback from the kernel.
    top_h1 = jnp.maximum(h[top_row].astype(jnp.float32) @ w1 + b1, 0.0)  # (1, 512)
    top_instance = top_h1 @ w2 + b2                                       # (1, C)

    results_dict = {}
    if return_features:
        results_dict['features'] = top_h1
    return top_instance, Y_prob, Y_hat, y_probs, results_dict


def _init_params(key, n_classes=N_CLASSES):
    """Deterministic xavier-normal-like init (mimics initialize_weights)."""
    k1, k2 = jax.random.split(key, 2)
    std1 = (2.0 / (D_IN + D_HID)) ** 0.5
    w1 = std1 * jax.random.normal(k1, (D_IN, D_HID), jnp.float32)
    b1 = jnp.zeros((D_HID,), jnp.float32)
    std2 = (2.0 / (D_HID + 1)) ** 0.5
    w2 = std2 * jax.random.normal(k2, (D_HID, n_classes), jnp.float32)
    b2 = jnp.zeros((n_classes,), jnp.float32)
    return w1, b1, w2, b2


def _reference_forward(h, w1, b1, w2, b2):
    """Pure-JAX f32 reference of the torch module (for a sanity check)."""
    h1 = jnp.maximum(h @ w1 + b1, 0.0)
    logits = h1 @ w2 + b2
    return jax.nn.softmax(logits, axis=1)


if __name__ == "__main__":
    key = jax.random.PRNGKey(0)
    k_h, k_p = jax.random.split(key)

    N = 300  # bag size (not a multiple of TN, exercises the padded last tile)
    h = jax.random.normal(k_h, (N, D_IN), jnp.float32)
    w1, b1, w2, b2 = _init_params(k_p, N_CLASSES)

    top_instance, Y_prob, Y_hat, y_probs, results_dict = jax.block_until_ready(
        mil_fc_mc_forward(h, w1, b1, w2, b2, n_classes=N_CLASSES,
                          return_features=True))

    # structural checks
    assert top_instance.shape == (1, N_CLASSES)
    assert Y_prob.shape == (1, N_CLASSES)
    assert Y_hat.shape == (1,)
    assert y_probs.shape == (N, N_CLASSES)
    assert results_dict['features'].shape == (1, D_HID)

    # softmax rows sum to ~1 (approx reciprocal + bf16 matmuls -> loose atol)
    assert jnp.allclose(jnp.sum(y_probs, axis=1), 1.0, atol=1e-2)

    # numerical sanity vs. f32 reference (bf16 MXU inputs -> generous tol)
    ref_probs = _reference_forward(h, w1, b1, w2, b2)
    assert jnp.allclose(y_probs, ref_probs, atol=5e-2)

    print("KERNEL_OK")
</pallas_src>

<mosaic_0001>
module attributes {stable_mosaic.version = 11 : i64} {
  func.func @_mil_kernel(%arg0: i32, %arg1: memref<512x1024xbf16, #tpu.memory_space<vmem>>, %arg2: memref<1024x512xbf16, #tpu.memory_space<vmem>>, %arg3: memref<1x512xf32, #tpu.memory_space<vmem>>, %arg4: memref<512x128xbf16, #tpu.memory_space<vmem>>, %arg5: memref<1x128xf32, #tpu.memory_space<vmem>>, %arg6: memref<512x128xf32, #tpu.memory_space<vmem>>) attributes {dimension_semantics = [#tpu.dimension_semantics<parallel>], iteration_bounds = array<i64: 1>, scalar_prefetch = 0 : i64, scratch_operands = 0 : i64, tpu.core_type = #tpu.core_type<tc>, window_params = [{transform_indices = @transform_0, window_bounds = array<i64: 512, 1024>}, {pipeline_mode = #tpu.pipeline_mode<synchronous>, transform_indices = @transform_1, window_bounds = array<i64: 1024, 512>}, {pipeline_mode = #tpu.pipeline_mode<synchronous>, transform_indices = @transform_2, window_bounds = array<i64: 1, 512>}, {pipeline_mode = #tpu.pipeline_mode<synchronous>, transform_indices = @transform_3, window_bounds = array<i64: 512, 128>}, {pipeline_mode = #tpu.pipeline_mode<synchronous>, transform_indices = @transform_4, window_bounds = array<i64: 1, 128>}, {transform_indices = @transform_5, window_bounds = array<i64: 512, 128>}]} {
    %c0 = arith.constant 0 : index
    %c0_0 = arith.constant 0 : index
    %0 = vector.load %arg1[%c0, %c0_0] : memref<512x1024xbf16, #tpu.memory_space<vmem>>, vector<512x1024xbf16>
    %c0_1 = arith.constant 0 : index
    %c0_2 = arith.constant 0 : index
    %1 = vector.load %arg2[%c0_1, %c0_2] : memref<1024x512xbf16, #tpu.memory_space<vmem>>, vector<1024x512xbf16>
    %cst = arith.constant dense<0.000000e+00> : vector<512x512xf32>
    %2 = tpu.matmul %0, %1, %cst {dimension_numbers = #tpu.dot_dimension_numbers<[1], [0], [0], [1], [0, 0, 1, 1], [], []>} : vector<512x1024xbf16>, vector<1024x512xbf16>, vector<512x512xf32> -> vector<512x512xf32>
    %c0_3 = arith.constant 0 : index
    %c0_4 = arith.constant 0 : index
    %3 = vector.load %arg3[%c0_3, %c0_4] : memref<1x512xf32, #tpu.memory_space<vmem>>, vector<1x512xf32>
    %4 = vector.broadcast %3 : vector<1x512xf32> to vector<512x512xf32>
    %5 = arith.addf %2, %4 : vector<512x512xf32>
    %cst_5 = arith.constant 0.000000e+00 : f32
    %6 = vector.broadcast %cst_5 : f32 to vector<512x512xf32>
    %7 = arith.maximumf %5, %6 : vector<512x512xf32>
    %8 = arith.truncf %7 : vector<512x512xf32> to vector<512x512xbf16>
    %c0_6 = arith.constant 0 : index
    %c0_7 = arith.constant 0 : index
    %9 = vector.load %arg4[%c0_6, %c0_7] : memref<512x128xbf16, #tpu.memory_space<vmem>>, vector<512x128xbf16>
    %cst_8 = arith.constant dense<0.000000e+00> : vector<512x128xf32>
    %10 = tpu.matmul %8, %9, %cst_8 {dimension_numbers = #tpu.dot_dimension_numbers<[1], [0], [0], [1], [0, 0, 1, 1], [], []>} : vector<512x512xbf16>, vector<512x128xbf16>, vector<512x128xf32> -> vector<512x128xf32>
    %c0_9 = arith.constant 0 : index
    %c0_10 = arith.constant 0 : index
    %11 = vector.load %arg5[%c0_9, %c0_10] : memref<1x128xf32, #tpu.memory_space<vmem>>, vector<1x128xf32>
    %12 = vector.broadcast %11 : vector<1x128xf32> to vector<512x128xf32>
    %13 = arith.addf %10, %12 : vector<512x128xf32>
    %cst_11 = arith.constant dense<0xFF800000> : vector<512xf32>
    %14 = vector.multi_reduction <maximumf>, %13, %cst_11 [1] : vector<512x128xf32> to vector<512xf32>
    %15 = vector.shape_cast %14 : vector<512xf32> to vector<512x1xf32>
    %16 = vector.broadcast %15 : vector<512x1xf32> to vector<512x128xf32>
    %17 = arith.subf %13, %16 : vector<512x128xf32>
    %18 = math.exp %17 : vector<512x128xf32>
    %cst_12 = arith.constant dense<0.000000e+00> : vector<512xf32>
    %19 = vector.multi_reduction <add>, %18, %cst_12 [1] : vector<512x128xf32> to vector<512xf32>
    %20 = vector.shape_cast %19 : vector<512xf32> to vector<512x1xf32>
    %21 = tpu.reciprocal %20 {approx = true} : vector<512x1xf32> -> vector<512x1xf32>
    %22 = vector.broadcast %21 : vector<512x1xf32> to vector<512x128xf32>
    %23 = arith.mulf %18, %22 : vector<512x128xf32>
    %c0_13 = arith.constant 0 : index
    %c0_14 = arith.constant 0 : index
    %24 = vector.load %arg6[%c0_13, %c0_14] : memref<512x128xf32, #tpu.memory_space<vmem>>, vector<512x128xf32>
    tpu.vector_store %arg6[%c0_13, %c0_14], %23 {strides = array<i32>} : memref<512x128xf32, #tpu.memory_space<vmem>>, vector<512x128xf32>,
    return
  }
  func.func @transform_0(%arg0: i32) -> (i32, i32) {
    %c0_i32 = arith.constant 0 : i32
    %c0_i32_0 = arith.constant 0 : i32
    return %arg0, %c0_i32 : i32, i32
  }
  func.func @transform_1(%arg0: i32) -> (i32, i32) {
    %c0_i32 = arith.constant 0 : i32
    %c0_i32_0 = arith.constant 0 : i32
    %c0_i32_1 = arith.constant 0 : i32
    return %c0_i32, %c0_i32_0 : i32, i32
  }
  func.func @transform_2(%arg0: i32) -> (i32, i32) {
    %c0_i32 = arith.constant 0 : i32
    %c0_i32_0 = arith.constant 0 : i32
    %c0_i32_1 = arith.constant 0 : i32
    return %c0_i32, %c0_i32_0 : i32, i32
  }
  func.func @transform_3(%arg0: i32) -> (i32, i32) {
    %c0_i32 = arith.constant 0 : i32
    %c0_i32_0 = arith.constant 0 : i32
    %c0_i32_1 = arith.constant 0 : i32
    return %c0_i32, %c0_i32_0 : i32, i32
  }
  func.func @transform_4(%arg0: i32) -> (i32, i32) {
    %c0_i32 = arith.constant 0 : i32
    %c0_i32_0 = arith.constant 0 : i32
    %c0_i32_1 = arith.constant 0 : i32
    return %c0_i32, %c0_i32_0 : i32, i32
  }
  func.func @transform_5(%arg0: i32) -> (i32, i32) {
    %c0_i32 = arith.constant 0 : i32
    %c0_i32_0 = arith.constant 0 : i32
    return %arg0, %c0_i32 : i32, i32
  }
}

</mosaic_0001>

<bundles_post_ra>
// kernel: mil_fc_mc_forward.1
= control target key start
LH: loop header
LB: loop body
LE: loop exit
PB: predicated region body
PF: predicated region fallthrough
CT: control target
= control target key end

     0   :  { %s14569_s1 = inlined_call_operand.vmem [shape: bf16[1024,512], index: 1, kind: input, shape index: {}]   ;;  %s14570_s0 = inlined_call_operand.vmem [shape: bf16[512,1024], index: 0, kind: input, shape index: {}]   ;;  %s14571_s3 = inlined_call_operand.vmem [shape: bf16[512,128], index: 3, kind: input, shape index: {}]   ;;  %s14572_s2 = inlined_call_operand.vmem [shape: f32[1,512], index: 2, kind: input, shape index: {}]   ;;  %s14573_s4 = inlined_call_operand.vmem [shape: f32[1,128], index: 4, kind: input, shape index: {}]   ;;  %s14574_s5 = inlined_call_operand.vmem [shape: f32[512,128], index: 5, kind: output, shape index: {}]  }
   0x1   :  { %v9570_v0 = vld [vmem:[%s14569_s1 + $0x4] ss:$16 sps:$4 sm:$0xff]   ;;  %v9574_v2 = vld [vmem:[%s14569_s1] ss:$16 sps:$4 sm:$0xff]   ;;  %v22_v49 = vld [vmem:[%s14570_s0 + $0x8] sm:$0xff] }
   0x2   :  { %v9572_v1 = vld [vmem:[%s14569_s1 + $0x204] ss:$16 sps:$4 sm:$0xff]   ;;  %3115 = vmatprep.subr.bf16.mxu1 %v9570_v0  ;;  %v9575_v3 = vld [vmem:[%s14569_s1 + $0x200] ss:$16 sps:$4 sm:$0xff]   ;;  %v26_v50 = vld [vmem:[%s14570_s0 + $0x28] sm:$0xff] }
   0x3   :  { %3468 = vmatprep.subr.bf16.mxu0 %v9572_v1  ;;  %v9576_v4 = vld [vmem:[%s14569_s1 + $0x24] ss:$16 sps:$4 sm:$0xff]   ;;  %3116 = vmatpush1.bf16.msra.mxu1 %v9574_v2  ;;  %v9580_v6 = vld [vmem:[%s14569_s1 + $0x20] ss:$16 sps:$4 sm:$0xff]   ;;  %v10438_v55 = vcombine.high %v22_v49, %v26_v50 }
   0x4   :  { %3469 = vmatpush1.bf16.msra.mxu0 %v9575_v3  ;;  %v9578_v5 = vld [vmem:[%s14569_s1 + $0x224] ss:$16 sps:$4 sm:$0xff]   ;;  %3117 = vmatprep.subr.bf16.mxu1 %v9576_v4  ;;  %v9581_v7 = vld [vmem:[%s14569_s1 + $0x220] ss:$16 sps:$4 sm:$0xff]  }
   0x5   :  { %3470 = vmatprep.subr.bf16.mxu0 %v9578_v5  ;;  %v9582_v8 = vld [vmem:[%s14569_s1 + $0x44] ss:$16 sps:$4 sm:$0xff]   ;;  %v9586_v10 = vld [vmem:[%s14569_s1 + $0x40] ss:$16 sps:$4 sm:$0xff]   ;;  %14792 = vst [vmem:[#allocation2_spill] sm:$0xff] %v10438_v55  ;;  %3500 = vmatprep.mubr.bf16.mxu0 %v10438_v55 }
   0x6   :  { %v9584_v9 = vld [vmem:[%s14569_s1 + $0x244] ss:$16 sps:$4 sm:$0xff]   ;;  %v9587_v11 = vld [vmem:[%s14569_s1 + $0x240] ss:$16 sps:$4 sm:$0xff]  }
   0x7   :  { %3118 = vmatpush1.bf16.msra.mxu1 %v9580_v6  ;;  %v9588_v12 = vld [vmem:[%s14569_s1 + $0x64] ss:$16 sps:$4 sm:$0xff]   ;;  %v9592_v14 = vld [vmem:[%s14569_s1 + $0x60] ss:$16 sps:$4 sm:$0xff]   ;;  %v9668_v6 = vld [vmem:[%s14569_s1 + $0xc] ss:$16 sps:$4 sm:$0xff]  }
   0x8   :  { %3471 = vmatpush1.bf16.msra.mxu0 %v9581_v7  ;;  %3119 = vmatprep.subr.bf16.mxu1 %v9582_v8  ;;  %v9590_v13 = vld [vmem:[%s14569_s1 + $0x264] ss:$16 sps:$4 sm:$0xff]   ;;  %v9593_v15 = vld [vmem:[%s14569_s1 + $0x260] ss:$16 sps:$4 sm:$0xff]  }
   0x9   :  { %3472 = vmatprep.subr.bf16.mxu0 %v9584_v9  ;;  %v9594_v16 = vld [vmem:[%s14569_s1 + $0x84] ss:$16 sps:$4 sm:$0xff]   ;;  %v9598_v18 = vld [vmem:[%s14569_s1 + $0x80] ss:$16 sps:$4 sm:$0xff]   ;;  %v30_v9 = vld [vmem:[%s14570_s0 + $0x48] sm:$0xff] }
   0xa   :  { %v9596_v17 = vld [vmem:[%s14569_s1 + $0x284] ss:$16 sps:$4 sm:$0xff]   ;;  %v9599_v19 = vld [vmem:[%s14569_s1 + $0x280] ss:$16 sps:$4 sm:$0xff]  }
   0xb   :  { %3120 = vmatpush1.bf16.msra.mxu1 %v9586_v10  ;;  %v9600_v20 = vld [vmem:[%s14569_s1 + $0xa4] ss:$16 sps:$4 sm:$0xff]   ;;  %v9604_v22 = vld [vmem:[%s14569_s1 + $0xa0] ss:$16 sps:$4 sm:$0xff]   ;;  %v34_v10 = vld [vmem:[%s14570_s0 + $0x68] sm:$0xff] }
   0xc   :  { %3473 = vmatpush1.bf16.msra.mxu0 %v9587_v11  ;;  %3121 = vmatprep.subr.bf16.mxu1 %v9588_v12  ;;  %v9602_v21 = vld [vmem:[%s14569_s1 + $0x2a4] ss:$16 sps:$4 sm:$0xff]   ;;  %v9605_v23 = vld [vmem:[%s14569_s1 + $0x2a0] ss:$16 sps:$4 sm:$0xff]   ;;  %v10501_v12 = vcombine.low %v22_v49, %v26_v50  ;;  %v9684_v49 = vld [vmem:[%s14569_s1 + $0xc8] ss:$16 sps:$4 sm:$0xff]  }
   0xd   :  { %3474 = vmatprep.subr.bf16.mxu0 %v9590_v13  ;;  %v9606_v24 = vld [vmem:[%s14569_s1 + $0xc4] ss:$16 sps:$4 sm:$0xff]   ;;  %v9610_v26 = vld [vmem:[%s14569_s1 + $0xc0] ss:$16 sps:$4 sm:$0xff]   ;;  %v9666_v13 = vld [vmem:[%s14569_s1 + $0x8] ss:$16 sps:$4 sm:$0xff]  }
   0xe   :  { %v9608_v25 = vld [vmem:[%s14569_s1 + $0x2c4] ss:$16 sps:$4 sm:$0xff]   ;;  %v9611_v27 = vld [vmem:[%s14569_s1 + $0x2c0] ss:$16 sps:$4 sm:$0xff]   ;;  %14793 = vst [vmem:[#allocation3_spill] sm:$0xff] %v10501_v12 }
   0xf   :  { %3122 = vmatpush1.bf16.msra.mxu1 %v9592_v14  ;;  %v9612_v28 = vld [vmem:[%s14569_s1 + $0xe4] ss:$16 sps:$4 sm:$0xff]   ;;  %v9616_v30 = vld [vmem:[%s14569_s1 + $0xe0] ss:$16 sps:$4 sm:$0xff]  }
  0x10   :  { %3475 = vmatpush1.bf16.msra.mxu0 %v9593_v15  ;;  %3123 = vmatprep.subr.bf16.mxu1 %v9594_v16  ;;  %v9614_v29 = vld [vmem:[%s14569_s1 + $0x2e4] ss:$16 sps:$4 sm:$0xff]   ;;  %v9617_v31 = vld [vmem:[%s14569_s1 + $0x2e0] ss:$16 sps:$4 sm:$0xff]   ;;  %v10508_v15 = vcombine.high %v30_v9, %v34_v10  ;;  %v9671_v16 = vld [vmem:[%s14569_s1 + $0x2c] ss:$16 sps:$4 sm:$0xff]  }
  0x11   :  { %3476 = vmatprep.subr.bf16.mxu0 %v9596_v17  ;;  %v9618_v32 = vld [vmem:[%s14569_s1 + $0x104] ss:$16 sps:$4 sm:$0xff]   ;;  %v9622_v34 = vld [vmem:[%s14569_s1 + $0x100] ss:$16 sps:$4 sm:$0xff]  }
  0x12   :  { %v9620_v33 = vld [vmem:[%s14569_s1 + $0x304] ss:$16 sps:$4 sm:$0xff]   ;;  %v9623_v35 = vld [vmem:[%s14569_s1 + $0x300] ss:$16 sps:$4 sm:$0xff]   ;;  %14794 = vst [vmem:[#allocation4_spill] sm:$0xff] %v10508_v15 }
  0x13   :  { %3124 = vmatpush1.bf16.msra.mxu1 %v9598_v18  ;;  %v9624_v36 = vld [vmem:[%s14569_s1 + $0x124] ss:$16 sps:$4 sm:$0xff]   ;;  %v9628_v38 = vld [vmem:[%s14569_s1 + $0x120] ss:$16 sps:$4 sm:$0xff]  }
  0x14   :  { %3477 = vmatpush1.bf16.msra.mxu0 %v9599_v19  ;;  %3125 = vmatprep.subr.bf16.mxu1 %v9600_v20  ;;  %v9626_v37 = vld [vmem:[%s14569_s1 + $0x324] ss:$16 sps:$4 sm:$0xff]   ;;  %v9629_v39 = vld [vmem:[%s14569_s1 + $0x320] ss:$16 sps:$4 sm:$0xff]   ;;  %v9669_v19 = vld [vmem:[%s14569_s1 + $0x28] ss:$16 sps:$4 sm:$0xff]  }
  0x15   :  { %3478 = vmatprep.subr.bf16.mxu0 %v9602_v21  ;;  %v9630_v40 = vld [vmem:[%s14569_s1 + $0x144] ss:$16 sps:$4 sm:$0xff]   ;;  %v9634_v42 = vld [vmem:[%s14569_s1 + $0x140] ss:$16 sps:$4 sm:$0xff]   ;;  %v38_v20 = vld [vmem:[%s14570_s0 + $0x88] sm:$0xff] }
  0x16   :  { %v9632_v41 = vld [vmem:[%s14569_s1 + $0x344] ss:$16 sps:$4 sm:$0xff]   ;;  %v9635_v43 = vld [vmem:[%s14569_s1 + $0x340] ss:$16 sps:$4 sm:$0xff]   ;;  %v42_v21 = vld [vmem:[%s14570_s0 + $0xa8] sm:$0xff] }
  0x17   :  { %3126 = vmatpush1.bf16.msra.mxu1 %v9604_v22  ;;  %v9636_v44 = vld [vmem:[%s14569_s1 + $0x164] ss:$16 sps:$4 sm:$0xff]   ;;  %v9640_v46 = vld [vmem:[%s14569_s1 + $0x160] ss:$16 sps:$4 sm:$0xff]   ;;  %v9674_v22 = vld [vmem:[%s14569_s1 + $0x4c] ss:$16 sps:$4 sm:$0xff]  }
  0x18   :  { %3479 = vmatpush1.bf16.msra.mxu0 %v9605_v23  ;;  %3127 = vmatprep.subr.bf16.mxu1 %v9606_v24  ;;  %v9638_v45 = vld [vmem:[%s14569_s1 + $0x364] ss:$16 sps:$4 sm:$0xff]   ;;  %v9641_v51 = vld [vmem:[%s14569_s1 + $0x360] ss:$16 sps:$4 sm:$0xff]   ;;  %v10537_v24 = vcombine.low %v30_v9, %v34_v10 }
  0x19   :  { %3480 = vmatprep.subr.bf16.mxu0 %v9608_v25  ;;  %v21_v47 = vld [vmem:[%s14570_s0] sm:$0xff] }
  0x1a   :  { %v25_v48 = vld [vmem:[%s14570_s0 + $0x20] sm:$0xff]  ;;  %14795 = vst [vmem:[#allocation5_spill] sm:$0xff] %v10537_v24 }
  0x1b   :  { %3128 = vmatpush1.bf16.msra.mxu1 %v9610_v26  ;;  %v10430_v52 = vcombine.high %v21_v47, %v25_v48  ;;  %v9642_v53 = vld [vmem:[%s14569_s1 + $0x184] ss:$16 sps:$4 sm:$0xff]   ;;  %v9646_v56 = vld [vmem:[%s14569_s1 + $0x180] ss:$16 sps:$4 sm:$0xff]   ;;  %v10499_v11 = vcombine.low %v21_v47, %v25_v48  ;;  %v10541_v26 = vcombine.high %v38_v20, %v42_v21 }
  0x1c   :  { %3481 = vmatpush1.bf16.msra.mxu0 %v9611_v27  ;;  %3129 = vmatprep.subr.bf16.mxu1 %v9612_v28  ;;  %v9644_v54 = vld [vmem:[%s14569_s1 + $0x384] ss:$16 sps:$4 sm:$0xff]   ;;  %v9647_v57 = vld [vmem:[%s14569_s1 + $0x380] ss:$16 sps:$4 sm:$0xff]   ;;  %v9672_v27 = vld [vmem:[%s14569_s1 + $0x48] ss:$16 sps:$4 sm:$0xff]  }
  0x1d   :  { %3482 = vmatprep.subr.bf16.mxu0 %v9614_v29  ;;  %3147 = vmatprep.mubr.bf16.mxu1 %v10430_v52  ;;  %v9648_v58 = vld [vmem:[%s14569_s1 + $0x1a4] ss:$16 sps:$4 sm:$0xff]   ;;  %v9652_v60 = vld [vmem:[%s14569_s1 + $0x1a0] ss:$16 sps:$4 sm:$0xff]   ;;  %14796 = vst [vmem:[#allocation6_spill] sm:$0xff] %v10541_v26 }
  0x1e   :  { %v9650_v59 = vld [vmem:[%s14569_s1 + $0x3a4] ss:$16 sps:$4 sm:$0xff]   ;;  %v9653_v61 = vld [vmem:[%s14569_s1 + $0x3a0] ss:$16 sps:$4 sm:$0xff]   ;;  %v9677_v28 = vld [vmem:[%s14569_s1 + $0x6c] ss:$16 sps:$4 sm:$0xff]  }
  0x1f   :  { %3130 = vmatpush1.bf16.msra.mxu1 %v9616_v30  ;;  %v9654_v62 = vld [vmem:[%s14569_s1 + $0x1c4] ss:$16 sps:$4 sm:$0xff]   ;;  %v9658_v0 = vld [vmem:[%s14569_s1 + $0x1c0] ss:$16 sps:$4 sm:$0xff]  }
  0x20   :  { %3483 = vmatpush1.bf16.msra.mxu0 %v9617_v31  ;;  %3131 = vmatprep.subr.bf16.mxu1 %v9618_v32  ;;  %v9656_v63 = vld [vmem:[%s14569_s1 + $0x3c4] ss:$16 sps:$4 sm:$0xff]   ;;  %v9659_v1 = vld [vmem:[%s14569_s1 + $0x3c0] ss:$16 sps:$4 sm:$0xff]   ;;  %v46_v31 = vld [vmem:[%s14570_s0 + $0xc8] sm:$0xff] }
  0x21   :  { %3484 = vmatprep.subr.bf16.mxu0 %v9620_v33  ;;  %v9660_v2 = vld [vmem:[%s14569_s1 + $0x1e4] ss:$16 sps:$4 sm:$0xff]   ;;  %v9664_v4 = vld [vmem:[%s14569_s1 + $0x1e0] ss:$16 sps:$4 sm:$0xff]   ;;  %v50_v32 = vld [vmem:[%s14570_s0 + $0xe8] sm:$0xff] }
  0x22   :  { %v9662_v3 = vld [vmem:[%s14569_s1 + $0x3e4] ss:$16 sps:$4 sm:$0xff]   ;;  %v9665_v5 = vld [vmem:[%s14569_s1 + $0x3e0] ss:$16 sps:$4 sm:$0xff]   ;;  %v9675_v33 = vld [vmem:[%s14569_s1 + $0x68] ss:$16 sps:$4 sm:$0xff]   ;;  %v10609_v48 = vcombine.low %v46_v31, %v50_v32 }
  0x23   :  { %3132 = vmatpush1.bf16.msra.mxu1 %v9622_v34  ;;  %v29_v7 = vld [vmem:[%s14570_s0 + $0x40] sm:$0xff]  ;;  %v9680_v34 = vld [vmem:[%s14569_s1 + $0x8c] ss:$16 sps:$4 sm:$0xff]  }
  0x24   :  { %3485 = vmatpush1.bf16.msra.mxu0 %v9623_v35  ;;  %3133 = vmatprep.subr.bf16.mxu1 %v9624_v36  ;;  %v33_v8 = vld [vmem:[%s14570_s0 + $0x60] sm:$0xff]  ;;  %v10573_v36 = vcombine.low %v38_v20, %v42_v21  ;;  %14799 = vst [vmem:[#allocation9_spill] sm:$0xff] %v10609_v48  ;;  %v78_v20 = vld [vmem:[%s14570_s0 + $0x1c8] sm:$0xff] }
  0x25   :  { %3486 = vmatprep.subr.bf16.mxu0 %v9626_v37  ;;  %v10506_v14 = vcombine.high %v29_v7, %v33_v8  ;;  %v37_v17 = vld [vmem:[%s14570_s0 + $0x80] sm:$0xff]  ;;  %v10535_v23 = vcombine.low %v29_v7, %v33_v8  ;;  %v9678_v37 = vld [vmem:[%s14569_s1 + $0x88] ss:$16 sps:$4 sm:$0xff]   ;;  %v9698_v8 = vld [vmem:[%s14569_s1 + $0x14c] ss:$16 sps:$4 sm:$0xff]  }
  0x26   :  { %v41_v18 = vld [vmem:[%s14570_s0 + $0xa0] sm:$0xff]  ;;  %14797 = vst [vmem:[#allocation7_spill] sm:$0xff] %v10573_v36  ;;  %v9693_v7 = vld [vmem:[%s14569_s1 + $0x128] ss:$16 sps:$4 sm:$0xff]  }
  0x27   :  { %3134 = vmatpush1.bf16.msra.mxu1 %v9628_v38  ;;  %v10539_v25 = vcombine.high %v37_v17, %v41_v18  ;;  %v45_v29 = vld [vmem:[%s14570_s0 + $0xc0] sm:$0xff]  ;;  %v10571_v35 = vcombine.low %v37_v17, %v41_v18  ;;  %v82_v21 = vld [vmem:[%s14570_s0 + $0x1e8] sm:$0xff] }
  0x28   :  { %3487 = vmatpush1.bf16.msra.mxu0 %v9629_v39  ;;  %3135 = vmatprep.subr.bf16.mxu1 %v9630_v40  ;;  %v49_v30 = vld [vmem:[%s14570_s0 + $0xe0] sm:$0xff]  ;;  %v10580_v39 = vcombine.high %v46_v31, %v50_v32  ;;  %v9683_v40 = vld [vmem:[%s14569_s1 + $0xac] ss:$16 sps:$4 sm:$0xff]   ;;  %v9699_v31 = vld [vmem:[%s14569_s1 + $0x168] ss:$16 sps:$4 sm:$0xff]  }
  0x29   :  { %3488 = vmatprep.subr.bf16.mxu0 %v9632_v41  ;;  %v10578_v38 = vcombine.high %v45_v29, %v49_v30  ;;  %v53_v41 = vld [vmem:[%s14570_s0 + $0x100] sm:$0xff]  ;;  %v10607_v47 = vcombine.low %v45_v29, %v49_v30  ;;  %v10712_v29 = vcombine.high %v78_v20, %v82_v21  ;;  %v9701_v32 = vld [vmem:[%s14569_s1 + $0x16c] ss:$16 sps:$4 sm:$0xff]  }
  0x2a   :  { %14798 = vst [vmem:[#allocation8_spill] sm:$0xff] %v10580_v39  ;;  %v77_v18 = vld [vmem:[%s14570_s0 + $0x1c0] sm:$0xff] }
  0x2b   :  { %3136 = vmatpush1.bf16.msra.mxu1 %v9634_v42  ;;  %v57_v42 = vld [vmem:[%s14570_s0 + $0x120] sm:$0xff]  ;;  %14806 = vst [vmem:[#allocation16_spill] sm:$0xff] %v10712_v29 }
  0x2c   :  { %3489 = vmatpush1.bf16.msra.mxu0 %v9635_v43  ;;  %3137 = vmatprep.subr.bf16.mxu1 %v9636_v44  ;;  %v54_v43 = vld [vmem:[%s14570_s0 + $0x108] sm:$0xff]  ;;  %v10614_v50 = vcombine.high %v53_v41, %v57_v42  ;;  %v85_v30 = vld [vmem:[%s14570_s0 + $0x200] sm:$0xff] }
  0x2d   :  { %3490 = vmatprep.subr.bf16.mxu0 %v9638_v45  ;;  %v58_v44 = vld [vmem:[%s14570_s0 + $0x128] sm:$0xff]  ;;  %v237_v55 = vld [vmem:[%s14570_s0 + $0x6c0] sm:$0xff] }
  0x2e   :  { %v9681_v45 = vld [vmem:[%s14569_s1 + $0xa8] ss:$16 sps:$4 sm:$0xff]  }
  0x2f   :  { %3138 = vmatpush1.bf16.msra.mxu1 %v9640_v46  ;;  %v9686_v46 = vld [vmem:[%s14569_s1 + $0xcc] ss:$16 sps:$4 sm:$0xff]  }
  0x30   :  { %3491 = vmatpush1.bf16.msra.mxu0 %v9641_v51  ;;  %3139 = vmatprep.subr.bf16.mxu1 %v9642_v53  ;;  %v10616_v51 = vcombine.high %v54_v43, %v58_v44  ;;  %v9689_v53 = vld [vmem:[%s14569_s1 + $0xec] ss:$16 sps:$4 sm:$0xff]  }
  0x31   :  { %3492 = vmatprep.subr.bf16.mxu0 %v9644_v54  ;;  %v61_v54 = vld [vmem:[%s14570_s0 + $0x140] sm:$0xff] }
  0x32   :  { %14800 = vst [vmem:[#allocation10_spill] sm:$0xff] %v10616_v51 }
  0x33   :  { %3140 = vmatpush1.bf16.msra.mxu1 %v9646_v56  ;;  %v65_v56 = vld [vmem:[%s14570_s0 + $0x160] sm:$0xff] }
  0x34   :  { %3493 = vmatpush1.bf16.msra.mxu0 %v9647_v57  ;;  %3141 = vmatprep.subr.bf16.mxu1 %v9648_v58  ;;  %v62_v57 = vld [vmem:[%s14570_s0 + $0x148] sm:$0xff]  ;;  %v10679_v9 = vcombine.low %v61_v54, %v65_v56 }
  0x35   :  { %3494 = vmatprep.subr.bf16.mxu0 %v9650_v59  ;;  %v66_v58 = vld [vmem:[%s14570_s0 + $0x168] sm:$0xff] }
  0x36   :  { %v9687_v59 = vld [vmem:[%s14569_s1 + $0xe8] ss:$16 sps:$4 sm:$0xff]   ;;  %v10681_v10 = vcombine.low %v62_v57, %v66_v58 }
  0x37   :  { %3142 = vmatpush1.bf16.msra.mxu1 %v9652_v60  ;;  %v9692_v60 = vld [vmem:[%s14569_s1 + $0x10c] ss:$16 sps:$4 sm:$0xff]  }
  0x38   :  { %3495 = vmatpush1.bf16.msra.mxu0 %v9653_v61  ;;  %3143 = vmatprep.subr.bf16.mxu1 %v9654_v62  ;;  %v10643_v61 = vcombine.low %v53_v41, %v57_v42  ;;  %v10645_v62 = vcombine.low %v54_v43, %v58_v44  ;;  %14803 = vst [vmem:[#allocation13_spill] sm:$0xff] %v10681_v10  ;;  %v93_v44 = vld [vmem:[%s14570_s0 + $0x240] sm:$0xff] }
  0x39   :  { %3496 = vmatprep.subr.bf16.mxu0 %v9656_v63  ;;  %v9690_v63 = vld [vmem:[%s14569_s1 + $0x108] ss:$16 sps:$4 sm:$0xff]   ;;  %v10738_v41 = vcombine.low %v78_v20, %v82_v21  ;;  %v9713_v20 = vld [vmem:[%s14569_s1 + $0x444] ss:$16 sps:$4 sm:$0xff]   ;;  %v9711_v21 = vld [vmem:[%s14569_s1 + $0x440] ss:$16 sps:$4 sm:$0xff]  }
  0x3a   :  { %14801 = vst [vmem:[#allocation11_spill] sm:$0xff] %v10645_v62 }
  0x3b   :  { %3144 = vmatpush1.bf16.msra.mxu1 %v9658_v0  ;;  %v10650_v0 = vcombine.high %v61_v54, %v65_v56  ;;  %14807 = vst [vmem:[#allocation17_spill] sm:$0xff] %v10738_v41 }
  0x3c   :  { %3497 = vmatpush1.bf16.msra.mxu0 %v9659_v1  ;;  %3145 = vmatprep.subr.bf16.mxu1 %v9660_v2  ;;  %v10652_v1 = vcombine.high %v62_v57, %v66_v58  ;;  %v9695_v2 = vld [vmem:[%s14569_s1 + $0x12c] ss:$16 sps:$4 sm:$0xff]   ;;  %v9704_v58 = vld [vmem:[%s14569_s1 + $0x404] ss:$16 sps:$4 sm:$0xff]  }
  0x3d   :  { %3498 = vmatprep.subr.bf16.mxu0 %v9662_v3  ;;  %v69_v3 = vld [vmem:[%s14570_s0 + $0x180] sm:$0xff] }
  0x3e   :  { %14802 = vst [vmem:[#allocation12_spill] sm:$0xff] %v10652_v1 }
  0x3f   :  { %3146 = vmatpush1.bf16.msra.mxu1 %v9664_v4  ;;  %v73_v4 = vld [vmem:[%s14570_s0 + $0x1a0] sm:$0xff] }
  0x40   :  { %3499 = vmatpush1.bf16.msra.mxu0 %v9665_v5  ;;  %4527 = vmatprep.subr.bf16.mxu1 %v9668_v6  ;;  %v70_v5 = vld [vmem:[%s14570_s0 + $0x188] sm:$0xff] }
  0x41   :  { %v74_v6 = vld [vmem:[%s14570_s0 + $0x1a8] sm:$0xff]  ;;  %3821 = vmatprep.subr.bf16.mxu0 %v9704_v58  ;;  %v9719_v58 = vld [vmem:[%s14569_s1 + $0x484] ss:$16 sps:$4 sm:$0xff]  }
  0x42   :  { %3148 = vmatmul.mubr.bf16.vlgmr.msra.gmra.mrb[0].mxu1 %v10499_v11  ;;  %v10688_v17 = vcombine.high %v70_v5, %v74_v6 }
  0x43   :  { %3501 = vmatmul.mubr.bf16.vlgmr.msra.gmra.mrb[0].mxu0 %v10501_v12  ;;  %4528 = vmatpush1.bf16.msra.mxu1 %v9666_v13  ;;  %v9696_v13 = vld [vmem:[%s14569_s1 + $0x148] ss:$16 sps:$4 sm:$0xff]  }
  0x44   :  { %3157 = vmatprep.mubr.bf16.mxu1 %v10506_v14  ;;  %3510 = vmatprep.mubr.bf16.mxu0 %v10508_v15  ;;  %14804 = vst [vmem:[#allocation14_spill] sm:$0xff] %v10688_v17  ;;  %v229_v15 = vld [vmem:[%s14570_s0 + $0x680] sm:$0xff] }
  0x45   :  { %4529 = vmatprep.subr.bf16.mxu1 %v9671_v16  ;;  %v10686_v16 = vcombine.high %v69_v3, %v73_v4 }
  0x47   :  { %4530 = vmatpush1.bf16.msra.mxu1 %v9669_v19  ;;  %v81_v19 = vld [vmem:[%s14570_s0 + $0x1e0] sm:$0xff] }
  0x48   :  { %4531 = vmatprep.subr.bf16.mxu1 %v9674_v22  ;;  %v10706_v22 = vcombine.low %v69_v3, %v73_v4  ;;  %v105_v3 = vld [vmem:[%s14570_s0 + $0x2a0] sm:$0xff]  ;;  %v102_v4 = vld [vmem:[%s14570_s0 + $0x288] sm:$0xff] }
  0x4a   :  { %3158 = vmatmul.mubr.bf16.gmra.mrb[4].mxu1 %v10535_v23 }
  0x4b   :  { %3511 = vmatmul.mubr.bf16.gmra.mrb[4].mxu0 %v10537_v24  ;;  %3167 = vmatprep.mubr.bf16.mxu1 %v10539_v25 }
  0x4c   :  { %3520 = vmatprep.mubr.bf16.mxu0 %v10541_v26  ;;  %4532 = vmatpush1.bf16.msra.mxu1 %v9672_v27  ;;  %v10708_v27 = vcombine.low %v70_v5, %v74_v6  ;;  %v9710_v5 = vld [vmem:[%s14569_s1 + $0x424] ss:$16 sps:$4 sm:$0xff]   ;;  %v106_v6 = vld [vmem:[%s14570_s0 + $0x2a8] sm:$0xff] }
  0x4d   :  { %4533 = vmatprep.subr.bf16.mxu1 %v9677_v28  ;;  %v10710_v28 = vcombine.high %v77_v18, %v81_v19  ;;  %v221_v26 = vld [vmem:[%s14570_s0 + $0x640] sm:$0xff] }
  0x4e   :  { %14805 = vst [vmem:[#allocation15_spill] sm:$0xff] %v10708_v27 }
  0x50   :  { %4534 = vmatpush1.bf16.msra.mxu1 %v9675_v33  ;;  %v89_v33 = vld [vmem:[%s14570_s0 + $0x220] sm:$0xff] }
  0x51   :  { %4535 = vmatprep.subr.bf16.mxu1 %v9680_v34  ;;  %v86_v34 = vld [vmem:[%s14570_s0 + $0x208] sm:$0xff]  ;;  %v10740_v42 = vcombine.high %v85_v30, %v89_v33 }
  0x52   :  { %3168 = vmatmul.mubr.bf16.gmra.mrb[8].mxu1 %v10571_v35 }
  0x53   :  { %3521 = vmatmul.mubr.bf16.gmra.mrb[8].mxu0 %v10573_v36  ;;  %3177 = vmatprep.mubr.bf16.mxu1 %v10578_v38 }
  0x54   :  { %3530 = vmatprep.mubr.bf16.mxu0 %v10580_v39  ;;  %4536 = vmatpush1.bf16.msra.mxu1 %v9678_v37  ;;  %v90_v37 = vld [vmem:[%s14570_s0 + $0x228] sm:$0xff]  ;;  %v213_v39 = vld [vmem:[%s14570_s0 + $0x600] sm:$0xff] }
  0x55   :  { %4537 = vmatprep.subr.bf16.mxu1 %v9683_v40  ;;  %v10736_v40 = vcombine.low %v77_v18, %v81_v19  ;;  %v10742_v43 = vcombine.high %v86_v34, %v90_v37  ;;  %v10762_v54 = vcombine.low %v86_v34, %v90_v37  ;;  %v10808_v19 = vcombine.high %v102_v4, %v106_v6  ;;  %v114_v34 = vld [vmem:[%s14570_s0 + $0x2e8] sm:$0xff]  ;;  %v9714_v37 = vld [vmem:[%s14569_s1 + $0x460] ss:$16 sps:$4 sm:$0xff]  }
  0x57   :  { %14808 = vst [vmem:[#allocation18_spill] sm:$0xff] %v10742_v43  ;;  %14809 = vst [vmem:[#allocation19_spill] sm:$0xff] %v10762_v54 }
  0x58   :  { %4538 = vmatpush1.bf16.msra.mxu1 %v9681_v45  ;;  %v97_v45 = vld [vmem:[%s14570_s0 + $0x260] sm:$0xff]  ;;  %14812 = vst [vmem:[#allocation22_spill] sm:$0xff] %v10808_v19 }
  0x59   :  { %4539 = vmatprep.subr.bf16.mxu1 %v9686_v46  ;;  %v94_v46 = vld [vmem:[%s14570_s0 + $0x248] sm:$0xff]  ;;  %v10764_v56 = vcombine.high %v93_v44, %v97_v45 }
  0x5a   :  { %3178 = vmatmul.mubr.bf16.gmra.mrb[12].mxu1 %v10607_v47 }
  0x5b   :  { %3531 = vmatmul.mubr.bf16.gmra.mrb[12].mxu0 %v10609_v48  ;;  %3187 = vmatprep.mubr.bf16.mxu1 %v10614_v50 }
  0x5c   :  { %3540 = vmatprep.mubr.bf16.mxu0 %v10616_v51  ;;  %4540 = vmatpush1.bf16.msra.mxu1 %v9684_v49  ;;  %v98_v49 = vld [vmem:[%s14570_s0 + $0x268] sm:$0xff]  ;;  %v205_v51 = vld [vmem:[%s14570_s0 + $0x5c0] sm:$0xff] }
  0x5d   :  { %4541 = vmatprep.subr.bf16.mxu1 %v9689_v53  ;;  %v10760_v53 = vcombine.low %v85_v30, %v89_v33  ;;  %v10766_v57 = vcombine.high %v94_v46, %v98_v49  ;;  %v109_v30 = vld [vmem:[%s14570_s0 + $0x2c0] sm:$0xff]  ;;  %v110_v33 = vld [vmem:[%s14570_s0 + $0x2c8] sm:$0xff] }
  0x5f   :  { %14810 = vst [vmem:[#allocation20_spill] sm:$0xff] %v10766_v57 }
  0x60   :  { %4542 = vmatpush1.bf16.msra.mxu1 %v9687_v59  ;;  %v9702_v59 = vld [vmem:[%s14569_s1 + $0x400] ss:$16 sps:$4 sm:$0xff]  }
  0x61   :  { %4543 = vmatprep.subr.bf16.mxu1 %v9692_v60  ;;  %v101_v60 = vld [vmem:[%s14570_s0 + $0x280] sm:$0xff]  ;;  %3822 = vmatpush1.bf16.msra.mxu0 %v9702_v59 }
  0x62   :  { %3188 = vmatmul.mubr.bf16.gmra.mrb[16].mxu1 %v10643_v61  ;;  %3823 = vmatprep.subr.bf16.mxu0 %v9710_v5  ;;  %v10806_v18 = vcombine.high %v101_v60, %v105_v3  ;;  %v9717_v59 = vld [vmem:[%s14569_s1 + $0x480] ss:$16 sps:$4 sm:$0xff]   ;;  %v122_v5 = vld [vmem:[%s14570_s0 + $0x328] sm:$0xff] }
  0x63   :  { %3541 = vmatmul.mubr.bf16.gmra.mrb[16].mxu0 %v10645_v62  ;;  %3197 = vmatprep.mubr.bf16.mxu1 %v10650_v0 }
  0x64   :  { %3550 = vmatprep.mubr.bf16.mxu0 %v10652_v1  ;;  %4544 = vmatpush1.bf16.msra.mxu1 %v9690_v63  ;;  %v9705_v63 = vld [vmem:[%s14569_s1 + $0x188] ss:$16 sps:$4 sm:$0xff]   ;;  %v197_v1 = vld [vmem:[%s14570_s0 + $0x580] sm:$0xff] }
  0x65   :  { %4545 = vmatprep.subr.bf16.mxu1 %v9695_v2  ;;  %v9707_v2 = vld [vmem:[%s14569_s1 + $0x18c] ss:$16 sps:$4 sm:$0xff]  }
  0x68   :  { %4546 = vmatpush1.bf16.msra.mxu1 %v9693_v7  ;;  %v9708_v7 = vld [vmem:[%s14569_s1 + $0x420] ss:$16 sps:$4 sm:$0xff]  }
  0x69   :  { %4547 = vmatprep.subr.bf16.mxu1 %v9698_v8  ;;  %v10802_v8 = vcombine.low %v93_v44, %v97_v45  ;;  %3824 = vmatpush1.bf16.msra.mxu0 %v9708_v7  ;;  %v10838_v44 = vcombine.low %v101_v60, %v105_v3  ;;  %v10840_v45 = vcombine.low %v102_v4, %v106_v6  ;;  %v117_v60 = vld [vmem:[%s14570_s0 + $0x300] sm:$0xff]  ;;  %v9720_v3 = vld [vmem:[%s14569_s1 + $0x1a8] ss:$16 sps:$4 sm:$0xff]   ;;  %v9722_v4 = vld [vmem:[%s14569_s1 + $0x1ac] ss:$16 sps:$4 sm:$0xff]  }
  0x6a   :  { %3198 = vmatmul.mubr.bf16.gmra.mrb[20].mxu1 %v10679_v9  ;;  %3825 = vmatprep.subr.bf16.mxu0 %v9713_v20  ;;  %v9725_v6 = vld [vmem:[%s14569_s1 + $0x4a4] ss:$16 sps:$4 sm:$0xff]   ;;  %v9723_v7 = vld [vmem:[%s14569_s1 + $0x4a0] ss:$16 sps:$4 sm:$0xff]  }
  0x6b   :  { %3551 = vmatmul.mubr.bf16.gmra.mrb[20].mxu0 %v10681_v10  ;;  %3207 = vmatprep.mubr.bf16.mxu1 %v10686_v16  ;;  %14813 = vst [vmem:[#allocation23_spill] sm:$0xff] %v10840_v45 }
  0x6c   :  { %3560 = vmatprep.mubr.bf16.mxu0 %v10688_v17  ;;  %4548 = vmatpush1.bf16.msra.mxu1 %v9696_v13  ;;  %v10804_v13 = vcombine.low %v94_v46, %v98_v49  ;;  %v10844_v49 = vcombine.high %v110_v33, %v114_v34  ;;  %v189_v17 = vld [vmem:[%s14570_s0 + $0x540] sm:$0xff] }
  0x6d   :  { %4549 = vmatprep.subr.bf16.mxu1 %v9701_v32  ;;  %v9716_v32 = vld [vmem:[%s14569_s1 + $0x464] ss:$16 sps:$4 sm:$0xff]   ;;  %3826 = vmatpush1.bf16.msra.mxu0 %v9711_v21  ;;  %v10882_v21 = vcombine.low %v110_v33, %v114_v34  ;;  %v126_v33 = vld [vmem:[%s14570_s0 + $0x348] sm:$0xff] }
  0x6e   :  { %14811 = vst [vmem:[#allocation21_spill] sm:$0xff] %v10804_v13  ;;  %3827 = vmatprep.subr.bf16.mxu0 %v9716_v32  ;;  %14814 = vst [vmem:[#allocation24_spill] sm:$0xff] %v10844_v49  ;;  %v130_v34 = vld [vmem:[%s14570_s0 + $0x368] sm:$0xff] }
  0x6f   :  { %14815 = vst [vmem:[#allocation25_spill] sm:$0xff] %v10882_v21 }
  0x70   :  { %4550 = vmatpush1.bf16.msra.mxu1 %v9699_v31  ;;  %v113_v31 = vld [vmem:[%s14570_s0 + $0x2e0] sm:$0xff] }
  0x71   :  { %4551 = vmatprep.subr.bf16.mxu1 %v9707_v2  ;;  %v10842_v46 = vcombine.high %v109_v30, %v113_v31  ;;  %3828 = vmatpush1.bf16.msra.mxu0 %v9714_v37  ;;  %v118_v2 = vld [vmem:[%s14570_s0 + $0x308] sm:$0xff]  ;;  %v10880_v20 = vcombine.low %v109_v30, %v113_v31  ;;  %v125_v30 = vld [vmem:[%s14570_s0 + $0x340] sm:$0xff] }
  0x72   :  { %3208 = vmatmul.mubr.bf16.gmra.mrb[24].mxu1 %v10706_v22  ;;  %3829 = vmatprep.subr.bf16.mxu0 %v9719_v58  ;;  %v10886_v37 = vcombine.high %v118_v2, %v122_v5  ;;  %v9728_v58 = vld [vmem:[%s14569_s1 + $0x4c4] ss:$16 sps:$4 sm:$0xff]  }
  0x73   :  { %3561 = vmatmul.mubr.bf16.gmra.mrb[24].mxu0 %v10708_v27  ;;  %3217 = vmatprep.mubr.bf16.mxu1 %v10710_v28  ;;  %v129_v31 = vld [vmem:[%s14570_s0 + $0x360] sm:$0xff] }
  0x74   :  { %3570 = vmatprep.mubr.bf16.mxu0 %v10712_v29  ;;  %4552 = vmatpush1.bf16.msra.mxu1 %v9705_v63  ;;  %v121_v63 = vld [vmem:[%s14570_s0 + $0x320] sm:$0xff]  ;;  %14816 = vst [vmem:[#allocation26_spill] sm:$0xff] %v10886_v37 }
  0x75   :  { %4553 = vmatprep.subr.bf16.mxu1 %v9722_v4  ;;  %3830 = vmatpush1.bf16.msra.mxu0 %v9717_v59  ;;  %v10884_v32 = vcombine.high %v117_v60, %v121_v63  ;;  %v9726_v59 = vld [vmem:[%s14569_s1 + $0x4c0] ss:$16 sps:$4 sm:$0xff]  }
  0x76   :  { %3831 = vmatprep.subr.bf16.mxu0 %v9725_v6  ;;  %v9729_v4 = vld [vmem:[%s14569_s1 + $0x4e0] ss:$16 sps:$4 sm:$0xff]   ;;  %v10916_v6 = vcombine.low %v117_v60, %v121_v63  ;;  %v9735_v60 = vld [vmem:[%s14569_s1 + $0x1c8] ss:$16 sps:$4 sm:$0xff]   ;;  %v9737_v63 = vld [vmem:[%s14569_s1 + $0x1cc] ss:$16 sps:$4 sm:$0xff]  }
  0x77   :  { %v181_v29 = vld [vmem:[%s14570_s0 + $0x500] sm:$0xff] }
  0x78   :  { %4554 = vmatpush1.bf16.msra.mxu1 %v9720_v3  ;;  %v9731_v3 = vld [vmem:[%s14569_s1 + $0x4e4] ss:$16 sps:$4 sm:$0xff]  }
  0x79   :  { %3832 = vmatpush1.bf16.msra.mxu0 %v9723_v7  ;;  %v10918_v7 = vcombine.low %v118_v2, %v122_v5  ;;  %v133_v2 = vld [vmem:[%s14570_s0 + $0x380] sm:$0xff]  ;;  %4555 = vmatprep.subr.bf16.mxu1 %v9737_v63 }
  0x7a   :  { %3218 = vmatmul.mubr.bf16.gmra.mrb[28].mxu1 %v10736_v40  ;;  %3833 = vmatprep.subr.bf16.mxu0 %v9728_v58  ;;  %v9734_v58 = vld [vmem:[%s14569_s1 + $0x504] ss:$16 sps:$4 sm:$0xff]  }
  0x7b   :  { %3571 = vmatmul.mubr.bf16.gmra.mrb[28].mxu0 %v10738_v41  ;;  %3227 = vmatprep.mubr.bf16.mxu1 %v10740_v42  ;;  %14817 = vst [vmem:[#allocation27_spill] sm:$0xff] %v10918_v7  ;;  %v137_v5 = vld [vmem:[%s14570_s0 + $0x3a0] sm:$0xff] }
  0x7c   :  { %3580 = vmatprep.mubr.bf16.mxu0 %v10742_v43  ;;  %4556 = vmatpush1.bf16.msra.mxu1 %v9735_v60  ;;  %v10994_v60 = vcombine.low %v133_v2, %v137_v5 }
  0x7d   :  { %3834 = vmatpush1.bf16.msra.mxu0 %v9726_v59  ;;  %v9732_v59 = vld [vmem:[%s14569_s1 + $0x500] ss:$16 sps:$4 sm:$0xff]  }
  0x7e   :  { %3835 = vmatprep.subr.bf16.mxu0 %v9731_v3  ;;  %v134_v3 = vld [vmem:[%s14570_s0 + $0x388] sm:$0xff] }
  0x81   :  { %3836 = vmatpush1.bf16.msra.mxu0 %v9729_v4  ;;  %v138_v4 = vld [vmem:[%s14570_s0 + $0x3a8] sm:$0xff] }
  0x82   :  { %3228 = vmatmul.mubr.bf16.gmra.mrb[32].mxu1 %v10760_v53  ;;  %3837 = vmatprep.subr.bf16.mxu0 %v9734_v58  ;;  %v9743_v58 = vld [vmem:[%s14569_s1 + $0x544] ss:$16 sps:$4 sm:$0xff]   ;;  %v10996_v63 = vcombine.low %v134_v3, %v138_v4 }
  0x83   :  { %3581 = vmatmul.mubr.bf16.gmra.mrb[32].mxu0 %v10762_v54  ;;  %3237 = vmatprep.mubr.bf16.mxu1 %v10764_v56 }
  0x84   :  { %3590 = vmatprep.mubr.bf16.mxu0 %v10766_v57  ;;  %14821 = vst [vmem:[#allocation31_spill] sm:$0xff] %v10996_v63 }
  0x85   :  { %3838 = vmatpush1.bf16.msra.mxu0 %v9732_v59  ;;  %v9741_v59 = vld [vmem:[%s14569_s1 + $0x540] ss:$16 sps:$4 sm:$0xff]  }
  0x8a   :  { %3238 = vmatmul.mubr.bf16.gmra.mrb[36].mxu1 %v10802_v8 }
  0x8b   :  { %3591 = vmatmul.mubr.bf16.gmra.mrb[36].mxu0 %v10804_v13  ;;  %3247 = vmatprep.mubr.bf16.mxu1 %v10806_v18  ;;  %v10964_v13 = vcombine.high %v134_v3, %v138_v4  ;;  %v149_v3 = vld [vmem:[%s14570_s0 + $0x400] sm:$0xff] }
  0x8c   :  { %3600 = vmatprep.mubr.bf16.mxu0 %v10808_v19  ;;  %v10962_v19 = vcombine.high %v133_v2, %v137_v5  ;;  %v9750_v2 = vld [vmem:[%s14569_s1 + $0x1e8] ss:$16 sps:$4 sm:$0xff]   ;;  %v9752_v5 = vld [vmem:[%s14569_s1 + $0x1ec] ss:$16 sps:$4 sm:$0xff]   ;;  %v153_v4 = vld [vmem:[%s14570_s0 + $0x420] sm:$0xff] }
  0x8d   :  { %14820 = vst [vmem:[#allocation30_spill] sm:$0xff] %v10964_v13  ;;  %4557 = vmatprep.subr.bf16.mxu1 %v9752_v5  ;;  %v11040_v43 = vcombine.high %v149_v3, %v153_v4 }
  0x8e   :  { %4558 = vmatpush1.bf16.msra.mxu1 %v9750_v2  ;;  %v11072_v2 = vcombine.low %v149_v3, %v153_v4  ;;  %v165_v3 = vld [vmem:[%s14570_s0 + $0x480] sm:$0xff] }
  0x8f   :  { %v169_v4 = vld [vmem:[%s14570_s0 + $0x4a0] sm:$0xff] }
  0x92   :  { %3248 = vmatmul.mubr.bf16.gmra.mrb[40].mxu1 %v10838_v44 }
  0x93   :  { %3601 = vmatmul.mubr.bf16.gmra.mrb[40].mxu0 %v10840_v45  ;;  %3257 = vmatprep.mubr.bf16.mxu1 %v10842_v46  ;;  %v10960_v45 = vcombine.low %v126_v33, %v130_v34 }
  0x94   :  { %3610 = vmatprep.mubr.bf16.mxu0 %v10844_v49  ;;  %v10922_v49 = vcombine.high %v126_v33, %v130_v34  ;;  %v146_v33 = vld [vmem:[%s14570_s0 + $0x3e8] sm:$0xff]  ;;  %v9746_v34 = vld [vmem:[%s14569_s1 + $0x564] ss:$16 sps:$4 sm:$0xff]  }
  0x95   :  { %14819 = vst [vmem:[#allocation29_spill] sm:$0xff] %v10960_v45 }
  0x96   :  { %14818 = vst [vmem:[#allocation28_spill] sm:$0xff] %v10922_v49 }
  0x9a   :  { %3258 = vmatmul.mubr.bf16.gmra.mrb[44].mxu1 %v10880_v20 }
  0x9b   :  { %3611 = vmatmul.mubr.bf16.gmra.mrb[44].mxu0 %v10882_v21  ;;  %3267 = vmatprep.mubr.bf16.mxu1 %v10884_v32  ;;  %v10920_v21 = vcombine.high %v125_v30, %v129_v31 }
  0x9c   :  { %3620 = vmatprep.mubr.bf16.mxu0 %v10886_v37  ;;  %v10958_v37 = vcombine.low %v125_v30, %v129_v31  ;;  %v145_v30 = vld [vmem:[%s14570_s0 + $0x3e0] sm:$0xff]  ;;  %v142_v31 = vld [vmem:[%s14570_s0 + $0x3c8] sm:$0xff] }
  0x9d   :  { %v11038_v54 = vcombine.low %v142_v31, %v146_v33 }
  0x9f   :  { %14823 = vst [vmem:[#allocation33_spill] sm:$0xff] %v11038_v54 }
  0xa2   :  { %3268 = vmatmul.mubr.bf16.gmra.mrb[48].mxu1 %v10916_v6 }
  0xa3   :  { %3621 = vmatmul.mubr.bf16.gmra.mrb[48].mxu0 %v10918_v7  ;;  %3277 = vmatprep.mubr.bf16.mxu1 %v10920_v21  ;;  %v9738_v7 = vld [vmem:[%s14569_s1 + $0x520] ss:$16 sps:$4 sm:$0xff]  }
  0xa4   :  { %3630 = vmatprep.mubr.bf16.mxu0 %v10922_v49  ;;  %v9740_v49 = vld [vmem:[%s14569_s1 + $0x524] ss:$16 sps:$4 sm:$0xff]  }
  0xa5   :  { %3839 = vmatprep.subr.bf16.mxu0 %v9740_v49  ;;  %v141_v49 = vld [vmem:[%s14570_s0 + $0x3c0] sm:$0xff] }
  0xa6   :  { %3840 = vmatpush1.bf16.msra.mxu0 %v9738_v7  ;;  %v9744_v7 = vld [vmem:[%s14569_s1 + $0x560] ss:$16 sps:$4 sm:$0xff]   ;;  %v11036_v57 = vcombine.low %v141_v49, %v145_v30 }
  0xa7   :  { %3841 = vmatprep.subr.bf16.mxu0 %v9743_v58  ;;  %v9749_v58 = vld [vmem:[%s14569_s1 + $0x584] ss:$16 sps:$4 sm:$0xff]  }
  0xaa   :  { %3278 = vmatmul.mubr.bf16.gmra.mrb[52].mxu1 %v10958_v37  ;;  %3842 = vmatpush1.bf16.msra.mxu0 %v9741_v59  ;;  %v9747_v59 = vld [vmem:[%s14569_s1 + $0x580] ss:$16 sps:$4 sm:$0xff]  }
  0xab   :  { %3631 = vmatmul.mubr.bf16.gmra.mrb[52].mxu0 %v10960_v45  ;;  %3287 = vmatprep.mubr.bf16.mxu1 %v10962_v19  ;;  %v11000_v45 = vcombine.high %v142_v31, %v146_v33  ;;  %v162_v31 = vld [vmem:[%s14570_s0 + $0x468] sm:$0xff]  ;;  %v9761_v33 = vld [vmem:[%s14569_s1 + $0x5e4] ss:$16 sps:$4 sm:$0xff]  }
  0xac   :  { %3640 = vmatprep.mubr.bf16.mxu0 %v10964_v13  ;;  %3843 = vmatprep.subr.bf16.mxu0 %v9746_v34  ;;  %v10998_v13 = vcombine.high %v141_v49, %v145_v30  ;;  %v150_v34 = vld [vmem:[%s14570_s0 + $0x408] sm:$0xff]  ;;  %v161_v49 = vld [vmem:[%s14570_s0 + $0x460] sm:$0xff] }
  0xad   :  { %14822 = vst [vmem:[#allocation32_spill] sm:$0xff] %v11000_v45  ;;  %v158_v30 = vld [vmem:[%s14570_s0 + $0x448] sm:$0xff] }
  0xae   :  { %3844 = vmatpush1.bf16.msra.mxu0 %v9744_v7  ;;  %v154_v7 = vld [vmem:[%s14570_s0 + $0x428] sm:$0xff] }
  0xaf   :  { %3845 = vmatprep.subr.bf16.mxu0 %v9749_v58  ;;  %v11042_v41 = vcombine.high %v150_v34, %v154_v7  ;;  %v9758_v58 = vld [vmem:[%s14569_s1 + $0x5c4] ss:$16 sps:$4 sm:$0xff]   ;;  %v11074_v5 = vcombine.low %v150_v34, %v154_v7  ;;  %v166_v34 = vld [vmem:[%s14570_s0 + $0x488] sm:$0xff] }
  0xb0   :  { %v170_v7 = vld [vmem:[%s14570_s0 + $0x4a8] sm:$0xff] }
  0xb1   :  { %14824 = vst [vmem:[#allocation34_spill] sm:$0xff] %v11042_v41  ;;  %14825 = vst [vmem:[#allocation35_spill] sm:$0xff] %v11074_v5 }
  0xb2   :  { %3288 = vmatmul.mubr.bf16.gmra.mrb[56].mxu1 %v10994_v60  ;;  %3846 = vmatpush1.bf16.msra.mxu0 %v9747_v59  ;;  %v9756_v59 = vld [vmem:[%s14569_s1 + $0x5c0] ss:$16 sps:$4 sm:$0xff]  }
  0xb3   :  { %3641 = vmatmul.mubr.bf16.gmra.mrb[56].mxu0 %v10996_v63  ;;  %3297 = vmatprep.mubr.bf16.mxu1 %v10998_v13  ;;  %v9753_v63 = vld [vmem:[%s14569_s1 + $0x5a0] ss:$16 sps:$4 sm:$0xff]  }
  0xb4   :  { %3650 = vmatprep.mubr.bf16.mxu0 %v11000_v45  ;;  %v9755_v45 = vld [vmem:[%s14569_s1 + $0x5a4] ss:$16 sps:$4 sm:$0xff]  }
  0xb5   :  { %3847 = vmatprep.subr.bf16.mxu0 %v9755_v45  ;;  %v157_v45 = vld [vmem:[%s14570_s0 + $0x440] sm:$0xff] }
  0xb6   :  { %3848 = vmatpush1.bf16.msra.mxu0 %v9753_v63  ;;  %v9759_v63 = vld [vmem:[%s14569_s1 + $0x5e0] ss:$16 sps:$4 sm:$0xff]  }
  0xb7   :  { %3849 = vmatprep.subr.bf16.mxu0 %v9758_v58  ;;  %v9764_v58 = vld [vmem:[%s14569_s1 + $0x20c] ss:$16 sps:$4 sm:$0xff]  }
  0xb8   :  { %4880 = vmatprep.subr.bf16.mxu1 %v9764_v58  ;;  %v173_v58 = vld [vmem:[%s14570_s0 + $0x4c0] sm:$0xff] }
  0xba   :  { %3298 = vmatmul.mubr.bf16.gmra.mrb[60].mxu1 %v11036_v57  ;;  %3850 = vmatpush1.bf16.msra.mxu0 %v9756_v59  ;;  %v11099_v59 = vcombine.low %v157_v45, %v161_v49 }
  0xbb   :  { %3651 = vmatmul.mubr.bf16.gmra.mrb[60].mxu0 %v11038_v54  ;;  %3307 = vmatprep.mubr.bf16.mxu1 %v11040_v43  ;;  %v11078_v54 = vcombine.high %v158_v30, %v162_v31 }
  0xbc   :  { %3660 = vmatprep.mubr.bf16.mxu0 %v11042_v41  ;;  %3851 = vmatprep.subr.bf16.mxu0 %v9761_v33  ;;  %v11076_v41 = vcombine.high %v157_v45, %v161_v49  ;;  %v11101_v33 = vcombine.low %v158_v30, %v162_v31  ;;  %v177_v45 = vld [vmem:[%s14570_s0 + $0x4e0] sm:$0xff]  ;;  %v174_v49 = vld [vmem:[%s14570_s0 + $0x4c8] sm:$0xff]  ;;  %v11123_v31 = vcombine.low %v165_v3, %v169_v4 }
  0xbd   :  { %14826 = vst [vmem:[#allocation36_spill] sm:$0xff] %v11078_v54  ;;  %v178_v30 = vld [vmem:[%s14570_s0 + $0x4e8] sm:$0xff] }
  0xbe   :  { %3852 = vmatpush1.bf16.msra.mxu0 %v9759_v63  ;;  %14827 = vst [vmem:[#allocation37_spill] sm:$0xff] %v11101_v33  ;;  %v11103_v63 = vcombine.high %v165_v3, %v169_v4  ;;  %v185_v3 = vld [vmem:[%s14570_s0 + $0x520] sm:$0xff]  ;;  %v182_v4 = vld [vmem:[%s14570_s0 + $0x508] sm:$0xff] }
  0xc2   :  { %3308 = vmatmul.mubr.bf16.gmra.mrb[64].mxu1 %v11072_v2 }
  0xc3   :  { %3661 = vmatmul.mubr.bf16.gmra.mrb[64].mxu0 %v11074_v5  ;;  %3317 = vmatprep.mubr.bf16.mxu1 %v11076_v41  ;;  %v11129_v5 = vcombine.high %v174_v49, %v178_v30 }
  0xc4   :  { %3670 = vmatprep.mubr.bf16.mxu0 %v11078_v54  ;;  %v11105_v54 = vcombine.high %v166_v34, %v170_v7 }
  0xc5   :  { %14830 = vst [vmem:[#allocation40_spill] sm:$0xff] %v11129_v5 }
  0xc6   :  { %14828 = vst [vmem:[#allocation38_spill] sm:$0xff] %v11105_v54 }
  0xca   :  { %3318 = vmatmul.mubr.bf16.gmra.mrb[68].mxu1 %v11099_v59 }
  0xcb   :  { %3671 = vmatmul.mubr.bf16.gmra.mrb[68].mxu0 %v11101_v33  ;;  %3327 = vmatprep.mubr.bf16.mxu1 %v11103_v63  ;;  %v11125_v33 = vcombine.low %v166_v34, %v170_v7  ;;  %v186_v34 = vld [vmem:[%s14570_s0 + $0x528] sm:$0xff]  ;;  %v11147_v7 = vcombine.low %v173_v58, %v177_v45 }
  0xcc   :  { %3680 = vmatprep.mubr.bf16.mxu0 %v11105_v54  ;;  %v11127_v54 = vcombine.high %v173_v58, %v177_v45  ;;  %v11153_v27 = vcombine.high %v182_v4, %v186_v34  ;;  %v193_v58 = vld [vmem:[%s14570_s0 + $0x560] sm:$0xff]  ;;  %v190_v45 = vld [vmem:[%s14570_s0 + $0x548] sm:$0xff] }
  0xcd   :  { %14829 = vst [vmem:[#allocation39_spill] sm:$0xff] %v11125_v33 }
  0xce   :  { %14832 = vst [vmem:[#allocation42_spill] sm:$0xff] %v11153_v27 }
  0xd2   :  { %3328 = vmatmul.mubr.bf16.gmra.mrb[72].mxu1 %v11123_v31 }
  0xd3   :  { %3681 = vmatmul.mubr.bf16.gmra.mrb[72].mxu0 %v11125_v33  ;;  %3337 = vmatprep.mubr.bf16.mxu1 %v11127_v54  ;;  %v11149_v33 = vcombine.low %v174_v49, %v178_v30  ;;  %v194_v49 = vld [vmem:[%s14570_s0 + $0x568] sm:$0xff]  ;;  %v11171_v30 = vcombine.low %v181_v29, %v185_v3 }
  0xd4   :  { %3690 = vmatprep.mubr.bf16.mxu0 %v11129_v5  ;;  %v11151_v5 = vcombine.high %v181_v29, %v185_v3  ;;  %v11177_v10 = vcombine.high %v190_v45, %v194_v49  ;;  %v201_v29 = vld [vmem:[%s14570_s0 + $0x5a0] sm:$0xff]  ;;  %v198_v3 = vld [vmem:[%s14570_s0 + $0x588] sm:$0xff] }
  0xd5   :  { %14831 = vst [vmem:[#allocation41_spill] sm:$0xff] %v11149_v33 }
  0xd6   :  { %14834 = vst [vmem:[#allocation44_spill] sm:$0xff] %v11177_v10 }
  0xda   :  { %3338 = vmatmul.mubr.bf16.gmra.mrb[76].mxu1 %v11147_v7 }
  0xdb   :  { %3691 = vmatmul.mubr.bf16.gmra.mrb[76].mxu0 %v11149_v33  ;;  %3347 = vmatprep.mubr.bf16.mxu1 %v11151_v5  ;;  %v11173_v33 = vcombine.low %v182_v4, %v186_v34  ;;  %v202_v4 = vld [vmem:[%s14570_s0 + $0x5a8] sm:$0xff]  ;;  %v11195_v34 = vcombine.low %v189_v17, %v193_v58 }
  0xdc   :  { %3700 = vmatprep.mubr.bf16.mxu0 %v11153_v27  ;;  %v11175_v27 = vcombine.high %v189_v17, %v193_v58  ;;  %v11201_v62 = vcombine.high %v198_v3, %v202_v4  ;;  %v209_v17 = vld [vmem:[%s14570_s0 + $0x5e0] sm:$0xff]  ;;  %v206_v58 = vld [vmem:[%s14570_s0 + $0x5c8] sm:$0xff] }
  0xdd   :  { %14833 = vst [vmem:[#allocation43_spill] sm:$0xff] %v11173_v33 }
  0xde   :  { %14836 = vst [vmem:[#allocation46_spill] sm:$0xff] %v11201_v62 }
  0xe2   :  { %3348 = vmatmul.mubr.bf16.gmra.mrb[80].mxu1 %v11171_v30 }
  0xe3   :  { %3701 = vmatmul.mubr.bf16.gmra.mrb[80].mxu0 %v11173_v33  ;;  %3357 = vmatprep.mubr.bf16.mxu1 %v11175_v27  ;;  %v11197_v33 = vcombine.low %v190_v45, %v194_v49  ;;  %v210_v45 = vld [vmem:[%s14570_s0 + $0x5e8] sm:$0xff]  ;;  %v11219_v49 = vcombine.low %v197_v1, %v201_v29 }
  0xe4   :  { %3710 = vmatprep.mubr.bf16.mxu0 %v11177_v10  ;;  %v11199_v10 = vcombine.high %v197_v1, %v201_v29  ;;  %v11225_v48 = vcombine.high %v206_v58, %v210_v45  ;;  %v217_v1 = vld [vmem:[%s14570_s0 + $0x620] sm:$0xff]  ;;  %v214_v29 = vld [vmem:[%s14570_s0 + $0x608] sm:$0xff] }
  0xe5   :  { %14835 = vst [vmem:[#allocation45_spill] sm:$0xff] %v11197_v33 }
  0xe6   :  { %14838 = vst [vmem:[#allocation48_spill] sm:$0xff] %v11225_v48 }
  0xea   :  { %3358 = vmatmul.mubr.bf16.gmra.mrb[84].mxu1 %v11195_v34 }
  0xeb   :  { %3711 = vmatmul.mubr.bf16.gmra.mrb[84].mxu0 %v11197_v33  ;;  %3367 = vmatprep.mubr.bf16.mxu1 %v11199_v10  ;;  %v11221_v33 = vcombine.low %v198_v3, %v202_v4  ;;  %v218_v3 = vld [vmem:[%s14570_s0 + $0x628] sm:$0xff]  ;;  %v11243_v4 = vcombine.low %v205_v51, %v209_v17 }
  0xec   :  { %3720 = vmatprep.mubr.bf16.mxu0 %v11201_v62  ;;  %v11223_v62 = vcombine.high %v205_v51, %v209_v17  ;;  %v11249_v36 = vcombine.high %v214_v29, %v218_v3  ;;  %v225_v51 = vld [vmem:[%s14570_s0 + $0x660] sm:$0xff]  ;;  %v222_v17 = vld [vmem:[%s14570_s0 + $0x648] sm:$0xff] }
  0xed   :  { %14837 = vst [vmem:[#allocation47_spill] sm:$0xff] %v11221_v33 }
  0xee   :  { %14841 = vst [vmem:[#allocation51_spill] sm:$0xff] %v11249_v36 }
  0xf2   :  { %3368 = vmatmul.mubr.bf16.gmra.mrb[88].mxu1 %v11219_v49 }
  0xf3   :  { %3721 = vmatmul.mubr.bf16.gmra.mrb[88].mxu0 %v11221_v33  ;;  %3377 = vmatprep.mubr.bf16.mxu1 %v11223_v62  ;;  %v11245_v33 = vcombine.low %v206_v58, %v210_v45  ;;  %v226_v58 = vld [vmem:[%s14570_s0 + $0x668] sm:$0xff]  ;;  %v11267_v45 = vcombine.low %v213_v39, %v217_v1 }
  0xf4   :  { %3730 = vmatprep.mubr.bf16.mxu0 %v11225_v48  ;;  %v11247_v48 = vcombine.high %v213_v39, %v217_v1  ;;  %v11273_v24 = vcombine.high %v222_v17, %v226_v58  ;;  %v233_v39 = vld [vmem:[%s14570_s0 + $0x6a0] sm:$0xff]  ;;  %v230_v1 = vld [vmem:[%s14570_s0 + $0x688] sm:$0xff] }
  0xf5   :  { %14839 = vst [vmem:[#allocation49_spill] sm:$0xff] %v11245_v33  ;;  %14842 = vst [vmem:[#allocation52_spill] sm:$0xff] %v11267_v45 }
  0xf6   :  { %14840 = vst [vmem:[#allocation50_spill] sm:$0xff] %v11247_v48  ;;  %14845 = vst [vmem:[#allocation55_spill] sm:$0xff] %v11273_v24 }
  0xfa   :  { %3378 = vmatmul.mubr.bf16.gmra.mrb[92].mxu1 %v11243_v4 }
  0xfb   :  { %3731 = vmatmul.mubr.bf16.gmra.mrb[92].mxu0 %v11245_v33  ;;  %3387 = vmatprep.mubr.bf16.mxu1 %v11247_v48  ;;  %v11269_v33 = vcombine.low %v214_v29, %v218_v3  ;;  %v234_v29 = vld [vmem:[%s14570_s0 + $0x6a8] sm:$0xff]  ;;  %v11291_v3 = vcombine.low %v221_v26, %v225_v51 }
  0xfc   :  { %3740 = vmatprep.mubr.bf16.mxu0 %v11249_v36  ;;  %v11271_v36 = vcombine.high %v221_v26, %v225_v51  ;;  %v11297_v12 = vcombine.high %v230_v1, %v234_v29  ;;  %v241_v26 = vld [vmem:[%s14570_s0 + $0x6e0] sm:$0xff]  ;;  %v238_v51 = vld [vmem:[%s14570_s0 + $0x6c8] sm:$0xff] }
  0xfd   :  { %14843 = vst [vmem:[#allocation53_spill] sm:$0xff] %v11269_v33  ;;  %14846 = vst [vmem:[#allocation56_spill] sm:$0xff] %v11291_v3 }
  0xfe   :  { %14844 = vst [vmem:[#allocation54_spill] sm:$0xff] %v11271_v36  ;;  %14849 = vst [vmem:[#allocation59_spill] sm:$0xff] %v11297_v12 }
 0x102   :  { %3388 = vmatmul.mubr.bf16.gmra.mrb[96].mxu1 %v11267_v45 }
 0x103   :  { %3741 = vmatmul.mubr.bf16.gmra.mrb[96].mxu0 %v11269_v33  ;;  %3397 = vmatprep.mubr.bf16.mxu1 %v11271_v36  ;;  %v11293_v33 = vcombine.low %v222_v17, %v226_v58  ;;  %v242_v17 = vld [vmem:[%s14570_s0 + $0x6e8] sm:$0xff]  ;;  %v11315_v58 = vcombine.low %v229_v15, %v233_v39 }
 0x104   :  { %3750 = vmatprep.mubr.bf16.mxu0 %v11273_v24  ;;  %v11295_v24 = vcombine.high %v229_v15, %v233_v39  ;;  %v249_v15 = vld [vmem:[%s14570_s0 + $0x720] sm:$0xff]  ;;  %v246_v39 = vld [vmem:[%s14570_s0 + $0x708] sm:$0xff] }
 0x105   :  { %14847 = vst [vmem:[#allocation57_spill] sm:$0xff] %v11293_v33  ;;  %14850 = vst [vmem:[#allocation60_spill] sm:$0xff] %v11315_v58 }
 0x106   :  { %14848 = vst [vmem:[#allocation58_spill] sm:$0xff] %v11295_v24 }
 0x10a   :  { %3398 = vmatmul.mubr.bf16.gmra.mrb[100].mxu1 %v11291_v3  ;;  %v245_v3 = vld [vmem:[%s14570_s0 + $0x700] sm:$0xff] }
 0x10b   :  { %3751 = vmatmul.mubr.bf16.gmra.mrb[100].mxu0 %v11293_v33  ;;  %3407 = vmatprep.mubr.bf16.mxu1 %v11295_v24  ;;  %v11317_v33 = vcombine.low %v230_v1, %v234_v29  ;;  %v11321_v24 = vcombine.high %v238_v51, %v242_v17  ;;  %v250_v1 = vld [vmem:[%s14570_s0 + $0x728] sm:$0xff]  ;;  %v11349_v36 = vcombine.high %v245_v3, %v249_v15 }
 0x10c   :  { %3760 = vmatprep.mubr.bf16.mxu0 %v11297_v12  ;;  %v11319_v12 = vcombine.high %v237_v55, %v241_v26  ;;  %v11351_v45 = vcombine.high %v246_v39, %v250_v1 }
 0x10d   :  { %14851 = vst [vmem:[#allocation61_spill] sm:$0xff] %v11317_v33  ;;  %14853 = vst [vmem:[#allocation63_spill] sm:$0xff] %v11321_v24 }
 0x10e   :  { %14852 = vst [vmem:[#allocation62_spill] sm:$0xff] %v11319_v12  ;;  %14859 = vst [vmem:[#allocation69_spill] sm:$0xff] %v11349_v36 }
 0x10f   :  { %14860 = vst [vmem:[#allocation70_spill] sm:$0xff] %v11351_v45 }
 0x112   :  { %3408 = vmatmul.mubr.bf16.gmra.mrb[104].mxu1 %v11315_v58 }
 0x113   :  { %3761 = vmatmul.mubr.bf16.gmra.mrb[104].mxu0 %v11317_v33  ;;  %3417 = vmatprep.mubr.bf16.mxu1 %v11319_v12  ;;  %v11345_v12 = vcombine.low %v238_v51, %v242_v17  ;;  %v254_v51 = vld [vmem:[%s14570_s0 + $0x748] sm:$0xff] }
 0x114   :  { %3770 = vmatprep.mubr.bf16.mxu0 %v11321_v24  ;;  %v11343_v24 = vcombine.low %v237_v55, %v241_v26  ;;  %v253_v55 = vld [vmem:[%s14570_s0 + $0x740] sm:$0xff]  ;;  %v258_v17 = vld [vmem:[%s14570_s0 + $0x768] sm:$0xff] }
 0x115   :  { %v11339_v29 = vpop.f32.mrb[0].mxu1  ;;  %14857 = vst [vmem:[#allocation67_spill] sm:$0xff] %v11345_v12  ;;  %v257_v26 = vld [vmem:[%s14570_s0 + $0x760] sm:$0xff] }
 0x116   :  { %14854 = vst [vmem:[#allocation64_spill] sm:$0xff] %v11339_v29  ;;  %v11341_v33 = vpop.f32.mrb[1].mxu1  ;;  %14856 = vst [vmem:[#allocation66_spill] sm:$0xff] %v11343_v24  ;;  %v11381_v29 = vcombine.high %v253_v55, %v257_v26 }
 0x117   :  { %14855 = vst [vmem:[#allocation65_spill] sm:$0xff] %v11341_v33  ;;  %v11347_v58 = vpop.f32.mrb[2].mxu1 }
 0x118   :  { %14858 = vst [vmem:[#allocation68_spill] sm:$0xff] %v11347_v58  ;;  %v11353_v48 = vpop.f32.mrb[3].mxu1  ;;  %v11377_v58 = vcombine.low %v246_v39, %v250_v1  ;;  %14867 = vst [vmem:[#allocation77_spill] sm:$0xff] %v11381_v29  ;;  %v262_v39 = vld [vmem:[%s14570_s0 + $0x788] sm:$0xff] }
 0x119   :  { %14861 = vst [vmem:[#allocation71_spill] sm:$0xff] %v11353_v48  ;;  %v266_v1 = vld [vmem:[%s14570_s0 + $0x7a8] sm:$0xff] }
 0x11a   :  { %3418 = vmatmul.mubr.bf16.gmra.mrb[108].mxu1 %v11343_v24  ;;  %14865 = vst [vmem:[#allocation75_spill] sm:$0xff] %v11377_v58 }
 0x11b   :  { %3771 = vmatmul.mubr.bf16.gmra.mrb[108].mxu0 %v11345_v12  ;;  %3427 = vmatprep.mubr.bf16.mxu1 %v11349_v36  ;;  %v11383_v36 = vcombine.high %v254_v51, %v258_v17 }
 0x11c   :  { %3780 = vmatprep.mubr.bf16.mxu0 %v11351_v45  ;;  %v11375_v45 = vcombine.low %v245_v3, %v249_v15  ;;  %v261_v3 = vld [vmem:[%s14570_s0 + $0x780] sm:$0xff] }
 0x11d   :  { %v11371_v12 = vpop.f32.mrb[4].mxu1  ;;  %14868 = vst [vmem:[#allocation78_spill] sm:$0xff] %v11383_v36  ;;  %v265_v15 = vld [vmem:[%s14570_s0 + $0x7a0] sm:$0xff] }
 0x11e   :  { %14862 = vst [vmem:[#allocation72_spill] sm:$0xff] %v11371_v12  ;;  %v11373_v48 = vpop.f32.mrb[5].mxu1  ;;  %14864 = vst [vmem:[#allocation74_spill] sm:$0xff] %v11375_v45  ;;  %v11413_v12 = vcombine.high %v261_v3, %v265_v15 }
 0x11f   :  { %14863 = vst [vmem:[#allocation73_spill] sm:$0xff] %v11373_v48  ;;  %v11379_v33 = vpop.f32.mrb[6].mxu1 }
 0x120   :  { %14866 = vst [vmem:[#allocation76_spill] sm:$0xff] %v11379_v33  ;;  %v11385_v24 = vpop.f32.mrb[7].mxu1  ;;  %v11409_v33 = vcombine.low %v254_v51, %v258_v17  ;;  %14875 = vst [vmem:[#allocation85_spill] sm:$0xff] %v11413_v12  ;;  %v270_v51 = vld [vmem:[%s14570_s0 + $0x7c8] sm:$0xff] }
 0x121   :  { %14869 = vst [vmem:[#allocation79_spill] sm:$0xff] %v11385_v24  ;;  %v274_v17 = vld [vmem:[%s14570_s0 + $0x7e8] sm:$0xff] }
 0x122   :  { %3428 = vmatmul.mubr.bf16.gmra.mrb[112].mxu1 %v11375_v45  ;;  %14873 = vst [vmem:[#allocation83_spill] sm:$0xff] %v11409_v33 }
 0x123   :  { %3781 = vmatmul.mubr.bf16.gmra.mrb[112].mxu0 %v11377_v58  ;;  %3437 = vmatprep.mubr.bf16.mxu1 %v11381_v29  ;;  %v11415_v29 = vcombine.high %v262_v39, %v266_v1 }
 0x124   :  { %3790 = vmatprep.mubr.bf16.mxu0 %v11383_v36  ;;  %v11407_v36 = vcombine.low %v253_v55, %v257_v26  ;;  %v269_v55 = vld [vmem:[%s14570_s0 + $0x7c0] sm:$0xff] }
 0x125   :  { %v11403_v58 = vpop.f32.mrb[8].mxu1  ;;  %14876 = vst [vmem:[#allocation86_spill] sm:$0xff] %v11415_v29  ;;  %v273_v26 = vld [vmem:[%s14570_s0 + $0x7e0] sm:$0xff] }
 0x126   :  { %14870 = vst [vmem:[#allocation80_spill] sm:$0xff] %v11403_v58  ;;  %v11405_v24 = vpop.f32.mrb[9].mxu1  ;;  %14872 = vst [vmem:[#allocation82_spill] sm:$0xff] %v11407_v36  ;;  %v11445_v58 = vcombine.high %v269_v55, %v273_v26 }
 0x127   :  { %14871 = vst [vmem:[#allocation81_spill] sm:$0xff] %v11405_v24  ;;  %v11411_v48 = vpop.f32.mrb[10].mxu1 }
 0x128   :  { %14874 = vst [vmem:[#allocation84_spill] sm:$0xff] %v11411_v48  ;;  %v11417_v45 = vpop.f32.mrb[11].mxu1  ;;  %v11441_v48 = vcombine.low %v262_v39, %v266_v1 }
 0x129   :  { %14877 = vst [vmem:[#allocation87_spill] sm:$0xff] %v11417_v45 }
 0x12a   :  { %3438 = vmatmul.mubr.bf16.gmra.mrb[116].mxu1 %v11407_v36  ;;  %14879 = vst [vmem:[#allocation89_spill] sm:$0xff] %v11441_v48 }
 0x12b   :  { %3791 = vmatmul.mubr.bf16.gmra.mrb[116].mxu0 %v11409_v33  ;;  %3447 = vmatprep.mubr.bf16.mxu1 %v11413_v12  ;;  %v11447_v12 = vcombine.high %v270_v51, %v274_v17 }
 0x12c   :  { %3800 = vmatprep.mubr.bf16.mxu0 %v11415_v29  ;;  %v11439_v29 = vcombine.low %v261_v3, %v265_v15  ;;  %v23_v3 = vld [vmem:[%s14570_s0 + $0x10] sm:$0xff] }
 0x12d   :  { %v11435_v33 = vpop.f32.mrb[12].mxu1  ;;  %14881 = vst [vmem:[#allocation91_spill] sm:$0xff] %v11447_v12  ;;  %v27_v15 = vld [vmem:[%s14570_s0 + $0x30] sm:$0xff] }
 0x12e   :  { %v11437_v45 = vpop.f32.mrb[13].mxu1 }
 0x12f   :  { %14878 = vst [vmem:[#allocation88_spill] sm:$0xff] %v11437_v45  ;;  %v11443_v24 = vpop.f32.mrb[14].mxu1  ;;  %v11471_v45 = vcombine.high %v23_v3, %v27_v15 }
 0x130   :  { %14880 = vst [vmem:[#allocation90_spill] sm:$0xff] %v11443_v24  ;;  %v11449_v36 = vpop.f32.mrb[15].mxu1  ;;  %v11467_v24 = vcombine.low %v270_v51, %v274_v17 }
 0x131   :  { %14882 = vst [vmem:[#allocation92_spill] sm:$0xff] %v11449_v36  ;;  %v11465_v36 = vcombine.low %v269_v55, %v273_v26  ;;  %14886 = vst [vmem:[#allocation96_spill] sm:$0xff] %v11471_v45  ;;  %v31_v55 = vld [vmem:[%s14570_s0 + $0x50] sm:$0xff] }
 0x132   :  { %3448 = vmatmul.mubr.bf16.gmra.mrb[120].mxu1 %v11439_v29  ;;  %14884 = vst [vmem:[#allocation94_spill] sm:$0xff] %v11467_v24  ;;  %v35_v26 = vld [vmem:[%s14570_s0 + $0x70] sm:$0xff] }
 0x133   :  { %3801 = vmatmul.mubr.bf16.gmra.mrb[120].mxu0 %v11441_v48  ;;  %3457 = vmatprep.mubr.bf16.mxu1 %v11445_v58 }
 0x134   :  { %3810 = vmatprep.mubr.bf16.mxu0 %v11447_v12 }
 0x135   :  { %v11461_v39 = vpop.f32.mrb[16].mxu1 }
 0x136   :  { %v11463_v1 = vpop.f32.mrb[17].mxu1 }
 0x137   :  { %14883 = vst [vmem:[#allocation93_spill] sm:$0xff] %v11463_v1  ;;  %v11469_v48 = vpop.f32.mrb[18].mxu1  ;;  %v9767_v1 = vld [vmem:[%s14569_s1 + $0x22c] ss:$16 sps:$4 sm:$0xff]  }
 0x138   :  { %14885 = vst [vmem:[#allocation95_spill] sm:$0xff] %v11469_v48  ;;  %v11473_v12 = vpop.f32.mrb[19].mxu1 }
 0x139   :  { %14887 = vst [vmem:[#allocation97_spill] sm:$0xff] %v11473_v12  ;;  %v11489_v12 = vcombine.low %v23_v3, %v27_v15  ;;  %v9765_v3 = vld [vmem:[%s14569_s1 + $0x228] ss:$16 sps:$4 sm:$0xff]   ;;  %v39_v15 = vld [vmem:[%s14570_s0 + $0x90] sm:$0xff] }
 0x13a   :  { %3458 = vmatmul.mubr.bf16.gmra.mrb[124].mxu1 %v11465_v36 }
 0x13b   :  { %3811 = vmatmul.mubr.bf16.gmra.mrb[124].mxu0 %v11467_v24  ;;  %4559 = vmatprep.mubr.bf16.mxu1 %v10430_v52  ;;  %14889 = vst [vmem:[#allocation99_spill] sm:$0xff] %v11489_v12  ;;  %v9762_v52 = vld [vmem:[%s14569_s1 + $0x208] ss:$16 sps:$4 sm:$0xff]  }
 0x13c   :  { %3853 = vmatprep.mubr.bf16.mxu0 %v11471_v45  ;;  %v11496_v45 = vcombine.high %v31_v55, %v35_v26 }
 0x13d   :  { %v11485_v51 = vpop.f32.mrb[20].mxu1 }
 0x13e   :  { %v11487_v17 = vpop.f32.mrb[21].mxu1  ;;  %14891 = vst [vmem:[#allocation101_spill] sm:$0xff] %v11496_v45 }
 0x13f   :  { %14888 = vst [vmem:[#allocation98_spill] sm:$0xff] %v11487_v17  ;;  %v11491_v48 = vpop.f32.mrb[22].mxu1 }
 0x140   :  { %14890 = vst [vmem:[#allocation100_spill] sm:$0xff] %v11491_v48  ;;  %v11498_v24 = vpop.f32.mrb[23].mxu1 }
 0x141   :  { %14892 = vst [vmem:[#allocation102_spill] sm:$0xff] %v11498_v24  ;;  %v43_v24 = vld [vmem:[%s14570_s0 + $0xb0] sm:$0xff] }
 0x142   :  { %4560 = vmatmul.mubr.bf16.vlgmr.msra.gmra.mrb[128].mxu1 %v10499_v11  ;;  %v9770_v11 = vld [vmem:[%s14569_s1 + $0x24c] ss:$16 sps:$4 sm:$0xff]   ;;  %v11527_v48 = vcombine.high %v39_v15, %v43_v24 }
 0x143   :  { %3854 = vmatmul.mubr.bf16.vlgmr.msra.gmra.mrb[0].mxu0 %v11489_v12  ;;  %4881 = vmatpush1.bf16.msra.mxu1 %v9762_v52  ;;  %v11523_v12 = vcombine.low %v31_v55, %v35_v26  ;;  %v47_v55 = vld [vmem:[%s14570_s0 + $0xd0] sm:$0xff] }
 0x144   :  { %3863 = vmatprep.mubr.bf16.mxu0 %v11496_v45  ;;  %4569 = vmatprep.mubr.bf16.mxu1 %v10506_v14  ;;  %14895 = vst [vmem:[#allocation105_spill] sm:$0xff] %v11527_v48  ;;  %v51_v26 = vld [vmem:[%s14570_s0 + $0xf0] sm:$0xff] }
 0x145   :  { %4882 = vmatprep.subr.bf16.mxu1 %v9767_v1  ;;  %v11519_v52 = vpop.f32.mrb[24].mxu1  ;;  %14894 = vst [vmem:[#allocation104_spill] sm:$0xff] %v11523_v12  ;;  %v9768_v1 = vld [vmem:[%s14569_s1 + $0x248] ss:$16 sps:$4 sm:$0xff]  }
 0x146   :  { %14893 = vst [vmem:[#allocation103_spill] sm:$0xff] %v11519_v52  ;;  %v11521_v45 = vpop.f32.mrb[25].mxu1  ;;  %v9773_v52 = vld [vmem:[%s14569_s1 + $0x26c] ss:$16 sps:$4 sm:$0xff]  }
 0x147   :  { %v11525_v14 = vpop.f32.mrb[26].mxu1  ;;  %4883 = vmatpush1.bf16.msra.mxu1 %v9765_v3  ;;  %v9771_v3 = vld [vmem:[%s14569_s1 + $0x268] ss:$16 sps:$4 sm:$0xff]  }
 0x148   :  { %v11529_v17 = vpop.f32.mrb[27].mxu1  ;;  %4884 = vmatprep.subr.bf16.mxu1 %v9770_v11 }
 0x149   :  { %14896 = vst [vmem:[#allocation106_spill] sm:$0xff] %v11529_v17  ;;  %v11561_v17 = vcombine.high %v47_v55, %v51_v26 }
 0x14a   :  { %4570 = vmatmul.mubr.bf16.gmra.mrb[132].mxu1 %v10535_v23  ;;  %v9776_v23 = vld [vmem:[%s14569_s1 + $0x28c] ss:$16 sps:$4 sm:$0xff]  }
 0x14b   :  { %3864 = vmatmul.mubr.bf16.gmra.mrb[4].mxu0 %v11523_v12  ;;  %4579 = vmatprep.mubr.bf16.mxu1 %v10539_v25  ;;  %14899 = vst [vmem:[#allocation109_spill] sm:$0xff] %v11561_v17 }
 0x14c   :  { %3873 = vmatprep.mubr.bf16.mxu0 %v11527_v48  ;;  %4885 = vmatpush1.bf16.msra.mxu1 %v9768_v1  ;;  %v11557_v48 = vcombine.low %v39_v15, %v43_v24  ;;  %v55_v24 = vld [vmem:[%s14570_s0 + $0x110] sm:$0xff] }
 0x14d   :  { %v11550_v11 = vpop.f32.mrb[28].mxu1  ;;  %4886 = vmatprep.subr.bf16.mxu1 %v9773_v52  ;;  %v9779_v52 = vld [vmem:[%s14569_s1 + $0x2ac] ss:$16 sps:$4 sm:$0xff]   ;;  %v59_v15 = vld [vmem:[%s14570_s0 + $0x130] sm:$0xff] }
 0x14e   :  { %14897 = vst [vmem:[#allocation107_spill] sm:$0xff] %v11550_v11  ;;  %v11555_v25 = vpop.f32.mrb[29].mxu1  ;;  %14898 = vst [vmem:[#allocation108_spill] sm:$0xff] %v11557_v48  ;;  %v9774_v11 = vld [vmem:[%s14569_s1 + $0x288] ss:$16 sps:$4 sm:$0xff]  }
 0x14f   :  { %v11559_v12 = vpop.f32.mrb[30].mxu1 }
 0x150   :  { %v11563_v1 = vpop.f32.mrb[31].mxu1  ;;  %4887 = vmatpush1.bf16.msra.mxu1 %v9771_v3  ;;  %v9777_v3 = vld [vmem:[%s14569_s1 + $0x2a8] ss:$16 sps:$4 sm:$0xff]  }
 0x151   :  { %14900 = vst [vmem:[#allocation110_spill] sm:$0xff] %v11563_v1  ;;  %4888 = vmatprep.subr.bf16.mxu1 %v9776_v23  ;;  %v11595_v1 = vcombine.high %v55_v24, %v59_v15 }
 0x152   :  { %4580 = vmatmul.mubr.bf16.gmra.mrb[136].mxu1 %v10571_v35  ;;  %v9782_v35 = vld [vmem:[%s14569_s1 + $0x2cc] ss:$16 sps:$4 sm:$0xff]  }
 0x153   :  { %3874 = vmatmul.mubr.bf16.gmra.mrb[8].mxu0 %v11557_v48  ;;  %4589 = vmatprep.mubr.bf16.mxu1 %v10578_v38  ;;  %14903 = vst [vmem:[#allocation113_spill] sm:$0xff] %v11595_v1 }
 0x154   :  { %3883 = vmatprep.mubr.bf16.mxu0 %v11561_v17  ;;  %4889 = vmatpush1.bf16.msra.mxu1 %v9774_v11  ;;  %v11591_v17 = vcombine.low %v47_v55, %v51_v26  ;;  %v63_v55 = vld [vmem:[%s14570_s0 + $0x150] sm:$0xff] }
 0x155   :  { %v11584_v23 = vpop.f32.mrb[32].mxu1  ;;  %4890 = vmatprep.subr.bf16.mxu1 %v9779_v52  ;;  %v9785_v52 = vld [vmem:[%s14569_s1 + $0x2ec] ss:$16 sps:$4 sm:$0xff]   ;;  %v67_v26 = vld [vmem:[%s14570_s0 + $0x170] sm:$0xff] }
 0x156   :  { %14901 = vst [vmem:[#allocation111_spill] sm:$0xff] %v11584_v23  ;;  %v11589_v38 = vpop.f32.mrb[33].mxu1  ;;  %14902 = vst [vmem:[#allocation112_spill] sm:$0xff] %v11591_v17  ;;  %v9780_v23 = vld [vmem:[%s14569_s1 + $0x2c8] ss:$16 sps:$4 sm:$0xff]  }
 0x157   :  { %v11593_v48 = vpop.f32.mrb[34].mxu1 }
 0x158   :  { %v11597_v11 = vpop.f32.mrb[35].mxu1  ;;  %4891 = vmatpush1.bf16.msra.mxu1 %v9777_v3  ;;  %v9783_v3 = vld [vmem:[%s14569_s1 + $0x2e8] ss:$16 sps:$4 sm:$0xff]  }
 0x159   :  { %14904 = vst [vmem:[#allocation114_spill] sm:$0xff] %v11597_v11  ;;  %4892 = vmatprep.subr.bf16.mxu1 %v9782_v35  ;;  %v11629_v11 = vcombine.high %v63_v55, %v67_v26 }
 0x15a   :  { %4590 = vmatmul.mubr.bf16.gmra.mrb[140].mxu1 %v10607_v47  ;;  %v9788_v47 = vld [vmem:[%s14569_s1 + $0x30c] ss:$16 sps:$4 sm:$0xff]  }
 0x15b   :  { %3884 = vmatmul.mubr.bf16.gmra.mrb[12].mxu0 %v11591_v17  ;;  %4599 = vmatprep.mubr.bf16.mxu1 %v10614_v50  ;;  %14907 = vst [vmem:[#allocation117_spill] sm:$0xff] %v11629_v11 }
 0x15c   :  { %3893 = vmatprep.mubr.bf16.mxu0 %v11595_v1  ;;  %4893 = vmatpush1.bf16.msra.mxu1 %v9780_v23  ;;  %v11625_v1 = vcombine.low %v55_v24, %v59_v15  ;;  %v71_v24 = vld [vmem:[%s14570_s0 + $0x190] sm:$0xff] }
 0x15d   :  { %v11618_v35 = vpop.f32.mrb[36].mxu1  ;;  %4894 = vmatprep.subr.bf16.mxu1 %v9785_v52  ;;  %v9791_v52 = vld [vmem:[%s14569_s1 + $0x32c] ss:$16 sps:$4 sm:$0xff]   ;;  %v75_v15 = vld [vmem:[%s14570_s0 + $0x1b0] sm:$0xff] }
 0x15e   :  { %14905 = vst [vmem:[#allocation115_spill] sm:$0xff] %v11618_v35  ;;  %v11623_v50 = vpop.f32.mrb[37].mxu1  ;;  %14906 = vst [vmem:[#allocation116_spill] sm:$0xff] %v11625_v1  ;;  %v9786_v35 = vld [vmem:[%s14569_s1 + $0x308] ss:$16 sps:$4 sm:$0xff]  }
 0x15f   :  { %v11627_v17 = vpop.f32.mrb[38].mxu1 }
 0x160   :  { %v11631_v23 = vpop.f32.mrb[39].mxu1  ;;  %4895 = vmatpush1.bf16.msra.mxu1 %v9783_v3  ;;  %v9789_v3 = vld [vmem:[%s14569_s1 + $0x328] ss:$16 sps:$4 sm:$0xff]  }
 0x161   :  { %14908 = vst [vmem:[#allocation118_spill] sm:$0xff] %v11631_v23  ;;  %4896 = vmatprep.subr.bf16.mxu1 %v9788_v47  ;;  %v11663_v23 = vcombine.high %v71_v24, %v75_v15 }
 0x162   :  { %4600 = vmatmul.mubr.bf16.gmra.mrb[144].mxu1 %v10643_v61  ;;  %v9794_v61 = vld [vmem:[%s14569_s1 + $0x34c] ss:$16 sps:$4 sm:$0xff]  }
 0x163   :  { %3894 = vmatmul.mubr.bf16.gmra.mrb[16].mxu0 %v11625_v1  ;;  %4609 = vmatprep.mubr.bf16.mxu1 %v10650_v0  ;;  %14910 = vst [vmem:[#allocation120_spill] sm:$0xff] %v11663_v23 }
 0x164   :  { %3903 = vmatprep.mubr.bf16.mxu0 %v11629_v11  ;;  %4897 = vmatpush1.bf16.msra.mxu1 %v9786_v35  ;;  %v11659_v11 = vcombine.low %v63_v55, %v67_v26  ;;  %v79_v55 = vld [vmem:[%s14570_s0 + $0x1d0] sm:$0xff] }
 0x165   :  { %v11652_v47 = vpop.f32.mrb[40].mxu1  ;;  %4898 = vmatprep.subr.bf16.mxu1 %v9791_v52  ;;  %v83_v26 = vld [vmem:[%s14570_s0 + $0x1f0] sm:$0xff] }
 0x166   :  { %14909 = vst [vmem:[#allocation119_spill] sm:$0xff] %v11652_v47  ;;  %v11657_v0 = vpop.f32.mrb[41].mxu1  ;;  %v9792_v47 = vld [vmem:[%s14569_s1 + $0x348] ss:$16 sps:$4 sm:$0xff]  }
 0x167   :  { %v11661_v1 = vpop.f32.mrb[42].mxu1 }
 0x168   :  { %v11665_v35 = vpop.f32.mrb[43].mxu1  ;;  %4899 = vmatpush1.bf16.msra.mxu1 %v9789_v3 }
 0x169   :  { %4900 = vmatprep.subr.bf16.mxu1 %v9794_v61  ;;  %v11684_v61 = vcombine.low %v71_v24, %v75_v15  ;;  %v87_v24 = vld [vmem:[%s14570_s0 + $0x210] sm:$0xff] }
 0x16a   :  { %4610 = vmatmul.mubr.bf16.gmra.mrb[148].mxu1 %v10679_v9 }
 0x16b   :  { %3904 = vmatmul.mubr.bf16.gmra.mrb[20].mxu0 %v11659_v11  ;;  %4619 = vmatprep.mubr.bf16.mxu1 %v10686_v16  ;;  %14912 = vst [vmem:[#allocation122_spill] sm:$0xff] %v11684_v61 }
 0x16c   :  { %3913 = vmatprep.mubr.bf16.mxu0 %v11663_v23  ;;  %4901 = vmatpush1.bf16.msra.mxu1 %v9792_v47  ;;  %v11688_v23 = vcombine.high %v79_v55, %v83_v26  ;;  %v9795_v47 = vld [vmem:[%s14569_s1 + $0x368] ss:$16 sps:$4 sm:$0xff]  }
 0x16d   :  { %v11680_v52 = vpop.f32.mrb[44].mxu1 }
 0x16e   :  { %v11682_v3 = vpop.f32.mrb[45].mxu1  ;;  %14914 = vst [vmem:[#allocation124_spill] sm:$0xff] %v11688_v23 }
 0x16f   :  { %14911 = vst [vmem:[#allocation121_spill] sm:$0xff] %v11682_v3  ;;  %v11686_v9 = vpop.f32.mrb[46].mxu1  ;;  %v9797_v3 = vld [vmem:[%s14569_s1 + $0x36c] ss:$16 sps:$4 sm:$0xff]  }
 0x170   :  { %14913 = vst [vmem:[#allocation123_spill] sm:$0xff] %v11686_v9  ;;  %v11690_v16 = vpop.f32.mrb[47].mxu1  ;;  %4902 = vmatprep.subr.bf16.mxu1 %v9797_v3  ;;  %v95_v3 = vld [vmem:[%s14570_s0 + $0x250] sm:$0xff] }
 0x171   :  { %14915 = vst [vmem:[#allocation125_spill] sm:$0xff] %v11690_v16  ;;  %4903 = vmatpush1.bf16.msra.mxu1 %v9795_v47  ;;  %v11712_v16 = vcombine.low %v79_v55, %v83_v26  ;;  %v99_v55 = vld [vmem:[%s14570_s0 + $0x270] sm:$0xff] }
 0x172   :  { %4620 = vmatmul.mubr.bf16.gmra.mrb[152].mxu1 %v10706_v22  ;;  %v91_v22 = vld [vmem:[%s14570_s0 + $0x230] sm:$0xff] }
 0x173   :  { %3914 = vmatmul.mubr.bf16.gmra.mrb[24].mxu0 %v11684_v61  ;;  %4629 = vmatprep.mubr.bf16.mxu1 %v10710_v28  ;;  %14916 = vst [vmem:[#allocation126_spill] sm:$0xff] %v11712_v16 }
 0x174   :  { %3923 = vmatprep.mubr.bf16.mxu0 %v11688_v23  ;;  %v11716_v23 = vcombine.high %v87_v24, %v91_v22 }
 0x175   :  { %v11708_v15 = vpop.f32.mrb[48].mxu1 }
 0x176   :  { %v11710_v61 = vpop.f32.mrb[49].mxu1  ;;  %14918 = vst [vmem:[#allocation128_spill] sm:$0xff] %v11716_v23 }
 0x177   :  { %v11714_v9 = vpop.f32.mrb[50].mxu1 }
 0x178   :  { %14917 = vst [vmem:[#allocation127_spill] sm:$0xff] %v11714_v9  ;;  %v11718_v28 = vpop.f32.mrb[51].mxu1  ;;  %v9798_v9 = vld [vmem:[%s14569_s1 + $0x600] ss:$16 sps:$4 sm:$0xff]  }
 0x179   :  { %14919 = vst [vmem:[#allocation129_spill] sm:$0xff] %v11718_v28  ;;  %v11734_v28 = vcombine.low %v87_v24, %v91_v22  ;;  %v9801_v24 = vld [vmem:[%s14569_s1 + $0x388] ss:$16 sps:$4 sm:$0xff]   ;;  %v9803_v22 = vld [vmem:[%s14569_s1 + $0x38c] ss:$16 sps:$4 sm:$0xff]  }
 0x17a   :  { %4630 = vmatmul.mubr.bf16.gmra.mrb[156].mxu1 %v10736_v40  ;;  %v11738_v40 = vcombine.high %v95_v3, %v99_v55  ;;  %4904 = vmatprep.subr.bf16.mxu1 %v9803_v22 }
 0x17b   :  { %3924 = vmatmul.mubr.bf16.gmra.mrb[28].mxu0 %v11712_v16  ;;  %4639 = vmatprep.mubr.bf16.mxu1 %v10740_v42  ;;  %14922 = vst [vmem:[#allocation132_spill] sm:$0xff] %v11734_v28  ;;  %v9800_v42 = vld [vmem:[%s14569_s1 + $0x604] ss:$16 sps:$4 sm:$0xff]  }
 0x17c   :  { %3933 = vmatprep.mubr.bf16.mxu0 %v11716_v23  ;;  %14924 = vst [vmem:[#allocation134_spill] sm:$0xff] %v11738_v40  ;;  %4174 = vmatprep.subr.bf16.mxu0 %v9800_v42 }
 0x17d   :  { %v11730_v26 = vpop.f32.mrb[52].mxu1  ;;  %4175 = vmatpush1.bf16.msra.mxu0 %v9798_v9  ;;  %4905 = vmatpush1.bf16.msra.mxu1 %v9801_v24  ;;  %v9809_v9 = vld [vmem:[%s14569_s1 + $0x644] ss:$16 sps:$4 sm:$0xff]   ;;  %v9807_v24 = vld [vmem:[%s14569_s1 + $0x640] ss:$16 sps:$4 sm:$0xff]  }
 0x17e   :  { %14920 = vst [vmem:[#allocation130_spill] sm:$0xff] %v11730_v26  ;;  %v11732_v47 = vpop.f32.mrb[53].mxu1 }
 0x17f   :  { %14921 = vst [vmem:[#allocation131_spill] sm:$0xff] %v11732_v47  ;;  %v11736_v16 = vpop.f32.mrb[54].mxu1  ;;  %v11774_v47 = vcombine.low %v95_v3, %v99_v55  ;;  %v115_v3 = vld [vmem:[%s14570_s0 + $0x2f0] sm:$0xff] }
 0x180   :  { %14923 = vst [vmem:[#allocation133_spill] sm:$0xff] %v11736_v16  ;;  %v11740_v23 = vpop.f32.mrb[55].mxu1  ;;  %v9812_v55 = vld [vmem:[%s14569_s1 + $0x664] ss:$16 sps:$4 sm:$0xff]  }
 0x181   :  { %14925 = vst [vmem:[#allocation135_spill] sm:$0xff] %v11740_v23  ;;  %v103_v23 = vld [vmem:[%s14570_s0 + $0x290] sm:$0xff]  ;;  %14926 = vst [vmem:[#allocation136_spill] sm:$0xff] %v11774_v47 }
 0x182   :  { %4640 = vmatmul.mubr.bf16.gmra.mrb[160].mxu1 %v10760_v53  ;;  %v107_v53 = vld [vmem:[%s14570_s0 + $0x2b0] sm:$0xff] }
 0x183   :  { %3934 = vmatmul.mubr.bf16.gmra.mrb[32].mxu0 %v11734_v28  ;;  %4649 = vmatprep.mubr.bf16.mxu1 %v10764_v56  ;;  %v9806_v28 = vld [vmem:[%s14569_s1 + $0x624] ss:$16 sps:$4 sm:$0xff]   ;;  %v9804_v56 = vld [vmem:[%s14569_s1 + $0x620] ss:$16 sps:$4 sm:$0xff]   ;;  %v11778_v42 = vcombine.high %v103_v23, %v107_v53 }
 0x184   :  { %3943 = vmatprep.mubr.bf16.mxu0 %v11738_v40  ;;  %4176 = vmatprep.subr.bf16.mxu0 %v9806_v28  ;;  %v111_v28 = vld [vmem:[%s14570_s0 + $0x2d0] sm:$0xff] }
 0x185   :  { %v11767_v16 = vpop.f32.mrb[56].mxu1  ;;  %14928 = vst [vmem:[#allocation138_spill] sm:$0xff] %v11778_v42  ;;  %4177 = vmatpush1.bf16.msra.mxu0 %v9804_v56 }
 0x186   :  { %v11772_v40 = vpop.f32.mrb[57].mxu1  ;;  %4178 = vmatprep.subr.bf16.mxu0 %v9809_v9 }
 0x187   :  { %v11776_v26 = vpop.f32.mrb[58].mxu1 }
 0x188   :  { %14927 = vst [vmem:[#allocation137_spill] sm:$0xff] %v11776_v26  ;;  %v11780_v22 = vpop.f32.mrb[59].mxu1 }
 0x189   :  { %14929 = vst [vmem:[#allocation139_spill] sm:$0xff] %v11780_v22  ;;  %4179 = vmatpush1.bf16.msra.mxu0 %v9807_v24  ;;  %v11812_v22 = vcombine.high %v111_v28, %v115_v3  ;;  %v9813_v24 = vld [vmem:[%s14569_s1 + $0x680] ss:$16 sps:$4 sm:$0xff]  }
 0x18a   :  { %4650 = vmatmul.mubr.bf16.gmra.mrb[164].mxu1 %v10802_v8  ;;  %v9810_v8 = vld [vmem:[%s14569_s1 + $0x660] ss:$16 sps:$4 sm:$0xff]   ;;  %4180 = vmatprep.subr.bf16.mxu0 %v9812_v55  ;;  %v9821_v55 = vld [vmem:[%s14569_s1 + $0x6a4] ss:$16 sps:$4 sm:$0xff]  }
 0x18b   :  { %3944 = vmatmul.mubr.bf16.gmra.mrb[36].mxu0 %v11774_v47  ;;  %4659 = vmatprep.mubr.bf16.mxu1 %v10806_v18  ;;  %14934 = vst [vmem:[#allocation144_spill] sm:$0xff] %v11812_v22 }
 0x18c   :  { %3953 = vmatprep.mubr.bf16.mxu0 %v11778_v42  ;;  %v11808_v42 = vcombine.low %v103_v23, %v107_v53  ;;  %v9816_v23 = vld [vmem:[%s14569_s1 + $0x3a8] ss:$16 sps:$4 sm:$0xff]   ;;  %v9818_v53 = vld [vmem:[%s14569_s1 + $0x3ac] ss:$16 sps:$4 sm:$0xff]  }
 0x18d   :  { %v11801_v56 = vpop.f32.mrb[60].mxu1  ;;  %4181 = vmatpush1.bf16.msra.mxu0 %v9810_v8  ;;  %v123_v8 = vld [vmem:[%s14570_s0 + $0x330] sm:$0xff]  ;;  %4906 = vmatprep.subr.bf16.mxu1 %v9818_v53 }
 0x18e   :  { %14930 = vst [vmem:[#allocation140_spill] sm:$0xff] %v11801_v56  ;;  %v11806_v18 = vpop.f32.mrb[61].mxu1  ;;  %14932 = vst [vmem:[#allocation142_spill] sm:$0xff] %v11808_v42  ;;  %v9815_v56 = vld [vmem:[%s14569_s1 + $0x684] ss:$16 sps:$4 sm:$0xff]   ;;  %4907 = vmatpush1.bf16.msra.mxu1 %v9816_v23 }
 0x18f   :  { %14931 = vst [vmem:[#allocation141_spill] sm:$0xff] %v11806_v18  ;;  %v11810_v47 = vpop.f32.mrb[62].mxu1  ;;  %4182 = vmatprep.subr.bf16.mxu0 %v9815_v56  ;;  %v9824_v56 = vld [vmem:[%s14569_s1 + $0x6c4] ss:$16 sps:$4 sm:$0xff]  }
 0x190   :  { %14933 = vst [vmem:[#allocation143_spill] sm:$0xff] %v11810_v47  ;;  %v11814_v9 = vpop.f32.mrb[63].mxu1  ;;  %v131_v23 = vld [vmem:[%s14570_s0 + $0x370] sm:$0xff] }
 0x191   :  { %14935 = vst [vmem:[#allocation145_spill] sm:$0xff] %v11814_v9  ;;  %4183 = vmatpush1.bf16.msra.mxu0 %v9813_v24  ;;  %v11848_v9 = vcombine.low %v111_v28, %v115_v3  ;;  %v9822_v24 = vld [vmem:[%s14569_s1 + $0x6c0] ss:$16 sps:$4 sm:$0xff]   ;;  %v9827_v28 = vld [vmem:[%s14569_s1 + $0x6e4] ss:$16 sps:$4 sm:$0xff]  }
 0x192   :  { %4660 = vmatmul.mubr.bf16.gmra.mrb[168].mxu1 %v10838_v44  ;;  %v119_v44 = vld [vmem:[%s14570_s0 + $0x310] sm:$0xff]  ;;  %4184 = vmatprep.subr.bf16.mxu0 %v9821_v55 }
 0x193   :  { %3954 = vmatmul.mubr.bf16.gmra.mrb[40].mxu0 %v11808_v42  ;;  %4669 = vmatprep.mubr.bf16.mxu1 %v10842_v46  ;;  %v9819_v46 = vld [vmem:[%s14569_s1 + $0x6a0] ss:$16 sps:$4 sm:$0xff]   ;;  %14936 = vst [vmem:[#allocation146_spill] sm:$0xff] %v11848_v9  ;;  %v11852_v18 = vcombine.high %v119_v44, %v123_v8 }
 0x194   :  { %3963 = vmatprep.mubr.bf16.mxu0 %v11812_v22  ;;  %v127_v3 = vld [vmem:[%s14570_s0 + $0x350] sm:$0xff] }
 0x195   :  { %v11841_v42 = vpop.f32.mrb[64].mxu1  ;;  %14937 = vst [vmem:[#allocation147_spill] sm:$0xff] %v11852_v18  ;;  %4185 = vmatpush1.bf16.msra.mxu0 %v9819_v46  ;;  %v11882_v46 = vcombine.low %v119_v44, %v123_v8  ;;  %v9831_v44 = vld [vmem:[%s14569_s1 + $0x3c8] ss:$16 sps:$4 sm:$0xff]   ;;  %v9833_v8 = vld [vmem:[%s14569_s1 + $0x3cc] ss:$16 sps:$4 sm:$0xff]  }
 0x196   :  { %v11846_v22 = vpop.f32.mrb[65].mxu1  ;;  %4186 = vmatprep.subr.bf16.mxu0 %v9824_v56  ;;  %v9830_v56 = vld [vmem:[%s14569_s1 + $0x704] ss:$16 sps:$4 sm:$0xff]   ;;  %4908 = vmatprep.subr.bf16.mxu1 %v9833_v8 }
 0x197   :  { %v11850_v47 = vpop.f32.mrb[66].mxu1  ;;  %14940 = vst [vmem:[#allocation150_spill] sm:$0xff] %v11882_v46  ;;  %4909 = vmatpush1.bf16.msra.mxu1 %v9831_v44  ;;  %v147_v44 = vld [vmem:[%s14570_s0 + $0x3f0] sm:$0xff] }
 0x198   :  { %v11854_v26 = vpop.f32.mrb[67].mxu1 }
 0x199   :  { %4187 = vmatpush1.bf16.msra.mxu0 %v9822_v24  ;;  %v9828_v24 = vld [vmem:[%s14569_s1 + $0x700] ss:$16 sps:$4 sm:$0xff]  }
 0x19a   :  { %4670 = vmatmul.mubr.bf16.gmra.mrb[172].mxu1 %v10880_v20  ;;  %v9825_v20 = vld [vmem:[%s14569_s1 + $0x6e0] ss:$16 sps:$4 sm:$0xff]   ;;  %4188 = vmatprep.subr.bf16.mxu0 %v9827_v28  ;;  %v9836_v28 = vld [vmem:[%s14569_s1 + $0x724] ss:$16 sps:$4 sm:$0xff]  }
 0x19b   :  { %3964 = vmatmul.mubr.bf16.gmra.mrb[44].mxu0 %v11848_v9  ;;  %4679 = vmatprep.mubr.bf16.mxu1 %v10884_v32 }
 0x19c   :  { %3973 = vmatprep.mubr.bf16.mxu0 %v11852_v18  ;;  %v11886_v18 = vcombine.high %v127_v3, %v131_v23 }
 0x19d   :  { %v11875_v53 = vpop.f32.mrb[68].mxu1  ;;  %4189 = vmatpush1.bf16.msra.mxu0 %v9825_v20  ;;  %v139_v20 = vld [vmem:[%s14570_s0 + $0x3b0] sm:$0xff] }
 0x19e   :  { %14938 = vst [vmem:[#allocation148_spill] sm:$0xff] %v11875_v53  ;;  %v11880_v55 = vpop.f32.mrb[69].mxu1  ;;  %14942 = vst [vmem:[#allocation152_spill] sm:$0xff] %v11886_v18  ;;  %4190 = vmatprep.subr.bf16.mxu0 %v9830_v56  ;;  %v9839_v56 = vld [vmem:[%s14569_s1 + $0x744] ss:$16 sps:$4 sm:$0xff]  }
 0x19f   :  { %14939 = vst [vmem:[#allocation149_spill] sm:$0xff] %v11880_v55  ;;  %v11884_v32 = vpop.f32.mrb[70].mxu1 }
 0x1a0   :  { %14941 = vst [vmem:[#allocation151_spill] sm:$0xff] %v11884_v32  ;;  %v11888_v9 = vpop.f32.mrb[71].mxu1 }
 0x1a1   :  { %14943 = vst [vmem:[#allocation153_spill] sm:$0xff] %v11888_v9  ;;  %4191 = vmatpush1.bf16.msra.mxu0 %v9828_v24  ;;  %v11922_v9 = vcombine.low %v127_v3, %v131_v23  ;;  %v9837_v24 = vld [vmem:[%s14569_s1 + $0x740] ss:$16 sps:$4 sm:$0xff]   ;;  %v9842_v3 = vld [vmem:[%s14569_s1 + $0x764] ss:$16 sps:$4 sm:$0xff]  }
 0x1a2   :  { %4680 = vmatmul.mubr.bf16.gmra.mrb[176].mxu1 %v10916_v6  ;;  %v135_v6 = vld [vmem:[%s14570_s0 + $0x390] sm:$0xff]  ;;  %4192 = vmatprep.subr.bf16.mxu0 %v9836_v28 }
 0x1a3   :  { %3974 = vmatmul.mubr.bf16.gmra.mrb[48].mxu0 %v11882_v46  ;;  %4689 = vmatprep.mubr.bf16.mxu1 %v10920_v21  ;;  %v9834_v21 = vld [vmem:[%s14569_s1 + $0x720] ss:$16 sps:$4 sm:$0xff]   ;;  %14944 = vst [vmem:[#allocation154_spill] sm:$0xff] %v11922_v9  ;;  %v11926_v55 = vcombine.high %v135_v6, %v139_v20 }
 0x1a4   :  { %3983 = vmatprep.mubr.bf16.mxu0 %v11886_v18  ;;  %v143_v23 = vld [vmem:[%s14570_s0 + $0x3d0] sm:$0xff] }
 0x1a5   :  { %v11915_v46 = vpop.f32.mrb[72].mxu1  ;;  %14945 = vst [vmem:[#allocation155_spill] sm:$0xff] %v11926_v55  ;;  %4193 = vmatpush1.bf16.msra.mxu0 %v9834_v21  ;;  %v11956_v21 = vcombine.low %v135_v6, %v139_v20  ;;  %v9846_v6 = vld [vmem:[%s14569_s1 + $0x3e8] ss:$16 sps:$4 sm:$0xff]   ;;  %v9848_v20 = vld [vmem:[%s14569_s1 + $0x3ec] ss:$16 sps:$4 sm:$0xff]  }
 0x1a6   :  { %v11920_v18 = vpop.f32.mrb[73].mxu1  ;;  %4194 = vmatprep.subr.bf16.mxu0 %v9839_v56  ;;  %v9845_v56 = vld [vmem:[%s14569_s1 + $0x784] ss:$16 sps:$4 sm:$0xff]   ;;  %4910 = vmatprep.subr.bf16.mxu1 %v9848_v20 }
 0x1a7   :  { %v11924_v32 = vpop.f32.mrb[74].mxu1  ;;  %14948 = vst [vmem:[#allocation158_spill] sm:$0xff] %v11956_v21  ;;  %4911 = vmatpush1.bf16.msra.mxu1 %v9846_v6  ;;  %v163_v6 = vld [vmem:[%s14570_s0 + $0x470] sm:$0xff] }
 0x1a8   :  { %v11928_v53 = vpop.f32.mrb[75].mxu1 }
 0x1a9   :  { %4195 = vmatpush1.bf16.msra.mxu0 %v9837_v24  ;;  %v9843_v24 = vld [vmem:[%s14569_s1 + $0x780] ss:$16 sps:$4 sm:$0xff]  }
 0x1aa   :  { %4690 = vmatmul.mubr.bf16.gmra.mrb[180].mxu1 %v10958_v37  ;;  %v9840_v37 = vld [vmem:[%s14569_s1 + $0x760] ss:$16 sps:$4 sm:$0xff]   ;;  %4196 = vmatprep.subr.bf16.mxu0 %v9842_v3  ;;  %v9851_v3 = vld [vmem:[%s14569_s1 + $0x7a4] ss:$16 sps:$4 sm:$0xff]  }
 0x1ab   :  { %3984 = vmatmul.mubr.bf16.gmra.mrb[52].mxu0 %v11922_v9  ;;  %4699 = vmatprep.mubr.bf16.mxu1 %v10962_v19 }
 0x1ac   :  { %3993 = vmatprep.mubr.bf16.mxu0 %v11926_v55  ;;  %v11960_v55 = vcombine.high %v143_v23, %v147_v44 }
 0x1ad   :  { %v11949_v8 = vpop.f32.mrb[76].mxu1  ;;  %4197 = vmatpush1.bf16.msra.mxu0 %v9840_v37  ;;  %v155_v37 = vld [vmem:[%s14570_s0 + $0x430] sm:$0xff] }
 0x1ae   :  { %14946 = vst [vmem:[#allocation156_spill] sm:$0xff] %v11949_v8  ;;  %v11954_v28 = vpop.f32.mrb[77].mxu1  ;;  %14950 = vst [vmem:[#allocation160_spill] sm:$0xff] %v11960_v55  ;;  %4198 = vmatprep.subr.bf16.mxu0 %v9845_v56  ;;  %v9854_v56 = vld [vmem:[%s14569_s1 + $0x7c4] ss:$16 sps:$4 sm:$0xff]  }
 0x1af   :  { %14947 = vst [vmem:[#allocation157_spill] sm:$0xff] %v11954_v28  ;;  %v11958_v19 = vpop.f32.mrb[78].mxu1 }
 0x1b0   :  { %14949 = vst [vmem:[#allocation159_spill] sm:$0xff] %v11958_v19  ;;  %v11962_v9 = vpop.f32.mrb[79].mxu1 }
 0x1b1   :  { %14951 = vst [vmem:[#allocation161_spill] sm:$0xff] %v11962_v9  ;;  %4199 = vmatpush1.bf16.msra.mxu0 %v9843_v24  ;;  %v11996_v9 = vcombine.low %v143_v23, %v147_v44  ;;  %v9852_v24 = vld [vmem:[%s14569_s1 + $0x7c0] ss:$16 sps:$4 sm:$0xff]   ;;  %v9857_v23 = vld [vmem:[%s14569_s1 + $0x7e4] ss:$16 sps:$4 sm:$0xff]  }
 0x1b2   :  { %4700 = vmatmul.mubr.bf16.gmra.mrb[184].mxu1 %v10994_v60  ;;  %v151_v60 = vld [vmem:[%s14570_s0 + $0x410] sm:$0xff]  ;;  %4200 = vmatprep.subr.bf16.mxu0 %v9851_v3 }
 0x1b3   :  { %3994 = vmatmul.mubr.bf16.gmra.mrb[56].mxu0 %v11956_v21  ;;  %4709 = vmatprep.mubr.bf16.mxu1 %v10998_v13  ;;  %v9849_v13 = vld [vmem:[%s14569_s1 + $0x7a0] ss:$16 sps:$4 sm:$0xff]   ;;  %14952 = vst [vmem:[#allocation162_spill] sm:$0xff] %v11996_v9  ;;  %v12000_v28 = vcombine.high %v151_v60, %v155_v37 }
 0x1b4   :  { %4003 = vmatprep.mubr.bf16.mxu0 %v11960_v55  ;;  %v159_v44 = vld [vmem:[%s14570_s0 + $0x450] sm:$0xff] }
 0x1b5   :  { %v11989_v21 = vpop.f32.mrb[80].mxu1  ;;  %14953 = vst [vmem:[#allocation163_spill] sm:$0xff] %v12000_v28  ;;  %4201 = vmatpush1.bf16.msra.mxu0 %v9849_v13  ;;  %v12030_v13 = vcombine.low %v151_v60, %v155_v37  ;;  %v167_v60 = vld [vmem:[%s14570_s0 + $0x490] sm:$0xff] }
 0x1b6   :  { %v11994_v55 = vpop.f32.mrb[81].mxu1  ;;  %4202 = vmatprep.subr.bf16.mxu0 %v9854_v56  ;;  %v9860_v56 = vld [vmem:[%s14569_s1 + $0x40c] ss:$16 sps:$4 sm:$0xff]   ;;  %v171_v37 = vld [vmem:[%s14570_s0 + $0x4b0] sm:$0xff] }
 0x1b7   :  { %v11998_v19 = vpop.f32.mrb[82].mxu1  ;;  %14954 = vst [vmem:[#allocation164_spill] sm:$0xff] %v12030_v13  ;;  %5233 = vmatprep.subr.bf16.mxu1 %v9860_v56  ;;  %v175_v56 = vld [vmem:[%s14570_s0 + $0x4d0] sm:$0xff] }
 0x1b8   :  { %v12002_v8 = vpop.f32.mrb[83].mxu1 }
 0x1b9   :  { %4203 = vmatpush1.bf16.msra.mxu0 %v9852_v24 }
 0x1ba   :  { %4710 = vmatmul.mubr.bf16.gmra.mrb[188].mxu1 %v11036_v57  ;;  %v9855_v57 = vld [vmem:[%s14569_s1 + $0x7e0] ss:$16 sps:$4 sm:$0xff]   ;;  %4204 = vmatprep.subr.bf16.mxu0 %v9857_v23  ;;  %v12055_v23 = vcombine.low %v159_v44, %v163_v6 }
 0x1bb   :  { %4004 = vmatmul.mubr.bf16.gmra.mrb[60].mxu0 %v11996_v9  ;;  %4719 = vmatprep.mubr.bf16.mxu1 %v11040_v43 }
 0x1bc   :  { %4013 = vmatprep.mubr.bf16.mxu0 %v12000_v28  ;;  %v12034_v28 = vcombine.high %v159_v44, %v163_v6  ;;  %14960 = vst [vmem:[#allocation170_spill] sm:$0xff] %v12055_v23  ;;  %v179_v44 = vld [vmem:[%s14570_s0 + $0x4f0] sm:$0xff] }
 0x1bd   :  { %v12023_v20 = vpop.f32.mrb[84].mxu1  ;;  %4205 = vmatpush1.bf16.msra.mxu0 %v9855_v57 }
 0x1be   :  { %v12028_v3 = vpop.f32.mrb[85].mxu1  ;;  %14956 = vst [vmem:[#allocation166_spill] sm:$0xff] %v12034_v28 }
 0x1bf   :  { %v12032_v43 = vpop.f32.mrb[86].mxu1 }
 0x1c0   :  { %14955 = vst [vmem:[#allocation165_spill] sm:$0xff] %v12032_v43  ;;  %v12036_v9 = vpop.f32.mrb[87].mxu1  ;;  %v15179_v43 = vld [vmem:[#allocation89_spill] sm:$0xff] }
 0x1c1   :  { %14957 = vst [vmem:[#allocation167_spill] sm:$0xff] %v12036_v9  ;;  %v15173_v9 = vld [vmem:[#allocation83_spill] sm:$0xff] }
 0x1c2   :  { %4720 = vmatmul.mubr.bf16.gmra.mrb[192].mxu1 %v11072_v2 }
 0x1c3   :  { %4014 = vmatmul.mubr.bf16.gmra.mrb[64].mxu0 %v12030_v13  ;;  %4729 = vmatprep.mubr.bf16.mxu1 %v11076_v41 }
 0x1c4   :  { %4023 = vmatprep.mubr.bf16.mxu0 %v12034_v28  ;;  %v12059_v28 = vcombine.high %v167_v60, %v171_v37 }
 0x1c5   :  { %v12051_v24 = vpop.f32.mrb[88].mxu1 }
 0x1c6   :  { %14958 = vst [vmem:[#allocation168_spill] sm:$0xff] %v12051_v24  ;;  %v12053_v2 = vpop.f32.mrb[89].mxu1  ;;  %14962 = vst [vmem:[#allocation172_spill] sm:$0xff] %v12059_v28  ;;  %v15165_v24 = vld [vmem:[#allocation75_spill] sm:$0xff] }
 0x1c7   :  { %14959 = vst [vmem:[#allocation169_spill] sm:$0xff] %v12053_v2  ;;  %v12057_v57 = vpop.f32.mrb[90].mxu1 }
 0x1c8   :  { %14961 = vst [vmem:[#allocation171_spill] sm:$0xff] %v12057_v57  ;;  %v12061_v41 = vpop.f32.mrb[91].mxu1 }
 0x1c9   :  { %14963 = vst [vmem:[#allocation173_spill] sm:$0xff] %v12061_v41  ;;  %v12077_v41 = vcombine.low %v167_v60, %v171_v37  ;;  %v187_v60 = vld [vmem:[%s14570_s0 + $0x530] sm:$0xff] }
 0x1ca   :  { %4730 = vmatmul.mubr.bf16.gmra.mrb[196].mxu1 %v11099_v59  ;;  %v12081_v59 = vcombine.high %v175_v56, %v179_v44 }
 0x1cb   :  { %4024 = vmatmul.mubr.bf16.gmra.mrb[68].mxu0 %v12055_v23  ;;  %4739 = vmatprep.mubr.bf16.mxu1 %v11103_v63  ;;  %14966 = vst [vmem:[#allocation176_spill] sm:$0xff] %v12077_v41  ;;  %v183_v63 = vld [vmem:[%s14570_s0 + $0x510] sm:$0xff] }
 0x1cc   :  { %4033 = vmatprep.mubr.bf16.mxu0 %v12059_v28  ;;  %14968 = vst [vmem:[#allocation178_spill] sm:$0xff] %v12081_v59 }
 0x1cd   :  { %v12073_v6 = vpop.f32.mrb[92].mxu1 }
 0x1ce   :  { %14964 = vst [vmem:[#allocation174_spill] sm:$0xff] %v12073_v6  ;;  %v12075_v57 = vpop.f32.mrb[93].mxu1  ;;  %v15157_v6 = vld [vmem:[#allocation67_spill] sm:$0xff] }
 0x1cf   :  { %14965 = vst [vmem:[#allocation175_spill] sm:$0xff] %v12075_v57  ;;  %v12079_v23 = vpop.f32.mrb[94].mxu1 }
 0x1d0   :  { %14967 = vst [vmem:[#allocation177_spill] sm:$0xff] %v12079_v23  ;;  %v12083_v28 = vpop.f32.mrb[95].mxu1 }
 0x1d1   :  { %14969 = vst [vmem:[#allocation179_spill] sm:$0xff] %v12083_v28  ;;  %v12099_v28 = vcombine.low %v175_v56, %v179_v44  ;;  %v195_v56 = vld [vmem:[%s14570_s0 + $0x570] sm:$0xff] }
 0x1d2   :  { %4740 = vmatmul.mubr.bf16.gmra.mrb[200].mxu1 %v11123_v31  ;;  %v12103_v31 = vcombine.high %v183_v63, %v187_v60 }
 0x1d3   :  { %4034 = vmatmul.mubr.bf16.gmra.mrb[72].mxu0 %v12077_v41  ;;  %4749 = vmatprep.mubr.bf16.mxu1 %v11127_v54  ;;  %14972 = vst [vmem:[#allocation182_spill] sm:$0xff] %v12099_v28  ;;  %v191_v54 = vld [vmem:[%s14570_s0 + $0x550] sm:$0xff] }
 0x1d4   :  { %4043 = vmatprep.mubr.bf16.mxu0 %v12081_v59  ;;  %14974 = vst [vmem:[#allocation184_spill] sm:$0xff] %v12103_v31 }
 0x1d5   :  { %v12095_v37 = vpop.f32.mrb[96].mxu1 }
 0x1d6   :  { %14970 = vst [vmem:[#allocation180_spill] sm:$0xff] %v12095_v37  ;;  %v12097_v23 = vpop.f32.mrb[97].mxu1 }
 0x1d7   :  { %14971 = vst [vmem:[#allocation181_spill] sm:$0xff] %v12097_v23  ;;  %v12101_v41 = vpop.f32.mrb[98].mxu1 }
 0x1d8   :  { %14973 = vst [vmem:[#allocation183_spill] sm:$0xff] %v12101_v41  ;;  %v12105_v59 = vpop.f32.mrb[99].mxu1 }
 0x1d9   :  { %14975 = vst [vmem:[#allocation185_spill] sm:$0xff] %v12105_v59  ;;  %v12121_v59 = vcombine.low %v183_v63, %v187_v60  ;;  %v203_v63 = vld [vmem:[%s14570_s0 + $0x5b0] sm:$0xff] }
 0x1da   :  { %4750 = vmatmul.mubr.bf16.gmra.mrb[204].mxu1 %v11147_v7  ;;  %v12125_v7 = vcombine.high %v191_v54, %v195_v56 }
 0x1db   :  { %4044 = vmatmul.mubr.bf16.gmra.mrb[76].mxu0 %v12099_v28  ;;  %4759 = vmatprep.mubr.bf16.mxu1 %v11151_v5  ;;  %14978 = vst [vmem:[#allocation188_spill] sm:$0xff] %v12121_v59  ;;  %v199_v5 = vld [vmem:[%s14570_s0 + $0x590] sm:$0xff] }
 0x1dc   :  { %4053 = vmatprep.mubr.bf16.mxu0 %v12103_v31  ;;  %14980 = vst [vmem:[#allocation190_spill] sm:$0xff] %v12125_v7 }
 0x1dd   :  { %v12117_v44 = vpop.f32.mrb[100].mxu1 }
 0x1de   :  { %14976 = vst [vmem:[#allocation186_spill] sm:$0xff] %v12117_v44  ;;  %v12119_v41 = vpop.f32.mrb[101].mxu1 }
 0x1df   :  { %14977 = vst [vmem:[#allocation187_spill] sm:$0xff] %v12119_v41  ;;  %v12123_v28 = vpop.f32.mrb[102].mxu1 }
 0x1e0   :  { %14979 = vst [vmem:[#allocation189_spill] sm:$0xff] %v12123_v28  ;;  %v12127_v31 = vpop.f32.mrb[103].mxu1 }
 0x1e1   :  { %14981 = vst [vmem:[#allocation191_spill] sm:$0xff] %v12127_v31  ;;  %v12143_v31 = vcombine.low %v191_v54, %v195_v56  ;;  %v211_v54 = vld [vmem:[%s14570_s0 + $0x5f0] sm:$0xff] }
 0x1e2   :  { %4760 = vmatmul.mubr.bf16.gmra.mrb[208].mxu1 %v11171_v30  ;;  %v12147_v30 = vcombine.high %v199_v5, %v203_v63 }
 0x1e3   :  { %4054 = vmatmul.mubr.bf16.gmra.mrb[80].mxu0 %v12121_v59  ;;  %4769 = vmatprep.mubr.bf16.mxu1 %v11175_v27  ;;  %14984 = vst [vmem:[#allocation194_spill] sm:$0xff] %v12143_v31  ;;  %v207_v27 = vld [vmem:[%s14570_s0 + $0x5d0] sm:$0xff] }
 0x1e4   :  { %4063 = vmatprep.mubr.bf16.mxu0 %v12125_v7  ;;  %14986 = vst [vmem:[#allocation196_spill] sm:$0xff] %v12147_v30 }
 0x1e5   :  { %v12139_v60 = vpop.f32.mrb[104].mxu1 }
 0x1e6   :  { %14982 = vst [vmem:[#allocation192_spill] sm:$0xff] %v12139_v60  ;;  %v12141_v28 = vpop.f32.mrb[105].mxu1 }
 0x1e7   :  { %14983 = vst [vmem:[#allocation193_spill] sm:$0xff] %v12141_v28  ;;  %v12145_v59 = vpop.f32.mrb[106].mxu1 }
 0x1e8   :  { %14985 = vst [vmem:[#allocation195_spill] sm:$0xff] %v12145_v59  ;;  %v12149_v7 = vpop.f32.mrb[107].mxu1 }
 0x1e9   :  { %14987 = vst [vmem:[#allocation197_spill] sm:$0xff] %v12149_v7  ;;  %v12165_v7 = vcombine.low %v199_v5, %v203_v63  ;;  %v219_v5 = vld [vmem:[%s14570_s0 + $0x630] sm:$0xff] }
 0x1ea   :  { %4770 = vmatmul.mubr.bf16.gmra.mrb[212].mxu1 %v11195_v34  ;;  %v12169_v34 = vcombine.high %v207_v27, %v211_v54 }
 0x1eb   :  { %4064 = vmatmul.mubr.bf16.gmra.mrb[84].mxu0 %v12143_v31  ;;  %4779 = vmatprep.mubr.bf16.mxu1 %v11199_v10  ;;  %14990 = vst [vmem:[#allocation200_spill] sm:$0xff] %v12165_v7  ;;  %v215_v10 = vld [vmem:[%s14570_s0 + $0x610] sm:$0xff] }
 0x1ec   :  { %4073 = vmatprep.mubr.bf16.mxu0 %v12147_v30  ;;  %14992 = vst [vmem:[#allocation202_spill] sm:$0xff] %v12169_v34 }
 0x1ed   :  { %v12161_v56 = vpop.f32.mrb[108].mxu1 }
 0x1ee   :  { %14988 = vst [vmem:[#allocation198_spill] sm:$0xff] %v12161_v56  ;;  %v12163_v59 = vpop.f32.mrb[109].mxu1 }
 0x1ef   :  { %14989 = vst [vmem:[#allocation199_spill] sm:$0xff] %v12163_v59  ;;  %v12167_v31 = vpop.f32.mrb[110].mxu1 }
 0x1f0   :  { %14991 = vst [vmem:[#allocation201_spill] sm:$0xff] %v12167_v31  ;;  %v12171_v30 = vpop.f32.mrb[111].mxu1 }
 0x1f1   :  { %14993 = vst [vmem:[#allocation203_spill] sm:$0xff] %v12171_v30  ;;  %v12187_v30 = vcombine.low %v207_v27, %v211_v54  ;;  %v227_v27 = vld [vmem:[%s14570_s0 + $0x670] sm:$0xff] }
 0x1f2   :  { %4780 = vmatmul.mubr.bf16.gmra.mrb[216].mxu1 %v11219_v49  ;;  %v12191_v49 = vcombine.high %v215_v10, %v219_v5 }
 0x1f3   :  { %4074 = vmatmul.mubr.bf16.gmra.mrb[88].mxu0 %v12165_v7  ;;  %4789 = vmatprep.mubr.bf16.mxu1 %v11223_v62  ;;  %14996 = vst [vmem:[#allocation206_spill] sm:$0xff] %v12187_v30  ;;  %v15000_v62 = vld [vmem:[#allocation50_spill] sm:$0xff] }
 0x1f4   :  { %4083 = vmatprep.mubr.bf16.mxu0 %v12169_v34  ;;  %14998 = vst [vmem:[#allocation208_spill] sm:$0xff] %v12191_v49 }
 0x1f5   :  { %v12183_v63 = vpop.f32.mrb[112].mxu1 }
 0x1f6   :  { %14994 = vst [vmem:[#allocation204_spill] sm:$0xff] %v12183_v63  ;;  %v12185_v31 = vpop.f32.mrb[113].mxu1  ;;  %v15008_v63 = vld [vmem:[#allocation54_spill] sm:$0xff] }
 0x1f7   :  { %14995 = vst [vmem:[#allocation205_spill] sm:$0xff] %v12185_v31  ;;  %v12189_v7 = vpop.f32.mrb[114].mxu1  ;;  %v223_v31 = vld [vmem:[%s14570_s0 + $0x650] sm:$0xff] }
 0x1f8   :  { %14997 = vst [vmem:[#allocation207_spill] sm:$0xff] %v12189_v7  ;;  %v12193_v34 = vpop.f32.mrb[115].mxu1 }
 0x1f9   :  { %14999 = vst [vmem:[#allocation209_spill] sm:$0xff] %v12193_v34  ;;  %v12209_v34 = vcombine.low %v215_v10, %v219_v5  ;;  %v235_v10 = vld [vmem:[%s14570_s0 + $0x6b0] sm:$0xff] }
 0x1fa   :  { %4790 = vmatmul.mubr.bf16.gmra.mrb[220].mxu1 %v11243_v4  ;;  %v12213_v4 = vcombine.high %v223_v31, %v227_v27 }
 0x1fb   :  { %4084 = vmatmul.mubr.bf16.gmra.mrb[92].mxu0 %v12187_v30  ;;  %4799 = vmatprep.mubr.bf16.mxu1 %v15000_v62  ;;  %15003 = vst [vmem:[#allocation211_spill] sm:$0xff] %v12209_v34  ;;  %v15007_v62 = vld [vmem:[#allocation52_spill] sm:$0xff] }
 0x1fc   :  { %4093 = vmatprep.mubr.bf16.mxu0 %v12191_v49  ;;  %15005 = vst [vmem:[#allocation213_spill] sm:$0xff] %v12213_v4 }
 0x1fd   :  { %v12205_v54 = vpop.f32.mrb[116].mxu1 }
 0x1fe   :  { %15001 = vst [vmem:[#allocation50_spill] sm:$0xff] %v12205_v54  ;;  %v12207_v7 = vpop.f32.mrb[117].mxu1  ;;  %v15016_v54 = vld [vmem:[#allocation58_spill] sm:$0xff] }
 0x1ff   :  { %15002 = vst [vmem:[#allocation210_spill] sm:$0xff] %v12207_v7  ;;  %v12211_v30 = vpop.f32.mrb[118].mxu1  ;;  %v231_v7 = vld [vmem:[%s14570_s0 + $0x690] sm:$0xff] }
 0x200   :  { %15004 = vst [vmem:[#allocation212_spill] sm:$0xff] %v12211_v30  ;;  %v12215_v49 = vpop.f32.mrb[119].mxu1 }
 0x201   :  { %15006 = vst [vmem:[#allocation214_spill] sm:$0xff] %v12215_v49  ;;  %v12231_v49 = vcombine.low %v223_v31, %v227_v27  ;;  %v243_v31 = vld [vmem:[%s14570_s0 + $0x6f0] sm:$0xff] }
 0x202   :  { %4800 = vmatmul.mubr.bf16.gmra.mrb[224].mxu1 %v15007_v62  ;;  %v12235_v62 = vcombine.high %v231_v7, %v235_v10 }
 0x203   :  { %4094 = vmatmul.mubr.bf16.gmra.mrb[96].mxu0 %v12209_v34  ;;  %4809 = vmatprep.mubr.bf16.mxu1 %v15008_v63  ;;  %15011 = vst [vmem:[#allocation215_spill] sm:$0xff] %v12231_v49  ;;  %v15015_v63 = vld [vmem:[#allocation56_spill] sm:$0xff] }
 0x204   :  { %4103 = vmatprep.mubr.bf16.mxu0 %v12213_v4  ;;  %15013 = vst [vmem:[#allocation217_spill] sm:$0xff] %v12235_v62 }
 0x205   :  { %v12227_v5 = vpop.f32.mrb[120].mxu1 }
 0x206   :  { %15009 = vst [vmem:[#allocation52_spill] sm:$0xff] %v12227_v5  ;;  %v12229_v30 = vpop.f32.mrb[121].mxu1  ;;  %v15024_v5 = vld [vmem:[#allocation62_spill] sm:$0xff] }
 0x207   :  { %15010 = vst [vmem:[#allocation54_spill] sm:$0xff] %v12229_v30  ;;  %v12233_v34 = vpop.f32.mrb[122].mxu1  ;;  %v239_v30 = vld [vmem:[%s14570_s0 + $0x6d0] sm:$0xff] }
 0x208   :  { %15012 = vst [vmem:[#allocation216_spill] sm:$0xff] %v12233_v34  ;;  %v12237_v4 = vpop.f32.mrb[123].mxu1 }
 0x209   :  { %15014 = vst [vmem:[#allocation218_spill] sm:$0xff] %v12237_v4  ;;  %v12253_v4 = vcombine.low %v231_v7, %v235_v10  ;;  %v251_v7 = vld [vmem:[%s14570_s0 + $0x730] sm:$0xff]  ;;  %v12271_v10 = vcombine.low %v239_v30, %v243_v31 }
 0x20a   :  { %4810 = vmatmul.mubr.bf16.gmra.mrb[228].mxu1 %v15015_v63  ;;  %v12257_v63 = vcombine.high %v239_v30, %v243_v31 }
 0x20b   :  { %4104 = vmatmul.mubr.bf16.gmra.mrb[100].mxu0 %v12231_v49  ;;  %4819 = vmatprep.mubr.bf16.mxu1 %v15016_v54  ;;  %15019 = vst [vmem:[#allocation219_spill] sm:$0xff] %v12253_v4  ;;  %v15023_v54 = vld [vmem:[#allocation60_spill] sm:$0xff] }
 0x20c   :  { %4113 = vmatprep.mubr.bf16.mxu0 %v12235_v62  ;;  %15021 = vst [vmem:[#allocation221_spill] sm:$0xff] %v12257_v63  ;;  %15025 = vst [vmem:[#allocation60_spill] sm:$0xff] %v12271_v10 }
 0x20d   :  { %v12249_v27 = vpop.f32.mrb[124].mxu1 }
 0x20e   :  { %15017 = vst [vmem:[#allocation56_spill] sm:$0xff] %v12249_v27  ;;  %v12251_v34 = vpop.f32.mrb[125].mxu1  ;;  %v15151_v27 = vld [vmem:[#allocation64_spill] sm:$0xff] }
 0x20f   :  { %15018 = vst [vmem:[#allocation58_spill] sm:$0xff] %v12251_v34  ;;  %v12255_v49 = vpop.f32.mrb[126].mxu1  ;;  %v247_v34 = vld [vmem:[%s14570_s0 + $0x710] sm:$0xff] }
 0x210   :  { %15020 = vst [vmem:[#allocation220_spill] sm:$0xff] %v12255_v49  ;;  %v12259_v62 = vpop.f32.mrb[127].mxu1  ;;  %v12273_v49 = vcombine.high %v247_v34, %v251_v7  ;;  %v12285_v30 = vcombine.low %v247_v34, %v251_v7 }
 0x211   :  { %15022 = vst [vmem:[#allocation222_spill] sm:$0xff] %v12259_v62  ;;  %v15150_v62 = vld [vmem:[#allocation63_spill] sm:$0xff] }
 0x212   :  { %4820 = vmatmul.mubr.bf16.gmra.mrb[232].mxu1 %v15023_v54  ;;  %15026 = vst [vmem:[#allocation62_spill] sm:$0xff] %v12273_v49  ;;  %v15028_v54 = vld [vmem:[#allocation69_spill] sm:$0xff] }
 0x213   :  { %4114 = vmatmul.mubr.bf16.gmra.mrb[104].mxu0 %v12253_v4  ;;  %4829 = vmatprep.mubr.bf16.mxu1 %v15024_v5  ;;  %v15027_v4 = vld [vmem:[#allocation66_spill] sm:$0xff]  ;;  %v255_v5 = vld [vmem:[%s14570_s0 + $0x750] sm:$0xff] }
 0x214   :  { %4123 = vmatprep.mubr.bf16.mxu0 %v12257_v63  ;;  %v259_v63 = vld [vmem:[%s14570_s0 + $0x770] sm:$0xff]  ;;  %15029 = vst [vmem:[#allocation66_spill] sm:$0xff] %v12285_v30 }
 0x215   :  { %v12287_v31 = vcombine.high %v255_v5, %v259_v63  ;;  %v12299_v34 = vcombine.low %v255_v5, %v259_v63 }
 0x217   :  { %15030 = vst [vmem:[#allocation69_spill] sm:$0xff] %v12287_v31 }
 0x21a   :  { %4830 = vmatmul.mubr.bf16.gmra.mrb[236].mxu1 %v15027_v4  ;;  %v15032_v4 = vld [vmem:[#allocation77_spill] sm:$0xff] }
 0x21b   :  { %4124 = vmatmul.mubr.bf16.gmra.mrb[108].mxu0 %v12271_v10  ;;  %4839 = vmatprep.mubr.bf16.mxu1 %v15028_v54  ;;  %v15031_v10 = vld [vmem:[#allocation74_spill] sm:$0xff]  ;;  %v263_v54 = vld [vmem:[%s14570_s0 + $0x790] sm:$0xff] }
 0x21c   :  { %4133 = vmatprep.mubr.bf16.mxu0 %v12273_v49  ;;  %v267_v49 = vld [vmem:[%s14570_s0 + $0x7b0] sm:$0xff]  ;;  %15033 = vst [vmem:[#allocation74_spill] sm:$0xff] %v12299_v34 }
 0x21d   :  { %v12301_v7 = vcombine.high %v263_v54, %v267_v49  ;;  %v12313_v63 = vcombine.low %v263_v54, %v267_v49 }
 0x21f   :  { %15034 = vst [vmem:[#allocation77_spill] sm:$0xff] %v12301_v7 }
 0x222   :  { %4840 = vmatmul.mubr.bf16.gmra.mrb[240].mxu1 %v15031_v10  ;;  %v15036_v10 = vld [vmem:[#allocation85_spill] sm:$0xff] }
 0x223   :  { %4134 = vmatmul.mubr.bf16.gmra.mrb[112].mxu0 %v12285_v30  ;;  %4849 = vmatprep.mubr.bf16.mxu1 %v15032_v4  ;;  %v15035_v30 = vld [vmem:[#allocation82_spill] sm:$0xff]  ;;  %v271_v4 = vld [vmem:[%s14570_s0 + $0x7d0] sm:$0xff] }
 0x224   :  { %4143 = vmatprep.mubr.bf16.mxu0 %v12287_v31  ;;  %v275_v31 = vld [vmem:[%s14570_s0 + $0x7f0] sm:$0xff]  ;;  %15037 = vst [vmem:[#allocation82_spill] sm:$0xff] %v12313_v63 }
 0x225   :  { %v12315_v5 = vcombine.high %v271_v4, %v275_v31  ;;  %v12327_v49 = vcombine.low %v271_v4, %v275_v31  ;;  %v9858_v4 = vld [vmem:[%s14569_s1 + $0x408] ss:$16 sps:$4 sm:$0xff]  }
 0x227   :  { %15038 = vst [vmem:[#allocation85_spill] sm:$0xff] %v12315_v5  ;;  %15039 = vst [vmem:[#allocation223_spill] sm:$0xff] %v12327_v49 }
 0x22a   :  { %4850 = vmatmul.mubr.bf16.gmra.mrb[244].mxu1 %v15035_v30  ;;  %v24_v30 = vld [vmem:[%s14570_s0 + $0x18] sm:$0xff] }
 0x22b   :  { %4144 = vmatmul.mubr.bf16.gmra.mrb[116].mxu0 %v12299_v34  ;;  %4859 = vmatprep.mubr.bf16.mxu1 %v15036_v10  ;;  %v28_v10 = vld [vmem:[%s14570_s0 + $0x38] sm:$0xff] }
 0x22c   :  { %4153 = vmatprep.mubr.bf16.mxu0 %v12301_v7  ;;  %v12329_v54 = vcombine.high %v24_v30, %v28_v10  ;;  %v12341_v31 = vcombine.low %v24_v30, %v28_v10  ;;  %v9861_v30 = vld [vmem:[%s14569_s1 + $0x428] ss:$16 sps:$4 sm:$0xff]   ;;  %v15045_v10 = vld [vmem:[#allocation4_spill] sm:$0xff] }
 0x22d   :  { %v15080_v7 = vld [vmem:[#allocation21_spill] sm:$0xff] }
 0x22e   :  { %15040 = vst [vmem:[#allocation224_spill] sm:$0xff] %v12329_v54 }
 0x232   :  { %4860 = vmatmul.mubr.bf16.gmra.mrb[248].mxu1 %v11439_v29  ;;  %v15041_v29 = vld [vmem:[#allocation2_spill] sm:$0xff] }
 0x233   :  { %4154 = vmatmul.mubr.bf16.gmra.mrb[120].mxu0 %v12313_v63  ;;  %4869 = vmatprep.mubr.bf16.mxu1 %v11445_v58  ;;  %v32_v58 = vld [vmem:[%s14570_s0 + $0x58] sm:$0xff]  ;;  %15042 = vst [vmem:[#allocation2_spill] sm:$0xff] %v12341_v31 }
 0x234   :  { %4163 = vmatprep.mubr.bf16.mxu0 %v12315_v5  ;;  %v36_v5 = vld [vmem:[%s14570_s0 + $0x78] sm:$0xff] }
 0x235   :  { %v44_v63 = vld [vmem:[%s14570_s0 + $0xb8] sm:$0xff] }
 0x23a   :  { %4870 = vmatmul.mubr.bf16.gmra.mrb[252].mxu1 %v11465_v36  ;;  %v9863_v36 = vld [vmem:[%s14569_s1 + $0x42c] ss:$16 sps:$4 sm:$0xff]  }
 0x23b   :  { %4164 = vmatmul.mubr.bf16.gmra.mrb[124].mxu0 %v12327_v49  ;;  %4912 = vmatprep.mubr.bf16.mxu1 %v15041_v29  ;;  %v12346_v49 = vcombine.high %v32_v58, %v36_v5  ;;  %v15044_v29 = vld [vmem:[#allocation3_spill] sm:$0xff] }
 0x23c   :  { %4206 = vmatprep.mubr.bf16.mxu0 %v12329_v54  ;;  %v40_v54 = vld [vmem:[%s14570_s0 + $0x98] sm:$0xff] }
 0x23d   :  { %15043 = vst [vmem:[#allocation225_spill] sm:$0xff] %v12346_v49 }
 0x242   :  { %4913 = vmatmul.mubr.bf16.vlgmr.msra.gmra.mrb[128].mxu1 %v15044_v29  ;;  %v12367_v29 = vcombine.low %v32_v58, %v36_v5  ;;  %v15049_v5 = vld [vmem:[#allocation6_spill] sm:$0xff]  ;;  %v48_v58 = vld [vmem:[%s14570_s0 + $0xd8] sm:$0xff] }
 0x243   :  { %4207 = vmatmul.mubr.bf16.vlgmr.msra.gmra.mrb[0].mxu0 %v12341_v31  ;;  %5234 = vmatpush1.bf16.msra.mxu1 %v9858_v4  ;;  %v9866_v4 = vld [vmem:[%s14569_s1 + $0x44c] ss:$16 sps:$4 sm:$0xff]  }
 0x244   :  { %4216 = vmatprep.mubr.bf16.mxu0 %v12346_v49  ;;  %4922 = vmatprep.mubr.bf16.mxu1 %v15045_v10  ;;  %15046 = vst [vmem:[#allocation3_spill] sm:$0xff] %v12367_v29  ;;  %v12369_v49 = vcombine.high %v40_v54, %v44_v63  ;;  %v9864_v10 = vld [vmem:[%s14569_s1 + $0x448] ss:$16 sps:$4 sm:$0xff]   ;;  %v9869_v31 = vld [vmem:[%s14569_s1 + $0x46c] ss:$16 sps:$4 sm:$0xff]  }
 0x245   :  { %5235 = vmatprep.subr.bf16.mxu1 %v9863_v36  ;;  %v15048_v36 = vld [vmem:[#allocation5_spill] sm:$0xff] }
 0x246   :  { %15047 = vst [vmem:[#allocation4_spill] sm:$0xff] %v12369_v49 }
 0x247   :  { %5236 = vmatpush1.bf16.msra.mxu1 %v9861_v30  ;;  %v52_v30 = vld [vmem:[%s14570_s0 + $0xf8] sm:$0xff] }
 0x248   :  { %5237 = vmatprep.subr.bf16.mxu1 %v9866_v4  ;;  %v9867_v4 = vld [vmem:[%s14569_s1 + $0x468] ss:$16 sps:$4 sm:$0xff]  }
 0x24a   :  { %4923 = vmatmul.mubr.bf16.gmra.mrb[132].mxu1 %v15048_v36  ;;  %v9872_v36 = vld [vmem:[%s14569_s1 + $0x48c] ss:$16 sps:$4 sm:$0xff]  }
 0x24b   :  { %4217 = vmatmul.mubr.bf16.gmra.mrb[4].mxu0 %v12367_v29  ;;  %4932 = vmatprep.mubr.bf16.mxu1 %v15049_v5  ;;  %v12395_v5 = vcombine.high %v48_v58, %v52_v30  ;;  %v9870_v29 = vld [vmem:[%s14569_s1 + $0x488] ss:$16 sps:$4 sm:$0xff]  }
 0x24c   :  { %4226 = vmatprep.mubr.bf16.mxu0 %v12369_v49  ;;  %5238 = vmatpush1.bf16.msra.mxu1 %v9864_v10  ;;  %v12393_v49 = vcombine.low %v40_v54, %v44_v63  ;;  %v9875_v10 = vld [vmem:[%s14569_s1 + $0x4ac] ss:$16 sps:$4 sm:$0xff]   ;;  %v15053_v63 = vld [vmem:[#allocation8_spill] sm:$0xff] }
 0x24d   :  { %5239 = vmatprep.subr.bf16.mxu1 %v9869_v31  ;;  %15051 = vst [vmem:[#allocation6_spill] sm:$0xff] %v12395_v5  ;;  %v15052_v31 = vld [vmem:[#allocation7_spill] sm:$0xff]  ;;  %v56_v54 = vld [vmem:[%s14570_s0 + $0x118] sm:$0xff] }
 0x24e   :  { %15050 = vst [vmem:[#allocation5_spill] sm:$0xff] %v12393_v49 }
 0x250   :  { %5240 = vmatpush1.bf16.msra.mxu1 %v9867_v4  ;;  %v60_v4 = vld [vmem:[%s14570_s0 + $0x138] sm:$0xff] }
 0x251   :  { %5241 = vmatprep.subr.bf16.mxu1 %v9872_v36  ;;  %v9873_v36 = vld [vmem:[%s14569_s1 + $0x4a8] ss:$16 sps:$4 sm:$0xff]  }
 0x252   :  { %4933 = vmatmul.mubr.bf16.gmra.mrb[136].mxu1 %v15052_v31  ;;  %v9878_v31 = vld [vmem:[%s14569_s1 + $0x4cc] ss:$16 sps:$4 sm:$0xff]  }
 0x253   :  { %4227 = vmatmul.mubr.bf16.gmra.mrb[8].mxu0 %v12393_v49  ;;  %4942 = vmatprep.mubr.bf16.mxu1 %v15053_v63  ;;  %v12421_v63 = vcombine.high %v56_v54, %v60_v4  ;;  %v9876_v49 = vld [vmem:[%s14569_s1 + $0x4c8] ss:$16 sps:$4 sm:$0xff]  }
 0x254   :  { %4236 = vmatprep.mubr.bf16.mxu0 %v12395_v5  ;;  %5242 = vmatpush1.bf16.msra.mxu1 %v9870_v29  ;;  %v12419_v5 = vcombine.low %v48_v58, %v52_v30  ;;  %v9881_v29 = vld [vmem:[%s14569_s1 + $0x4ec] ss:$16 sps:$4 sm:$0xff]   ;;  %v15057_v58 = vld [vmem:[#allocation10_spill] sm:$0xff] }
 0x255   :  { %5243 = vmatprep.subr.bf16.mxu1 %v9875_v10  ;;  %15055 = vst [vmem:[#allocation8_spill] sm:$0xff] %v12421_v63  ;;  %v15056_v10 = vld [vmem:[#allocation9_spill] sm:$0xff] }
 0x256   :  { %15054 = vst [vmem:[#allocation7_spill] sm:$0xff] %v12419_v5  ;;  %v64_v30 = vld [vmem:[%s14570_s0 + $0x158] sm:$0xff] }
 0x258   :  { %5244 = vmatpush1.bf16.msra.mxu1 %v9873_v36  ;;  %v68_v36 = vld [vmem:[%s14570_s0 + $0x178] sm:$0xff] }
 0x259   :  { %5245 = vmatprep.subr.bf16.mxu1 %v9878_v31  ;;  %v9879_v31 = vld [vmem:[%s14569_s1 + $0x4e8] ss:$16 sps:$4 sm:$0xff]  }
 0x25a   :  { %4943 = vmatmul.mubr.bf16.gmra.mrb[140].mxu1 %v15056_v10  ;;  %v9884_v10 = vld [vmem:[%s14569_s1 + $0x50c] ss:$16 sps:$4 sm:$0xff]  }
 0x25b   :  { %4237 = vmatmul.mubr.bf16.gmra.mrb[12].mxu0 %v12419_v5  ;;  %4952 = vmatprep.mubr.bf16.mxu1 %v15057_v58  ;;  %v12447_v58 = vcombine.high %v64_v30, %v68_v36  ;;  %v9882_v5 = vld [vmem:[%s14569_s1 + $0x508] ss:$16 sps:$4 sm:$0xff]  }
 0x25c   :  { %4246 = vmatprep.mubr.bf16.mxu0 %v12421_v63  ;;  %5246 = vmatpush1.bf16.msra.mxu1 %v9876_v49  ;;  %v12445_v63 = vcombine.low %v56_v54, %v60_v4  ;;  %v9887_v49 = vld [vmem:[%s14569_s1 + $0x52c] ss:$16 sps:$4 sm:$0xff]   ;;  %v15061_v54 = vld [vmem:[#allocation12_spill] sm:$0xff] }
 0x25d   :  { %5247 = vmatprep.subr.bf16.mxu1 %v9881_v29  ;;  %15059 = vst [vmem:[#allocation10_spill] sm:$0xff] %v12447_v58  ;;  %v15060_v29 = vld [vmem:[#allocation11_spill] sm:$0xff]  ;;  %v72_v4 = vld [vmem:[%s14570_s0 + $0x198] sm:$0xff] }
 0x25e   :  { %15058 = vst [vmem:[#allocation9_spill] sm:$0xff] %v12445_v63 }
 0x260   :  { %5248 = vmatpush1.bf16.msra.mxu1 %v9879_v31  ;;  %v76_v31 = vld [vmem:[%s14570_s0 + $0x1b8] sm:$0xff] }
 0x261   :  { %5249 = vmatprep.subr.bf16.mxu1 %v9884_v10  ;;  %v9885_v10 = vld [vmem:[%s14569_s1 + $0x528] ss:$16 sps:$4 sm:$0xff]  }
 0x262   :  { %4953 = vmatmul.mubr.bf16.gmra.mrb[144].mxu1 %v15060_v29  ;;  %v9890_v29 = vld [vmem:[%s14569_s1 + $0x54c] ss:$16 sps:$4 sm:$0xff]  }
 0x263   :  { %4247 = vmatmul.mubr.bf16.gmra.mrb[16].mxu0 %v12445_v63  ;;  %4962 = vmatprep.mubr.bf16.mxu1 %v15061_v54  ;;  %v12473_v54 = vcombine.high %v72_v4, %v76_v31  ;;  %v9888_v63 = vld [vmem:[%s14569_s1 + $0x548] ss:$16 sps:$4 sm:$0xff]  }
 0x264   :  { %4256 = vmatprep.mubr.bf16.mxu0 %v12447_v58  ;;  %5250 = vmatpush1.bf16.msra.mxu1 %v9882_v5  ;;  %v12471_v58 = vcombine.low %v64_v30, %v68_v36  ;;  %v15064_v5 = vld [vmem:[#allocation13_spill] sm:$0xff] }
 0x265   :  { %5251 = vmatprep.subr.bf16.mxu1 %v9887_v49  ;;  %15063 = vst [vmem:[#allocation12_spill] sm:$0xff] %v12473_v54  ;;  %v15065_v49 = vld [vmem:[#allocation14_spill] sm:$0xff]  ;;  %v80_v30 = vld [vmem:[%s14570_s0 + $0x1d8] sm:$0xff] }
 0x266   :  { %15062 = vst [vmem:[#allocation11_spill] sm:$0xff] %v12471_v58  ;;  %v84_v36 = vld [vmem:[%s14570_s0 + $0x1f8] sm:$0xff] }
 0x268   :  { %5252 = vmatpush1.bf16.msra.mxu1 %v9885_v10  ;;  %v12488_v10 = vcombine.low %v72_v4, %v76_v31  ;;  %v92_v4 = vld [vmem:[%s14570_s0 + $0x238] sm:$0xff]  ;;  %v12508_v31 = vcombine.low %v80_v30, %v84_v36 }
 0x269   :  { %5253 = vmatprep.subr.bf16.mxu1 %v9890_v29  ;;  %v12490_v29 = vcombine.high %v80_v30, %v84_v36 }
 0x26a   :  { %4963 = vmatmul.mubr.bf16.gmra.mrb[148].mxu1 %v15064_v5  ;;  %15066 = vst [vmem:[#allocation13_spill] sm:$0xff] %v12488_v10  ;;  %v15068_v5 = vld [vmem:[#allocation15_spill] sm:$0xff] }
 0x26b   :  { %4257 = vmatmul.mubr.bf16.gmra.mrb[20].mxu0 %v12471_v58  ;;  %4972 = vmatprep.mubr.bf16.mxu1 %v15065_v49  ;;  %15067 = vst [vmem:[#allocation14_spill] sm:$0xff] %v12490_v29  ;;  %v9891_v49 = vld [vmem:[%s14569_s1 + $0x568] ss:$16 sps:$4 sm:$0xff]   ;;  %v15069_v58 = vld [vmem:[#allocation16_spill] sm:$0xff]  ;;  %15070 = vst [vmem:[#allocation15_spill] sm:$0xff] %v12508_v31 }
 0x26c   :  { %4266 = vmatprep.mubr.bf16.mxu0 %v12473_v54  ;;  %5254 = vmatpush1.bf16.msra.mxu1 %v9888_v63  ;;  %v9893_v54 = vld [vmem:[%s14569_s1 + $0x56c] ss:$16 sps:$4 sm:$0xff]  }
 0x26d   :  { %v88_v63 = vld [vmem:[%s14570_s0 + $0x218] sm:$0xff]  ;;  %5255 = vmatprep.subr.bf16.mxu1 %v9893_v54 }
 0x26e   :  { %v100_v54 = vld [vmem:[%s14570_s0 + $0x278] sm:$0xff]  ;;  %v12522_v30 = vcombine.low %v88_v63, %v92_v4 }
 0x270   :  { %5256 = vmatpush1.bf16.msra.mxu1 %v9891_v49  ;;  %v15076_v49 = vld [vmem:[#allocation19_spill] sm:$0xff] }
 0x272   :  { %4973 = vmatmul.mubr.bf16.gmra.mrb[152].mxu1 %v15068_v5  ;;  %v12510_v5 = vcombine.high %v88_v63, %v92_v4  ;;  %v15077_v63 = vld [vmem:[#allocation20_spill] sm:$0xff]  ;;  %v104_v4 = vld [vmem:[%s14570_s0 + $0x298] sm:$0xff] }
 0x273   :  { %4267 = vmatmul.mubr.bf16.gmra.mrb[24].mxu0 %v12488_v10  ;;  %4982 = vmatprep.mubr.bf16.mxu1 %v15069_v58  ;;  %v15072_v10 = vld [vmem:[#allocation17_spill] sm:$0xff]  ;;  %v15073_v58 = vld [vmem:[#allocation18_spill] sm:$0xff] }
 0x274   :  { %4276 = vmatprep.mubr.bf16.mxu0 %v12490_v29  ;;  %15071 = vst [vmem:[#allocation16_spill] sm:$0xff] %v12510_v5  ;;  %v96_v29 = vld [vmem:[%s14570_s0 + $0x258] sm:$0xff]  ;;  %15074 = vst [vmem:[#allocation17_spill] sm:$0xff] %v12522_v30 }
 0x275   :  { %v12524_v36 = vcombine.high %v96_v29, %v100_v54 }
 0x277   :  { %15075 = vst [vmem:[#allocation18_spill] sm:$0xff] %v12524_v36 }
 0x27a   :  { %4983 = vmatmul.mubr.bf16.gmra.mrb[156].mxu1 %v15072_v10  ;;  %v9897_v10 = vld [vmem:[%s14571_s3] sm:$0xff]  }
 0x27b   :  { %4277 = vmatmul.mubr.bf16.gmra.mrb[28].mxu0 %v12508_v31  ;;  %4992 = vmatprep.mubr.bf16.mxu1 %v15073_v58  ;;  %v9894_v58 = vld [vmem:[%s14569_s1 + $0x588] ss:$16 sps:$4 sm:$0xff]  }
 0x27c   :  { %4286 = vmatprep.mubr.bf16.mxu0 %v12510_v5  ;;  %v9896_v5 = vld [vmem:[%s14569_s1 + $0x58c] ss:$16 sps:$4 sm:$0xff]  }
 0x27d   :  { %5257 = vmatprep.subr.bf16.mxu1 %v9896_v5  ;;  %v9898_v31 = vld [vmem:[%s14571_s3 + $0x8] sm:$0xff]   ;;  %v9899_v5 = vld [vmem:[%s14571_s3 + $0x10] sm:$0xff]  }
 0x27e   :  { %5258 = vmatpush1.bf16.msra.mxu1 %v9894_v58  ;;  %v112_v58 = vld [vmem:[%s14570_s0 + $0x2d8] sm:$0xff] }
 0x282   :  { %4993 = vmatmul.mubr.bf16.gmra.mrb[160].mxu1 %v15076_v49  ;;  %v108_v49 = vld [vmem:[%s14570_s0 + $0x2b8] sm:$0xff] }
 0x283   :  { %4287 = vmatmul.mubr.bf16.gmra.mrb[32].mxu0 %v12522_v30  ;;  %5002 = vmatprep.mubr.bf16.mxu1 %v15077_v63  ;;  %v14746_v30 = vmov 0   ;;  %v12552_v63 = vcombine.high %v104_v4, %v108_v49 }
 0x284   :  { %4296 = vmatprep.mubr.bf16.mxu0 %v12524_v36  ;;  %6586 = vmatprep.subr.bf16.mxu0 %v14746_v30  ;;  %v12549_v36 = vcombine.low %v96_v29, %v100_v54  ;;  %v116_v29 = vld [vmem:[%s14570_s0 + $0x2f8] sm:$0xff]  ;;  %v15081_v54 = vld [vmem:[#allocation22_spill] sm:$0xff] }
 0x285   :  { %6587 = vmatpush1.bf16.msra.mxu0 %v9897_v10  ;;  %15079 = vst [vmem:[#allocation20_spill] sm:$0xff] %v12552_v63  ;;  %v12574_v10 = vcombine.high %v112_v58, %v116_v29 }
 0x286   :  { %15078 = vst [vmem:[#allocation19_spill] sm:$0xff] %v12549_v36  ;;  %6588 = vmatprep.subr.bf16.mxu0 %v14746_v30 }
 0x287   :  { %15083 = vst [vmem:[#allocation22_spill] sm:$0xff] %v12574_v10 }
 0x289   :  { %6589 = vmatpush1.bf16.msra.mxu0 %v9898_v31  ;;  %v9900_v31 = vld [vmem:[%s14571_s3 + $0x18] sm:$0xff]  }
 0x28a   :  { %5003 = vmatmul.mubr.bf16.gmra.mrb[164].mxu1 %v15080_v7  ;;  %6590 = vmatprep.subr.bf16.mxu0 %v14746_v30  ;;  %v12571_v7 = vcombine.low %v104_v4, %v108_v49  ;;  %v124_v4 = vld [vmem:[%s14570_s0 + $0x338] sm:$0xff] }
 0x28b   :  { %4297 = vmatmul.mubr.bf16.gmra.mrb[36].mxu0 %v12549_v36  ;;  %5012 = vmatprep.mubr.bf16.mxu1 %v15081_v54  ;;  %v15084_v54 = vld [vmem:[#allocation23_spill] sm:$0xff]  ;;  %v120_v36 = vld [vmem:[%s14570_s0 + $0x318] sm:$0xff] }
 0x28c   :  { %4306 = vmatprep.mubr.bf16.mxu0 %v12552_v63  ;;  %15082 = vst [vmem:[#allocation21_spill] sm:$0xff] %v12571_v7  ;;  %v9904_v63 = vld [vmem:[%s14571_s3 + $0x20] sm:$0xff]   ;;  %v9901_v49 = vld [vmem:[%s14569_s1 + $0x5a8] ss:$16 sps:$4 sm:$0xff]   ;;  %v12602_v34 = vcombine.high %v120_v36, %v124_v4 }
 0x28d   :  { %6591 = vmatpush1.bf16.msra.mxu0 %v9899_v5  ;;  %v9903_v5 = vld [vmem:[%s14569_s1 + $0x5ac] ss:$16 sps:$4 sm:$0xff]  }
 0x28e   :  { %6592 = vmatprep.subr.bf16.mxu0 %v14746_v30  ;;  %5259 = vmatprep.subr.bf16.mxu1 %v9903_v5  ;;  %v15088_v5 = vld [vmem:[#allocation25_spill] sm:$0xff] }
 0x28f   :  { %5260 = vmatpush1.bf16.msra.mxu1 %v9901_v49  ;;  %v9907_v49 = vld [vmem:[%s14571_s3 + $0x38] sm:$0xff]  }
 0x291   :  { %6593 = vmatpush1.bf16.msra.mxu0 %v9900_v31  ;;  %v15085_v31 = vld [vmem:[#allocation24_spill] sm:$0xff] }
 0x292   :  { %5013 = vmatmul.mubr.bf16.gmra.mrb[168].mxu1 %v15084_v54  ;;  %6594 = vmatprep.subr.bf16.mxu0 %v14746_v30  ;;  %v9905_v54 = vld [vmem:[%s14571_s3 + $0x28] sm:$0xff]   ;;  %15087 = vst [vmem:[#allocation24_spill] sm:$0xff] %v12602_v34 }
 0x293   :  { %4307 = vmatmul.mubr.bf16.gmra.mrb[40].mxu0 %v12571_v7  ;;  %5022 = vmatprep.mubr.bf16.mxu1 %v15085_v31  ;;  %v12599_v7 = vcombine.low %v112_v58, %v116_v29  ;;  %v9906_v31 = vld [vmem:[%s14571_s3 + $0x30] sm:$0xff]   ;;  %v128_v58 = vld [vmem:[%s14570_s0 + $0x358] sm:$0xff] }
 0x294   :  { %4316 = vmatprep.mubr.bf16.mxu0 %v12574_v10  ;;  %v132_v29 = vld [vmem:[%s14570_s0 + $0x378] sm:$0xff]  ;;  %v15097_v10 = vld [vmem:[#allocation30_spill] sm:$0xff] }
 0x295   :  { %6595 = vmatpush1.bf16.msra.mxu0 %v9904_v63  ;;  %15086 = vst [vmem:[#allocation23_spill] sm:$0xff] %v12599_v7  ;;  %v15089_v63 = vld [vmem:[#allocation26_spill] sm:$0xff] }
 0x296   :  { %6596 = vmatprep.subr.bf16.mxu0 %v14746_v30 }
 0x299   :  { %6597 = vmatpush1.bf16.msra.mxu0 %v9905_v54  ;;  %v12621_v54 = vcombine.low %v120_v36, %v124_v4  ;;  %v136_v36 = vld [vmem:[%s14570_s0 + $0x398] sm:$0xff] }
 0x29a   :  { %5023 = vmatmul.mubr.bf16.gmra.mrb[172].mxu1 %v15088_v5  ;;  %6598 = vmatprep.subr.bf16.mxu0 %v14746_v30  ;;  %v12624_v5 = vcombine.high %v128_v58, %v132_v29  ;;  %v140_v4 = vld [vmem:[%s14570_s0 + $0x3b8] sm:$0xff] }
 0x29b   :  { %4317 = vmatmul.mubr.bf16.gmra.mrb[44].mxu0 %v12599_v7  ;;  %5032 = vmatprep.mubr.bf16.mxu1 %v15089_v63  ;;  %15090 = vst [vmem:[#allocation25_spill] sm:$0xff] %v12621_v54  ;;  %v9911_v63 = vld [vmem:[%s14571_s3 + $0x40] sm:$0xff]   ;;  %v9913_v7 = vld [vmem:[%s14571_s3 + $0x50] sm:$0xff]  }
 0x29c   :  { %4326 = vmatprep.mubr.bf16.mxu0 %v12602_v34  ;;  %15091 = vst [vmem:[#allocation26_spill] sm:$0xff] %v12624_v5  ;;  %v15092_v34 = vld [vmem:[#allocation27_spill] sm:$0xff] }
 0x29d   :  { %6599 = vmatpush1.bf16.msra.mxu0 %v9906_v31  ;;  %v15093_v31 = vld [vmem:[#allocation28_spill] sm:$0xff] }
 0x29e   :  { %6600 = vmatprep.subr.bf16.mxu0 %v14746_v30 }
 0x2a1   :  { %6601 = vmatpush1.bf16.msra.mxu0 %v9907_v49  ;;  %v9908_v49 = vld [vmem:[%s14569_s1 + $0x5c8] ss:$16 sps:$4 sm:$0xff]  }
 0x2a2   :  { %5033 = vmatmul.mubr.bf16.gmra.mrb[176].mxu1 %v15092_v34  ;;  %6602 = vmatprep.subr.bf16.mxu0 %v14746_v30  ;;  %v9910_v34 = vld [vmem:[%s14569_s1 + $0x5cc] ss:$16 sps:$4 sm:$0xff]  }
 0x2a3   :  { %4327 = vmatmul.mubr.bf16.gmra.mrb[48].mxu0 %v12621_v54  ;;  %5042 = vmatprep.mubr.bf16.mxu1 %v15093_v31  ;;  %v9912_v31 = vld [vmem:[%s14571_s3 + $0x48] sm:$0xff]   ;;  %v12652_v54 = vcombine.high %v136_v36, %v140_v4 }
 0x2a4   :  { %4336 = vmatprep.mubr.bf16.mxu0 %v12624_v5  ;;  %v12649_v5 = vcombine.low %v128_v58, %v132_v29  ;;  %5261 = vmatprep.subr.bf16.mxu1 %v9910_v34  ;;  %v144_v58 = vld [vmem:[%s14570_s0 + $0x3d8] sm:$0xff]  ;;  %v12671_v34 = vcombine.low %v136_v36, %v140_v4 }
 0x2a5   :  { %6603 = vmatpush1.bf16.msra.mxu0 %v9911_v63  ;;  %15095 = vst [vmem:[#allocation28_spill] sm:$0xff] %v12652_v54  ;;  %5262 = vmatpush1.bf16.msra.mxu1 %v9908_v49  ;;  %v15096_v63 = vld [vmem:[#allocation29_spill] sm:$0xff] }
 0x2a6   :  { %15094 = vst [vmem:[#allocation27_spill] sm:$0xff] %v12649_v5  ;;  %6604 = vmatprep.subr.bf16.mxu0 %v14746_v30  ;;  %v148_v29 = vld [vmem:[%s14570_s0 + $0x3f8] sm:$0xff]  ;;  %15098 = vst [vmem:[#allocation29_spill] sm:$0xff] %v12671_v34 }
 0x2a7   :  { %v9914_v49 = vld [vmem:[%s14571_s3 + $0x58] sm:$0xff]  }
 0x2a8   :  { %v152_v36 = vld [vmem:[%s14570_s0 + $0x418] sm:$0xff] }
 0x2a9   :  { %6605 = vmatpush1.bf16.msra.mxu0 %v9912_v31  ;;  %v9918_v31 = vld [vmem:[%s14571_s3 + $0x60] sm:$0xff]   ;;  %v156_v4 = vld [vmem:[%s14570_s0 + $0x438] sm:$0xff] }
 0x2aa   :  { %5043 = vmatmul.mubr.bf16.gmra.mrb[180].mxu1 %v15096_v63  ;;  %6606 = vmatprep.subr.bf16.mxu0 %v14746_v30  ;;  %v15100_v63 = vld [vmem:[#allocation31_spill] sm:$0xff] }
 0x2ab   :  { %4337 = vmatmul.mubr.bf16.gmra.mrb[52].mxu0 %v12649_v5  ;;  %5052 = vmatprep.mubr.bf16.mxu1 %v15097_v10  ;;  %v12674_v10 = vcombine.high %v144_v58, %v148_v29  ;;  %v15105_v5 = vld [vmem:[#allocation34_spill] sm:$0xff] }
 0x2ac   :  { %4346 = vmatprep.mubr.bf16.mxu0 %v12652_v54  ;;  %v9920_v54 = vld [vmem:[%s14571_s3 + $0x70] sm:$0xff]  }
 0x2ad   :  { %6607 = vmatpush1.bf16.msra.mxu0 %v9913_v7  ;;  %15099 = vst [vmem:[#allocation30_spill] sm:$0xff] %v12674_v10  ;;  %v15101_v7 = vld [vmem:[#allocation32_spill] sm:$0xff] }
 0x2ae   :  { %6608 = vmatprep.subr.bf16.mxu0 %v14746_v30 }
 0x2b1   :  { %6609 = vmatpush1.bf16.msra.mxu0 %v9914_v49  ;;  %v9915_v49 = vld [vmem:[%s14569_s1 + $0x5e8] ss:$16 sps:$4 sm:$0xff]  }
 0x2b2   :  { %5053 = vmatmul.mubr.bf16.gmra.mrb[184].mxu1 %v15100_v63  ;;  %6610 = vmatprep.subr.bf16.mxu0 %v14746_v30  ;;  %v9917_v63 = vld [vmem:[%s14569_s1 + $0x5ec] ss:$16 sps:$4 sm:$0xff]  }
 0x2b3   :  { %4347 = vmatmul.mubr.bf16.gmra.mrb[56].mxu0 %v12671_v34  ;;  %5062 = vmatprep.mubr.bf16.mxu1 %v15101_v7  ;;  %v9919_v7 = vld [vmem:[%s14571_s3 + $0x68] sm:$0xff]   ;;  %v12702_v34 = vcombine.high %v152_v36, %v156_v4 }
 0x2b4   :  { %4356 = vmatprep.mubr.bf16.mxu0 %v12674_v10  ;;  %v12699_v10 = vcombine.low %v144_v58, %v148_v29  ;;  %5263 = vmatprep.subr.bf16.mxu1 %v9917_v63  ;;  %v160_v58 = vld [vmem:[%s14570_s0 + $0x458] sm:$0xff]  ;;  %v12721_v63 = vcombine.low %v152_v36, %v156_v4 }
 0x2b5   :  { %6611 = vmatpush1.bf16.msra.mxu0 %v9918_v31  ;;  %15103 = vst [vmem:[#allocation32_spill] sm:$0xff] %v12702_v34  ;;  %5264 = vmatpush1.bf16.msra.mxu1 %v9915_v49  ;;  %v15104_v31 = vld [vmem:[#allocation33_spill] sm:$0xff] }
 0x2b6   :  { %15102 = vst [vmem:[#allocation31_spill] sm:$0xff] %v12699_v10  ;;  %6612 = vmatprep.subr.bf16.mxu0 %v14746_v30  ;;  %v164_v29 = vld [vmem:[%s14570_s0 + $0x478] sm:$0xff]  ;;  %15106 = vst [vmem:[#allocation33_spill] sm:$0xff] %v12721_v63 }
 0x2b7   :  { %v9921_v49 = vld [vmem:[%s14571_s3 + $0x78] sm:$0xff]  }
 0x2b8   :  { %v172_v36 = vld [vmem:[%s14570_s0 + $0x4b8] sm:$0xff] }
 0x2b9   :  { %6613 = vmatpush1.bf16.msra.mxu0 %v9919_v7  ;;  %v15108_v7 = vld [vmem:[#allocation35_spill] sm:$0xff] }
 0x2ba   :  { %5063 = vmatmul.mubr.bf16.gmra.mrb[188].mxu1 %v15104_v31  ;;  %6614 = vmatprep.subr.bf16.mxu0 %v14746_v30  ;;  %v15109_v31 = vld [vmem:[#allocation36_spill] sm:$0xff]  ;;  %v9924_v4 = vld [vmem:[%s14569_s1 + $0x60c] ss:$16 sps:$4 sm:$0xff]  }
 0x2bb   :  { %4357 = vmatmul.mubr.bf16.gmra.mrb[60].mxu0 %v12699_v10  ;;  %5072 = vmatprep.mubr.bf16.mxu1 %v15105_v5  ;;  %v12724_v5 = vcombine.high %v160_v58, %v164_v29  ;;  %v15149_v10 = vld [vmem:[#allocation61_spill] sm:$0xff] }
 0x2bc   :  { %4366 = vmatprep.mubr.bf16.mxu0 %v12702_v34  ;;  %5586 = vmatprep.subr.bf16.mxu1 %v9924_v4  ;;  %v15116_v4 = vld [vmem:[#allocation39_spill] sm:$0xff]  ;;  %v240_v34 = vld [vmem:[%s14570_s0 + $0x6d8] sm:$0xff] }
 0x2bd   :  { %6615 = vmatpush1.bf16.msra.mxu0 %v9920_v54  ;;  %15107 = vst [vmem:[#allocation34_spill] sm:$0xff] %v12724_v5  ;;  %v168_v54 = vld [vmem:[%s14570_s0 + $0x498] sm:$0xff] }
 0x2be   :  { %6616 = vmatprep.subr.bf16.mxu0 %v14746_v30 }
 0x2c1   :  { %6617 = vmatpush1.bf16.msra.mxu0 %v9921_v49  ;;  %v12740_v49 = vcombine.low %v160_v58, %v164_v29  ;;  %v180_v58 = vld [vmem:[%s14570_s0 + $0x4f8] sm:$0xff]  ;;  %v12754_v29 = vcombine.low %v168_v54, %v172_v36 }
 0x2c2   :  { %5073 = vmatmul.mubr.bf16.gmra.mrb[192].mxu1 %v15108_v7  ;;  %6875 = vmatprep.subr.bf16.mxu0 %v14746_v30  ;;  %v12742_v7 = vcombine.high %v168_v54, %v172_v36  ;;  %v176_v30 = vld [vmem:[%s14570_s0 + $0x4d8] sm:$0xff] }
 0x2c3   :  { %4367 = vmatmul.mubr.bf16.gmra.mrb[64].mxu0 %v12721_v63  ;;  %5082 = vmatprep.mubr.bf16.mxu1 %v15109_v31  ;;  %15110 = vst [vmem:[#allocation35_spill] sm:$0xff] %v12740_v49  ;;  %v15112_v31 = vld [vmem:[#allocation37_spill] sm:$0xff]  ;;  %v12756_v63 = vcombine.high %v176_v30, %v180_v58  ;;  %v12768_v54 = vcombine.low %v176_v30, %v180_v58 }
 0x2c4   :  { %4376 = vmatprep.mubr.bf16.mxu0 %v12724_v5  ;;  %15111 = vst [vmem:[#allocation36_spill] sm:$0xff] %v12742_v7  ;;  %v15113_v5 = vld [vmem:[#allocation38_spill] sm:$0xff]  ;;  %15114 = vst [vmem:[#allocation37_spill] sm:$0xff] %v12754_v29 }
 0x2c5   :  { %15115 = vst [vmem:[#allocation38_spill] sm:$0xff] %v12756_v63  ;;  %15118 = vst [vmem:[#allocation39_spill] sm:$0xff] %v12768_v54 }
 0x2ca   :  { %5083 = vmatmul.mubr.bf16.gmra.mrb[196].mxu1 %v15112_v31  ;;  %v15117_v31 = vld [vmem:[#allocation40_spill] sm:$0xff] }
 0x2cb   :  { %4377 = vmatmul.mubr.bf16.gmra.mrb[68].mxu0 %v12740_v49  ;;  %5092 = vmatprep.mubr.bf16.mxu1 %v15113_v5  ;;  %v184_v5 = vld [vmem:[%s14570_s0 + $0x518] sm:$0xff] }
 0x2cc   :  { %4386 = vmatprep.mubr.bf16.mxu0 %v12742_v7  ;;  %v188_v7 = vld [vmem:[%s14570_s0 + $0x538] sm:$0xff] }
 0x2cd   :  { %v12770_v36 = vcombine.high %v184_v5, %v188_v7  ;;  %v12782_v30 = vcombine.low %v184_v5, %v188_v7 }
 0x2cf   :  { %15119 = vst [vmem:[#allocation40_spill] sm:$0xff] %v12770_v36 }
 0x2d2   :  { %5093 = vmatmul.mubr.bf16.gmra.mrb[200].mxu1 %v15116_v4  ;;  %v15121_v4 = vld [vmem:[#allocation42_spill] sm:$0xff] }
 0x2d3   :  { %4387 = vmatmul.mubr.bf16.gmra.mrb[72].mxu0 %v12754_v29  ;;  %5102 = vmatprep.mubr.bf16.mxu1 %v15117_v31  ;;  %v15120_v29 = vld [vmem:[#allocation41_spill] sm:$0xff] }
 0x2d4   :  { %4396 = vmatprep.mubr.bf16.mxu0 %v12756_v63  ;;  %v192_v31 = vld [vmem:[%s14570_s0 + $0x558] sm:$0xff]  ;;  %15122 = vst [vmem:[#allocation41_spill] sm:$0xff] %v12782_v30 }
 0x2d5   :  { %v196_v63 = vld [vmem:[%s14570_s0 + $0x578] sm:$0xff] }
 0x2d6   :  { %v12784_v58 = vcombine.high %v192_v31, %v196_v63  ;;  %v12796_v7 = vcombine.low %v192_v31, %v196_v63 }
 0x2d8   :  { %15123 = vst [vmem:[#allocation42_spill] sm:$0xff] %v12784_v58 }
 0x2da   :  { %5103 = vmatmul.mubr.bf16.gmra.mrb[204].mxu1 %v15120_v29  ;;  %v15125_v29 = vld [vmem:[#allocation44_spill] sm:$0xff] }
 0x2db   :  { %4397 = vmatmul.mubr.bf16.gmra.mrb[76].mxu0 %v12768_v54  ;;  %5112 = vmatprep.mubr.bf16.mxu1 %v15121_v4  ;;  %v15124_v54 = vld [vmem:[#allocation43_spill] sm:$0xff]  ;;  %v200_v4 = vld [vmem:[%s14570_s0 + $0x598] sm:$0xff] }
 0x2dc   :  { %4406 = vmatprep.mubr.bf16.mxu0 %v12770_v36  ;;  %v204_v36 = vld [vmem:[%s14570_s0 + $0x5b8] sm:$0xff]  ;;  %15126 = vst [vmem:[#allocation43_spill] sm:$0xff] %v12796_v7 }
 0x2dd   :  { %v12798_v5 = vcombine.high %v200_v4, %v204_v36  ;;  %v12810_v63 = vcombine.low %v200_v4, %v204_v36 }
 0x2df   :  { %15127 = vst [vmem:[#allocation44_spill] sm:$0xff] %v12798_v5 }
 0x2e2   :  { %5113 = vmatmul.mubr.bf16.gmra.mrb[208].mxu1 %v15124_v54  ;;  %v15129_v54 = vld [vmem:[#allocation46_spill] sm:$0xff] }
 0x2e3   :  { %4407 = vmatmul.mubr.bf16.gmra.mrb[80].mxu0 %v12782_v30  ;;  %5122 = vmatprep.mubr.bf16.mxu1 %v15125_v29  ;;  %v15128_v30 = vld [vmem:[#allocation45_spill] sm:$0xff] }
 0x2e4   :  { %4416 = vmatprep.mubr.bf16.mxu0 %v12784_v58  ;;  %v208_v29 = vld [vmem:[%s14570_s0 + $0x5d8] sm:$0xff]  ;;  %15130 = vst [vmem:[#allocation45_spill] sm:$0xff] %v12810_v63 }
 0x2e5   :  { %v212_v58 = vld [vmem:[%s14570_s0 + $0x5f8] sm:$0xff] }
 0x2e6   :  { %v12812_v31 = vcombine.high %v208_v29, %v212_v58  ;;  %v12824_v36 = vcombine.low %v208_v29, %v212_v58 }
 0x2e8   :  { %15131 = vst [vmem:[#allocation46_spill] sm:$0xff] %v12812_v31 }
 0x2ea   :  { %5123 = vmatmul.mubr.bf16.gmra.mrb[212].mxu1 %v15128_v30  ;;  %v15133_v30 = vld [vmem:[#allocation48_spill] sm:$0xff] }
 0x2eb   :  { %4417 = vmatmul.mubr.bf16.gmra.mrb[84].mxu0 %v12796_v7  ;;  %5132 = vmatprep.mubr.bf16.mxu1 %v15129_v54  ;;  %v15132_v7 = vld [vmem:[#allocation47_spill] sm:$0xff]  ;;  %v216_v54 = vld [vmem:[%s14570_s0 + $0x618] sm:$0xff] }
 0x2ec   :  { %4426 = vmatprep.mubr.bf16.mxu0 %v12798_v5  ;;  %v220_v5 = vld [vmem:[%s14570_s0 + $0x638] sm:$0xff]  ;;  %15134 = vst [vmem:[#allocation47_spill] sm:$0xff] %v12824_v36 }
 0x2ed   :  { %v12826_v4 = vcombine.high %v216_v54, %v220_v5  ;;  %v12838_v58 = vcombine.low %v216_v54, %v220_v5  ;;  %v236_v5 = vld [vmem:[%s14570_s0 + $0x6b8] sm:$0xff] }
 0x2ef   :  { %15135 = vst [vmem:[#allocation48_spill] sm:$0xff] %v12826_v4 }
 0x2f2   :  { %5133 = vmatmul.mubr.bf16.gmra.mrb[216].mxu1 %v15132_v7  ;;  %v15137_v7 = vld [vmem:[#allocation51_spill] sm:$0xff] }
 0x2f3   :  { %4427 = vmatmul.mubr.bf16.gmra.mrb[88].mxu0 %v12810_v63  ;;  %5142 = vmatprep.mubr.bf16.mxu1 %v15133_v30  ;;  %v15136_v63 = vld [vmem:[#allocation49_spill] sm:$0xff] }
 0x2f4   :  { %4436 = vmatprep.mubr.bf16.mxu0 %v12812_v31  ;;  %v224_v30 = vld [vmem:[%s14570_s0 + $0x658] sm:$0xff]  ;;  %15138 = vst [vmem:[#allocation49_spill] sm:$0xff] %v12838_v58 }
 0x2f5   :  { %v228_v31 = vld [vmem:[%s14570_s0 + $0x678] sm:$0xff] }
 0x2f6   :  { %v12840_v29 = vcombine.high %v224_v30, %v228_v31  ;;  %v12852_v54 = vcombine.low %v224_v30, %v228_v31  ;;  %v244_v31 = vld [vmem:[%s14570_s0 + $0x6f8] sm:$0xff]  ;;  %v533_v30 = vld [vmem:[%s14572_s2] sm:$0xf] }
 0x2f8   :  { %15139 = vst [vmem:[#allocation51_spill] sm:$0xff] %v12840_v29 }
 0x2fa   :  { %5143 = vmatmul.mubr.bf16.gmra.mrb[220].mxu1 %v15136_v63  ;;  %v15141_v63 = vld [vmem:[#allocation55_spill] sm:$0xff] }
 0x2fb   :  { %4437 = vmatmul.mubr.bf16.gmra.mrb[92].mxu0 %v12824_v36  ;;  %5152 = vmatprep.mubr.bf16.mxu1 %v15137_v7  ;;  %v15140_v36 = vld [vmem:[#allocation53_spill] sm:$0xff]  ;;  %v535_v7 = vlaneseq }
 0x2fc   :  { %4446 = vmatprep.mubr.bf16.mxu0 %v12826_v4  ;;  %v232_v4 = vld [vmem:[%s14570_s0 + $0x698] sm:$0xff]  ;;  %15142 = vst [vmem:[#allocation53_spill] sm:$0xff] %v12852_v54 }
 0x2fd   :  { %v12854_v49 = vcombine.high %v232_v4, %v236_v5 }
 0x2ff   :  { %15143 = vst [vmem:[#allocation55_spill] sm:$0xff] %v12854_v49 }
 0x302   :  { %5153 = vmatmul.mubr.bf16.gmra.mrb[224].mxu1 %v15140_v36  ;;  %v15145_v36 = vld [vmem:[#allocation57_spill] sm:$0xff] }
 0x303   :  { %4447 = vmatmul.mubr.bf16.gmra.mrb[96].mxu0 %v12838_v58  ;;  %5162 = vmatprep.mubr.bf16.mxu1 %v15141_v63  ;;  %v12856_v58 = vshrl.u32 %v535_v7, 7  ;;  %v15146_v63 = vld [vmem:[#allocation59_spill] sm:$0xff] }
 0x304   :  { %4456 = vmatprep.mubr.bf16.mxu0 %v12840_v29 }
 0x305   :  { %15144 = vst [vmem:[#allocation226_spill] sm:$0xff] %v12856_v58  ;;  %v537_v29 = vsub.s32 0, %v12856_v58  ;;  %v541_v7 = vsub.s32 1, %v12856_v58  ;;  %v12897_v58 = vcombine.low %v240_v34, %v244_v31 }
 0x307   :  { %15154 = vst [vmem:[#allocation61_spill] sm:$0xff] %v12897_v58 }
 0x30a   :  { %5163 = vmatmul.mubr.bf16.gmra.mrb[228].mxu1 %v15145_v36  ;;  %v12873_v36 = vcombine.low %v232_v4, %v236_v5  ;;  %v248_v4 = vld [vmem:[%s14570_s0 + $0x718] sm:$0xff] }
 0x30b   :  { %4457 = vmatmul.mubr.bf16.gmra.mrb[100].mxu0 %v12852_v54  ;;  %5172 = vmatprep.mubr.bf16.mxu1 %v15146_v63  ;;  %v12877_v63 = vrot.slane %v533_v30, %v537_v29  ;;  %v12879_v54 = vrot.slane %v533_v30, %v541_v7  ;;  %v252_v29 = vld [vmem:[%s14570_s0 + $0x738] sm:$0xff] }
 0x30c   :  { %4466 = vmatprep.mubr.bf16.mxu0 %v12854_v49  ;;  %15147 = vst [vmem:[#allocation57_spill] sm:$0xff] %v12873_v36  ;;  %v12875_v49 = vcombine.high %v240_v34, %v244_v31  ;;  %v15152_v5 = vld [vmem:[#allocation65_spill] sm:$0xff]  ;;  %v12901_v41 = vcombine.high %v248_v4, %v252_v29  ;;  %v15158_v34 = vld [vmem:[#allocation70_spill] sm:$0xff]  ;;  %v15159_v31 = vld [vmem:[#allocation72_spill] sm:$0xff] }
 0x30d   :  { %v3150_v59 = vadd.f32 %v15151_v27, %v12877_v63  ;;  %v3152_v30 = vadd.f32 %v15152_v5, %v12879_v54  ;;  %v15155_v27 = vld [vmem:[#allocation71_spill] sm:$0xff] }
 0x30e   :  { %15148 = vst [vmem:[#allocation59_spill] sm:$0xff] %v12875_v49  ;;  %v3156_v56 = vadd.f32 %v15155_v27, %v12879_v54  ;;  %15156 = vst [vmem:[#allocation63_spill] sm:$0xff] %v12901_v41  ;;  %v15163_v27 = vld [vmem:[#allocation79_spill] sm:$0xff] }
 0x312   :  { %5173 = vmatmul.mubr.bf16.gmra.mrb[232].mxu1 %v15149_v10  ;;  %v15153_v10 = vld [vmem:[#allocation68_spill] sm:$0xff] }
 0x313   :  { %4467 = vmatmul.mubr.bf16.gmra.mrb[104].mxu0 %v12873_v36  ;;  %5182 = vmatprep.mubr.bf16.mxu1 %v15150_v62 }
 0x314   :  { %4476 = vmatprep.mubr.bf16.mxu0 %v12875_v49  ;;  %v3154_v49 = vadd.f32 %v15153_v10, %v12877_v63 }
 0x316   :  { %v4208_v7 = vpop.f32.mrb[0].mxu0 }
 0x317   :  { %v8354_v36 = vadd.f32 %v4208_v7, %v3150_v59  ;;  %v4210_v62 = vpop.f32.mrb[1].mxu0 }
 0x318   :  { %v8356_v28 = vadd.f32 %v4210_v62, %v3152_v30  ;;  %v4212_v60 = vpop.f32.mrb[2].mxu0  ;;  %v3160_v30 = vadd.f32 %v15159_v31, %v12877_v63  ;;  %v12923_v62 = vcombine.low %v248_v4, %v252_v29  ;;  %v15166_v4 = vld [vmem:[#allocation78_spill] sm:$0xff]  ;;  %v15167_v29 = vld [vmem:[#allocation80_spill] sm:$0xff] }
 0x319   :  { %v8358_v44 = vadd.f32 %v4212_v60, %v3154_v49  ;;  %v4214_v23 = vpop.f32.mrb[3].mxu0  ;;  %v5939_v57 = vmax.f32 %v8354_v36, 0.0 }
 0x31a   :  { %v8360_v37 = vadd.f32 %v4214_v23, %v3156_v56  ;;  %5183 = vmatmul.mubr.bf16.gmra.mrb[236].mxu1 %v15157_v6  ;;  %v5940_v59 = vmax.f32 %v8356_v28, 0.0  ;;  %v256_v23 = vld [vmem:[%s14570_s0 + $0x758] sm:$0xff]  ;;  %v15161_v56 = vld [vmem:[#allocation76_spill] sm:$0xff]  ;;  %15162 = vst [vmem:[#allocation64_spill] sm:$0xff] %v12923_v62 }
 0x31b   :  { %v5943_v5 = vmax.f32 %v8358_v44, 0.0  ;;  %4477 = vmatmul.mubr.bf16.gmra.mrb[108].mxu0 %v12897_v58  ;;  %5192 = vmatprep.mubr.bf16.mxu1 %v15158_v34  ;;  %v260_v44 = vld [vmem:[%s14570_s0 + $0x778] sm:$0xff]  ;;  %v3164_v49 = vadd.f32 %v15161_v56, %v12877_v63 }
 0x31c   :  { %v5944_v7 = vmax.f32 %v8360_v37, 0.0  ;;  %4486 = vmatprep.mubr.bf16.mxu0 %v12901_v41  ;;  %v15160_v28 = vld [vmem:[#allocation73_spill] sm:$0xff]  ;;  %v12927_v41 = vcombine.high %v256_v23, %v260_v44 }
 0x31d   :  { %v12909_v10 = vpack.c.bf16 %v5943_v5, %v5939_v57  ;;  %v3162_v6 = vadd.f32 %v15160_v28, %v12879_v54  ;;  %v3166_v5 = vadd.f32 %v15163_v27, %v12879_v54  ;;  %v15169_v27 = vld [vmem:[#allocation84_spill] sm:$0xff] }
 0x31e   :  { %v12919_v37 = vpack.c.bf16 %v5944_v7, %v5940_v59  ;;  %v4218_v60 = vpop.f32.mrb[4].mxu0  ;;  %15164 = vst [vmem:[#allocation65_spill] sm:$0xff] %v12927_v41 }
 0x31f   :  { %v8362_v36 = vadd.f32 %v4218_v60, %v3160_v30  ;;  %v4220_v57 = vpop.f32.mrb[5].mxu0 }
 0x320   :  { %v8364_v34 = vadd.f32 %v4220_v57, %v3162_v6  ;;  %v4222_v31 = vpop.f32.mrb[6].mxu0  ;;  %v3170_v6 = vadd.f32 %v15167_v29, %v12877_v63 }
 0x321   :  { %v8366_v58 = vadd.f32 %v4222_v31, %v3164_v49  ;;  %v4224_v2 = vpop.f32.mrb[7].mxu0  ;;  %v5947_v59 = vmax.f32 %v8362_v36, 0.0 }
 0x322   :  { %v8368_v28 = vadd.f32 %v4224_v2, %v3166_v5  ;;  %5193 = vmatmul.mubr.bf16.gmra.mrb[240].mxu1 %v15165_v24  ;;  %v5948_v30 = vmax.f32 %v8364_v34, 0.0  ;;  %v264_v2 = vld [vmem:[%s14570_s0 + $0x798] sm:$0xff]  ;;  %v3174_v5 = vadd.f32 %v15169_v27, %v12877_v63 }
 0x323   :  { %v5951_v7 = vmax.f32 %v8366_v58, 0.0  ;;  %4487 = vmatmul.mubr.bf16.gmra.mrb[112].mxu0 %v12923_v62  ;;  %5202 = vmatprep.mubr.bf16.mxu1 %v15166_v4  ;;  %v268_v58 = vld [vmem:[%s14570_s0 + $0x7b8] sm:$0xff] }
 0x324   :  { %v5952_v60 = vmax.f32 %v8368_v28, 0.0  ;;  %4496 = vmatprep.mubr.bf16.mxu0 %v12927_v41  ;;  %v15168_v24 = vld [vmem:[#allocation81_spill] sm:$0xff]  ;;  %v12949_v28 = vcombine.low %v256_v23, %v260_v44  ;;  %v12953_v41 = vcombine.high %v264_v2, %v268_v58  ;;  %v15174_v23 = vld [vmem:[#allocation86_spill] sm:$0xff]  ;;  %v3180_v44 = vadd.f32 %v11435_v33, %v12877_v63 }
 0x325   :  { %v12935_v56 = vpack.c.bf16 %v5951_v7, %v5947_v59  ;;  %v3172_v49 = vadd.f32 %v15168_v24, %v12879_v54  ;;  %v15171_v59 = vld [vmem:[#allocation87_spill] sm:$0xff] }
 0x326   :  { %v12945_v36 = vpack.c.bf16 %v5952_v60, %v5948_v30  ;;  %v4228_v57 = vpop.f32.mrb[8].mxu0  ;;  %15170 = vst [vmem:[#allocation68_spill] sm:$0xff] %v12949_v28  ;;  %v3176_v7 = vadd.f32 %v15171_v59, %v12879_v54  ;;  %15172 = vst [vmem:[#allocation71_spill] sm:$0xff] %v12953_v41 }
 0x327   :  { %v8370_v34 = vadd.f32 %v4228_v57, %v3170_v6  ;;  %v4230_v31 = vpop.f32.mrb[9].mxu0 }
 0x328   :  { %v8372_v4 = vadd.f32 %v4230_v31, %v3172_v49  ;;  %v4232_v29 = vpop.f32.mrb[10].mxu0  ;;  %v15176_v31 = vld [vmem:[#allocation90_spill] sm:$0xff] }
 0x329   :  { %v8374_v62 = vadd.f32 %v4232_v29, %v3174_v5  ;;  %v4234_v13 = vpop.f32.mrb[11].mxu0  ;;  %v5955_v30 = vmax.f32 %v8370_v34, 0.0  ;;  %v3184_v59 = vadd.f32 %v15176_v31, %v12877_v63  ;;  %v15177_v29 = vld [vmem:[#allocation92_spill] sm:$0xff]  ;;  %v15181_v31 = vld [vmem:[#allocation93_spill] sm:$0xff] }
 0x32a   :  { %v8376_v24 = vadd.f32 %v4234_v13, %v3176_v7  ;;  %5203 = vmatmul.mubr.bf16.gmra.mrb[244].mxu1 %v15173_v9  ;;  %v5956_v6 = vmax.f32 %v8372_v4, 0.0  ;;  %v272_v13 = vld [vmem:[%s14570_s0 + $0x7d8] sm:$0xff]  ;;  %v15175_v9 = vld [vmem:[#allocation88_spill] sm:$0xff]  ;;  %v12975_v4 = vcombine.low %v264_v2, %v268_v58  ;;  %v15180_v2 = vld [vmem:[#allocation91_spill] sm:$0xff]  ;;  %v3190_v58 = vadd.f32 %v11461_v39, %v12877_v63 }
 0x32b   :  { %v5959_v60 = vmax.f32 %v8374_v62, 0.0  ;;  %4497 = vmatmul.mubr.bf16.gmra.mrb[116].mxu0 %v12949_v28  ;;  %5212 = vmatprep.mubr.bf16.mxu1 %v15174_v23  ;;  %v276_v62 = vld [vmem:[%s14570_s0 + $0x7f8] sm:$0xff]  ;;  %v3182_v27 = vadd.f32 %v15175_v9, %v12879_v54 }
 0x32c   :  { %v5960_v57 = vmax.f32 %v8376_v24, 0.0  ;;  %4506 = vmatprep.mubr.bf16.mxu0 %v12953_v41  ;;  %v3186_v24 = vadd.f32 %v15177_v29, %v12879_v54  ;;  %v12979_v23 = vcombine.high %v272_v13, %v276_v62 }
 0x32d   :  { %v12961_v49 = vpack.c.bf16 %v5959_v60, %v5955_v30 }
 0x32e   :  { %v12971_v5 = vpack.c.bf16 %v5960_v57, %v5956_v6  ;;  %v4238_v34 = vpop.f32.mrb[12].mxu0  ;;  %15178 = vst [vmem:[#allocation67_spill] sm:$0xff] %v12979_v23 }
 0x32f   :  { %v8378_v33 = vadd.f32 %v4238_v34, %v3180_v44  ;;  %v4240_v7 = vpop.f32.mrb[13].mxu0 }
 0x330   :  { %v8380_v30 = vadd.f32 %v4240_v7, %v3182_v27  ;;  %v4242_v60 = vpop.f32.mrb[14].mxu0 }
 0x331   :  { %v8382_v41 = vadd.f32 %v4242_v60, %v3184_v59  ;;  %v4244_v28 = vpop.f32.mrb[15].mxu0  ;;  %v5963_v6 = vmax.f32 %v8378_v33, 0.0  ;;  %v15182_v33 = vld [vmem:[#allocation95_spill] sm:$0xff] }
 0x332   :  { %v8384_v9 = vadd.f32 %v4244_v28, %v3186_v24  ;;  %5213 = vmatmul.mubr.bf16.gmra.mrb[248].mxu1 %v15179_v43  ;;  %v5964_v44 = vmax.f32 %v8380_v30, 0.0  ;;  %v3192_v28 = vadd.f32 %v15181_v31, %v12879_v54  ;;  %v3194_v43 = vadd.f32 %v15182_v33, %v12877_v63  ;;  %v15183_v30 = vld [vmem:[#allocation97_spill] sm:$0xff] }
 0x333   :  { %v5967_v57 = vmax.f32 %v8382_v41, 0.0  ;;  %4507 = vmatmul.mubr.bf16.gmra.mrb[120].mxu0 %v12975_v4  ;;  %5222 = vmatprep.mubr.bf16.mxu1 %v15180_v2  ;;  %v12995_v24 = vcombine.low %v272_v13, %v276_v62  ;;  %v3196_v60 = vadd.f32 %v15183_v30, %v12879_v54  ;;  %v15185_v13 = vld [vmem:[#allocation96_spill] sm:$0xff]  ;;  %v3200_v62 = vadd.f32 %v11485_v51, %v12877_v63  ;;  %v9922_v51 = vld [vmem:[%s14569_s1 + $0x608] ss:$16 sps:$4 sm:$0xff]  }
 0x334   :  { %v5968_v34 = vmax.f32 %v8384_v9, 0.0  ;;  %4516 = vmatprep.mubr.bf16.mxu0 %v12979_v23 }
 0x335   :  { %v12987_v27 = vpack.c.bf16 %v5967_v57, %v5963_v6 }
 0x336   :  { %v12991_v59 = vpack.c.bf16 %v5968_v34, %v5964_v44  ;;  %v4248_v41 = vpop.f32.mrb[16].mxu0  ;;  %v15184_v44 = vld [vmem:[#allocation94_spill] sm:$0xff] }
 0x337   :  { %v8386_v7 = vadd.f32 %v4248_v41, %v3190_v58  ;;  %v4250_v29 = vpop.f32.mrb[17].mxu0 }
 0x338   :  { %v8388_v9 = vadd.f32 %v4250_v29, %v3192_v28  ;;  %v4252_v39 = vpop.f32.mrb[18].mxu0  ;;  %v15186_v28 = vld [vmem:[#allocation98_spill] sm:$0xff]  ;;  %v15187_v29 = vld [vmem:[#allocation100_spill] sm:$0xff] }
 0x339   :  { %v8390_v6 = vadd.f32 %v4252_v39, %v3194_v43  ;;  %v4254_v57 = vpop.f32.mrb[19].mxu0  ;;  %v5971_v23 = vmax.f32 %v8386_v7, 0.0  ;;  %v3202_v41 = vadd.f32 %v15186_v28, %v12879_v54  ;;  %v3204_v30 = vadd.f32 %v15187_v29, %v12877_v63 }
 0x33a   :  { %v8392_v2 = vadd.f32 %v4254_v57, %v3196_v60  ;;  %5223 = vmatmul.mubr.bf16.gmra.mrb[252].mxu1 %v15184_v44  ;;  %v5972_v34 = vmax.f32 %v8388_v9, 0.0 }
 0x33b   :  { %v5975_v31 = vmax.f32 %v8390_v6, 0.0  ;;  %4517 = vmatmul.mubr.bf16.gmra.mrb[124].mxu0 %v12995_v24  ;;  %5265 = vmatprep.mubr.bf16.mxu1 %v15185_v13  ;;  %v15189_v13 = vld [vmem:[#allocation99_spill] sm:$0xff] }
 0x33c   :  { %v5976_v33 = vmax.f32 %v8392_v2, 0.0  ;;  %6618 = vmatprep.mubr.bf16.mxu0 %v12919_v37  ;;  %v15188_v37 = vld [vmem:[#allocation102_spill] sm:$0xff] }
 0x33d   :  { %v13005_v58 = vpack.c.bf16 %v5975_v31, %v5971_v23  ;;  %v3206_v39 = vadd.f32 %v15188_v37, %v12879_v54  ;;  %v9927_v31 = vld [vmem:[%s14569_s1 + $0x62c] ss:$16 sps:$4 sm:$0xff]  }
 0x33e   :  { %v13009_v43 = vpack.c.bf16 %v5976_v33, %v5972_v34  ;;  %v4258_v7 = vpop.f32.mrb[20].mxu0 }
 0x33f   :  { %v8394_v60 = vadd.f32 %v4258_v7, %v3200_v62  ;;  %v4260_v9 = vpop.f32.mrb[21].mxu0  ;;  %v15190_v7 = vld [vmem:[#allocation103_spill] sm:$0xff] }
 0x340   :  { %v8396_v6 = vadd.f32 %v4260_v9, %v3202_v41  ;;  %v4262_v57 = vpop.f32.mrb[22].mxu0  ;;  %v9925_v41 = vld [vmem:[%s14569_s1 + $0x628] ss:$16 sps:$4 sm:$0xff]   ;;  %v3210_v29 = vadd.f32 %v15190_v7, %v12877_v63  ;;  %v3212_v9 = vadd.f32 %v11521_v45, %v12879_v54 }
 0x341   :  { %v8398_v23 = vadd.f32 %v4262_v57, %v3204_v30  ;;  %v4264_v2 = vpop.f32.mrb[23].mxu0  ;;  %v5979_v34 = vmax.f32 %v8394_v60, 0.0  ;;  %v15191_v60 = vld [vmem:[#allocation101_spill] sm:$0xff] }
 0x342   :  { %v8400_v44 = vadd.f32 %v4264_v2, %v3206_v39  ;;  %5266 = vmatmul.mubr.bf16.vlgmr.msra.gmra.mrb[128].mxu1 %v15189_v13  ;;  %v5980_v62 = vmax.f32 %v8396_v6, 0.0  ;;  %v3214_v39 = vadd.f32 %v11525_v14, %v12877_v63  ;;  %v9928_v45 = vld [vmem:[%s14569_s1 + $0x648] ss:$16 sps:$4 sm:$0xff]   ;;  %v9933_v14 = vld [vmem:[%s14569_s1 + $0x66c] ss:$16 sps:$4 sm:$0xff]  }
 0x343   :  { %v5983_v33 = vmax.f32 %v8398_v23, 0.0  ;;  %6619 = vmatmul.mubr.bf16.vlgmr.msra.gmra.mrb[128].mxu0 %v12909_v10  ;;  %5587 = vmatpush1.bf16.msra.mxu1 %v9922_v51  ;;  %v9930_v10 = vld [vmem:[%s14569_s1 + $0x64c] ss:$16 sps:$4 sm:$0xff]   ;;  %v15192_v51 = vld [vmem:[#allocation106_spill] sm:$0xff] }
 0x344   :  { %v5984_v28 = vmax.f32 %v8400_v44, 0.0  ;;  %6626 = vmatprep.mubr.bf16.mxu0 %v12945_v36  ;;  %5275 = vmatprep.mubr.bf16.mxu1 %v15191_v60  ;;  %v3216_v23 = vadd.f32 %v15192_v51, %v12879_v54  ;;  %v15195_v60 = vld [vmem:[#allocation107_spill] sm:$0xff] }
 0x345   :  { %v13029_v30 = vpack.c.bf16 %v5983_v33, %v5979_v34  ;;  %5588 = vmatprep.subr.bf16.mxu1 %v9927_v31 }
 0x346   :  { %v13037_v36 = vpack.c.bf16 %v5984_v28, %v5980_v62  ;;  %v4268_v37 = vpop.f32.mrb[24].mxu0  ;;  %v15193_v28 = vld [vmem:[#allocation104_spill] sm:$0xff] }
 0x347   :  { %v8402_v6 = vadd.f32 %v4268_v37, %v3210_v29  ;;  %v4270_v57 = vpop.f32.mrb[25].mxu0  ;;  %5589 = vmatpush1.bf16.msra.mxu1 %v9925_v41  ;;  %v15194_v29 = vld [vmem:[#allocation105_spill] sm:$0xff] }
 0x348   :  { %v8404_v2 = vadd.f32 %v4270_v57, %v3212_v9  ;;  %v4272_v31 = vpop.f32.mrb[26].mxu0  ;;  %5590 = vmatprep.subr.bf16.mxu1 %v9930_v10  ;;  %v3220_v10 = vadd.f32 %v15195_v60, %v12877_v63  ;;  %v9931_v37 = vld [vmem:[%s14569_s1 + $0x668] ss:$16 sps:$4 sm:$0xff]   ;;  %v3224_v57 = vadd.f32 %v11559_v12, %v12877_v63  ;;  %v9939_v12 = vld [vmem:[%s14569_s1 + $0x6ac] ss:$16 sps:$4 sm:$0xff]  }
 0x349   :  { %v8406_v44 = vadd.f32 %v4272_v31, %v3214_v39  ;;  %v4274_v34 = vpop.f32.mrb[27].mxu0  ;;  %v5987_v13 = vmax.f32 %v8402_v6, 0.0  ;;  %v3222_v39 = vadd.f32 %v11555_v25, %v12879_v54  ;;  %v15199_v60 = vld [vmem:[#allocation111_spill] sm:$0xff] }
 0x34a   :  { %v8408_v33 = vadd.f32 %v4274_v34, %v3216_v23  ;;  %5276 = vmatmul.mubr.bf16.gmra.mrb[132].mxu1 %v15193_v28  ;;  %v5988_v7 = vmax.f32 %v8404_v2, 0.0  ;;  %v15196_v2 = vld [vmem:[#allocation110_spill] sm:$0xff]  ;;  %v15197_v28 = vld [vmem:[#allocation108_spill] sm:$0xff] }
 0x34b   :  { %v5991_v62 = vmax.f32 %v8406_v44, 0.0  ;;  %6627 = vmatmul.mubr.bf16.gmra.mrb[132].mxu0 %v12935_v56  ;;  %5285 = vmatprep.mubr.bf16.mxu1 %v15194_v29  ;;  %v3226_v31 = vadd.f32 %v15196_v2, %v12879_v54  ;;  %v15198_v29 = vld [vmem:[#allocation109_spill] sm:$0xff]  ;;  %v15200_v2 = vld [vmem:[#allocation114_spill] sm:$0xff] }
 0x34c   :  { %v5992_v41 = vmax.f32 %v8408_v33, 0.0  ;;  %6634 = vmatprep.mubr.bf16.mxu0 %v12971_v5  ;;  %5591 = vmatpush1.bf16.msra.mxu1 %v9928_v45  ;;  %v9936_v5 = vld [vmem:[%s14569_s1 + $0x68c] ss:$16 sps:$4 sm:$0xff]   ;;  %v9934_v33 = vld [vmem:[%s14569_s1 + $0x688] ss:$16 sps:$4 sm:$0xff]  }
 0x34d   :  { %v13055_v9 = vpack.c.bf16 %v5991_v62, %v5987_v13  ;;  %5592 = vmatprep.subr.bf16.mxu1 %v9933_v14 }
 0x34e   :  { %v13062_v56 = vpack.c.bf16 %v5992_v41, %v5988_v7  ;;  %v4278_v6 = vpop.f32.mrb[28].mxu0 }
 0x34f   :  { %v8410_v51 = vadd.f32 %v4278_v6, %v3220_v10  ;;  %v4280_v23 = vpop.f32.mrb[29].mxu0  ;;  %v3230_v10 = vadd.f32 %v15199_v60, %v12877_v63  ;;  %v3232_v6 = vadd.f32 %v11589_v38, %v12879_v54 }
 0x350   :  { %v8412_v44 = vadd.f32 %v4280_v23, %v3222_v39  ;;  %v4282_v34 = vpop.f32.mrb[30].mxu0  ;;  %5593 = vmatpush1.bf16.msra.mxu1 %v9931_v37  ;;  %v9937_v39 = vld [vmem:[%s14569_s1 + $0x6a8] ss:$16 sps:$4 sm:$0xff]  }
 0x351   :  { %v8414_v45 = vadd.f32 %v4282_v34, %v3224_v57  ;;  %v4284_v25 = vpop.f32.mrb[31].mxu0  ;;  %5594 = vmatprep.subr.bf16.mxu1 %v9936_v5  ;;  %v5995_v13 = vmax.f32 %v8410_v51, 0.0  ;;  %v3234_v57 = vadd.f32 %v11593_v48, %v12877_v63  ;;  %v9945_v48 = vld [vmem:[%s14569_s1 + $0x6ec] ss:$16 sps:$4 sm:$0xff]  }
 0x352   :  { %v8416_v14 = vadd.f32 %v4284_v25, %v3226_v31  ;;  %5286 = vmatmul.mubr.bf16.gmra.mrb[136].mxu1 %v15197_v28  ;;  %v5996_v7 = vmax.f32 %v8412_v44, 0.0  ;;  %v3236_v31 = vadd.f32 %v15200_v2, %v12879_v54  ;;  %v9940_v25 = vld [vmem:[%s14569_s1 + $0x6c8] ss:$16 sps:$4 sm:$0xff]  }
 0x353   :  { %v5999_v62 = vmax.f32 %v8414_v45, 0.0  ;;  %6635 = vmatmul.mubr.bf16.gmra.mrb[136].mxu0 %v12961_v49  ;;  %5295 = vmatprep.mubr.bf16.mxu1 %v15198_v29 }
 0x354   :  { %v6000_v41 = vmax.f32 %v8416_v14, 0.0  ;;  %6642 = vmatprep.mubr.bf16.mxu0 %v12991_v59  ;;  %5595 = vmatpush1.bf16.msra.mxu1 %v9934_v33  ;;  %v9942_v59 = vld [vmem:[%s14569_s1 + $0x6cc] ss:$16 sps:$4 sm:$0xff]  }
 0x355   :  { %v13083_v37 = vpack.c.bf16 %v5999_v62, %v5995_v13  ;;  %5596 = vmatprep.subr.bf16.mxu1 %v9939_v12  ;;  %v15201_v13 = vld [vmem:[#allocation112_spill] sm:$0xff] }
 0x356   :  { %v13090_v49 = vpack.c.bf16 %v6000_v41, %v5996_v7  ;;  %v4288_v5 = vpop.f32.mrb[32].mxu0  ;;  %v15202_v7 = vld [vmem:[#allocation113_spill] sm:$0xff]  ;;  %v15203_v41 = vld [vmem:[#allocation115_spill] sm:$0xff] }
 0x357   :  { %v8418_v51 = vadd.f32 %v4288_v5, %v3230_v10  ;;  %v4290_v23 = vpop.f32.mrb[33].mxu0  ;;  %v3240_v29 = vadd.f32 %v15203_v41, %v12877_v63  ;;  %v9943_v10 = vld [vmem:[%s14569_s1 + $0x6e8] ss:$16 sps:$4 sm:$0xff]   ;;  %v3244_v5 = vadd.f32 %v11627_v17, %v12877_v63  ;;  %v9951_v17 = vld [vmem:[%s14569_s1 + $0x72c] ss:$16 sps:$4 sm:$0xff]   ;;  %v3252_v41 = vadd.f32 %v11657_v0, %v12879_v54 }
 0x358   :  { %v8420_v44 = vadd.f32 %v4290_v23, %v3232_v6  ;;  %v4292_v34 = vpop.f32.mrb[34].mxu0  ;;  %5597 = vmatpush1.bf16.msra.mxu1 %v9937_v39  ;;  %v3242_v39 = vadd.f32 %v11623_v50, %v12879_v54 }
 0x359   :  { %v8422_v45 = vadd.f32 %v4292_v34, %v3234_v57  ;;  %v4294_v38 = vpop.f32.mrb[35].mxu0  ;;  %5598 = vmatprep.subr.bf16.mxu1 %v9942_v59  ;;  %v6003_v14 = vmax.f32 %v8418_v51, 0.0  ;;  %v15204_v51 = vld [vmem:[#allocation118_spill] sm:$0xff]  ;;  %v9946_v34 = vld [vmem:[%s14569_s1 + $0x708] ss:$16 sps:$4 sm:$0xff]  }
 0x35a   :  { %v8424_v33 = vadd.f32 %v4294_v38, %v3236_v31  ;;  %5296 = vmatmul.mubr.bf16.gmra.mrb[140].mxu1 %v15201_v13  ;;  %v6004_v62 = vmax.f32 %v8420_v44, 0.0  ;;  %v3246_v23 = vadd.f32 %v15204_v51, %v12879_v54  ;;  %v15207_v13 = vld [vmem:[#allocation119_spill] sm:$0xff] }
 0x35b   :  { %v6007_v12 = vmax.f32 %v8422_v45, 0.0  ;;  %6643 = vmatmul.mubr.bf16.gmra.mrb[140].mxu0 %v12987_v27  ;;  %5305 = vmatprep.mubr.bf16.mxu1 %v15202_v7  ;;  %v9949_v7 = vld [vmem:[%s14569_s1 + $0x728] ss:$16 sps:$4 sm:$0xff]  }
 0x35c   :  { %v6008_v28 = vmax.f32 %v8424_v33, 0.0  ;;  %6650 = vmatprep.mubr.bf16.mxu0 %v13009_v43  ;;  %5599 = vmatpush1.bf16.msra.mxu1 %v9940_v25  ;;  %v9948_v43 = vld [vmem:[%s14569_s1 + $0x70c] ss:$16 sps:$4 sm:$0xff]   ;;  %v15205_v33 = vld [vmem:[#allocation116_spill] sm:$0xff]  ;;  %v9952_v51 = vld [vmem:[%s14569_s1 + $0x748] ss:$16 sps:$4 sm:$0xff]  }
 0x35d   :  { %v13111_v60 = vpack.c.bf16 %v6007_v12, %v6003_v14  ;;  %5600 = vmatprep.subr.bf16.mxu1 %v9945_v48  ;;  %v15206_v12 = vld [vmem:[#allocation117_spill] sm:$0xff] }
 0x35e   :  { %v13118_v27 = vpack.c.bf16 %v6008_v28, %v6004_v62  ;;  %v4298_v6 = vpop.f32.mrb[36].mxu0  ;;  %v3250_v62 = vadd.f32 %v15207_v13, %v12877_v63 }
 0x35f   :  { %v8426_v59 = vadd.f32 %v4298_v6, %v3240_v29  ;;  %v4300_v57 = vpop.f32.mrb[37].mxu0 }
 0x360   :  { %v8428_v2 = vadd.f32 %v4300_v57, %v3242_v39  ;;  %v4302_v31 = vpop.f32.mrb[38].mxu0  ;;  %5601 = vmatpush1.bf16.msra.mxu1 %v9943_v10  ;;  %v3254_v10 = vadd.f32 %v11661_v1, %v12877_v63 }
 0x361   :  { %v8430_v44 = vadd.f32 %v4302_v31, %v3244_v5  ;;  %v4304_v50 = vpop.f32.mrb[39].mxu0  ;;  %5602 = vmatprep.subr.bf16.mxu1 %v9948_v43  ;;  %v6011_v38 = vmax.f32 %v8426_v59, 0.0  ;;  %v3256_v43 = vadd.f32 %v11665_v35, %v12879_v54  ;;  %v15208_v35 = vld [vmem:[#allocation120_spill] sm:$0xff] }
 0x362   :  { %v8432_v45 = vadd.f32 %v4304_v50, %v3246_v23  ;;  %5306 = vmatmul.mubr.bf16.gmra.mrb[144].mxu1 %v15205_v33  ;;  %v6012_v48 = vmax.f32 %v8428_v2, 0.0  ;;  %v3260_v50 = vadd.f32 %v11680_v52, %v12877_v63 }
 0x363   :  { %v6015_v25 = vmax.f32 %v8430_v44, 0.0  ;;  %6651 = vmatmul.mubr.bf16.gmra.mrb[144].mxu0 %v13005_v58  ;;  %5315 = vmatprep.mubr.bf16.mxu1 %v15206_v12 }
 0x364   :  { %v6016_v14 = vmax.f32 %v8432_v45, 0.0  ;;  %6658 = vmatprep.mubr.bf16.mxu0 %v13037_v36  ;;  %5603 = vmatpush1.bf16.msra.mxu1 %v9946_v34  ;;  %v9954_v36 = vld [vmem:[%s14569_s1 + $0x74c] ss:$16 sps:$4 sm:$0xff]  }
 0x365   :  { %v13139_v28 = vpack.c.bf16 %v6015_v25, %v6011_v38  ;;  %5604 = vmatprep.subr.bf16.mxu1 %v9951_v17  ;;  %v15209_v45 = vld [vmem:[#allocation121_spill] sm:$0xff] }
 0x366   :  { %v13146_v58 = vpack.c.bf16 %v6016_v14, %v6012_v48  ;;  %v4308_v29 = vpop.f32.mrb[40].mxu0  ;;  %v3262_v17 = vadd.f32 %v15209_v45, %v12879_v54 }
 0x367   :  { %v8434_v39 = vadd.f32 %v4308_v29, %v3250_v62  ;;  %v4310_v6 = vpop.f32.mrb[41].mxu0 }
 0x368   :  { %v8436_v5 = vadd.f32 %v4310_v6, %v3252_v41  ;;  %v4312_v59 = vpop.f32.mrb[42].mxu0  ;;  %5605 = vmatpush1.bf16.msra.mxu1 %v9949_v7  ;;  %v15213_v6 = vld [vmem:[#allocation124_spill] sm:$0xff] }
 0x369   :  { %v8438_v57 = vadd.f32 %v4312_v59, %v3254_v10  ;;  %v4314_v0 = vpop.f32.mrb[43].mxu0  ;;  %5606 = vmatprep.subr.bf16.mxu1 %v9954_v36  ;;  %v6019_v2 = vmax.f32 %v8434_v39, 0.0  ;;  %v15212_v36 = vld [vmem:[#allocation122_spill] sm:$0xff]  ;;  %v3272_v59 = vadd.f32 %v11710_v61, %v12879_v54 }
 0x36a   :  { %v8440_v23 = vadd.f32 %v4314_v0, %v3256_v43  ;;  %5316 = vmatmul.mubr.bf16.gmra.mrb[148].mxu1 %v11659_v11  ;;  %v6020_v1 = vmax.f32 %v8436_v5, 0.0  ;;  %v3270_v43 = vadd.f32 %v11708_v15, %v12877_v63 }
 0x36b   :  { %v6023_v31 = vmax.f32 %v8438_v57, 0.0  ;;  %6659 = vmatmul.mubr.bf16.gmra.mrb[148].mxu0 %v13029_v30  ;;  %5325 = vmatprep.mubr.bf16.mxu1 %v15208_v35  ;;  %v15210_v30 = vld [vmem:[#allocation123_spill] sm:$0xff] }
 0x36c   :  { %v6024_v44 = vmax.f32 %v8440_v23, 0.0  ;;  %6666 = vmatprep.mubr.bf16.mxu0 %v13062_v56  ;;  %5607 = vmatpush1.bf16.msra.mxu1 %v9952_v51  ;;  %v3264_v25 = vadd.f32 %v15210_v30, %v12877_v63  ;;  %v15211_v56 = vld [vmem:[#allocation125_spill] sm:$0xff]  ;;  %v15214_v51 = vld [vmem:[#allocation127_spill] sm:$0xff]  ;;  %v15216_v30 = vld [vmem:[#allocation126_spill] sm:$0xff] }
 0x36d   :  { %v13164_v34 = vpack.c.bf16 %v6023_v31, %v6019_v2  ;;  %v3266_v14 = vadd.f32 %v15211_v56, %v12879_v54  ;;  %v3274_v23 = vadd.f32 %v15214_v51, %v12877_v63  ;;  %v15215_v31 = vld [vmem:[#allocation129_spill] sm:$0xff]  ;;  %v15218_v56 = vld [vmem:[#allocation130_spill] sm:$0xff]  ;;  %v15222_v51 = vld [vmem:[#allocation132_spill] sm:$0xff] }
 0x36e   :  { %v13168_v38 = vpack.c.bf16 %v6024_v44, %v6020_v1  ;;  %v4318_v11 = vpop.f32.mrb[44].mxu0  ;;  %v3276_v1 = vadd.f32 %v15215_v31, %v12879_v54  ;;  %v3290_v31 = vadd.f32 %v11767_v16, %v12877_v63 }
 0x36f   :  { %v8442_v33 = vadd.f32 %v4318_v11, %v3260_v50  ;;  %v4320_v48 = vpop.f32.mrb[45].mxu0 }
 0x370   :  { %v8444_v12 = vadd.f32 %v4320_v48, %v3262_v17  ;;  %v4322_v13 = vpop.f32.mrb[46].mxu0  ;;  %v15217_v48 = vld [vmem:[#allocation128_spill] sm:$0xff] }
 0x371   :  { %v8446_v52 = vadd.f32 %v4322_v13, %v3264_v25  ;;  %v4324_v62 = vpop.f32.mrb[47].mxu0  ;;  %v6027_v41 = vmax.f32 %v8442_v33, 0.0  ;;  %v15219_v13 = vld [vmem:[#allocation131_spill] sm:$0xff] }
 0x372   :  { %v8448_v7 = vadd.f32 %v4324_v62, %v3266_v14  ;;  %5326 = vmatmul.mubr.bf16.gmra.mrb[152].mxu1 %v15212_v36  ;;  %v6028_v10 = vmax.f32 %v8444_v12, 0.0  ;;  %v3280_v14 = vadd.f32 %v15218_v56, %v12877_v63 }
 0x373   :  { %v6031_v29 = vmax.f32 %v8446_v52, 0.0  ;;  %6667 = vmatmul.mubr.bf16.gmra.mrb[152].mxu0 %v13055_v9  ;;  %5335 = vmatprep.mubr.bf16.mxu1 %v15213_v6  ;;  %v9955_v9 = vld [vmem:[%s14569_s1 + $0x768] ss:$16 sps:$4 sm:$0xff]   ;;  %v3282_v52 = vadd.f32 %v15219_v13, %v12879_v54 }
 0x374   :  { %v6032_v39 = vmax.f32 %v8448_v7, 0.0  ;;  %6674 = vmatprep.mubr.bf16.mxu0 %v13090_v49  ;;  %v9957_v49 = vld [vmem:[%s14569_s1 + $0x76c] ss:$16 sps:$4 sm:$0xff]  }
 0x375   :  { %v13180_v5 = vpack.c.bf16 %v6031_v29, %v6027_v41  ;;  %5608 = vmatprep.subr.bf16.mxu1 %v9957_v49  ;;  %v15220_v41 = vld [vmem:[#allocation133_spill] sm:$0xff] }
 0x376   :  { %v13184_v57 = vpack.c.bf16 %v6032_v39, %v6028_v10  ;;  %v4328_v0 = vpop.f32.mrb[48].mxu0  ;;  %5609 = vmatpush1.bf16.msra.mxu1 %v9955_v9 }
 0x377   :  { %v8450_v15 = vadd.f32 %v4328_v0, %v3270_v43  ;;  %v4330_v2 = vpop.f32.mrb[49].mxu0 }
 0x378   :  { %v8452_v61 = vadd.f32 %v4330_v2, %v3272_v59  ;;  %v4332_v44 = vpop.f32.mrb[50].mxu0  ;;  %v15223_v2 = vld [vmem:[#allocation134_spill] sm:$0xff] }
 0x379   :  { %v8454_v35 = vadd.f32 %v4332_v44, %v3274_v23  ;;  %v4334_v50 = vpop.f32.mrb[51].mxu0  ;;  %v6035_v17 = vmax.f32 %v8450_v15, 0.0 }
 0x37a   :  { %v8456_v45 = vadd.f32 %v4334_v50, %v3276_v1  ;;  %5336 = vmatmul.mubr.bf16.gmra.mrb[156].mxu1 %v15216_v30  ;;  %v6036_v25 = vmax.f32 %v8452_v61, 0.0  ;;  %v3292_v61 = vadd.f32 %v11772_v40, %v12879_v54  ;;  %v15224_v50 = vld [vmem:[#allocation137_spill] sm:$0xff] }
 0x37b   :  { %v6039_v11 = vmax.f32 %v8454_v35, 0.0  ;;  %6675 = vmatmul.mubr.bf16.gmra.mrb[156].mxu0 %v13083_v37  ;;  %5345 = vmatprep.mubr.bf16.mxu1 %v15217_v48  ;;  %v3284_v37 = vadd.f32 %v15220_v41, %v12877_v63 }
 0x37c   :  { %v6040_v33 = vmax.f32 %v8456_v45, 0.0  ;;  %6682 = vmatprep.mubr.bf16.mxu0 %v13118_v27  ;;  %v15221_v27 = vld [vmem:[#allocation135_spill] sm:$0xff]  ;;  %v3294_v45 = vadd.f32 %v15224_v50, %v12877_v63 }
 0x37d   :  { %v13202_v12 = vpack.c.bf16 %v6039_v11, %v6035_v17  ;;  %v3286_v10 = vadd.f32 %v15221_v27, %v12879_v54  ;;  %v15225_v11 = vld [vmem:[#allocation139_spill] sm:$0xff] }
 0x37e   :  { %v13206_v62 = vpack.c.bf16 %v6040_v33, %v6036_v25  ;;  %v4338_v7 = vpop.f32.mrb[52].mxu0  ;;  %v3296_v30 = vadd.f32 %v15225_v11, %v12879_v54  ;;  %v3312_v11 = vadd.f32 %v11846_v22, %v12879_v54 }
 0x37f   :  { %v8458_v29 = vadd.f32 %v4338_v7, %v3280_v14  ;;  %v4340_v36 = vpop.f32.mrb[53].mxu0 }
 0x380   :  { %v8460_v39 = vadd.f32 %v4340_v36, %v3282_v52  ;;  %v4342_v6 = vpop.f32.mrb[54].mxu0  ;;  %v15226_v52 = vld [vmem:[#allocation136_spill] sm:$0xff] }
 0x381   :  { %v8462_v43 = vadd.f32 %v4342_v6, %v3284_v37  ;;  %v4344_v59 = vpop.f32.mrb[55].mxu0  ;;  %v6043_v9 = vmax.f32 %v8458_v29, 0.0  ;;  %v15227_v37 = vld [vmem:[#allocation138_spill] sm:$0xff]  ;;  %v15228_v29 = vld [vmem:[#allocation140_spill] sm:$0xff] }
 0x382   :  { %v8464_v0 = vadd.f32 %v4344_v59, %v3286_v10  ;;  %5346 = vmatmul.mubr.bf16.gmra.mrb[160].mxu1 %v15222_v51  ;;  %v6044_v23 = vmax.f32 %v8460_v39, 0.0  ;;  %v3300_v36 = vadd.f32 %v15228_v29, %v12877_v63  ;;  %v15229_v10 = vld [vmem:[#allocation141_spill] sm:$0xff]  ;;  %v15230_v59 = vld [vmem:[#allocation143_spill] sm:$0xff] }
 0x383   :  { %v6047_v49 = vmax.f32 %v8462_v43, 0.0  ;;  %6683 = vmatmul.mubr.bf16.gmra.mrb[160].mxu0 %v13111_v60  ;;  %5355 = vmatprep.mubr.bf16.mxu1 %v15223_v2  ;;  %v9958_v60 = vld [vmem:[%s14569_s1 + $0x788] ss:$16 sps:$4 sm:$0xff]   ;;  %v3302_v39 = vadd.f32 %v15229_v10, %v12879_v54  ;;  %v15236_v10 = vld [vmem:[#allocation148_spill] sm:$0xff] }
 0x384   :  { %v6048_v15 = vmax.f32 %v8464_v0, 0.0  ;;  %6690 = vmatprep.mubr.bf16.mxu0 %v13146_v58  ;;  %v9960_v58 = vld [vmem:[%s14569_s1 + $0x78c] ss:$16 sps:$4 sm:$0xff]  }
 0x385   :  { %v13218_v1 = vpack.c.bf16 %v6047_v49, %v6043_v9  ;;  %5610 = vmatprep.subr.bf16.mxu1 %v9960_v58 }
 0x386   :  { %v13222_v44 = vpack.c.bf16 %v6048_v15, %v6044_v23  ;;  %v4348_v35 = vpop.f32.mrb[56].mxu0  ;;  %5611 = vmatpush1.bf16.msra.mxu1 %v9958_v60  ;;  %v15232_v60 = vld [vmem:[#allocation142_spill] sm:$0xff] }
 0x387   :  { %v8466_v16 = vadd.f32 %v4348_v35, %v3290_v31  ;;  %v4350_v17 = vpop.f32.mrb[57].mxu0 }
 0x388   :  { %v8468_v40 = vadd.f32 %v4350_v17, %v3292_v61  ;;  %v4352_v25 = vpop.f32.mrb[58].mxu0 }
 0x389   :  { %v8470_v33 = vadd.f32 %v4352_v25, %v3294_v45  ;;  %v4354_v48 = vpop.f32.mrb[59].mxu0  ;;  %v6051_v14 = vmax.f32 %v8466_v16, 0.0  ;;  %v15233_v45 = vld [vmem:[#allocation144_spill] sm:$0xff]  ;;  %v3310_v16 = vadd.f32 %v11841_v42, %v12877_v63  ;;  %v3314_v25 = vadd.f32 %v11850_v47, %v12877_v63 }
 0x38a   :  { %v8472_v56 = vadd.f32 %v4354_v48, %v3296_v30  ;;  %5356 = vmatmul.mubr.bf16.gmra.mrb[164].mxu1 %v15226_v52  ;;  %v6052_v7 = vmax.f32 %v8468_v40, 0.0  ;;  %v3316_v48 = vadd.f32 %v11854_v26, %v12879_v54  ;;  %v9964_v26 = vld [vmem:[%s14571_s3 + $0x80] sm:$0xff]  }
 0x38b   :  { %v6055_v13 = vmax.f32 %v8470_v33, 0.0  ;;  %6691 = vmatmul.mubr.bf16.gmra.mrb[164].mxu0 %v13139_v28  ;;  %5365 = vmatprep.mubr.bf16.mxu1 %v15227_v37  ;;  %v3304_v28 = vadd.f32 %v15230_v59, %v12877_v63  ;;  %v15234_v37 = vld [vmem:[#allocation146_spill] sm:$0xff]  ;;  %v15237_v59 = vld [vmem:[#allocation149_spill] sm:$0xff] }
 0x38c   :  { %v6056_v41 = vmax.f32 %v8472_v56, 0.0  ;;  %6698 = vmatprep.mubr.bf16.mxu0 %v13168_v38  ;;  %v15231_v38 = vld [vmem:[#allocation145_spill] sm:$0xff]  ;;  %6876 = vmatpush1.bf16.msra.mxu0 %v9964_v26  ;;  %v15245_v26 = vld [vmem:[#allocation156_spill] sm:$0xff] }
 0x38d   :  { %v13240_v27 = vpack.c.bf16 %v6055_v13, %v6051_v14  ;;  %v3306_v49 = vadd.f32 %v15231_v38, %v12879_v54 }
 0x38e   :  { %v13244_v6 = vpack.c.bf16 %v6056_v41, %v6052_v7  ;;  %v4358_v43 = vpop.f32.mrb[60].mxu0 }
 0x38f   :  { %v8474_v0 = vadd.f32 %v4358_v43, %v3300_v36  ;;  %v4360_v9 = vpop.f32.mrb[61].mxu0  ;;  %v15235_v36 = vld [vmem:[#allocation147_spill] sm:$0xff] }
 0x390   :  { %v8476_v51 = vadd.f32 %v4360_v9, %v3302_v39  ;;  %v4362_v23 = vpop.f32.mrb[62].mxu0  ;;  %v3320_v39 = vadd.f32 %v15236_v10, %v12877_v63  ;;  %v3340_v10 = vadd.f32 %v15245_v26, %v12877_v63 }
 0x391   :  { %v8478_v15 = vadd.f32 %v4362_v23, %v3304_v28  ;;  %v4364_v2 = vpop.f32.mrb[63].mxu0  ;;  %v6059_v61 = vmax.f32 %v8474_v0, 0.0  ;;  %v3322_v28 = vadd.f32 %v15237_v59, %v12879_v54  ;;  %v15240_v23 = vld [vmem:[#allocation153_spill] sm:$0xff] }
 0x392   :  { %v8480_v31 = vadd.f32 %v4364_v2, %v3306_v49  ;;  %5366 = vmatmul.mubr.bf16.gmra.mrb[168].mxu1 %v15232_v60  ;;  %v6060_v58 = vmax.f32 %v8476_v51, 0.0  ;;  %v15239_v51 = vmov 0   ;;  %v15246_v59 = vld [vmem:[#allocation157_spill] sm:$0xff] }
 0x393   :  { %v6063_v35 = vmax.f32 %v8478_v15, 0.0  ;;  %6699 = vmatmul.mubr.bf16.gmra.mrb[168].mxu0 %v13164_v34  ;;  %5375 = vmatprep.mubr.bf16.mxu1 %v15233_v45  ;;  %v9961_v34 = vld [vmem:[%s14569_s1 + $0x7a8] ss:$16 sps:$4 sm:$0xff]   ;;  %v3326_v15 = vadd.f32 %v15240_v23, %v12879_v54  ;;  %v15241_v45 = vld [vmem:[#allocation150_spill] sm:$0xff] }
 0x394   :  { %v6064_v50 = vmax.f32 %v8480_v31, 0.0  ;;  %6706 = vmatprep.mubr.bf16.mxu0 %v13184_v57  ;;  %v9963_v57 = vld [vmem:[%s14569_s1 + $0x7ac] ss:$16 sps:$4 sm:$0xff]   ;;  %6877 = vmatprep.subr.bf16.mxu0 %v15239_v51 }
 0x395   :  { %v13256_v17 = vpack.c.bf16 %v6063_v35, %v6059_v61  ;;  %5612 = vmatprep.subr.bf16.mxu1 %v9963_v57  ;;  %v15242_v57 = vld [vmem:[#allocation152_spill] sm:$0xff] }
 0x396   :  { %v13260_v30 = vpack.c.bf16 %v6064_v50, %v6060_v58  ;;  %v4368_v40 = vpop.f32.mrb[64].mxu0  ;;  %5613 = vmatpush1.bf16.msra.mxu1 %v9961_v34 }
 0x397   :  { %v8482_v42 = vadd.f32 %v4368_v40, %v3310_v16  ;;  %v4370_v33 = vpop.f32.mrb[65].mxu0  ;;  %v9965_v16 = vld [vmem:[%s14569_s1 + $0x7c8] ss:$16 sps:$4 sm:$0xff]  }
 0x398   :  { %v8484_v22 = vadd.f32 %v4370_v33, %v3312_v11  ;;  %v4372_v56 = vpop.f32.mrb[66].mxu0  ;;  %v9967_v11 = vld [vmem:[%s14569_s1 + $0x7cc] ss:$16 sps:$4 sm:$0xff]  }
 0x399   :  { %v8486_v14 = vadd.f32 %v4372_v56, %v3314_v25  ;;  %v4374_v13 = vpop.f32.mrb[67].mxu0  ;;  %v6067_v7 = vmax.f32 %v8482_v42, 0.0  ;;  %v3330_v25 = vadd.f32 %v11915_v46, %v12877_v63  ;;  %5614 = vmatprep.subr.bf16.mxu1 %v9967_v11 }
 0x39a   :  { %v8488_v52 = vadd.f32 %v4374_v13, %v3316_v48  ;;  %5376 = vmatmul.mubr.bf16.gmra.mrb[172].mxu1 %v15234_v37  ;;  %v6068_v29 = vmax.f32 %v8484_v22, 0.0  ;;  %v3334_v22 = vadd.f32 %v11924_v32, %v12877_v63  ;;  %v15244_v32 = vld [vmem:[#allocation155_spill] sm:$0xff] }
 0x39b   :  { %v6071_v41 = vmax.f32 %v8486_v14, 0.0  ;;  %6707 = vmatmul.mubr.bf16.gmra.mrb[172].mxu0 %v13180_v5  ;;  %5385 = vmatprep.mubr.bf16.mxu1 %v15235_v36  ;;  %v3336_v14 = vadd.f32 %v11928_v53, %v12879_v54  ;;  %v9968_v53 = vld [vmem:[%s14571_s3 + $0x88] sm:$0xff]  }
 0x39c   :  { %v6072_v47 = vmax.f32 %v8488_v52, 0.0  ;;  %6714 = vmatprep.mubr.bf16.mxu0 %v13206_v62  ;;  %v15238_v62 = vld [vmem:[#allocation151_spill] sm:$0xff]  ;;  %5615 = vmatpush1.bf16.msra.mxu1 %v9965_v16 }
 0x39d   :  { %v13281_v43 = vpack.c.bf16 %v6071_v41, %v6067_v7  ;;  %v3324_v9 = vadd.f32 %v15238_v62, %v12877_v63  ;;  %6878 = vmatpush1.bf16.msra.mxu0 %v9968_v53  ;;  %v9971_v16 = vld [vmem:[%s14569_s1 + $0x7ec] ss:$16 sps:$4 sm:$0xff]  }
 0x39e   :  { %v13285_v0 = vpack.c.bf16 %v6072_v47, %v6068_v29  ;;  %v4378_v5 = vpop.f32.mrb[68].mxu0  ;;  %6879 = vmatprep.subr.bf16.mxu0 %v15239_v51  ;;  %5616 = vmatprep.subr.bf16.mxu1 %v9971_v16  ;;  %v15259_v16 = vld [vmem:[#allocation171_spill] sm:$0xff] }
 0x39f   :  { %v8490_v38 = vadd.f32 %v4378_v5, %v3320_v39  ;;  %v4380_v49 = vpop.f32.mrb[69].mxu0 }
 0x3a0   :  { %v8492_v2 = vadd.f32 %v4380_v49, %v3322_v28  ;;  %v4382_v31 = vpop.f32.mrb[70].mxu0  ;;  %v3342_v28 = vadd.f32 %v15246_v59, %v12879_v54  ;;  %v15248_v49 = vld [vmem:[#allocation161_spill] sm:$0xff]  ;;  %v15254_v59 = vld [vmem:[#allocation167_spill] sm:$0xff] }
 0x3a1   :  { %v8494_v61 = vadd.f32 %v4382_v31, %v3324_v9  ;;  %v4384_v35 = vpop.f32.mrb[71].mxu0  ;;  %v6075_v58 = vmax.f32 %v8490_v38, 0.0  ;;  %v3346_v23 = vadd.f32 %v15248_v49, %v12879_v54  ;;  %v15255_v49 = vld [vmem:[#allocation164_spill] sm:$0xff] }
 0x3a2   :  { %v8496_v60 = vadd.f32 %v4384_v35, %v3326_v15  ;;  %5386 = vmatmul.mubr.bf16.gmra.mrb[176].mxu1 %v15241_v45  ;;  %v6076_v40 = vmax.f32 %v8492_v2, 0.0  ;;  %v9969_v45 = vld [vmem:[%s14569_s1 + $0x7e8] ss:$16 sps:$4 sm:$0xff]  }
 0x3a3   :  { %v6079_v50 = vmax.f32 %v8494_v61, 0.0  ;;  %6715 = vmatmul.mubr.bf16.gmra.mrb[176].mxu0 %v13202_v12  ;;  %5395 = vmatprep.mubr.bf16.mxu1 %v15242_v57  ;;  %v3332_v12 = vadd.f32 %v11920_v18, %v12879_v54  ;;  %v15243_v18 = vld [vmem:[#allocation154_spill] sm:$0xff]  ;;  %v3350_v57 = vadd.f32 %v11989_v21, %v12877_v63 }
 0x3a4   :  { %v6080_v34 = vmax.f32 %v8496_v60, 0.0  ;;  %6722 = vmatprep.mubr.bf16.mxu0 %v13222_v44  ;;  %5617 = vmatpush1.bf16.msra.mxu1 %v9969_v45 }
 0x3a5   :  { %v13304_v42 = vpack.c.bf16 %v6079_v50, %v6075_v58  ;;  %v15249_v50 = vld [vmem:[#allocation158_spill] sm:$0xff] }
 0x3a6   :  { %v13308_v33 = vpack.c.bf16 %v6080_v34, %v6076_v40  ;;  %v4388_v48 = vpop.f32.mrb[72].mxu0  ;;  %v15250_v34 = vld [vmem:[#allocation160_spill] sm:$0xff] }
 0x3a7   :  { %v8498_v56 = vadd.f32 %v4388_v48, %v3330_v25  ;;  %v4390_v44 = vpop.f32.mrb[73].mxu0 }
 0x3a8   :  { %v8500_v13 = vadd.f32 %v4390_v44, %v3332_v12  ;;  %v4392_v46 = vpop.f32.mrb[74].mxu0  ;;  %v3356_v44 = vadd.f32 %v12002_v8, %v12879_v54  ;;  %v9972_v8 = vld [vmem:[%s14571_s3 + $0x90] sm:$0xff]  }
 0x3a9   :  { %v8502_v52 = vadd.f32 %v4392_v46, %v3334_v22  ;;  %v4394_v7 = vpop.f32.mrb[75].mxu0  ;;  %v6083_v37 = vmax.f32 %v8498_v56, 0.0  ;;  %v3354_v22 = vadd.f32 %v11998_v19, %v12877_v63  ;;  %v15252_v19 = vld [vmem:[#allocation163_spill] sm:$0xff]  ;;  %6880 = vmatpush1.bf16.msra.mxu0 %v9972_v8 }
 0x3aa   :  { %v8504_v41 = vadd.f32 %v4394_v7, %v3336_v14  ;;  %5396 = vmatmul.mubr.bf16.gmra.mrb[180].mxu1 %v15243_v18  ;;  %v6084_v47 = vmax.f32 %v8500_v13, 0.0  ;;  %v3360_v18 = vadd.f32 %v12023_v20, %v12877_v63  ;;  %6881 = vmatprep.subr.bf16.mxu0 %v15239_v51 }
 0x3ab   :  { %v6087_v29 = vmax.f32 %v8502_v52, 0.0  ;;  %6723 = vmatmul.mubr.bf16.gmra.mrb[180].mxu0 %v13218_v1  ;;  %5405 = vmatprep.mubr.bf16.mxu1 %v15244_v32 }
 0x3ac   :  { %v6088_v36 = vmax.f32 %v8504_v41, 0.0  ;;  %6730 = vmatprep.mubr.bf16.mxu0 %v13244_v6  ;;  %v15247_v6 = vld [vmem:[#allocation159_spill] sm:$0xff] }
 0x3ad   :  { %v13323_v39 = vpack.c.bf16 %v6087_v29, %v6083_v37  ;;  %v3344_v62 = vadd.f32 %v15247_v6, %v12877_v63 }
 0x3ae   :  { %v13327_v5 = vpack.c.bf16 %v6088_v36, %v6084_v47  ;;  %v4398_v1 = vpop.f32.mrb[76].mxu0  ;;  %v3362_v36 = vadd.f32 %v12028_v3, %v12879_v54 }
 0x3af   :  { %v8506_v9 = vadd.f32 %v4398_v1, %v3340_v10  ;;  %v4400_v38 = vpop.f32.mrb[77].mxu0 }
 0x3b0   :  { %v8508_v15 = vadd.f32 %v4400_v38, %v3342_v28  ;;  %v4402_v2 = vpop.f32.mrb[78].mxu0  ;;  %v3366_v28 = vadd.f32 %v15254_v59, %v12879_v54 }
 0x3b1   :  { %v8510_v31 = vadd.f32 %v4402_v2, %v3344_v62  ;;  %v4404_v61 = vpop.f32.mrb[79].mxu0  ;;  %v6091_v60 = vmax.f32 %v8506_v9, 0.0  ;;  %v15256_v2 = vld [vmem:[#allocation166_spill] sm:$0xff] }
 0x3b2   :  { %v8512_v35 = vadd.f32 %v4404_v61, %v3346_v23  ;;  %5406 = vmatmul.mubr.bf16.gmra.mrb[184].mxu1 %v15249_v50  ;;  %v6092_v11 = vmax.f32 %v8508_v15, 0.0 }
 0x3b3   :  { %v6095_v58 = vmax.f32 %v8510_v31, 0.0  ;;  %6731 = vmatmul.mubr.bf16.gmra.mrb[184].mxu0 %v13240_v27  ;;  %5415 = vmatprep.mubr.bf16.mxu1 %v15250_v34  ;;  %v3352_v27 = vadd.f32 %v11994_v55, %v12879_v54  ;;  %v15251_v55 = vld [vmem:[#allocation162_spill] sm:$0xff]  ;;  %v15257_v31 = vld [vmem:[#allocation168_spill] sm:$0xff] }
 0x3b4   :  { %v6096_v40 = vmax.f32 %v8512_v35, 0.0  ;;  %6738 = vmatprep.mubr.bf16.mxu0 %v13260_v30  ;;  %v3370_v61 = vadd.f32 %v15257_v31, %v12877_v63 }
 0x3b5   :  { %v13346_v25 = vpack.c.bf16 %v6095_v58, %v6091_v60  ;;  %v15258_v60 = vld [vmem:[#allocation169_spill] sm:$0xff] }
 0x3b6   :  { %v13350_v12 = vpack.c.bf16 %v6096_v40, %v6092_v11  ;;  %v4408_v48 = vpop.f32.mrb[80].mxu0  ;;  %v3372_v58 = vadd.f32 %v15258_v60, %v12879_v54  ;;  %v15271_v60 = vld [vmem:[#allocation183_spill] sm:$0xff] }
 0x3b7   :  { %v8514_v56 = vadd.f32 %v4408_v48, %v3350_v57  ;;  %v4410_v30 = vpop.f32.mrb[81].mxu0 }
 0x3b8   :  { %v8516_v14 = vadd.f32 %v4410_v30, %v3352_v27  ;;  %v4412_v21 = vpop.f32.mrb[82].mxu0 }
 0x3b9   :  { %v8518_v13 = vadd.f32 %v4412_v21, %v3354_v22  ;;  %v4414_v46 = vpop.f32.mrb[83].mxu0  ;;  %v6099_v7 = vmax.f32 %v8514_v56, 0.0 }
 0x3ba   :  { %v8520_v52 = vadd.f32 %v4414_v46, %v3356_v44  ;;  %5416 = vmatmul.mubr.bf16.gmra.mrb[188].mxu1 %v15251_v55  ;;  %v6100_v37 = vmax.f32 %v8516_v14, 0.0  ;;  %v15261_v14 = vld [vmem:[#allocation170_spill] sm:$0xff]  ;;  %v15262_v46 = vld [vmem:[#allocation172_spill] sm:$0xff] }
 0x3bb   :  { %v6103_v41 = vmax.f32 %v8518_v13, 0.0  ;;  %6739 = vmatmul.mubr.bf16.gmra.mrb[188].mxu0 %v13256_v17  ;;  %5425 = vmatprep.mubr.bf16.mxu1 %v15252_v19 }
 0x3bc   :  { %v6104_v29 = vmax.f32 %v8520_v52, 0.0  ;;  %6746 = vmatprep.mubr.bf16.mxu0 %v13285_v0  ;;  %v15253_v0 = vld [vmem:[#allocation165_spill] sm:$0xff] }
 0x3bd   :  { %v13365_v47 = vpack.c.bf16 %v6103_v41, %v6099_v7  ;;  %v3364_v53 = vadd.f32 %v15253_v0, %v12877_v63  ;;  %v9973_v52 = vld [vmem:[%s14571_s3 + $0x98] sm:$0xff]   ;;  %v15263_v7 = vld [vmem:[#allocation174_spill] sm:$0xff] }
 0x3be   :  { %v13369_v32 = vpack.c.bf16 %v6104_v29, %v6100_v37  ;;  %v4418_v17 = vpop.f32.mrb[84].mxu0  ;;  %v3380_v41 = vadd.f32 %v15263_v7, %v12877_v63  ;;  %v15264_v37 = vld [vmem:[#allocation175_spill] sm:$0xff]  ;;  %6882 = vmatpush1.bf16.msra.mxu0 %v9973_v52 }
 0x3bf   :  { %v8522_v26 = vadd.f32 %v4418_v17, %v3360_v18  ;;  %v4420_v10 = vpop.f32.mrb[85].mxu0  ;;  %v3382_v29 = vadd.f32 %v15264_v37, %v12879_v54  ;;  %6883 = vmatprep.subr.bf16.mxu0 %v15239_v51  ;;  %v15266_v17 = vld [vmem:[#allocation179_spill] sm:$0xff] }
 0x3c0   :  { %v8524_v20 = vadd.f32 %v4420_v10, %v3362_v36  ;;  %v4422_v1 = vpop.f32.mrb[86].mxu0  ;;  %v3386_v0 = vadd.f32 %v15266_v17, %v12879_v54 }
 0x3c1   :  { %v8526_v6 = vadd.f32 %v4422_v1, %v3364_v53  ;;  %v4424_v62 = vpop.f32.mrb[87].mxu0  ;;  %v6107_v3 = vmax.f32 %v8522_v26, 0.0 }
 0x3c2   :  { %v8528_v9 = vadd.f32 %v4424_v62, %v3366_v28  ;;  %5426 = vmatmul.mubr.bf16.gmra.mrb[192].mxu1 %v15255_v49  ;;  %v6108_v23 = vmax.f32 %v8524_v20, 0.0 }
 0x3c3   :  { %v6111_v38 = vmax.f32 %v8526_v6, 0.0  ;;  %6747 = vmatmul.mubr.bf16.gmra.mrb[192].mxu0 %v13281_v43  ;;  %5435 = vmatprep.mubr.bf16.mxu1 %v15256_v2  ;;  %v3374_v43 = vadd.f32 %v15259_v16, %v12877_v63  ;;  %v15267_v6 = vld [vmem:[#allocation176_spill] sm:$0xff] }
 0x3c4   :  { %v6112_v15 = vmax.f32 %v8528_v9, 0.0  ;;  %6754 = vmatprep.mubr.bf16.mxu0 %v13308_v33  ;;  %v15260_v33 = vld [vmem:[#allocation173_spill] sm:$0xff] }
 0x3c5   :  { %v13382_v35 = vpack.c.bf16 %v6111_v38, %v6107_v3  ;;  %v3376_v34 = vadd.f32 %v15260_v33, %v12879_v54  ;;  %v15268_v3 = vld [vmem:[#allocation178_spill] sm:$0xff]  ;;  %v15269_v38 = vld [vmem:[#allocation180_spill] sm:$0xff] }
 0x3c6   :  { %v13386_v50 = vpack.c.bf16 %v6112_v15, %v6108_v23  ;;  %v4428_v45 = vpop.f32.mrb[88].mxu0  ;;  %v3390_v49 = vadd.f32 %v15269_v38, %v12877_v63  ;;  %v15270_v15 = vld [vmem:[#allocation181_spill] sm:$0xff] }
 0x3c7   :  { %v8530_v11 = vadd.f32 %v4428_v45, %v3370_v61  ;;  %v4430_v40 = vpop.f32.mrb[89].mxu0  ;;  %v3392_v2 = vadd.f32 %v15270_v15, %v12879_v54  ;;  %v15283_v15 = vld [vmem:[#allocation195_spill] sm:$0xff] }
 0x3c8   :  { %v8532_v57 = vadd.f32 %v4430_v40, %v3372_v58  ;;  %v4432_v27 = vpop.f32.mrb[90].mxu0 }
 0x3c9   :  { %v8534_v48 = vadd.f32 %v4432_v27, %v3374_v43  ;;  %v4434_v22 = vpop.f32.mrb[91].mxu0  ;;  %v6115_v30 = vmax.f32 %v8530_v11, 0.0 }
 0x3ca   :  { %v8536_v56 = vadd.f32 %v4434_v22, %v3376_v34  ;;  %5436 = vmatmul.mubr.bf16.gmra.mrb[196].mxu1 %v15261_v14  ;;  %v6116_v21 = vmax.f32 %v8532_v57, 0.0  ;;  %v15275_v14 = vld [vmem:[#allocation186_spill] sm:$0xff] }
 0x3cb   :  { %v6119_v44 = vmax.f32 %v8534_v48, 0.0  ;;  %6755 = vmatmul.mubr.bf16.gmra.mrb[196].mxu0 %v13304_v42  ;;  %5445 = vmatprep.mubr.bf16.mxu1 %v15262_v46  ;;  %v15273_v48 = vld [vmem:[#allocation182_spill] sm:$0xff]  ;;  %v15276_v46 = vld [vmem:[#allocation187_spill] sm:$0xff] }
 0x3cc   :  { %v6120_v13 = vmax.f32 %v8536_v56, 0.0  ;;  %6762 = vmatprep.mubr.bf16.mxu0 %v13327_v5  ;;  %v15265_v5 = vld [vmem:[#allocation177_spill] sm:$0xff]  ;;  %v3402_v52 = vadd.f32 %v15276_v46, %v12879_v54 }
 0x3cd   :  { %v13401_v55 = vpack.c.bf16 %v6119_v44, %v6115_v30  ;;  %v3384_v8 = vadd.f32 %v15265_v5, %v12877_v63  ;;  %v15274_v30 = vld [vmem:[#allocation184_spill] sm:$0xff]  ;;  %v9974_v44 = vld [vmem:[%s14571_s3 + $0xa0] sm:$0xff]  }
 0x3ce   :  { %v13405_v19 = vpack.c.bf16 %v6120_v13, %v6116_v21  ;;  %v4438_v42 = vpop.f32.mrb[92].mxu0  ;;  %v3400_v21 = vadd.f32 %v15275_v14, %v12877_v63  ;;  %6884 = vmatpush1.bf16.msra.mxu0 %v9974_v44 }
 0x3cf   :  { %v8538_v18 = vadd.f32 %v4438_v42, %v3380_v41  ;;  %v4440_v36 = vpop.f32.mrb[93].mxu0  ;;  %6885 = vmatprep.subr.bf16.mxu0 %v15239_v51  ;;  %v15278_v42 = vld [vmem:[#allocation191_spill] sm:$0xff] }
 0x3d0   :  { %v8540_v53 = vadd.f32 %v4440_v36, %v3382_v29  ;;  %v4442_v26 = vpop.f32.mrb[94].mxu0  ;;  %v3406_v5 = vadd.f32 %v15278_v42, %v12879_v54 }
 0x3d1   :  { %v8542_v10 = vadd.f32 %v4442_v26, %v3384_v8  ;;  %v4444_v59 = vpop.f32.mrb[95].mxu0  ;;  %v6123_v20 = vmax.f32 %v8538_v18, 0.0 }
 0x3d2   :  { %v8544_v28 = vadd.f32 %v4444_v59, %v3386_v0  ;;  %5446 = vmatmul.mubr.bf16.gmra.mrb[200].mxu1 %v15267_v6  ;;  %v6124_v62 = vmax.f32 %v8540_v53, 0.0 }
 0x3d3   :  { %v6127_v1 = vmax.f32 %v8542_v10, 0.0  ;;  %6763 = vmatmul.mubr.bf16.gmra.mrb[200].mxu0 %v13323_v39  ;;  %5455 = vmatprep.mubr.bf16.mxu1 %v15268_v3  ;;  %v3394_v39 = vadd.f32 %v15271_v60, %v12877_v63  ;;  %v15279_v10 = vld [vmem:[#allocation188_spill] sm:$0xff] }
 0x3d4   :  { %v6128_v9 = vmax.f32 %v8544_v28, 0.0  ;;  %6770 = vmatprep.mubr.bf16.mxu0 %v13350_v12  ;;  %v15272_v12 = vld [vmem:[#allocation185_spill] sm:$0xff] }
 0x3d5   :  { %v13418_v23 = vpack.c.bf16 %v6127_v1, %v6123_v20  ;;  %v3396_v16 = vadd.f32 %v15272_v12, %v12879_v54  ;;  %v15280_v20 = vld [vmem:[#allocation190_spill] sm:$0xff]  ;;  %v15281_v1 = vld [vmem:[#allocation192_spill] sm:$0xff] }
 0x3d6   :  { %v13422_v31 = vpack.c.bf16 %v6128_v9, %v6124_v62  ;;  %v4448_v61 = vpop.f32.mrb[96].mxu0  ;;  %v3410_v6 = vadd.f32 %v15281_v1, %v12877_v63  ;;  %v15282_v9 = vld [vmem:[#allocation193_spill] sm:$0xff] }
 0x3d7   :  { %v8546_v58 = vadd.f32 %v4448_v61, %v3390_v49  ;;  %v4450_v45 = vpop.f32.mrb[97].mxu0  ;;  %v3412_v3 = vadd.f32 %v15282_v9, %v12879_v54  ;;  %v15295_v9 = vld [vmem:[#allocation207_spill] sm:$0xff] }
 0x3d8   :  { %v8548_v43 = vadd.f32 %v4450_v45, %v3392_v2  ;;  %v4452_v11 = vpop.f32.mrb[98].mxu0 }
 0x3d9   :  { %v8550_v40 = vadd.f32 %v4452_v11, %v3394_v39  ;;  %v4454_v33 = vpop.f32.mrb[99].mxu0  ;;  %v6131_v57 = vmax.f32 %v8546_v58, 0.0 }
 0x3da   :  { %v8552_v34 = vadd.f32 %v4454_v33, %v3396_v16  ;;  %5456 = vmatmul.mubr.bf16.gmra.mrb[204].mxu1 %v15273_v48  ;;  %v6132_v22 = vmax.f32 %v8548_v43, 0.0  ;;  %v15287_v48 = vld [vmem:[#allocation198_spill] sm:$0xff] }
 0x3db   :  { %v6135_v27 = vmax.f32 %v8550_v40, 0.0  ;;  %6771 = vmatmul.mubr.bf16.gmra.mrb[204].mxu0 %v13346_v25  ;;  %5465 = vmatprep.mubr.bf16.mxu1 %v15274_v30  ;;  %v15285_v40 = vld [vmem:[#allocation194_spill] sm:$0xff]  ;;  %v15288_v30 = vld [vmem:[#allocation199_spill] sm:$0xff] }
 0x3dc   :  { %v6136_v56 = vmax.f32 %v8552_v34, 0.0  ;;  %6778 = vmatprep.mubr.bf16.mxu0 %v13369_v32  ;;  %v15277_v32 = vld [vmem:[#allocation189_spill] sm:$0xff]  ;;  %v3422_v44 = vadd.f32 %v15288_v30, %v12879_v54 }
 0x3dd   :  { %v13437_v13 = vpack.c.bf16 %v6135_v27, %v6131_v57  ;;  %v3404_v41 = vadd.f32 %v15277_v32, %v12877_v63  ;;  %v15286_v57 = vld [vmem:[#allocation196_spill] sm:$0xff]  ;;  %v9975_v27 = vld [vmem:[%s14571_s3 + $0xa8] sm:$0xff]  }
 0x3de   :  { %v13441_v7 = vpack.c.bf16 %v6136_v56, %v6132_v22  ;;  %v4458_v25 = vpop.f32.mrb[100].mxu0  ;;  %v3420_v22 = vadd.f32 %v15287_v48, %v12877_v63  ;;  %6886 = vmatpush1.bf16.msra.mxu0 %v9975_v27 }
 0x3df   :  { %v8554_v37 = vadd.f32 %v4458_v25, %v3400_v21  ;;  %v4460_v29 = vpop.f32.mrb[101].mxu0  ;;  %6887 = vmatprep.subr.bf16.mxu0 %v15239_v51  ;;  %v15290_v25 = vld [vmem:[#allocation203_spill] sm:$0xff] }
 0x3e0   :  { %v8556_v8 = vadd.f32 %v4460_v29, %v3402_v52  ;;  %v4462_v18 = vpop.f32.mrb[102].mxu0  ;;  %v3426_v32 = vadd.f32 %v15290_v25, %v12879_v54 }
 0x3e1   :  { %v8558_v36 = vadd.f32 %v4462_v18, %v3404_v41  ;;  %v4464_v17 = vpop.f32.mrb[103].mxu0  ;;  %v6139_v53 = vmax.f32 %v8554_v37, 0.0 }
 0x3e2   :  { %v8560_v0 = vadd.f32 %v4464_v17, %v3406_v5  ;;  %5466 = vmatmul.mubr.bf16.gmra.mrb[208].mxu1 %v15279_v10  ;;  %v6140_v59 = vmax.f32 %v8556_v8, 0.0 }
 0x3e3   :  { %v6143_v26 = vmax.f32 %v8558_v36, 0.0  ;;  %6779 = vmatmul.mubr.bf16.gmra.mrb[208].mxu0 %v13365_v47  ;;  %5475 = vmatprep.mubr.bf16.mxu1 %v15280_v20  ;;  %v3414_v47 = vadd.f32 %v15283_v15, %v12877_v63  ;;  %v15291_v36 = vld [vmem:[#allocation200_spill] sm:$0xff] }
 0x3e4   :  { %v6144_v28 = vmax.f32 %v8560_v0, 0.0  ;;  %6786 = vmatprep.mubr.bf16.mxu0 %v13386_v50  ;;  %v15284_v50 = vld [vmem:[#allocation197_spill] sm:$0xff] }
 0x3e5   :  { %v13454_v62 = vpack.c.bf16 %v6143_v26, %v6139_v53  ;;  %v3416_v60 = vadd.f32 %v15284_v50, %v12879_v54  ;;  %v15292_v53 = vld [vmem:[#allocation202_spill] sm:$0xff]  ;;  %v15293_v26 = vld [vmem:[#allocation204_spill] sm:$0xff] }
 0x3e6   :  { %v13458_v38 = vpack.c.bf16 %v6144_v28, %v6140_v59  ;;  %v4468_v49 = vpop.f32.mrb[104].mxu0  ;;  %v3430_v10 = vadd.f32 %v15293_v26, %v12877_v63  ;;  %v15294_v28 = vld [vmem:[#allocation205_spill] sm:$0xff] }
 0x3e7   :  { %v8562_v2 = vadd.f32 %v4468_v49, %v3410_v6  ;;  %v4470_v61 = vpop.f32.mrb[105].mxu0  ;;  %v3432_v20 = vadd.f32 %v15294_v28, %v12879_v54  ;;  %v15307_v28 = vld [vmem:[#allocation216_spill] sm:$0xff] }
 0x3e8   :  { %v8564_v39 = vadd.f32 %v4470_v61, %v3412_v3  ;;  %v4472_v58 = vpop.f32.mrb[106].mxu0 }
 0x3e9   :  { %v8566_v45 = vadd.f32 %v4472_v58, %v3414_v47  ;;  %v4474_v12 = vpop.f32.mrb[107].mxu0  ;;  %v6147_v43 = vmax.f32 %v8562_v2, 0.0 }
 0x3ea   :  { %v8568_v16 = vadd.f32 %v4474_v12, %v3416_v60  ;;  %5476 = vmatmul.mubr.bf16.gmra.mrb[212].mxu1 %v15285_v40  ;;  %v6148_v33 = vmax.f32 %v8564_v39, 0.0  ;;  %v15299_v40 = vld [vmem:[#allocation50_spill] sm:$0xff] }
 0x3eb   :  { %v6151_v11 = vmax.f32 %v8566_v45, 0.0  ;;  %6787 = vmatmul.mubr.bf16.gmra.mrb[212].mxu0 %v13382_v35  ;;  %5485 = vmatprep.mubr.bf16.mxu1 %v15286_v57  ;;  %v15297_v45 = vld [vmem:[#allocation206_spill] sm:$0xff] }
 0x3ec   :  { %v6152_v34 = vmax.f32 %v8568_v16, 0.0  ;;  %6794 = vmatprep.mubr.bf16.mxu0 %v13405_v19  ;;  %v15289_v19 = vld [vmem:[#allocation201_spill] sm:$0xff]  ;;  %v15300_v57 = vld [vmem:[#allocation210_spill] sm:$0xff] }
 0x3ed   :  { %v13473_v56 = vpack.c.bf16 %v6151_v11, %v6147_v43  ;;  %v3424_v21 = vadd.f32 %v15289_v19, %v12877_v63  ;;  %v15298_v43 = vld [vmem:[#allocation208_spill] sm:$0xff]  ;;  %v3442_v27 = vadd.f32 %v15300_v57, %v12879_v54 }
 0x3ee   :  { %v13477_v14 = vpack.c.bf16 %v6152_v34, %v6148_v33  ;;  %v4478_v35 = vpop.f32.mrb[108].mxu0  ;;  %v9976_v11 = vld [vmem:[%s14571_s3 + $0xb0] sm:$0xff]   ;;  %v3440_v33 = vadd.f32 %v15299_v40, %v12877_v63 }
 0x3ef   :  { %v8570_v46 = vadd.f32 %v4478_v35, %v3420_v22  ;;  %v4480_v52 = vpop.f32.mrb[109].mxu0  ;;  %6888 = vmatpush1.bf16.msra.mxu0 %v9976_v11  ;;  %v15302_v35 = vld [vmem:[#allocation214_spill] sm:$0xff] }
 0x3f0   :  { %v8572_v41 = vadd.f32 %v4480_v52, %v3422_v44  ;;  %v4482_v37 = vpop.f32.mrb[110].mxu0  ;;  %6889 = vmatprep.subr.bf16.mxu0 %v15239_v51  ;;  %v3446_v19 = vadd.f32 %v15302_v35, %v12879_v54 }
 0x3f1   :  { %v8574_v29 = vadd.f32 %v4482_v37, %v3424_v21  ;;  %v4484_v42 = vpop.f32.mrb[111].mxu0  ;;  %v6155_v8 = vmax.f32 %v8570_v46, 0.0 }
 0x3f2   :  { %v8576_v5 = vadd.f32 %v4484_v42, %v3426_v32  ;;  %5486 = vmatmul.mubr.bf16.gmra.mrb[216].mxu1 %v15291_v36  ;;  %v6156_v17 = vmax.f32 %v8572_v41, 0.0 }
 0x3f3   :  { %v6159_v18 = vmax.f32 %v8574_v29, 0.0  ;;  %6795 = vmatmul.mubr.bf16.gmra.mrb[216].mxu0 %v13401_v55  ;;  %5495 = vmatprep.mubr.bf16.mxu1 %v15292_v53  ;;  %v3434_v55 = vadd.f32 %v15295_v9, %v12877_v63  ;;  %v15303_v29 = vld [vmem:[#allocation211_spill] sm:$0xff]  ;;  %v15308_v9 = vld [vmem:[#allocation218_spill] sm:$0xff] }
 0x3f4   :  { %v6160_v0 = vmax.f32 %v8576_v5, 0.0  ;;  %6802 = vmatprep.mubr.bf16.mxu0 %v13422_v31  ;;  %v15296_v31 = vld [vmem:[#allocation209_spill] sm:$0xff] }
 0x3f5   :  { %v13490_v59 = vpack.c.bf16 %v6159_v18, %v6155_v8  ;;  %v3436_v15 = vadd.f32 %v15296_v31, %v12879_v54  ;;  %v15304_v8 = vld [vmem:[#allocation213_spill] sm:$0xff]  ;;  %v15305_v18 = vld [vmem:[#allocation52_spill] sm:$0xff] }
 0x3f6   :  { %v13494_v1 = vpack.c.bf16 %v6160_v0, %v6156_v17  ;;  %v4488_v6 = vpop.f32.mrb[112].mxu0  ;;  %v3450_v36 = vadd.f32 %v15305_v18, %v12877_v63  ;;  %v15306_v0 = vld [vmem:[#allocation54_spill] sm:$0xff]  ;;  %v15325_v18 = vld [vmem:[#allocation223_spill] sm:$0xff] }
 0x3f7   :  { %v8578_v3 = vadd.f32 %v4488_v6, %v3430_v10  ;;  %v4490_v49 = vpop.f32.mrb[113].mxu0  ;;  %v3452_v53 = vadd.f32 %v15306_v0, %v12879_v54  ;;  %v15327_v0 = vld [vmem:[#allocation2_spill] sm:$0xff] }
 0x3f8   :  { %v8580_v47 = vadd.f32 %v4490_v49, %v3432_v20  ;;  %v4492_v2 = vpop.f32.mrb[114].mxu0  ;;  %v3454_v20 = vadd.f32 %v15307_v28, %v12877_v63  ;;  %v9981_v28 = vld [vmem:[%s14571_s3 + $0xd8] sm:$0xff]  }
 0x3f9   :  { %v8582_v61 = vadd.f32 %v4492_v2, %v3434_v55  ;;  %v4494_v50 = vpop.f32.mrb[115].mxu0  ;;  %v6163_v39 = vmax.f32 %v8578_v3, 0.0  ;;  %v3456_v55 = vadd.f32 %v15308_v9, %v12879_v54  ;;  %v15334_v9 = vld [vmem:[#allocation8_spill] sm:$0xff] }
 0x3fa   :  { %v8584_v60 = vadd.f32 %v4494_v50, %v3436_v15  ;;  %5496 = vmatmul.mubr.bf16.gmra.mrb[220].mxu1 %v15297_v45  ;;  %v6164_v12 = vmax.f32 %v8580_v47, 0.0  ;;  %v15311_v45 = vld [vmem:[#allocation56_spill] sm:$0xff] }
 0x3fb   :  { %v6167_v58 = vmax.f32 %v8582_v61, 0.0  ;;  %6803 = vmatmul.mubr.bf16.gmra.mrb[220].mxu0 %v13418_v23  ;;  %5505 = vmatprep.mubr.bf16.mxu1 %v15298_v43  ;;  %v15309_v61 = vld [vmem:[#allocation215_spill] sm:$0xff]  ;;  %v15312_v43 = vld [vmem:[#allocation58_spill] sm:$0xff] }
 0x3fc   :  { %v6168_v16 = vmax.f32 %v8584_v60, 0.0  ;;  %6810 = vmatprep.mubr.bf16.mxu0 %v13441_v7  ;;  %v15301_v7 = vld [vmem:[#allocation212_spill] sm:$0xff]  ;;  %v3462_v11 = vadd.f32 %v15312_v43, %v12879_v54  ;;  %v15347_v43 = vld [vmem:[#allocation21_spill] sm:$0xff] }
 0x3fd   :  { %v13509_v34 = vpack.c.bf16 %v6167_v58, %v6163_v39  ;;  %v3444_v22 = vadd.f32 %v15301_v7, %v12877_v63  ;;  %v15310_v39 = vld [vmem:[#allocation217_spill] sm:$0xff] }
 0x3fe   :  { %v13513_v48 = vpack.c.bf16 %v6168_v16, %v6164_v12  ;;  %v4498_v23 = vpop.f32.mrb[116].mxu0  ;;  %v9977_v58 = vld [vmem:[%s14571_s3 + $0xb8] sm:$0xff]   ;;  %v3460_v12 = vadd.f32 %v15311_v45, %v12877_v63  ;;  %v15345_v45 = vld [vmem:[#allocation19_spill] sm:$0xff] }
 0x3ff   :  { %v8586_v30 = vadd.f32 %v4498_v23, %v3440_v33  ;;  %v4500_v44 = vpop.f32.mrb[117].mxu0  ;;  %6890 = vmatpush1.bf16.msra.mxu0 %v9977_v58  ;;  %v15314_v23 = vld [vmem:[#allocation222_spill] sm:$0xff] }
 0x400   :  { %v8588_v21 = vadd.f32 %v4500_v44, %v3442_v27  ;;  %v4502_v46 = vpop.f32.mrb[118].mxu0  ;;  %6891 = vmatprep.subr.bf16.mxu0 %v15239_v51  ;;  %v3466_v7 = vadd.f32 %v15314_v23, %v12879_v54  ;;  %v15317_v54 = vld [vmem:[#allocation60_spill] sm:$0xff]  ;;  %v15344_v58 = vld [vmem:[#allocation18_spill] sm:$0xff] }
 0x401   :  { %v8590_v52 = vadd.f32 %v4502_v46, %v3444_v22  ;;  %v4504_v25 = vpop.f32.mrb[119].mxu0  ;;  %v6171_v41 = vmax.f32 %v8586_v30, 0.0  ;;  %v15356_v23 = vld [vmem:[#allocation30_spill] sm:$0xff] }
 0x402   :  { %v8592_v32 = vadd.f32 %v4504_v25, %v3446_v19  ;;  %5506 = vmatmul.mubr.bf16.gmra.mrb[224].mxu1 %v15303_v29  ;;  %v6172_v42 = vmax.f32 %v8588_v21, 0.0  ;;  %v15318_v29 = vld [vmem:[#allocation62_spill] sm:$0xff] }
 0x403   :  { %v6175_v37 = vmax.f32 %v8590_v52, 0.0  ;;  %6811 = vmatmul.mubr.bf16.gmra.mrb[224].mxu0 %v13437_v13  ;;  %5515 = vmatprep.mubr.bf16.mxu1 %v15304_v8  ;;  %v15315_v52 = vld [vmem:[#allocation219_spill] sm:$0xff]  ;;  %v15323_v8 = vld [vmem:[#allocation82_spill] sm:$0xff] }
 0x404   :  { %v6176_v5 = vmax.f32 %v8592_v32, 0.0  ;;  %6818 = vmatprep.mubr.bf16.mxu0 %v13458_v38  ;;  %v15316_v32 = vld [vmem:[#allocation221_spill] sm:$0xff] }
 0x405   :  { %v6311_v17 = vpack.c.bf16 %v6175_v37, %v6171_v41 }
 0x406   :  { %v6312_v26 = vpack.c.bf16 %v6176_v5, %v6172_v42  ;;  %v4508_v10 = vpop.f32.mrb[120].mxu0  ;;  %v15320_v42 = vld [vmem:[#allocation69_spill] sm:$0xff]  ;;  %v15321_v5 = vld [vmem:[#allocation74_spill] sm:$0xff] }
 0x407   :  { %v8594_v6 = vadd.f32 %v4508_v10, %v3450_v36  ;;  %v4510_v13 = vpop.f32.mrb[121].mxu0  ;;  %v15326_v36 = vld [vmem:[#allocation224_spill] sm:$0xff] }
 0x408   :  { %v8596_v38 = vadd.f32 %v4510_v13, %v3452_v53  ;;  %v4512_v3 = vpop.f32.mrb[122].mxu0  ;;  %v15328_v53 = vld [vmem:[#allocation225_spill] sm:$0xff]  ;;  %v15330_v10 = vld [vmem:[#allocation4_spill] sm:$0xff]  ;;  %v15333_v13 = vld [vmem:[#allocation7_spill] sm:$0xff] }
 0x409   :  { %v8598_v49 = vadd.f32 %v4512_v3, %v3454_v20  ;;  %v4514_v31 = vpop.f32.mrb[123].mxu0  ;;  %v6179_v47 = vmax.f32 %v8594_v6, 0.0  ;;  %v15331_v20 = vld [vmem:[#allocation5_spill] sm:$0xff]  ;;  %v15332_v6 = vld [vmem:[#allocation6_spill] sm:$0xff] }
 0x40a   :  { %v8600_v15 = vadd.f32 %v4514_v31, %v3456_v55  ;;  %5516 = vmatmul.mubr.bf16.gmra.mrb[228].mxu1 %v15309_v61  ;;  %v6180_v50 = vmax.f32 %v8596_v38, 0.0  ;;  %v9982_v55 = vld [vmem:[%s14571_s3 + $0xe0] sm:$0xff]   ;;  %v15335_v38 = vld [vmem:[#allocation9_spill] sm:$0xff]  ;;  %v15338_v31 = vld [vmem:[#allocation12_spill] sm:$0xff] }
 0x40b   :  { %v6183_v2 = vmax.f32 %v8598_v49, 0.0  ;;  %6819 = vmatmul.mubr.bf16.gmra.mrb[228].mxu0 %v13454_v62  ;;  %5525 = vmatprep.mubr.bf16.mxu1 %v15310_v39  ;;  %v15313_v62 = vld [vmem:[#allocation220_spill] sm:$0xff]  ;;  %v15336_v3 = vld [vmem:[#allocation10_spill] sm:$0xff]  ;;  %v15337_v49 = vld [vmem:[#allocation11_spill] sm:$0xff] }
 0x40c   :  { %v6184_v60 = vmax.f32 %v8600_v15, 0.0  ;;  %6826 = vmatprep.mubr.bf16.mxu0 %v13477_v14  ;;  %v3464_v57 = vadd.f32 %v15313_v62, %v12877_v63  ;;  %v9983_v15 = vld [vmem:[%s14571_s3 + $0xe8] sm:$0xff]   ;;  %v15343_v39 = vld [vmem:[#allocation17_spill] sm:$0xff]  ;;  %v15352_v62 = vld [vmem:[#allocation26_spill] sm:$0xff] }
 0x40d   :  { %v6315_v16 = vpack.c.bf16 %v6183_v2, %v6179_v47  ;;  %v15339_v47 = vld [vmem:[#allocation13_spill] sm:$0xff]  ;;  %v15340_v2 = vld [vmem:[#allocation14_spill] sm:$0xff]  ;;  %v15341_v61 = vld [vmem:[#allocation15_spill] sm:$0xff] }
 0x40e   :  { %v6316_v40 = vpack.c.bf16 %v6184_v60, %v6180_v50  ;;  %v4518_v33 = vpop.f32.mrb[124].mxu0  ;;  %v15342_v50 = vld [vmem:[#allocation16_spill] sm:$0xff] }
 0x40f   :  { %v8602_v14 = vadd.f32 %v4518_v33, %v3460_v12  ;;  %v4520_v27 = vpop.f32.mrb[125].mxu0  ;;  %v9984_v60 = vld [vmem:[%s14571_s3 + $0xf0] sm:$0xff]   ;;  %v15351_v33 = vld [vmem:[#allocation25_spill] sm:$0xff] }
 0x410   :  { %v8604_v22 = vadd.f32 %v4520_v27, %v3462_v11  ;;  %v4522_v30 = vpop.f32.mrb[126].mxu0  ;;  %v15346_v12 = vld [vmem:[#allocation20_spill] sm:$0xff]  ;;  %v15348_v11 = vld [vmem:[#allocation22_spill] sm:$0xff]  ;;  %v15355_v27 = vld [vmem:[#allocation29_spill] sm:$0xff] }
 0x411   :  { %v8606_v44 = vadd.f32 %v4522_v30, %v3464_v57  ;;  %v4524_v35 = vpop.f32.mrb[127].mxu0  ;;  %v6187_v21 = vmax.f32 %v8602_v14, 0.0  ;;  %v15353_v57 = vld [vmem:[#allocation27_spill] sm:$0xff]  ;;  %v15354_v14 = vld [vmem:[#allocation28_spill] sm:$0xff]  ;;  %v15359_v30 = vld [vmem:[#allocation33_spill] sm:$0xff] }
 0x412   :  { %v8608_v19 = vadd.f32 %v4524_v35, %v3466_v7  ;;  %5526 = vmatmul.mubr.bf16.gmra.mrb[232].mxu1 %v15315_v52  ;;  %v6188_v25 = vmax.f32 %v8604_v22, 0.0  ;;  %v15357_v7 = vld [vmem:[#allocation31_spill] sm:$0xff]  ;;  %v15358_v22 = vld [vmem:[#allocation32_spill] sm:$0xff] }
 0x413   :  { %v6191_v46 = vmax.f32 %v8606_v44, 0.0  ;;  %6827 = vmatmul.mubr.bf16.gmra.mrb[232].mxu0 %v13473_v56  ;;  %5535 = vmatprep.mubr.bf16.mxu1 %v15316_v32  ;;  %v9978_v56 = vld [vmem:[%s14571_s3 + $0xc0] sm:$0xff]   ;;  %v15361_v35 = vld [vmem:[#allocation35_spill] sm:$0xff] }
 0x414   :  { %v6192_v63 = vmax.f32 %v8608_v19, 0.0  ;;  %6834 = vmatprep.mubr.bf16.mxu0 %v13494_v1  ;;  %6892 = vmatpush1.bf16.msra.mxu0 %v9978_v56  ;;  %v15319_v1 = vld [vmem:[#allocation66_spill] sm:$0xff]  ;;  %v15362_v19 = vld [vmem:[#allocation36_spill] sm:$0xff]  ;;  %v15365_v52 = vld [vmem:[#allocation39_spill] sm:$0xff] }
 0x415   :  { %v6319_v41 = vpack.c.bf16 %v6191_v46, %v6187_v21  ;;  %6893 = vmatprep.subr.bf16.mxu0 %v15239_v51  ;;  %v15360_v44 = vld [vmem:[#allocation34_spill] sm:$0xff]  ;;  %v15363_v21 = vld [vmem:[#allocation37_spill] sm:$0xff]  ;;  %v15373_v56 = vld [vmem:[#allocation47_spill] sm:$0xff] }
 0x416   :  { %v6320_v37 = vpack.c.bf16 %v6192_v63, %v6188_v25  ;;  %v15364_v46 = vld [vmem:[#allocation38_spill] sm:$0xff]  ;;  %v15366_v25 = vld [vmem:[#allocation40_spill] sm:$0xff]  ;;  %v15367_v63 = vld [vmem:[#allocation41_spill] sm:$0xff] }
 0x417   :  { %v15368_v32 = vld [vmem:[#allocation42_spill] sm:$0xff] }
 0x41a   :  { %5536 = vmatmul.mubr.bf16.gmra.mrb[236].mxu1 %v15317_v54  ;;  %v15371_v54 = vld [vmem:[#allocation45_spill] sm:$0xff] }
 0x41b   :  { %6835 = vmatmul.mubr.bf16.gmra.mrb[236].mxu0 %v13490_v59  ;;  %5545 = vmatprep.mubr.bf16.mxu1 %v15318_v29  ;;  %v15322_v59 = vld [vmem:[#allocation77_spill] sm:$0xff]  ;;  %v15372_v29 = vld [vmem:[#allocation46_spill] sm:$0xff] }
 0x41c   :  { %6842 = vmatprep.mubr.bf16.mxu0 %v13513_v48  ;;  %v9979_v48 = vld [vmem:[%s14571_s3 + $0xc8] sm:$0xff]  }
 0x41d   :  { %6894 = vmatpush1.bf16.msra.mxu0 %v9979_v48  ;;  %v15378_v48 = vld [vmem:[#allocation55_spill] sm:$0xff] }
 0x41e   :  { %6895 = vmatprep.subr.bf16.mxu0 %v15239_v51 }
 0x422   :  { %5546 = vmatmul.mubr.bf16.gmra.mrb[240].mxu1 %v15319_v1  ;;  %v15374_v1 = vld [vmem:[#allocation48_spill] sm:$0xff] }
 0x423   :  { %6843 = vmatmul.mubr.bf16.gmra.mrb[240].mxu0 %v13509_v34  ;;  %5555 = vmatprep.mubr.bf16.mxu1 %v15320_v42  ;;  %v15324_v34 = vld [vmem:[#allocation85_spill] sm:$0xff] }
 0x424   :  { %6850 = vmatprep.mubr.bf16.mxu0 %v6312_v26  ;;  %v15329_v26 = vld [vmem:[#allocation3_spill] sm:$0xff]  ;;  %v15375_v42 = vld [vmem:[#allocation49_spill] sm:$0xff] }
 0x42a   :  { %5556 = vmatmul.mubr.bf16.gmra.mrb[244].mxu1 %v15321_v5  ;;  %v15376_v5 = vld [vmem:[#allocation51_spill] sm:$0xff] }
 0x42b   :  { %6851 = vmatmul.mubr.bf16.gmra.mrb[244].mxu0 %v6311_v17  ;;  %5565 = vmatprep.mubr.bf16.mxu1 %v15322_v59  ;;  %v9980_v17 = vld [vmem:[%s14571_s3 + $0xd0] sm:$0xff]   ;;  %v15377_v59 = vld [vmem:[#allocation53_spill] sm:$0xff] }
 0x42c   :  { %6858 = vmatprep.mubr.bf16.mxu0 %v6316_v40  ;;  %6896 = vmatpush1.bf16.msra.mxu0 %v9980_v17  ;;  %v15349_v40 = vld [vmem:[#allocation23_spill] sm:$0xff]  ;;  %v10242_v17 = vld [vmem:[%s14572_s2] sm:$0xf] }
 0x42d   :  { %6897 = vmatprep.subr.bf16.mxu0 %v15239_v51 }
 0x430   :  { %6898 = vmatpush1.bf16.msra.mxu0 %v9981_v28 }
 0x431   :  { %6899 = vmatprep.subr.bf16.mxu0 %v15239_v51 }
 0x432   :  { %5566 = vmatmul.mubr.bf16.gmra.mrb[248].mxu1 %v15323_v8  ;;  %v15379_v8 = vld [vmem:[#allocation226_spill] sm:$0xff] }
 0x433   :  { %6859 = vmatmul.mubr.bf16.gmra.mrb[248].mxu0 %v6315_v16  ;;  %5575 = vmatprep.mubr.bf16.mxu1 %v15324_v34  ;;  %v9985_v16 = vld [vmem:[%s14571_s3 + $0xf8] sm:$0xff]   ;;  %v545_v34 = vsub.s32 2, %v15379_v8 }
 0x434   :  { %6866 = vmatprep.mubr.bf16.mxu0 %v6320_v37  ;;  %6900 = vmatpush1.bf16.msra.mxu0 %v9982_v55  ;;  %v15370_v37 = vld [vmem:[#allocation44_spill] sm:$0xff] }
 0x435   :  { %6901 = vmatprep.subr.bf16.mxu0 %v15239_v51 }
 0x438   :  { %6902 = vmatpush1.bf16.msra.mxu0 %v9983_v15 }
 0x439   :  { %6903 = vmatprep.subr.bf16.mxu0 %v15239_v51 }
 0x43a   :  { %5576 = vmatmul.mubr.bf16.gmra.mrb[252].mxu1 %v15325_v18  ;;  %v549_v18 = vsub.s32 3, %v15379_v8 }
 0x43b   :  { %6867 = vmatmul.mubr.bf16.gmra.mrb[252].mxu0 %v6319_v41  ;;  %5618 = vmatprep.mubr.bf16.mxu1 %v15326_v36  ;;  %v15369_v41 = vld [vmem:[#allocation43_spill] sm:$0xff]  ;;  %v15380_v36 = vld [vmem:[#allocation57_spill] sm:$0xff] }
 0x43c   :  { %6904 = vmatpush1.bf16.msra.mxu0 %v9984_v60 }
 0x43d   :  { %6905 = vmatprep.subr.bf16.mxu0 %v15239_v51  ;;  %v15350_v51 = vld [vmem:[#allocation24_spill] sm:$0xff] }
 0x440   :  { %6906 = vmatpush1.bf16.msra.mxu0 %v9985_v16 }
 0x442   :  { %5619 = vmatmul.mubr.bf16.vlgmr.msra.gmra.mrb[128].mxu1 %v15327_v0  ;;  %v13654_v0 = vrot.slane %v10242_v17, %v545_v34 }
 0x443   :  { %5628 = vmatprep.mubr.bf16.mxu1 %v15328_v53  ;;  %v13656_v53 = vrot.slane %v10242_v17, %v549_v18 }
 0x44a   :  { %5629 = vmatmul.mubr.bf16.gmra.mrb[132].mxu1 %v15329_v26  ;;  %v15381_v26 = vld [vmem:[#allocation59_spill] sm:$0xff] }
 0x44b   :  { %5638 = vmatprep.mubr.bf16.mxu1 %v15330_v10 }
 0x452   :  { %5639 = vmatmul.mubr.bf16.gmra.mrb[136].mxu1 %v15331_v20 }
 0x453   :  { %5648 = vmatprep.mubr.bf16.mxu1 %v15332_v6 }
 0x45a   :  { %5649 = vmatmul.mubr.bf16.gmra.mrb[140].mxu1 %v15333_v13 }
 0x45b   :  { %5658 = vmatprep.mubr.bf16.mxu1 %v15334_v9 }
 0x462   :  { %5659 = vmatmul.mubr.bf16.gmra.mrb[144].mxu1 %v15335_v38 }
 0x463   :  { %5668 = vmatprep.mubr.bf16.mxu1 %v15336_v3 }
 0x46a   :  { %5669 = vmatmul.mubr.bf16.gmra.mrb[148].mxu1 %v15337_v49 }
 0x46b   :  { %5678 = vmatprep.mubr.bf16.mxu1 %v15338_v31  ;;  %v15382_v31 = vld [vmem:[#allocation61_spill] sm:$0xff] }
 0x472   :  { %5679 = vmatmul.mubr.bf16.gmra.mrb[152].mxu1 %v15339_v47 }
 0x473   :  { %5688 = vmatprep.mubr.bf16.mxu1 %v15340_v2  ;;  %v15383_v2 = vld [vmem:[#allocation63_spill] sm:$0xff] }
 0x47a   :  { %5689 = vmatmul.mubr.bf16.gmra.mrb[156].mxu1 %v15341_v61 }
 0x47b   :  { %5698 = vmatprep.mubr.bf16.mxu1 %v15342_v50 }
 0x482   :  { %5699 = vmatmul.mubr.bf16.gmra.mrb[160].mxu1 %v15343_v39 }
 0x483   :  { %5708 = vmatprep.mubr.bf16.mxu1 %v15344_v58 }
 0x48a   :  { %5709 = vmatmul.mubr.bf16.gmra.mrb[164].mxu1 %v15345_v45 }
 0x48b   :  { %5718 = vmatprep.mubr.bf16.mxu1 %v15346_v12 }
 0x492   :  { %5719 = vmatmul.mubr.bf16.gmra.mrb[168].mxu1 %v15347_v43 }
 0x493   :  { %5728 = vmatprep.mubr.bf16.mxu1 %v15348_v11 }
 0x49a   :  { %5729 = vmatmul.mubr.bf16.gmra.mrb[172].mxu1 %v15349_v40 }
 0x49b   :  { %5738 = vmatprep.mubr.bf16.mxu1 %v15350_v51 }
 0x4a2   :  { %5739 = vmatmul.mubr.bf16.gmra.mrb[176].mxu1 %v15351_v33  ;;  %v15384_v33 = vld [vmem:[#allocation64_spill] sm:$0xff] }
 0x4a3   :  { %5748 = vmatprep.mubr.bf16.mxu1 %v15352_v62 }
 0x4aa   :  { %5749 = vmatmul.mubr.bf16.gmra.mrb[180].mxu1 %v15353_v57 }
 0x4ab   :  { %5758 = vmatprep.mubr.bf16.mxu1 %v15354_v14  ;;  %v15385_v14 = vld [vmem:[#allocation65_spill] sm:$0xff] }
 0x4b2   :  { %5759 = vmatmul.mubr.bf16.gmra.mrb[184].mxu1 %v15355_v27 }
 0x4b3   :  { %5768 = vmatprep.mubr.bf16.mxu1 %v15356_v23 }
 0x4ba   :  { %5769 = vmatmul.mubr.bf16.gmra.mrb[188].mxu1 %v15357_v7 }
 0x4bb   :  { %5778 = vmatprep.mubr.bf16.mxu1 %v15358_v22 }
 0x4c2   :  { %5779 = vmatmul.mubr.bf16.gmra.mrb[192].mxu1 %v15359_v30 }
 0x4c3   :  { %5788 = vmatprep.mubr.bf16.mxu1 %v15360_v44 }
 0x4ca   :  { %5789 = vmatmul.mubr.bf16.gmra.mrb[196].mxu1 %v15361_v35 }
 0x4cb   :  { %5798 = vmatprep.mubr.bf16.mxu1 %v15362_v19 }
 0x4d2   :  { %5799 = vmatmul.mubr.bf16.gmra.mrb[200].mxu1 %v15363_v21 }
 0x4d3   :  { %5808 = vmatprep.mubr.bf16.mxu1 %v15364_v46 }
 0x4da   :  { %5809 = vmatmul.mubr.bf16.gmra.mrb[204].mxu1 %v15365_v52 }
 0x4db   :  { %5818 = vmatprep.mubr.bf16.mxu1 %v15366_v25 }
 0x4e2   :  { %5819 = vmatmul.mubr.bf16.gmra.mrb[208].mxu1 %v15367_v63  ;;  %v15386_v63 = vld [vmem:[#allocation68_spill] sm:$0xff] }
 0x4e3   :  { %5828 = vmatprep.mubr.bf16.mxu1 %v15368_v32 }
 0x4ea   :  { %5829 = vmatmul.mubr.bf16.gmra.mrb[212].mxu1 %v15369_v41 }
 0x4eb   :  { %5838 = vmatprep.mubr.bf16.mxu1 %v15370_v37  ;;  %v15387_v37 = vld [vmem:[#allocation71_spill] sm:$0xff] }
 0x4f2   :  { %5839 = vmatmul.mubr.bf16.gmra.mrb[216].mxu1 %v15371_v54 }
 0x4f3   :  { %5848 = vmatprep.mubr.bf16.mxu1 %v15372_v29 }
 0x4fa   :  { %5849 = vmatmul.mubr.bf16.gmra.mrb[220].mxu1 %v15373_v56 }
 0x4fb   :  { %5858 = vmatprep.mubr.bf16.mxu1 %v15374_v1 }
 0x502   :  { %5859 = vmatmul.mubr.bf16.gmra.mrb[224].mxu1 %v15375_v42 }
 0x503   :  { %5868 = vmatprep.mubr.bf16.mxu1 %v15376_v5 }
 0x50a   :  { %5869 = vmatmul.mubr.bf16.gmra.mrb[228].mxu1 %v15377_v59 }
 0x50b   :  { %5878 = vmatprep.mubr.bf16.mxu1 %v15378_v48 }
 0x512   :  { %5879 = vmatmul.mubr.bf16.gmra.mrb[232].mxu1 %v15380_v36 }
 0x513   :  { %5888 = vmatprep.mubr.bf16.mxu1 %v15381_v26 }
 0x515   :  { %v5620_v10 = vpop.f32.mrb[128].mxu1 }
 0x516   :  { %v8609_v28 = vadd.f32 %v5620_v10, %v13654_v0  ;;  %v5622_v20 = vpop.f32.mrb[129].mxu1  ;;  %v15388_v10 = vld [vmem:[#allocation67_spill] sm:$0xff] }
 0x517   :  { %v8610_v6 = vadd.f32 %v5622_v20, %v13656_v53  ;;  %v5624_v13 = vpop.f32.mrb[130].mxu1 }
 0x518   :  { %v8611_v9 = vadd.f32 %v5624_v13, %v13654_v0  ;;  %v5626_v55 = vpop.f32.mrb[131].mxu1  ;;  %v5941_v3 = vmax.f32 %v8609_v28, 0.0 }
 0x519   :  { %v8612_v38 = vadd.f32 %v5626_v55, %v13656_v53  ;;  %v5942_v15 = vmax.f32 %v8610_v6, 0.0 }
 0x51a   :  { %v5945_v49 = vmax.f32 %v8611_v9, 0.0  ;;  %5889 = vmatmul.mubr.bf16.gmra.mrb[236].mxu1 %v15382_v31 }
 0x51b   :  { %v5946_v47 = vmax.f32 %v8612_v38, 0.0  ;;  %5898 = vmatprep.mubr.bf16.mxu1 %v15383_v2 }
 0x51c   :  { %v6197_v61 = vpack.c.bf16 %v5945_v49, %v5941_v3 }
 0x51d   :  { %v6198_v50 = vpack.c.bf16 %v5946_v47, %v5942_v15  ;;  %v5630_v60 = vpop.f32.mrb[132].mxu1 }
 0x51e   :  { %v8613_v39 = vadd.f32 %v5630_v60, %v13654_v0  ;;  %v5632_v58 = vpop.f32.mrb[133].mxu1 }
 0x51f   :  { %v8614_v45 = vadd.f32 %v5632_v58, %v13656_v53  ;;  %v5634_v12 = vpop.f32.mrb[134].mxu1  ;;  %6907 = vmatprep.mubr.bf16.mxu0 %v6198_v50 }
 0x520   :  { %v8615_v16 = vadd.f32 %v5634_v12, %v13654_v0  ;;  %v5636_v43 = vpop.f32.mrb[135].mxu1  ;;  %6908 = vmatmul.mubr.bf16.vlgmr.msra.gmra.mrb[128].mxu0 %v6197_v61  ;;  %v5949_v40 = vmax.f32 %v8613_v39, 0.0 }
 0x521   :  { %v8616_v11 = vadd.f32 %v5636_v43, %v13656_v53  ;;  %v5950_v62 = vmax.f32 %v8614_v45, 0.0 }
 0x522   :  { %v5953_v51 = vmax.f32 %v8615_v16, 0.0  ;;  %5899 = vmatmul.mubr.bf16.gmra.mrb[240].mxu1 %v15384_v33 }
 0x523   :  { %v5954_v57 = vmax.f32 %v8616_v11, 0.0  ;;  %5908 = vmatprep.mubr.bf16.mxu1 %v15385_v14 }
 0x524   :  { %v6201_v27 = vpack.c.bf16 %v5953_v51, %v5949_v40 }
 0x525   :  { %v6202_v23 = vpack.c.bf16 %v5954_v57, %v5950_v62  ;;  %v5640_v7 = vpop.f32.mrb[136].mxu1 }
 0x526   :  { %v8617_v22 = vadd.f32 %v5640_v7, %v13654_v0  ;;  %v5642_v30 = vpop.f32.mrb[137].mxu1 }
 0x527   :  { %v8618_v44 = vadd.f32 %v5642_v30, %v13656_v53  ;;  %v5644_v35 = vpop.f32.mrb[138].mxu1  ;;  %6915 = vmatprep.mubr.bf16.mxu0 %v6202_v23 }
 0x528   :  { %v8619_v19 = vadd.f32 %v5644_v35, %v13654_v0  ;;  %v5646_v21 = vpop.f32.mrb[139].mxu1  ;;  %6916 = vmatmul.mubr.bf16.gmra.mrb[132].mxu0 %v6201_v27  ;;  %v5957_v52 = vmax.f32 %v8617_v22, 0.0 }
 0x529   :  { %v8620_v46 = vadd.f32 %v5646_v21, %v13656_v53  ;;  %v5958_v32 = vmax.f32 %v8618_v44, 0.0 }
 0x52a   :  { %v5961_v25 = vmax.f32 %v8619_v19, 0.0  ;;  %5909 = vmatmul.mubr.bf16.gmra.mrb[244].mxu1 %v15386_v63 }
 0x52b   :  { %v5962_v41 = vmax.f32 %v8620_v46, 0.0  ;;  %5918 = vmatprep.mubr.bf16.mxu1 %v15387_v37 }
 0x52c   :  { %v6205_v54 = vpack.c.bf16 %v5961_v25, %v5957_v52 }
 0x52d   :  { %v6206_v29 = vpack.c.bf16 %v5962_v41, %v5958_v32  ;;  %v5650_v56 = vpop.f32.mrb[140].mxu1 }
 0x52e   :  { %v8621_v1 = vadd.f32 %v5650_v56, %v13654_v0  ;;  %v5652_v42 = vpop.f32.mrb[141].mxu1 }
 0x52f   :  { %v8622_v5 = vadd.f32 %v5652_v42, %v13656_v53  ;;  %v5654_v59 = vpop.f32.mrb[142].mxu1  ;;  %6923 = vmatprep.mubr.bf16.mxu0 %v6206_v29 }
 0x530   :  { %v8623_v48 = vadd.f32 %v5654_v59, %v13654_v0  ;;  %v5656_v8 = vpop.f32.mrb[143].mxu1  ;;  %6924 = vmatmul.mubr.bf16.gmra.mrb[136].mxu0 %v6205_v54  ;;  %v5965_v18 = vmax.f32 %v8621_v1, 0.0 }
 0x531   :  { %v8624_v34 = vadd.f32 %v5656_v8, %v13656_v53  ;;  %v5966_v17 = vmax.f32 %v8622_v5, 0.0 }
 0x532   :  { %v5969_v36 = vmax.f32 %v8623_v48, 0.0  ;;  %5919 = vmatmul.mubr.bf16.gmra.mrb[248].mxu1 %v12975_v4 }
 0x533   :  { %v5970_v26 = vmax.f32 %v8624_v34, 0.0  ;;  %5928 = vmatprep.mubr.bf16.mxu1 %v15388_v10 }
 0x534   :  { %v6209_v28 = vpack.c.bf16 %v5969_v36, %v5965_v18 }
 0x535   :  { %v6210_v20 = vpack.c.bf16 %v5970_v26, %v5966_v17  ;;  %v5660_v6 = vpop.f32.mrb[144].mxu1 }
 0x536   :  { %v8625_v13 = vadd.f32 %v5660_v6, %v13654_v0  ;;  %v5662_v9 = vpop.f32.mrb[145].mxu1 }
 0x537   :  { %v8626_v55 = vadd.f32 %v5662_v9, %v13656_v53  ;;  %v5664_v38 = vpop.f32.mrb[146].mxu1  ;;  %6931 = vmatprep.mubr.bf16.mxu0 %v6210_v20 }
 0x538   :  { %v8627_v3 = vadd.f32 %v5664_v38, %v13654_v0  ;;  %v5666_v49 = vpop.f32.mrb[147].mxu1  ;;  %6932 = vmatmul.mubr.bf16.gmra.mrb[140].mxu0 %v6209_v28  ;;  %v5973_v31 = vmax.f32 %v8625_v13, 0.0 }
 0x539   :  { %v8628_v4 = vadd.f32 %v5666_v49, %v13656_v53  ;;  %v5974_v47 = vmax.f32 %v8626_v55, 0.0 }
 0x53a   :  { %v5977_v15 = vmax.f32 %v8627_v3, 0.0  ;;  %5929 = vmatmul.mubr.bf16.gmra.mrb[252].mxu1 %v12995_v24 }
 0x53b   :  { %v5978_v2 = vmax.f32 %v8628_v4, 0.0 }
 0x53c   :  { %v6213_v61 = vpack.c.bf16 %v5977_v15, %v5973_v31 }
 0x53d   :  { %v6214_v50 = vpack.c.bf16 %v5978_v2, %v5974_v47  ;;  %v5670_v60 = vpop.f32.mrb[148].mxu1 }
 0x53e   :  { %v8629_v39 = vadd.f32 %v5670_v60, %v13654_v0  ;;  %v5672_v58 = vpop.f32.mrb[149].mxu1 }
 0x53f   :  { %v8630_v45 = vadd.f32 %v5672_v58, %v13656_v53  ;;  %v5674_v12 = vpop.f32.mrb[150].mxu1  ;;  %6939 = vmatprep.mubr.bf16.mxu0 %v6214_v50 }
 0x540   :  { %v8631_v16 = vadd.f32 %v5674_v12, %v13654_v0  ;;  %v5676_v43 = vpop.f32.mrb[151].mxu1  ;;  %6940 = vmatmul.mubr.bf16.gmra.mrb[144].mxu0 %v6213_v61  ;;  %v5981_v40 = vmax.f32 %v8629_v39, 0.0 }
 0x541   :  { %v8632_v11 = vadd.f32 %v5676_v43, %v13656_v53  ;;  %v5982_v51 = vmax.f32 %v8630_v45, 0.0 }
 0x542   :  { %v5985_v24 = vmax.f32 %v8631_v16, 0.0 }
 0x543   :  { %v5986_v33 = vmax.f32 %v8632_v11, 0.0 }
 0x544   :  { %v6217_v62 = vpack.c.bf16 %v5985_v24, %v5981_v40 }
 0x545   :  { %v6218_v57 = vpack.c.bf16 %v5986_v33, %v5982_v51  ;;  %v5680_v14 = vpop.f32.mrb[152].mxu1 }
 0x546   :  { %v8633_v27 = vadd.f32 %v5680_v14, %v13654_v0  ;;  %v5682_v23 = vpop.f32.mrb[153].mxu1 }
 0x547   :  { %v8634_v7 = vadd.f32 %v5682_v23, %v13656_v53  ;;  %v5684_v22 = vpop.f32.mrb[154].mxu1  ;;  %6947 = vmatprep.mubr.bf16.mxu0 %v6218_v57 }
 0x548   :  { %v8635_v30 = vadd.f32 %v5684_v22, %v13654_v0  ;;  %v5686_v44 = vpop.f32.mrb[155].mxu1  ;;  %6948 = vmatmul.mubr.bf16.gmra.mrb[148].mxu0 %v6217_v62  ;;  %v5989_v19 = vmax.f32 %v8633_v27, 0.0 }
 0x549   :  { %v8636_v35 = vadd.f32 %v5686_v44, %v13656_v53  ;;  %v5990_v46 = vmax.f32 %v8634_v7, 0.0 }
 0x54a   :  { %v5993_v21 = vmax.f32 %v8635_v30, 0.0 }
 0x54b   :  { %v5994_v52 = vmax.f32 %v8636_v35, 0.0 }
 0x54c   :  { %v6221_v25 = vpack.c.bf16 %v5993_v21, %v5989_v19 }
 0x54d   :  { %v6222_v63 = vpack.c.bf16 %v5994_v52, %v5990_v46  ;;  %v5690_v32 = vpop.f32.mrb[156].mxu1 }
 0x54e   :  { %v8637_v41 = vadd.f32 %v5690_v32, %v13654_v0  ;;  %v5692_v37 = vpop.f32.mrb[157].mxu1 }
 0x54f   :  { %v8638_v54 = vadd.f32 %v5692_v37, %v13656_v53  ;;  %v5694_v29 = vpop.f32.mrb[158].mxu1  ;;  %6955 = vmatprep.mubr.bf16.mxu0 %v6222_v63 }
 0x550   :  { %v8639_v56 = vadd.f32 %v5694_v29, %v13654_v0  ;;  %v5696_v1 = vpop.f32.mrb[159].mxu1  ;;  %6956 = vmatmul.mubr.bf16.gmra.mrb[152].mxu0 %v6221_v25  ;;  %v5997_v5 = vmax.f32 %v8637_v41, 0.0 }
 0x551   :  { %v8640_v42 = vadd.f32 %v5696_v1, %v13656_v53  ;;  %v5998_v48 = vmax.f32 %v8638_v54, 0.0 }
 0x552   :  { %v6001_v59 = vmax.f32 %v8639_v56, 0.0 }
 0x553   :  { %v6002_v8 = vmax.f32 %v8640_v42, 0.0 }
 0x554   :  { %v6225_v34 = vpack.c.bf16 %v6001_v59, %v5997_v5 }
 0x555   :  { %v6226_v18 = vpack.c.bf16 %v6002_v8, %v5998_v48  ;;  %v5700_v36 = vpop.f32.mrb[160].mxu1 }
 0x556   :  { %v8641_v17 = vadd.f32 %v5700_v36, %v13654_v0  ;;  %v5702_v26 = vpop.f32.mrb[161].mxu1 }
 0x557   :  { %v8642_v10 = vadd.f32 %v5702_v26, %v13656_v53  ;;  %v5704_v28 = vpop.f32.mrb[162].mxu1  ;;  %6963 = vmatprep.mubr.bf16.mxu0 %v6226_v18 }
 0x558   :  { %v8643_v20 = vadd.f32 %v5704_v28, %v13654_v0  ;;  %v5706_v6 = vpop.f32.mrb[163].mxu1  ;;  %6964 = vmatmul.mubr.bf16.gmra.mrb[156].mxu0 %v6225_v34  ;;  %v6005_v9 = vmax.f32 %v8641_v17, 0.0 }
 0x559   :  { %v8644_v13 = vadd.f32 %v5706_v6, %v13656_v53  ;;  %v6006_v38 = vmax.f32 %v8642_v10, 0.0 }
 0x55a   :  { %v6009_v55 = vmax.f32 %v8643_v20, 0.0 }
 0x55b   :  { %v6010_v3 = vmax.f32 %v8644_v13, 0.0 }
 0x55c   :  { %v6229_v49 = vpack.c.bf16 %v6009_v55, %v6005_v9 }
 0x55d   :  { %v6230_v4 = vpack.c.bf16 %v6010_v3, %v6006_v38  ;;  %v5710_v31 = vpop.f32.mrb[164].mxu1 }
 0x55e   :  { %v8645_v15 = vadd.f32 %v5710_v31, %v13654_v0  ;;  %v5712_v47 = vpop.f32.mrb[165].mxu1 }
 0x55f   :  { %v8646_v2 = vadd.f32 %v5712_v47, %v13656_v53  ;;  %v5714_v61 = vpop.f32.mrb[166].mxu1  ;;  %6971 = vmatprep.mubr.bf16.mxu0 %v6230_v4 }
 0x560   :  { %v8647_v50 = vadd.f32 %v5714_v61, %v13654_v0  ;;  %v5716_v60 = vpop.f32.mrb[167].mxu1  ;;  %6972 = vmatmul.mubr.bf16.gmra.mrb[160].mxu0 %v6229_v49  ;;  %v6013_v58 = vmax.f32 %v8645_v15, 0.0 }
 0x561   :  { %v8648_v39 = vadd.f32 %v5716_v60, %v13656_v53  ;;  %v6014_v12 = vmax.f32 %v8646_v2, 0.0 }
 0x562   :  { %v6017_v45 = vmax.f32 %v8647_v50, 0.0 }
 0x563   :  { %v6018_v16 = vmax.f32 %v8648_v39, 0.0 }
 0x564   :  { %v6233_v43 = vpack.c.bf16 %v6017_v45, %v6013_v58 }
 0x565   :  { %v6234_v11 = vpack.c.bf16 %v6018_v16, %v6014_v12  ;;  %v5720_v40 = vpop.f32.mrb[168].mxu1 }
 0x566   :  { %v8649_v24 = vadd.f32 %v5720_v40, %v13654_v0  ;;  %v5722_v51 = vpop.f32.mrb[169].mxu1 }
 0x567   :  { %v8650_v33 = vadd.f32 %v5722_v51, %v13656_v53  ;;  %v5724_v62 = vpop.f32.mrb[170].mxu1  ;;  %6979 = vmatprep.mubr.bf16.mxu0 %v6234_v11 }
 0x568   :  { %v8651_v57 = vadd.f32 %v5724_v62, %v13654_v0  ;;  %v5726_v14 = vpop.f32.mrb[171].mxu1  ;;  %6980 = vmatmul.mubr.bf16.gmra.mrb[164].mxu0 %v6233_v43  ;;  %v6021_v23 = vmax.f32 %v8649_v24, 0.0 }
 0x569   :  { %v8652_v27 = vadd.f32 %v5726_v14, %v13656_v53  ;;  %v6022_v22 = vmax.f32 %v8650_v33, 0.0 }
 0x56a   :  { %v6025_v7 = vmax.f32 %v8651_v57, 0.0 }
 0x56b   :  { %v6026_v30 = vmax.f32 %v8652_v27, 0.0 }
 0x56c   :  { %v6237_v44 = vpack.c.bf16 %v6025_v7, %v6021_v23 }
 0x56d   :  { %v6238_v35 = vpack.c.bf16 %v6026_v30, %v6022_v22  ;;  %v5730_v19 = vpop.f32.mrb[172].mxu1 }
 0x56e   :  { %v8653_v21 = vadd.f32 %v5730_v19, %v13654_v0  ;;  %v5732_v46 = vpop.f32.mrb[173].mxu1 }
 0x56f   :  { %v8654_v52 = vadd.f32 %v5732_v46, %v13656_v53  ;;  %v5734_v25 = vpop.f32.mrb[174].mxu1  ;;  %6987 = vmatprep.mubr.bf16.mxu0 %v6238_v35 }
 0x570   :  { %v8655_v63 = vadd.f32 %v5734_v25, %v13654_v0  ;;  %v5736_v32 = vpop.f32.mrb[175].mxu1  ;;  %6988 = vmatmul.mubr.bf16.gmra.mrb[168].mxu0 %v6237_v44  ;;  %v6029_v37 = vmax.f32 %v8653_v21, 0.0 }
 0x571   :  { %v8656_v41 = vadd.f32 %v5736_v32, %v13656_v53  ;;  %v6030_v29 = vmax.f32 %v8654_v52, 0.0 }
 0x572   :  { %v6033_v54 = vmax.f32 %v8655_v63, 0.0 }
 0x573   :  { %v6034_v56 = vmax.f32 %v8656_v41, 0.0 }
 0x574   :  { %v6241_v1 = vpack.c.bf16 %v6033_v54, %v6029_v37 }
 0x575   :  { %v6242_v42 = vpack.c.bf16 %v6034_v56, %v6030_v29  ;;  %v5740_v5 = vpop.f32.mrb[176].mxu1 }
 0x576   :  { %v8657_v59 = vadd.f32 %v5740_v5, %v13654_v0  ;;  %v5742_v48 = vpop.f32.mrb[177].mxu1 }
 0x577   :  { %v8658_v8 = vadd.f32 %v5742_v48, %v13656_v53  ;;  %v5744_v34 = vpop.f32.mrb[178].mxu1  ;;  %6995 = vmatprep.mubr.bf16.mxu0 %v6242_v42 }
 0x578   :  { %v8659_v18 = vadd.f32 %v5744_v34, %v13654_v0  ;;  %v5746_v36 = vpop.f32.mrb[179].mxu1  ;;  %6996 = vmatmul.mubr.bf16.gmra.mrb[172].mxu0 %v6241_v1  ;;  %v6037_v26 = vmax.f32 %v8657_v59, 0.0 }
 0x579   :  { %v8660_v17 = vadd.f32 %v5746_v36, %v13656_v53  ;;  %v6038_v28 = vmax.f32 %v8658_v8, 0.0 }
 0x57a   :  { %v6041_v10 = vmax.f32 %v8659_v18, 0.0 }
 0x57b   :  { %v6042_v20 = vmax.f32 %v8660_v17, 0.0 }
 0x57c   :  { %v6245_v6 = vpack.c.bf16 %v6041_v10, %v6037_v26 }
 0x57d   :  { %v6246_v13 = vpack.c.bf16 %v6042_v20, %v6038_v28  ;;  %v5750_v9 = vpop.f32.mrb[180].mxu1 }
 0x57e   :  { %v8661_v55 = vadd.f32 %v5750_v9, %v13654_v0  ;;  %v5752_v38 = vpop.f32.mrb[181].mxu1 }
 0x57f   :  { %v8662_v3 = vadd.f32 %v5752_v38, %v13656_v53  ;;  %v5754_v49 = vpop.f32.mrb[182].mxu1  ;;  %7003 = vmatprep.mubr.bf16.mxu0 %v6246_v13 }
 0x580   :  { %v8663_v4 = vadd.f32 %v5754_v49, %v13654_v0  ;;  %v5756_v31 = vpop.f32.mrb[183].mxu1  ;;  %7004 = vmatmul.mubr.bf16.gmra.mrb[176].mxu0 %v6245_v6  ;;  %v6045_v47 = vmax.f32 %v8661_v55, 0.0 }
 0x581   :  { %v8664_v15 = vadd.f32 %v5756_v31, %v13656_v53  ;;  %v6046_v61 = vmax.f32 %v8662_v3, 0.0 }
 0x582   :  { %v6049_v2 = vmax.f32 %v8663_v4, 0.0 }
 0x583   :  { %v6050_v50 = vmax.f32 %v8664_v15, 0.0 }
 0x584   :  { %v6249_v60 = vpack.c.bf16 %v6049_v2, %v6045_v47 }
 0x585   :  { %v6250_v39 = vpack.c.bf16 %v6050_v50, %v6046_v61  ;;  %v5760_v58 = vpop.f32.mrb[184].mxu1 }
 0x586   :  { %v8665_v45 = vadd.f32 %v5760_v58, %v13654_v0  ;;  %v5762_v12 = vpop.f32.mrb[185].mxu1 }
 0x587   :  { %v8666_v16 = vadd.f32 %v5762_v12, %v13656_v53  ;;  %v5764_v43 = vpop.f32.mrb[186].mxu1  ;;  %7011 = vmatprep.mubr.bf16.mxu0 %v6250_v39 }
 0x588   :  { %v8667_v11 = vadd.f32 %v5764_v43, %v13654_v0  ;;  %v5766_v40 = vpop.f32.mrb[187].mxu1  ;;  %7012 = vmatmul.mubr.bf16.gmra.mrb[180].mxu0 %v6249_v60  ;;  %v6053_v51 = vmax.f32 %v8665_v45, 0.0 }
 0x589   :  { %v8668_v24 = vadd.f32 %v5766_v40, %v13656_v53  ;;  %v6054_v62 = vmax.f32 %v8666_v16, 0.0 }
 0x58a   :  { %v6057_v33 = vmax.f32 %v8667_v11, 0.0 }
 0x58b   :  { %v6058_v57 = vmax.f32 %v8668_v24, 0.0 }
 0x58c   :  { %v6253_v14 = vpack.c.bf16 %v6057_v33, %v6053_v51 }
 0x58d   :  { %v6254_v27 = vpack.c.bf16 %v6058_v57, %v6054_v62  ;;  %v5770_v23 = vpop.f32.mrb[188].mxu1 }
 0x58e   :  { %v8669_v7 = vadd.f32 %v5770_v23, %v13654_v0  ;;  %v5772_v22 = vpop.f32.mrb[189].mxu1 }
 0x58f   :  { %v8670_v30 = vadd.f32 %v5772_v22, %v13656_v53  ;;  %v5774_v44 = vpop.f32.mrb[190].mxu1  ;;  %7019 = vmatprep.mubr.bf16.mxu0 %v6254_v27 }
 0x590   :  { %v8671_v35 = vadd.f32 %v5774_v44, %v13654_v0  ;;  %v5776_v19 = vpop.f32.mrb[191].mxu1  ;;  %7020 = vmatmul.mubr.bf16.gmra.mrb[184].mxu0 %v6253_v14  ;;  %v6061_v46 = vmax.f32 %v8669_v7, 0.0 }
 0x591   :  { %v8672_v21 = vadd.f32 %v5776_v19, %v13656_v53  ;;  %v6062_v25 = vmax.f32 %v8670_v30, 0.0 }
 0x592   :  { %v6065_v52 = vmax.f32 %v8671_v35, 0.0 }
 0x593   :  { %v6066_v63 = vmax.f32 %v8672_v21, 0.0 }
 0x594   :  { %v6257_v32 = vpack.c.bf16 %v6065_v52, %v6061_v46 }
 0x595   :  { %v6258_v41 = vpack.c.bf16 %v6066_v63, %v6062_v25  ;;  %v5780_v37 = vpop.f32.mrb[192].mxu1 }
 0x596   :  { %v8673_v54 = vadd.f32 %v5780_v37, %v13654_v0  ;;  %v5782_v29 = vpop.f32.mrb[193].mxu1 }
 0x597   :  { %v8674_v56 = vadd.f32 %v5782_v29, %v13656_v53  ;;  %v5784_v1 = vpop.f32.mrb[194].mxu1  ;;  %7027 = vmatprep.mubr.bf16.mxu0 %v6258_v41 }
 0x598   :  { %v8675_v42 = vadd.f32 %v5784_v1, %v13654_v0  ;;  %v5786_v5 = vpop.f32.mrb[195].mxu1  ;;  %7028 = vmatmul.mubr.bf16.gmra.mrb[188].mxu0 %v6257_v32  ;;  %v6069_v48 = vmax.f32 %v8673_v54, 0.0 }
 0x599   :  { %v8676_v59 = vadd.f32 %v5786_v5, %v13656_v53  ;;  %v6070_v34 = vmax.f32 %v8674_v56, 0.0 }
 0x59a   :  { %v6073_v8 = vmax.f32 %v8675_v42, 0.0 }
 0x59b   :  { %v6074_v18 = vmax.f32 %v8676_v59, 0.0 }
 0x59c   :  { %v6261_v36 = vpack.c.bf16 %v6073_v8, %v6069_v48 }
 0x59d   :  { %v6262_v17 = vpack.c.bf16 %v6074_v18, %v6070_v34  ;;  %v5790_v26 = vpop.f32.mrb[196].mxu1 }
 0x59e   :  { %v8677_v10 = vadd.f32 %v5790_v26, %v13654_v0  ;;  %v5792_v28 = vpop.f32.mrb[197].mxu1 }
 0x59f   :  { %v8678_v20 = vadd.f32 %v5792_v28, %v13656_v53  ;;  %v5794_v6 = vpop.f32.mrb[198].mxu1  ;;  %7035 = vmatprep.mubr.bf16.mxu0 %v6262_v17 }
 0x5a0   :  { %v8679_v13 = vadd.f32 %v5794_v6, %v13654_v0  ;;  %v5796_v9 = vpop.f32.mrb[199].mxu1  ;;  %7036 = vmatmul.mubr.bf16.gmra.mrb[192].mxu0 %v6261_v36  ;;  %v6077_v38 = vmax.f32 %v8677_v10, 0.0 }
 0x5a1   :  { %v8680_v55 = vadd.f32 %v5796_v9, %v13656_v53  ;;  %v6078_v49 = vmax.f32 %v8678_v20, 0.0 }
 0x5a2   :  { %v6081_v3 = vmax.f32 %v8679_v13, 0.0 }
 0x5a3   :  { %v6082_v4 = vmax.f32 %v8680_v55, 0.0 }
 0x5a4   :  { %v6265_v31 = vpack.c.bf16 %v6081_v3, %v6077_v38 }
 0x5a5   :  { %v6266_v15 = vpack.c.bf16 %v6082_v4, %v6078_v49  ;;  %v5800_v47 = vpop.f32.mrb[200].mxu1 }
 0x5a6   :  { %v8681_v2 = vadd.f32 %v5800_v47, %v13654_v0  ;;  %v5802_v61 = vpop.f32.mrb[201].mxu1 }
 0x5a7   :  { %v8682_v50 = vadd.f32 %v5802_v61, %v13656_v53  ;;  %v5804_v60 = vpop.f32.mrb[202].mxu1  ;;  %7043 = vmatprep.mubr.bf16.mxu0 %v6266_v15 }
 0x5a8   :  { %v8683_v39 = vadd.f32 %v5804_v60, %v13654_v0  ;;  %v5806_v58 = vpop.f32.mrb[203].mxu1  ;;  %7044 = vmatmul.mubr.bf16.gmra.mrb[196].mxu0 %v6265_v31  ;;  %v6085_v12 = vmax.f32 %v8681_v2, 0.0 }
 0x5a9   :  { %v8684_v45 = vadd.f32 %v5806_v58, %v13656_v53  ;;  %v6086_v43 = vmax.f32 %v8682_v50, 0.0 }
 0x5aa   :  { %v6089_v16 = vmax.f32 %v8683_v39, 0.0 }
 0x5ab   :  { %v6090_v11 = vmax.f32 %v8684_v45, 0.0 }
 0x5ac   :  { %v6269_v40 = vpack.c.bf16 %v6089_v16, %v6085_v12 }
 0x5ad   :  { %v6270_v24 = vpack.c.bf16 %v6090_v11, %v6086_v43  ;;  %v5810_v51 = vpop.f32.mrb[204].mxu1 }
 0x5ae   :  { %v8685_v33 = vadd.f32 %v5810_v51, %v13654_v0  ;;  %v5812_v62 = vpop.f32.mrb[205].mxu1 }
 0x5af   :  { %v8686_v57 = vadd.f32 %v5812_v62, %v13656_v53  ;;  %v5814_v14 = vpop.f32.mrb[206].mxu1  ;;  %7051 = vmatprep.mubr.bf16.mxu0 %v6270_v24 }
 0x5b0   :  { %v8687_v27 = vadd.f32 %v5814_v14, %v13654_v0  ;;  %v5816_v23 = vpop.f32.mrb[207].mxu1  ;;  %7052 = vmatmul.mubr.bf16.gmra.mrb[200].mxu0 %v6269_v40  ;;  %v6093_v22 = vmax.f32 %v8685_v33, 0.0 }
 0x5b1   :  { %v8688_v7 = vadd.f32 %v5816_v23, %v13656_v53  ;;  %v6094_v44 = vmax.f32 %v8686_v57, 0.0 }
 0x5b2   :  { %v6097_v30 = vmax.f32 %v8687_v27, 0.0 }
 0x5b3   :  { %v6098_v35 = vmax.f32 %v8688_v7, 0.0 }
 0x5b4   :  { %v6273_v19 = vpack.c.bf16 %v6097_v30, %v6093_v22 }
 0x5b5   :  { %v6274_v21 = vpack.c.bf16 %v6098_v35, %v6094_v44  ;;  %v5820_v46 = vpop.f32.mrb[208].mxu1 }
 0x5b6   :  { %v8689_v52 = vadd.f32 %v5820_v46, %v13654_v0  ;;  %v5822_v25 = vpop.f32.mrb[209].mxu1 }
 0x5b7   :  { %v8690_v63 = vadd.f32 %v5822_v25, %v13656_v53  ;;  %v5824_v32 = vpop.f32.mrb[210].mxu1  ;;  %7059 = vmatprep.mubr.bf16.mxu0 %v6274_v21 }
 0x5b8   :  { %v8691_v41 = vadd.f32 %v5824_v32, %v13654_v0  ;;  %v5826_v37 = vpop.f32.mrb[211].mxu1  ;;  %7060 = vmatmul.mubr.bf16.gmra.mrb[204].mxu0 %v6273_v19  ;;  %v6101_v29 = vmax.f32 %v8689_v52, 0.0 }
 0x5b9   :  { %v8692_v54 = vadd.f32 %v5826_v37, %v13656_v53  ;;  %v6102_v1 = vmax.f32 %v8690_v63, 0.0 }
 0x5ba   :  { %v6105_v56 = vmax.f32 %v8691_v41, 0.0 }
 0x5bb   :  { %v6106_v42 = vmax.f32 %v8692_v54, 0.0 }
 0x5bc   :  { %v6277_v5 = vpack.c.bf16 %v6105_v56, %v6101_v29 }
 0x5bd   :  { %v6278_v59 = vpack.c.bf16 %v6106_v42, %v6102_v1  ;;  %v5830_v48 = vpop.f32.mrb[212].mxu1 }
 0x5be   :  { %v8693_v8 = vadd.f32 %v5830_v48, %v13654_v0  ;;  %v5832_v34 = vpop.f32.mrb[213].mxu1 }
 0x5bf   :  { %v8694_v18 = vadd.f32 %v5832_v34, %v13656_v53  ;;  %v5834_v36 = vpop.f32.mrb[214].mxu1  ;;  %7067 = vmatprep.mubr.bf16.mxu0 %v6278_v59 }
 0x5c0   :  { %v8695_v17 = vadd.f32 %v5834_v36, %v13654_v0  ;;  %v5836_v26 = vpop.f32.mrb[215].mxu1  ;;  %7068 = vmatmul.mubr.bf16.gmra.mrb[208].mxu0 %v6277_v5  ;;  %v6109_v28 = vmax.f32 %v8693_v8, 0.0 }
 0x5c1   :  { %v8696_v10 = vadd.f32 %v5836_v26, %v13656_v53  ;;  %v6110_v6 = vmax.f32 %v8694_v18, 0.0 }
 0x5c2   :  { %v6113_v20 = vmax.f32 %v8695_v17, 0.0 }
 0x5c3   :  { %v6114_v13 = vmax.f32 %v8696_v10, 0.0 }
 0x5c4   :  { %v6281_v9 = vpack.c.bf16 %v6113_v20, %v6109_v28 }
 0x5c5   :  { %v6282_v55 = vpack.c.bf16 %v6114_v13, %v6110_v6  ;;  %v5840_v38 = vpop.f32.mrb[216].mxu1 }
 0x5c6   :  { %v8697_v3 = vadd.f32 %v5840_v38, %v13654_v0  ;;  %v5842_v49 = vpop.f32.mrb[217].mxu1 }
 0x5c7   :  { %v8698_v4 = vadd.f32 %v5842_v49, %v13656_v53  ;;  %v5844_v31 = vpop.f32.mrb[218].mxu1  ;;  %7075 = vmatprep.mubr.bf16.mxu0 %v6282_v55 }
 0x5c8   :  { %v8699_v15 = vadd.f32 %v5844_v31, %v13654_v0  ;;  %v5846_v47 = vpop.f32.mrb[219].mxu1  ;;  %7076 = vmatmul.mubr.bf16.gmra.mrb[212].mxu0 %v6281_v9  ;;  %v6117_v61 = vmax.f32 %v8697_v3, 0.0 }
 0x5c9   :  { %v8700_v2 = vadd.f32 %v5846_v47, %v13656_v53  ;;  %v6118_v60 = vmax.f32 %v8698_v4, 0.0 }
 0x5ca   :  { %v6121_v50 = vmax.f32 %v8699_v15, 0.0 }
 0x5cb   :  { %v6122_v39 = vmax.f32 %v8700_v2, 0.0 }
 0x5cc   :  { %v6285_v58 = vpack.c.bf16 %v6121_v50, %v6117_v61 }
 0x5cd   :  { %v6286_v45 = vpack.c.bf16 %v6122_v39, %v6118_v60  ;;  %v5850_v12 = vpop.f32.mrb[220].mxu1 }
 0x5ce   :  { %v8701_v16 = vadd.f32 %v5850_v12, %v13654_v0  ;;  %v5852_v43 = vpop.f32.mrb[221].mxu1 }
 0x5cf   :  { %v8702_v11 = vadd.f32 %v5852_v43, %v13656_v53  ;;  %v5854_v40 = vpop.f32.mrb[222].mxu1  ;;  %7083 = vmatprep.mubr.bf16.mxu0 %v6286_v45  ;;  %v13783_v43 = vld [vmem:[%s14573_s4] ss:$0 sm:$0xff] }
 0x5d0   :  { %v8703_v24 = vadd.f32 %v5854_v40, %v13654_v0  ;;  %v5856_v51 = vpop.f32.mrb[223].mxu1  ;;  %7084 = vmatmul.mubr.bf16.gmra.mrb[216].mxu0 %v6285_v58  ;;  %v6125_v62 = vmax.f32 %v8701_v16, 0.0 }
 0x5d1   :  { %v8704_v33 = vadd.f32 %v5856_v51, %v13656_v53  ;;  %v6126_v14 = vmax.f32 %v8702_v11, 0.0 }
 0x5d2   :  { %v6129_v57 = vmax.f32 %v8703_v24, 0.0 }
 0x5d3   :  { %v6130_v27 = vmax.f32 %v8704_v33, 0.0 }
 0x5d4   :  { %v6289_v23 = vpack.c.bf16 %v6129_v57, %v6125_v62 }
 0x5d5   :  { %v6290_v7 = vpack.c.bf16 %v6130_v27, %v6126_v14  ;;  %v5860_v22 = vpop.f32.mrb[224].mxu1 }
 0x5d6   :  { %v8705_v30 = vadd.f32 %v5860_v22, %v13654_v0  ;;  %v5862_v44 = vpop.f32.mrb[225].mxu1 }
 0x5d7   :  { %v8706_v35 = vadd.f32 %v5862_v44, %v13656_v53  ;;  %v5864_v19 = vpop.f32.mrb[226].mxu1  ;;  %7091 = vmatprep.mubr.bf16.mxu0 %v6290_v7 }
 0x5d8   :  { %v8707_v21 = vadd.f32 %v5864_v19, %v13654_v0  ;;  %v5866_v46 = vpop.f32.mrb[227].mxu1  ;;  %7092 = vmatmul.mubr.bf16.gmra.mrb[220].mxu0 %v6289_v23  ;;  %v6133_v25 = vmax.f32 %v8705_v30, 0.0 }
 0x5d9   :  { %v8708_v52 = vadd.f32 %v5866_v46, %v13656_v53  ;;  %v6134_v32 = vmax.f32 %v8706_v35, 0.0 }
 0x5da   :  { %v6137_v63 = vmax.f32 %v8707_v21, 0.0 }
 0x5db   :  { %v6138_v41 = vmax.f32 %v8708_v52, 0.0 }
 0x5dc   :  { %v6293_v37 = vpack.c.bf16 %v6137_v63, %v6133_v25 }
 0x5dd   :  { %v6294_v54 = vpack.c.bf16 %v6138_v41, %v6134_v32  ;;  %v5870_v29 = vpop.f32.mrb[228].mxu1 }
 0x5de   :  { %v8709_v56 = vadd.f32 %v5870_v29, %v13654_v0  ;;  %v5872_v1 = vpop.f32.mrb[229].mxu1 }
 0x5df   :  { %v8710_v42 = vadd.f32 %v5872_v1, %v13656_v53  ;;  %v5874_v5 = vpop.f32.mrb[230].mxu1  ;;  %7099 = vmatprep.mubr.bf16.mxu0 %v6294_v54 }
 0x5e0   :  { %v8711_v59 = vadd.f32 %v5874_v5, %v13654_v0  ;;  %v5876_v48 = vpop.f32.mrb[231].mxu1  ;;  %7100 = vmatmul.mubr.bf16.gmra.mrb[224].mxu0 %v6293_v37  ;;  %v6141_v34 = vmax.f32 %v8709_v56, 0.0 }
 0x5e1   :  { %v8712_v8 = vadd.f32 %v5876_v48, %v13656_v53  ;;  %v6142_v36 = vmax.f32 %v8710_v42, 0.0 }
 0x5e2   :  { %v6145_v18 = vmax.f32 %v8711_v59, 0.0 }
 0x5e3   :  { %v6146_v17 = vmax.f32 %v8712_v8, 0.0 }
 0x5e4   :  { %v6297_v26 = vpack.c.bf16 %v6145_v18, %v6141_v34 }
 0x5e5   :  { %v6298_v10 = vpack.c.bf16 %v6146_v17, %v6142_v36  ;;  %v5880_v28 = vpop.f32.mrb[232].mxu1 }
 0x5e6   :  { %v8713_v20 = vadd.f32 %v5880_v28, %v13654_v0  ;;  %v5882_v6 = vpop.f32.mrb[233].mxu1 }
 0x5e7   :  { %v8714_v13 = vadd.f32 %v5882_v6, %v13656_v53  ;;  %v5884_v9 = vpop.f32.mrb[234].mxu1  ;;  %7107 = vmatprep.mubr.bf16.mxu0 %v6298_v10 }
 0x5e8   :  { %v8715_v55 = vadd.f32 %v5884_v9, %v13654_v0  ;;  %v5886_v38 = vpop.f32.mrb[235].mxu1  ;;  %7108 = vmatmul.mubr.bf16.gmra.mrb[228].mxu0 %v6297_v26  ;;  %v6149_v49 = vmax.f32 %v8713_v20, 0.0 }
 0x5e9   :  { %v8716_v3 = vadd.f32 %v5886_v38, %v13656_v53  ;;  %v6150_v31 = vmax.f32 %v8714_v13, 0.0 }
 0x5ea   :  { %v6153_v4 = vmax.f32 %v8715_v55, 0.0 }
 0x5eb   :  { %v6154_v15 = vmax.f32 %v8716_v3, 0.0 }
 0x5ec   :  { %v6301_v47 = vpack.c.bf16 %v6153_v4, %v6149_v49 }
 0x5ed   :  { %v6302_v2 = vpack.c.bf16 %v6154_v15, %v6150_v31  ;;  %v5890_v61 = vpop.f32.mrb[236].mxu1 }
 0x5ee   :  { %v8717_v50 = vadd.f32 %v5890_v61, %v13654_v0  ;;  %v5892_v60 = vpop.f32.mrb[237].mxu1 }
 0x5ef   :  { %v8718_v39 = vadd.f32 %v5892_v60, %v13656_v53  ;;  %v5894_v58 = vpop.f32.mrb[238].mxu1  ;;  %7115 = vmatprep.mubr.bf16.mxu0 %v6302_v2 }
 0x5f0   :  { %v8719_v45 = vadd.f32 %v5894_v58, %v13654_v0  ;;  %v5896_v12 = vpop.f32.mrb[239].mxu1  ;;  %7116 = vmatmul.mubr.bf16.gmra.mrb[232].mxu0 %v6301_v47  ;;  %v6157_v11 = vmax.f32 %v8717_v50, 0.0 }
 0x5f1   :  { %v8720_v16 = vadd.f32 %v5896_v12, %v13656_v53  ;;  %v6158_v24 = vmax.f32 %v8718_v39, 0.0 }
 0x5f2   :  { %v6161_v40 = vmax.f32 %v8719_v45, 0.0 }
 0x5f3   :  { %v6162_v51 = vmax.f32 %v8720_v16, 0.0  ;;  %v6909_v33 = vpop.f32.mrb[128].mxu0 }
 0x5f4   :  { %v6305_v62 = vpack.c.bf16 %v6161_v40, %v6157_v11  ;;  %v13786_v57 = vadd.f32 %v13783_v43, %v6909_v33  ;;  %v6911_v14 = vpop.f32.mrb[129].mxu0 }
 0x5f5   :  { %v6306_v27 = vpack.c.bf16 %v6162_v51, %v6158_v24  ;;  %v5900_v23 = vpop.f32.mrb[240].mxu1  ;;  %v6912_v7 = vpop.f32.mrb[130].mxu0 }
 0x5f6   :  { %v8721_v22 = vadd.f32 %v5900_v23, %v13654_v0  ;;  %v5902_v30 = vpop.f32.mrb[241].mxu1  ;;  %v6914_v44 = vpop.f32.mrb[131].mxu0  ;;  %7164 = vmax.xlane.f32.xlu0 %v13786_v57  ;;  %v13792_v21 = vadd.f32 %v13783_v43, %v6912_v7 }
 0x5f7   :  { %v8722_v35 = vadd.f32 %v5902_v30, %v13656_v53  ;;  %v5904_v19 = vpop.f32.mrb[242].mxu1  ;;  %7123 = vmatprep.mubr.bf16.mxu0 %v6306_v27 }
 0x5f8   :  { %v8723_v46 = vadd.f32 %v5904_v19, %v13654_v0  ;;  %v5906_v52 = vpop.f32.mrb[243].mxu1  ;;  %7124 = vmatmul.mubr.bf16.gmra.mrb[236].mxu0 %v6305_v62  ;;  %v6165_v63 = vmax.f32 %v8721_v22, 0.0 }
 0x5f9   :  { %v8724_v25 = vadd.f32 %v5906_v52, %v13656_v53  ;;  %v6166_v41 = vmax.f32 %v8722_v35, 0.0 }
 0x5fa   :  { %v6169_v32 = vmax.f32 %v8723_v46, 0.0  ;;  %7166 = vmax.xlane.f32.xlu0 %v13792_v21 }
 0x5fb   :  { %v6170_v37 = vmax.f32 %v8724_v25, 0.0  ;;  %v6917_v54 = vpop.f32.mrb[132].mxu0 }
 0x5fc   :  { %v6309_v29 = vpack.c.bf16 %v6169_v32, %v6165_v63  ;;  %v13798_v56 = vadd.f32 %v13783_v43, %v6917_v54  ;;  %v6919_v1 = vpop.f32.mrb[133].mxu0 }
 0x5fd   :  { %v6310_v42 = vpack.c.bf16 %v6170_v37, %v6166_v41  ;;  %v5910_v5 = vpop.f32.mrb[244].mxu1  ;;  %v6920_v59 = vpop.f32.mrb[134].mxu0 }
 0x5fe   :  { %v8725_v48 = vadd.f32 %v5910_v5, %v13654_v0  ;;  %v5912_v8 = vpop.f32.mrb[245].mxu1  ;;  %v6922_v34 = vpop.f32.mrb[135].mxu0  ;;  %7168 = vmax.xlane.f32.xlu1 %v13798_v56  ;;  %v13804_v17 = vadd.f32 %v13783_v43, %v6920_v59 }
 0x5ff   :  { %v8726_v18 = vadd.f32 %v5912_v8, %v13656_v53  ;;  %v5914_v36 = vpop.f32.mrb[246].mxu1  ;;  %7131 = vmatprep.mubr.bf16.mxu0 %v6310_v42 }
 0x600   :  { %v8727_v26 = vadd.f32 %v5914_v36, %v13654_v0  ;;  %v5916_v10 = vpop.f32.mrb[247].mxu1  ;;  %7132 = vmatmul.mubr.bf16.gmra.mrb[240].mxu0 %v6309_v29  ;;  %v6173_v20 = vmax.f32 %v8725_v48, 0.0 }
 0x601   :  { %v8728_v28 = vadd.f32 %v5916_v10, %v13656_v53  ;;  %v6174_v13 = vmax.f32 %v8726_v18, 0.0 }
 0x602   :  { %v6177_v6 = vmax.f32 %v8727_v26, 0.0  ;;  %7170 = vmax.xlane.f32.xlu1 %v13804_v17 }
 0x603   :  { %v6178_v9 = vmax.f32 %v8728_v28, 0.0  ;;  %v6925_v55 = vpop.f32.mrb[136].mxu0 }
 0x604   :  { %v6313_v38 = vpack.c.bf16 %v6177_v6, %v6173_v20  ;;  %v13810_v3 = vadd.f32 %v13783_v43, %v6925_v55  ;;  %v6927_v49 = vpop.f32.mrb[137].mxu0 }
 0x605   :  { %v6314_v4 = vpack.c.bf16 %v6178_v9, %v6174_v13  ;;  %v5920_v31 = vpop.f32.mrb[248].mxu1  ;;  %v6928_v15 = vpop.f32.mrb[138].mxu0 }
 0x606   :  { %v8729_v47 = vadd.f32 %v5920_v31, %v13654_v0  ;;  %v13814_v2 = vadd.f32 %v13783_v43, %v6928_v15  ;;  %v5922_v61 = vpop.f32.mrb[249].mxu1  ;;  %v6930_v50 = vpop.f32.mrb[139].mxu0  ;;  %7172 = vmax.xlane.f32.xlu0 %v13810_v3 }
 0x607   :  { %v8730_v60 = vadd.f32 %v5922_v61, %v13656_v53  ;;  %v5924_v39 = vpop.f32.mrb[250].mxu1  ;;  %7139 = vmatprep.mubr.bf16.mxu0 %v6314_v4 }
 0x608   :  { %v8731_v58 = vadd.f32 %v5924_v39, %v13654_v0  ;;  %v5926_v45 = vpop.f32.mrb[251].mxu1  ;;  %7140 = vmatmul.mubr.bf16.gmra.mrb[244].mxu0 %v6313_v38  ;;  %7174 = vmax.xlane.f32.xlu1 %v13814_v2  ;;  %v6181_v16 = vmax.f32 %v8729_v47, 0.0 }
 0x609   :  { %v8732_v12 = vadd.f32 %v5926_v45, %v13656_v53  ;;  %v6182_v40 = vmax.f32 %v8730_v60, 0.0 }
 0x60a   :  { %v6185_v11 = vmax.f32 %v8731_v58, 0.0 }
 0x60b   :  { %v6186_v24 = vmax.f32 %v8732_v12, 0.0  ;;  %v6933_v51 = vpop.f32.mrb[140].mxu0 }
 0x60c   :  { %v6317_v33 = vpack.c.bf16 %v6185_v11, %v6181_v16  ;;  %v13822_v62 = vadd.f32 %v13783_v43, %v6933_v51  ;;  %v6935_v14 = vpop.f32.mrb[141].mxu0 }
 0x60d   :  { %v6318_v27 = vpack.c.bf16 %v6186_v24, %v6182_v40  ;;  %v5930_v23 = vpop.f32.mrb[252].mxu1  ;;  %v6936_v7 = vpop.f32.mrb[142].mxu0 }
 0x60e   :  { %v8733_v22 = vadd.f32 %v5930_v23, %v13654_v0  ;;  %v13826_v30 = vadd.f32 %v13783_v43, %v6936_v7  ;;  %v5932_v44 = vpop.f32.mrb[253].mxu1  ;;  %v6938_v35 = vpop.f32.mrb[143].mxu0  ;;  %7176 = vmax.xlane.f32.xlu0 %v13822_v62 }
 0x60f   :  { %v8734_v19 = vadd.f32 %v5932_v44, %v13656_v53  ;;  %v5934_v46 = vpop.f32.mrb[254].mxu1  ;;  %7147 = vmatprep.mubr.bf16.mxu0 %v6318_v27 }
 0x610   :  { %v8735_v52 = vadd.f32 %v5934_v46, %v13654_v0  ;;  %v5936_v25 = vpop.f32.mrb[255].mxu1  ;;  %7148 = vmatmul.mubr.bf16.gmra.mrb[248].mxu0 %v6317_v33  ;;  %7178 = vmax.xlane.f32.xlu1 %v13826_v30  ;;  %v6189_v32 = vmax.f32 %v8733_v22, 0.0 }
 0x611   :  { %v8736_v63 = vadd.f32 %v5936_v25, %v13656_v53  ;;  %v6190_v37 = vmax.f32 %v8734_v19, 0.0 }
 0x612   :  { %v6193_v41 = vmax.f32 %v8735_v52, 0.0 }
 0x613   :  { %v6194_v54 = vmax.f32 %v8736_v63, 0.0  ;;  %v6941_v29 = vpop.f32.mrb[144].mxu0 }
 0x614   :  { %v6321_v1 = vpack.c.bf16 %v6193_v41, %v6189_v32  ;;  %v13834_v42 = vadd.f32 %v13783_v43, %v6941_v29  ;;  %v6943_v5 = vpop.f32.mrb[145].mxu0 }
 0x615   :  { %v6322_v59 = vpack.c.bf16 %v6194_v54, %v6190_v37  ;;  %v6944_v48 = vpop.f32.mrb[146].mxu0 }
 0x616   :  { %v13837_v0 = vadd.f32 %v13783_v43, %v6944_v48  ;;  %v6946_v8 = vpop.f32.mrb[147].mxu0  ;;  %7180 = vmax.xlane.f32.xlu0 %v13834_v42 }
 0x617   :  { %7155 = vmatprep.mubr.bf16.mxu0 %v6322_v59 }
 0x618   :  { %7156 = vmatmul.mubr.bf16.gmra.mrb[252].mxu0 %v6321_v1  ;;  %7182 = vmax.xlane.f32.xlu1 %v13837_v0 }
 0x61b   :  { %v6949_v53 = vpop.f32.mrb[148].mxu0 }
 0x61c   :  { %v13842_v34 = vadd.f32 %v13783_v43, %v6949_v53  ;;  %v6951_v18 = vpop.f32.mrb[149].mxu0 }
 0x61d   :  { %v6952_v36 = vpop.f32.mrb[150].mxu0 }
 0x61e   :  { %v13845_v26 = vadd.f32 %v13783_v43, %v6952_v36  ;;  %v6954_v10 = vpop.f32.mrb[151].mxu0  ;;  %7184 = vmax.xlane.f32.xlu0 %v13842_v34 }
 0x620   :  { %7186 = vmax.xlane.f32.xlu1 %v13845_v26 }
 0x623   :  { %v6957_v28 = vpop.f32.mrb[152].mxu0 }
 0x624   :  { %v13850_v20 = vadd.f32 %v13783_v43, %v6957_v28  ;;  %v6959_v6 = vpop.f32.mrb[153].mxu0 }
 0x625   :  { %v6960_v13 = vpop.f32.mrb[154].mxu0 }
 0x626   :  { %v13853_v9 = vadd.f32 %v13783_v43, %v6960_v13  ;;  %v6962_v55 = vpop.f32.mrb[155].mxu0  ;;  %7188 = vmax.xlane.f32.xlu0 %v13850_v20 }
 0x628   :  { %7190 = vmax.xlane.f32.xlu1 %v13853_v9 }
 0x62b   :  { %v6965_v38 = vpop.f32.mrb[156].mxu0 }
 0x62c   :  { %v13858_v49 = vadd.f32 %v13783_v43, %v6965_v38  ;;  %v6967_v4 = vpop.f32.mrb[157].mxu0 }
 0x62d   :  { %v6968_v31 = vpop.f32.mrb[158].mxu0 }
 0x62e   :  { %v13861_v15 = vadd.f32 %v13783_v43, %v6968_v31  ;;  %v6970_v47 = vpop.f32.mrb[159].mxu0  ;;  %7192 = vmax.xlane.f32.xlu0 %v13858_v49 }
 0x630   :  { %7194 = vmax.xlane.f32.xlu1 %v13861_v15 }
 0x633   :  { %v6973_v61 = vpop.f32.mrb[160].mxu0 }
 0x634   :  { %v13866_v50 = vadd.f32 %v13783_v43, %v6973_v61  ;;  %v6975_v60 = vpop.f32.mrb[161].mxu0 }
 0x635   :  { %v6976_v39 = vpop.f32.mrb[162].mxu0 }
 0x636   :  { %v13869_v58 = vadd.f32 %v13783_v43, %v6976_v39  ;;  %v6978_v45 = vpop.f32.mrb[163].mxu0  ;;  %7196 = vmax.xlane.f32.xlu0 %v13866_v50 }
 0x638   :  { %7198 = vmax.xlane.f32.xlu1 %v13869_v58 }
 0x63b   :  { %v6981_v12 = vpop.f32.mrb[164].mxu0 }
 0x63c   :  { %v13874_v16 = vadd.f32 %v13783_v43, %v6981_v12  ;;  %v6983_v11 = vpop.f32.mrb[165].mxu0 }
 0x63d   :  { %v6984_v40 = vpop.f32.mrb[166].mxu0 }
 0x63e   :  { %v13877_v24 = vadd.f32 %v13783_v43, %v6984_v40  ;;  %v6986_v51 = vpop.f32.mrb[167].mxu0  ;;  %7200 = vmax.xlane.f32.xlu0 %v13874_v16 }
 0x640   :  { %7202 = vmax.xlane.f32.xlu1 %v13877_v24 }
 0x643   :  { %v6989_v33 = vpop.f32.mrb[168].mxu0 }
 0x644   :  { %v13882_v14 = vadd.f32 %v13783_v43, %v6989_v33  ;;  %v6991_v27 = vpop.f32.mrb[169].mxu0 }
 0x645   :  { %v6992_v23 = vpop.f32.mrb[170].mxu0 }
 0x646   :  { %v13885_v7 = vadd.f32 %v13783_v43, %v6992_v23  ;;  %v6994_v22 = vpop.f32.mrb[171].mxu0  ;;  %7204 = vmax.xlane.f32.xlu0 %v13882_v14 }
 0x648   :  { %7206 = vmax.xlane.f32.xlu1 %v13885_v7 }
 0x64b   :  { %v6997_v44 = vpop.f32.mrb[172].mxu0 }
 0x64c   :  { %v13890_v35 = vadd.f32 %v13783_v43, %v6997_v44  ;;  %v6999_v19 = vpop.f32.mrb[173].mxu0 }
 0x64d   :  { %v7000_v46 = vpop.f32.mrb[174].mxu0 }
 0x64e   :  { %v13893_v52 = vadd.f32 %v13783_v43, %v7000_v46  ;;  %v7002_v25 = vpop.f32.mrb[175].mxu0  ;;  %7208 = vmax.xlane.f32.xlu0 %v13890_v35 }
 0x650   :  { %7210 = vmax.xlane.f32.xlu1 %v13893_v52 }
 0x653   :  { %v7005_v63 = vpop.f32.mrb[176].mxu0 }
 0x654   :  { %v13898_v32 = vadd.f32 %v13783_v43, %v7005_v63  ;;  %v7007_v41 = vpop.f32.mrb[177].mxu0 }
 0x655   :  { %v7008_v37 = vpop.f32.mrb[178].mxu0 }
 0x656   :  { %v13901_v54 = vadd.f32 %v13783_v43, %v7008_v37  ;;  %v7010_v29 = vpop.f32.mrb[179].mxu0  ;;  %7212 = vmax.xlane.f32.xlu0 %v13898_v32 }
 0x658   :  { %7214 = vmax.xlane.f32.xlu1 %v13901_v54 }
 0x65b   :  { %v7013_v1 = vpop.f32.mrb[180].mxu0 }
 0x65c   :  { %v13906_v5 = vadd.f32 %v13783_v43, %v7013_v1  ;;  %v7015_v59 = vpop.f32.mrb[181].mxu0 }
 0x65d   :  { %v7016_v48 = vpop.f32.mrb[182].mxu0 }
 0x65e   :  { %v13909_v8 = vadd.f32 %v13783_v43, %v7016_v48  ;;  %v7018_v53 = vpop.f32.mrb[183].mxu0  ;;  %7216 = vmax.xlane.f32.xlu0 %v13906_v5 }
 0x660   :  { %7218 = vmax.xlane.f32.xlu1 %v13909_v8 }
 0x663   :  { %v7021_v18 = vpop.f32.mrb[184].mxu0 }
 0x664   :  { %v13914_v36 = vadd.f32 %v13783_v43, %v7021_v18  ;;  %v7023_v10 = vpop.f32.mrb[185].mxu0 }
 0x665   :  { %v7024_v28 = vpop.f32.mrb[186].mxu0 }
 0x666   :  { %v13917_v6 = vadd.f32 %v13783_v43, %v7024_v28  ;;  %v7026_v13 = vpop.f32.mrb[187].mxu0  ;;  %7220 = vmax.xlane.f32.xlu0 %v13914_v36 }
 0x668   :  { %7222 = vmax.xlane.f32.xlu1 %v13917_v6 }
 0x66b   :  { %v7029_v55 = vpop.f32.mrb[188].mxu0 }
 0x66c   :  { %v13922_v38 = vadd.f32 %v13783_v43, %v7029_v55  ;;  %v7031_v4 = vpop.f32.mrb[189].mxu0 }
 0x66d   :  { %v7032_v31 = vpop.f32.mrb[190].mxu0 }
 0x66e   :  { %v13925_v47 = vadd.f32 %v13783_v43, %v7032_v31  ;;  %v7034_v61 = vpop.f32.mrb[191].mxu0  ;;  %7224 = vmax.xlane.f32.xlu0 %v13922_v38 }
 0x670   :  { %7226 = vmax.xlane.f32.xlu1 %v13925_v47 }
 0x673   :  { %v7037_v60 = vpop.f32.mrb[192].mxu0 }
 0x674   :  { %v13930_v39 = vadd.f32 %v13783_v43, %v7037_v60  ;;  %v7039_v45 = vpop.f32.mrb[193].mxu0 }
 0x675   :  { %v7040_v12 = vpop.f32.mrb[194].mxu0 }
 0x676   :  { %v13933_v11 = vadd.f32 %v13783_v43, %v7040_v12  ;;  %v7042_v40 = vpop.f32.mrb[195].mxu0  ;;  %7228 = vmax.xlane.f32.xlu0 %v13930_v39 }
 0x678   :  { %7230 = vmax.xlane.f32.xlu1 %v13933_v11 }
 0x67b   :  { %v7045_v51 = vpop.f32.mrb[196].mxu0 }
 0x67c   :  { %v13938_v33 = vadd.f32 %v13783_v43, %v7045_v51  ;;  %v7047_v27 = vpop.f32.mrb[197].mxu0 }
 0x67d   :  { %v7048_v23 = vpop.f32.mrb[198].mxu0 }
 0x67e   :  { %v13941_v22 = vadd.f32 %v13783_v43, %v7048_v23  ;;  %v7050_v44 = vpop.f32.mrb[199].mxu0  ;;  %7232 = vmax.xlane.f32.xlu0 %v13938_v33 }
 0x680   :  { %7234 = vmax.xlane.f32.xlu1 %v13941_v22 }
 0x683   :  { %v7053_v19 = vpop.f32.mrb[200].mxu0  ;;  %v7165_v46 = vpop.xlane.xlu0 %7164 }
 0x684   :  { %v13946_v25 = vadd.f32 %v13783_v43, %v7053_v19  ;;  %v7292_v63 = vsub.f32 %v13786_v57, %v7165_v46  ;;  %v7055_v41 = vpop.f32.mrb[201].mxu0 }
 0x685   :  { %v7056_v37 = vpop.f32.mrb[202].mxu0 }
 0x686   :  { %v7356_v29 = vmul.f32 1.442695, %v7292_v63  ;;  %v13950_v1 = vadd.f32 %v13783_v43, %v7056_v37  ;;  %v7058_v59 = vpop.f32.mrb[203].mxu0  ;;  %7236 = vmax.xlane.f32.xlu0 %v13946_v25 }
 0x687   :  { %v7167_v48 = vpop.xlane.xlu0 %7166 }
 0x688   :  { %9986 = vpow2.f32 %v7356_v29  ;;  %v7293_v53 = vsub.f32 %v13792_v21, %v7167_v48  ;;  %7238 = vmax.xlane.f32.xlu1 %v13950_v1 }
 0x68a   :  { %v7358_v18 = vmul.f32 1.442695, %v7293_v53 }
 0x68b   :  { %v7061_v10 = vpop.f32.mrb[204].mxu0  ;;  %v7169_v28 = vpop.xlane.xlu1 %7168 }
 0x68c   :  { %9988 = vpow2.f32 %v7358_v18  ;;  %v13956_v57 = vadd.f32 %v13783_v43, %v7061_v10  ;;  %v7294_v13 = vsub.f32 %v13798_v56, %v7169_v28  ;;  %v7063_v55 = vpop.f32.mrb[205].mxu0 }
 0x68d   :  { %v7064_v4 = vpop.f32.mrb[206].mxu0 }
 0x68e   :  { %v7360_v31 = vmul.f32 1.442695, %v7294_v13  ;;  %v13960_v61 = vadd.f32 %v13783_v43, %v7064_v4  ;;  %v7066_v60 = vpop.f32.mrb[207].mxu0  ;;  %7240 = vmax.xlane.f32.xlu0 %v13956_v57 }
 0x68f   :  { %v7171_v21 = vpop.xlane.xlu1 %7170 }
 0x690   :  { %9990 = vpow2.f32 %v7360_v31  ;;  %v7295_v45 = vsub.f32 %v13804_v17, %v7171_v21  ;;  %7242 = vmax.xlane.f32.xlu1 %v13960_v61 }
 0x692   :  { %v13965_v12 = vpop.eup %9986  ;;  %v7362_v40 = vmul.f32 1.442695, %v7295_v45 }
 0x693   :  { %v7069_v51 = vpop.f32.mrb[208].mxu0  ;;  %7484 = vadd.xlane.f32.xlu0 %v13965_v12  ;;  %v7173_v56 = vpop.xlane.xlu0 %7172 }
 0x694   :  { %9992 = vpow2.f32 %v7362_v40  ;;  %v13969_v27 = vadd.f32 %v13783_v43, %v7069_v51  ;;  %v7296_v23 = vsub.f32 %v13810_v3, %v7173_v56  ;;  %v7071_v44 = vpop.f32.mrb[209].mxu0 }
 0x695   :  { %v7072_v19 = vpop.f32.mrb[210].mxu0  ;;  %v7175_v46 = vpop.xlane.xlu1 %7174 }
 0x696   :  { %v13972_v63 = vpop.eup %9988  ;;  %v7364_v17 = vmul.f32 1.442695, %v7296_v23  ;;  %v7297_v41 = vsub.f32 %v13814_v2, %v7175_v46  ;;  %v7074_v37 = vpop.f32.mrb[211].mxu0  ;;  %v13978_v59 = vadd.f32 %v13783_v43, %v7072_v19 }
 0x697   :  { %7244 = vmax.xlane.f32.xlu0 %v13969_v27  ;;  %7486 = vadd.xlane.f32.xlu1 %v13972_v63 }
 0x698   :  { %9994 = vpow2.f32 %v7364_v17  ;;  %v7366_v29 = vmul.f32 1.442695, %v7297_v41 }
 0x69a   :  { %v13980_v48 = vpop.eup %9990  ;;  %9996 = vpow2.f32 %v7366_v29 }
 0x69b   :  { %v7077_v3 = vpop.f32.mrb[212].mxu0  ;;  %7488 = vadd.xlane.f32.xlu0 %v13980_v48  ;;  %7246 = vmax.xlane.f32.xlu1 %v13978_v59  ;;  %v7177_v53 = vpop.xlane.xlu0 %7176 }
 0x69c   :  { %v13985_v2 = vadd.f32 %v13783_v43, %v7077_v3  ;;  %v7298_v18 = vsub.f32 %v13822_v62, %v7177_v53  ;;  %v7079_v10 = vpop.f32.mrb[213].mxu0 }
 0x69d   :  { %v7080_v28 = vpop.f32.mrb[214].mxu0  ;;  %v7179_v13 = vpop.xlane.xlu1 %7178 }
 0x69e   :  { %v13988_v55 = vpop.eup %9992  ;;  %v7368_v4 = vmul.f32 1.442695, %v7298_v18  ;;  %v7299_v31 = vsub.f32 %v13826_v30, %v7179_v13  ;;  %v7082_v60 = vpop.f32.mrb[215].mxu0  ;;  %v13994_v45 = vadd.f32 %v13783_v43, %v7080_v28 }
 0x69f   :  { %7248 = vmax.xlane.f32.xlu0 %v13985_v2  ;;  %7490 = vadd.xlane.f32.xlu1 %v13988_v55 }
 0x6a0   :  { %9998 = vpow2.f32 %v7368_v4  ;;  %v7370_v21 = vmul.f32 1.442695, %v7299_v31 }
 0x6a2   :  { %v13996_v40 = vpop.eup %9994  ;;  %10000 = vpow2.f32 %v7370_v21 }
 0x6a3   :  { %v7085_v62 = vpop.f32.mrb[216].mxu0  ;;  %7250 = vmax.xlane.f32.xlu1 %v13994_v45  ;;  %7492 = vadd.xlane.f32.xlu0 %v13996_v40  ;;  %v7181_v51 = vpop.xlane.xlu0 %7180 }
 0x6a4   :  { %v14001_v30 = vadd.f32 %v13783_v43, %v7085_v62  ;;  %v7300_v56 = vsub.f32 %v13834_v42, %v7181_v51  ;;  %v7087_v23 = vpop.f32.mrb[217].mxu0  ;;  %v14004_v46 = vpop.eup %9996 }
 0x6a5   :  { %v7088_v44 = vpop.f32.mrb[218].mxu0  ;;  %v7183_v19 = vpop.xlane.xlu1 %7182 }
 0x6a6   :  { %v7372_v17 = vmul.f32 1.442695, %v7300_v56  ;;  %v7301_v41 = vsub.f32 %v13837_v0, %v7183_v19  ;;  %v7090_v37 = vpop.f32.mrb[219].mxu0  ;;  %v14010_v3 = vadd.f32 %v13783_v43, %v7088_v44 }
 0x6a7   :  { %7494 = vadd.xlane.f32.xlu1 %v14004_v46  ;;  %7252 = vmax.xlane.f32.xlu0 %v14001_v30 }
 0x6a8   :  { %10002 = vpow2.f32 %v7372_v17  ;;  %v7374_v29 = vmul.f32 1.442695, %v7301_v41 }
 0x6aa   :  { %v14012_v53 = vpop.eup %9998  ;;  %10004 = vpow2.f32 %v7374_v29 }
 0x6ab   :  { %v7093_v42 = vpop.f32.mrb[220].mxu0  ;;  %7254 = vmax.xlane.f32.xlu1 %v14010_v3  ;;  %7496 = vadd.xlane.f32.xlu0 %v14012_v53  ;;  %v7185_v18 = vpop.xlane.xlu0 %7184 }
 0x6ac   :  { %v14017_v0 = vadd.f32 %v13783_v43, %v7093_v42  ;;  %v7302_v10 = vsub.f32 %v13842_v34, %v7185_v18  ;;  %v7095_v28 = vpop.f32.mrb[221].mxu0  ;;  %v14020_v31 = vpop.eup %10000 }
 0x6ad   :  { %v7096_v13 = vpop.f32.mrb[222].mxu0  ;;  %v7187_v4 = vpop.xlane.xlu1 %7186 }
 0x6ae   :  { %v7376_v60 = vmul.f32 1.442695, %v7302_v10  ;;  %v7303_v21 = vsub.f32 %v13845_v26, %v7187_v4  ;;  %v7098_v62 = vpop.f32.mrb[223].mxu0  ;;  %v14026_v56 = vadd.f32 %v13783_v43, %v7096_v13 }
 0x6af   :  { %7498 = vadd.xlane.f32.xlu1 %v14020_v31  ;;  %7256 = vmax.xlane.f32.xlu0 %v14017_v0 }
 0x6b0   :  { %10006 = vpow2.f32 %v7376_v60  ;;  %v7378_v51 = vmul.f32 1.442695, %v7303_v21 }
 0x6b2   :  { %v14028_v23 = vpop.eup %10002  ;;  %10008 = vpow2.f32 %v7378_v51 }
 0x6b3   :  { %v7101_v34 = vpop.f32.mrb[224].mxu0  ;;  %7258 = vmax.xlane.f32.xlu1 %v14026_v56  ;;  %7500 = vadd.xlane.f32.xlu0 %v14028_v23  ;;  %v7189_v44 = vpop.xlane.xlu0 %7188 }
 0x6b4   :  { %v14033_v26 = vadd.f32 %v13783_v43, %v7101_v34  ;;  %v7304_v19 = vsub.f32 %v13850_v20, %v7189_v44  ;;  %v7103_v17 = vpop.f32.mrb[225].mxu0  ;;  %v14036_v29 = vpop.eup %10004 }
 0x6b5   :  { %v7104_v41 = vpop.f32.mrb[226].mxu0  ;;  %v7191_v37 = vpop.xlane.xlu1 %7190 }
 0x6b6   :  { %v7380_v42 = vmul.f32 1.442695, %v7304_v19  ;;  %v7305_v18 = vsub.f32 %v13853_v9, %v7191_v37  ;;  %v7106_v10 = vpop.f32.mrb[227].mxu0  ;;  %v14042_v13 = vadd.f32 %v13783_v43, %v7104_v41 }
 0x6b7   :  { %7502 = vadd.xlane.f32.xlu1 %v14036_v29  ;;  %7260 = vmax.xlane.f32.xlu0 %v14033_v26 }
 0x6b8   :  { %10010 = vpow2.f32 %v7380_v42  ;;  %v7382_v28 = vmul.f32 1.442695, %v7305_v18 }
 0x6ba   :  { %v14044_v4 = vpop.eup %10006  ;;  %10012 = vpow2.f32 %v7382_v28 }
 0x6bb   :  { %v7109_v20 = vpop.f32.mrb[228].mxu0  ;;  %7262 = vmax.xlane.f32.xlu1 %v14042_v13  ;;  %7504 = vadd.xlane.f32.xlu0 %v14044_v4  ;;  %v7193_v60 = vpop.xlane.xlu0 %7192 }
 0x6bc   :  { %v14049_v9 = vadd.f32 %v13783_v43, %v7109_v20  ;;  %v7306_v21 = vsub.f32 %v13858_v49, %v7193_v60  ;;  %v7111_v62 = vpop.f32.mrb[229].mxu0  ;;  %v14052_v44 = vpop.eup %10008 }
 0x6bd   :  { %v7112_v51 = vpop.f32.mrb[230].mxu0  ;;  %v7195_v34 = vpop.xlane.xlu1 %7194 }
 0x6be   :  { %v7384_v19 = vmul.f32 1.442695, %v7306_v21  ;;  %v7307_v17 = vsub.f32 %v13861_v15, %v7195_v34  ;;  %v7114_v41 = vpop.f32.mrb[231].mxu0  ;;  %v14058_v42 = vadd.f32 %v13783_v43, %v7112_v51 }
 0x6bf   :  { %7506 = vadd.xlane.f32.xlu1 %v14052_v44  ;;  %7264 = vmax.xlane.f32.xlu0 %v14049_v9 }
 0x6c0   :  { %10014 = vpow2.f32 %v7384_v19  ;;  %v7386_v37 = vmul.f32 1.442695, %v7307_v17 }
 0x6c2   :  { %v14060_v18 = vpop.eup %10010  ;;  %10016 = vpow2.f32 %v7386_v37 }
 0x6c3   :  { %v7117_v49 = vpop.f32.mrb[232].mxu0  ;;  %7266 = vmax.xlane.f32.xlu1 %v14058_v42  ;;  %7508 = vadd.xlane.f32.xlu0 %v14060_v18  ;;  %v7197_v10 = vpop.xlane.xlu0 %7196 }
 0x6c4   :  { %v14065_v15 = vadd.f32 %v13783_v43, %v7117_v49  ;;  %v7308_v28 = vsub.f32 %v13866_v50, %v7197_v10  ;;  %v7119_v20 = vpop.f32.mrb[233].mxu0  ;;  %v14068_v62 = vpop.eup %10012 }
 0x6c5   :  { %v7120_v60 = vpop.f32.mrb[234].mxu0  ;;  %v7199_v21 = vpop.xlane.xlu1 %7198  ;;  %15389 = vst [vmem:[#allocation70_spill] sm:$0xff] %v14068_v62 }
 0x6c6   :  { %v7388_v51 = vmul.f32 1.442695, %v7308_v28  ;;  %v7309_v34 = vsub.f32 %v13869_v58, %v7199_v21  ;;  %v7122_v19 = vpop.f32.mrb[235].mxu0  ;;  %v14074_v41 = vadd.f32 %v13783_v43, %v7120_v60 }
 0x6c7   :  { %7510 = vadd.xlane.f32.xlu1 %v14068_v62  ;;  %7268 = vmax.xlane.f32.xlu0 %v14065_v15 }
 0x6c8   :  { %10018 = vpow2.f32 %v7388_v51  ;;  %v7390_v17 = vmul.f32 1.442695, %v7309_v34 }
 0x6ca   :  { %v14076_v37 = vpop.eup %10014  ;;  %10020 = vpow2.f32 %v7390_v17 }
 0x6cb   :  { %15390 = vst [vmem:[#allocation72_spill] sm:$0xff] %v14076_v37  ;;  %v7125_v50 = vpop.f32.mrb[236].mxu0  ;;  %7270 = vmax.xlane.f32.xlu1 %v14074_v41  ;;  %7512 = vadd.xlane.f32.xlu0 %v14076_v37  ;;  %v7201_v49 = vpop.xlane.xlu0 %7200 }
 0x6cc   :  { %v14081_v58 = vadd.f32 %v13783_v43, %v7125_v50  ;;  %v7310_v10 = vsub.f32 %v13874_v16, %v7201_v49  ;;  %v7127_v28 = vpop.f32.mrb[237].mxu0  ;;  %v14084_v51 = vpop.eup %10016 }
 0x6cd   :  { %v7128_v20 = vpop.f32.mrb[238].mxu0  ;;  %v7203_v21 = vpop.xlane.xlu1 %7202  ;;  %15391 = vst [vmem:[#allocation73_spill] sm:$0xff] %v14084_v51 }
 0x6ce   :  { %v7392_v60 = vmul.f32 1.442695, %v7310_v10  ;;  %v7311_v34 = vsub.f32 %v13877_v24, %v7203_v21  ;;  %v7130_v19 = vpop.f32.mrb[239].mxu0  ;;  %v14090_v50 = vadd.f32 %v13783_v43, %v7128_v20 }
 0x6cf   :  { %7514 = vadd.xlane.f32.xlu1 %v14084_v51  ;;  %7272 = vmax.xlane.f32.xlu0 %v14081_v58 }
 0x6d0   :  { %10022 = vpow2.f32 %v7392_v60  ;;  %v7394_v17 = vmul.f32 1.442695, %v7311_v34  ;;  %15392 = vst [vmem:[#allocation76_spill] sm:$0xff] %v14090_v50 }
 0x6d2   :  { %v14092_v37 = vpop.eup %10018  ;;  %10024 = vpow2.f32 %v7394_v17 }
 0x6d3   :  { %15393 = vst [vmem:[#allocation79_spill] sm:$0xff] %v14092_v37  ;;  %v7133_v16 = vpop.f32.mrb[240].mxu0  ;;  %7274 = vmax.xlane.f32.xlu1 %v14090_v50  ;;  %7516 = vadd.xlane.f32.xlu0 %v14092_v37  ;;  %v7205_v19 = vpop.xlane.xlu0 %7204 }
 0x6d4   :  { %v14097_v24 = vadd.f32 %v13783_v43, %v7133_v16  ;;  %v7135_v49 = vpop.f32.mrb[241].mxu0  ;;  %v14099_v28 = vpop.eup %10020 }
 0x6d5   :  { %v7136_v10 = vpop.f32.mrb[242].mxu0  ;;  %15395 = vst [vmem:[#allocation78_spill] sm:$0xff] %v14099_v28 }
 0x6d6   :  { %15394 = vst [vmem:[#allocation75_spill] sm:$0xff] %v14097_v24  ;;  %v7138_v21 = vpop.f32.mrb[243].mxu0  ;;  %v14104_v20 = vadd.f32 %v13783_v43, %v7136_v10  ;;  %v7312_v10 = vsub.f32 %v13882_v14, %v7205_v19 }
 0x6d7   :  { %7518 = vadd.xlane.f32.xlu1 %v14099_v28  ;;  %7276 = vmax.xlane.f32.xlu0 %v14097_v24  ;;  %v7207_v28 = vpop.xlane.xlu1 %7206 }
 0x6d8   :  { %15396 = vst [vmem:[#allocation80_spill] sm:$0xff] %v14104_v20  ;;  %v7396_v24 = vmul.f32 1.442695, %v7312_v10 }
 0x6da   :  { %v14106_v60 = vpop.eup %10022  ;;  %10026 = vpow2.f32 %v7396_v24 }
 0x6db   :  { %15397 = vst [vmem:[#allocation81_spill] sm:$0xff] %v14106_v60  ;;  %v7141_v34 = vpop.f32.mrb[244].mxu0  ;;  %7278 = vmax.xlane.f32.xlu1 %v14104_v20  ;;  %7520 = vadd.xlane.f32.xlu0 %v14106_v60  ;;  %v7209_v51 = vpop.xlane.xlu0 %7208  ;;  %v7313_v20 = vsub.f32 %v13885_v7, %v7207_v28 }
 0x6dc   :  { %v14111_v17 = vadd.f32 %v13783_v43, %v7141_v34  ;;  %v7143_v16 = vpop.f32.mrb[245].mxu0  ;;  %v14113_v21 = vpop.eup %10024 }
 0x6dd   :  { %v7144_v49 = vpop.f32.mrb[246].mxu0  ;;  %15399 = vst [vmem:[#allocation87_spill] sm:$0xff] %v14113_v21  ;;  %v7211_v34 = vpop.xlane.xlu1 %7210  ;;  %v7314_v16 = vsub.f32 %v13890_v35, %v7209_v51 }
 0x6de   :  { %15398 = vst [vmem:[#allocation84_spill] sm:$0xff] %v14111_v17  ;;  %v7146_v37 = vpop.f32.mrb[247].mxu0  ;;  %v14120_v60 = vadd.f32 %v13783_v43, %v7144_v49 }
 0x6df   :  { %7522 = vadd.xlane.f32.xlu1 %v14113_v21  ;;  %7280 = vmax.xlane.f32.xlu0 %v14111_v17  ;;  %v7398_v21 = vmul.f32 1.442695, %v7313_v20  ;;  %v7315_v17 = vsub.f32 %v13893_v52, %v7211_v34  ;;  %v7400_v35 = vmul.f32 1.442695, %v7314_v16 }
 0x6e1   :  { %10028 = vpow2.f32 %v7398_v21 }
 0x6e2   :  { %10030 = vpow2.f32 %v7400_v35 }
 0x6e3   :  { %v7149_v50 = vpop.f32.mrb[248].mxu0  ;;  %7282 = vmax.xlane.f32.xlu1 %v14120_v60  ;;  %v7213_v14 = vpop.xlane.xlu0 %7212 }
 0x6e4   :  { %v14125_v37 = vadd.f32 %v13783_v43, %v7149_v50  ;;  %v7151_v19 = vpop.f32.mrb[249].mxu0  ;;  %v7316_v51 = vsub.f32 %v13898_v32, %v7213_v14  ;;  %v7402_v50 = vmul.f32 1.442695, %v7315_v17 }
 0x6e5   :  { %v7152_v62 = vpop.f32.mrb[250].mxu0  ;;  %v7215_v28 = vpop.xlane.xlu1 %7214 }
 0x6e6   :  { %v14129_v7 = vadd.f32 %v13783_v43, %v7152_v62  ;;  %v7154_v49 = vpop.f32.mrb[251].mxu0  ;;  %7284 = vmax.xlane.f32.xlu0 %v14125_v37  ;;  %v7317_v20 = vsub.f32 %v13901_v54, %v7215_v28  ;;  %v7404_v52 = vmul.f32 1.442695, %v7316_v51  ;;  %10032 = vpow2.f32 %v7402_v50  ;;  %v14145_v28 = vpop.eup %10026 }
 0x6e8   :  { %7286 = vmax.xlane.f32.xlu1 %v14129_v7  ;;  %v7406_v24 = vmul.f32 1.442695, %v7317_v20  ;;  %10034 = vpow2.f32 %v7404_v52 }
 0x6ea   :  { %10036 = vpow2.f32 %v7406_v24 }
 0x6eb   :  { %v7157_v10 = vpop.f32.mrb[252].mxu0  ;;  %v7217_v34 = vpop.xlane.xlu0 %7216 }
 0x6ec   :  { %v14136_v62 = vadd.f32 %v13783_v43, %v7157_v10  ;;  %v7318_v19 = vsub.f32 %v13906_v5, %v7217_v34  ;;  %v7159_v49 = vpop.f32.mrb[253].mxu0  ;;  %v14148_v35 = vpop.eup %10028 }
 0x6ed   :  { %v7160_v16 = vpop.f32.mrb[254].mxu0  ;;  %v7219_v32 = vpop.xlane.xlu1 %7218 }
 0x6ee   :  { %v14140_v14 = vadd.f32 %v13783_v43, %v7160_v16  ;;  %v7319_v17 = vsub.f32 %v13909_v8, %v7219_v32  ;;  %v7162_v54 = vpop.f32.mrb[255].mxu0  ;;  %7288 = vmax.xlane.f32.xlu0 %v14136_v62  ;;  %v7408_v21 = vmul.f32 1.442695, %v7318_v19  ;;  %v14152_v8 = vpop.eup %10030 }
 0x6f0   :  { %7290 = vmax.xlane.f32.xlu1 %v14140_v14  ;;  %v7410_v5 = vmul.f32 1.442695, %v7319_v17  ;;  %10038 = vpow2.f32 %v7408_v21  ;;  %v14156_v10 = vpop.eup %10032 }
 0x6f2   :  { %7524 = vadd.xlane.f32.xlu0 %v14145_v28  ;;  %10040 = vpow2.f32 %v7410_v5  ;;  %v14159_v19 = vpop.eup %10034 }
 0x6f3   :  { %v7221_v43 = vpop.xlane.xlu0 %7220 }
 0x6f4   :  { %v7320_v51 = vsub.f32 %v13914_v36, %v7221_v43  ;;  %7526 = vadd.xlane.f32.xlu1 %v14148_v35  ;;  %v14162_v36 = vpop.eup %10036 }
 0x6f5   :  { %v7223_v50 = vpop.xlane.xlu1 %7222 }
 0x6f6   :  { %v7412_v20 = vmul.f32 1.442695, %v7320_v51  ;;  %v7321_v52 = vsub.f32 %v13917_v6, %v7223_v50  ;;  %7528 = vadd.xlane.f32.xlu0 %v14152_v8 }
 0x6f8   :  { %10042 = vpow2.f32 %v7412_v20  ;;  %v7414_v34 = vmul.f32 1.442695, %v7321_v52  ;;  %7530 = vadd.xlane.f32.xlu1 %v14156_v10 }
 0x6fa   :  { %10044 = vpow2.f32 %v7414_v34  ;;  %7532 = vadd.xlane.f32.xlu0 %v14159_v19  ;;  %v14166_v6 = vpop.eup %10038 }
 0x6fb   :  { %v7225_v49 = vpop.xlane.xlu0 %7224 }
 0x6fc   :  { %v7322_v24 = vsub.f32 %v13922_v38, %v7225_v49  ;;  %7534 = vadd.xlane.f32.xlu1 %v14162_v36  ;;  %v14170_v54 = vpop.eup %10040 }
 0x6fd   :  { %v7227_v16 = vpop.xlane.xlu1 %7226 }
 0x6fe   :  { %v7416_v32 = vmul.f32 1.442695, %v7322_v24  ;;  %v7323_v17 = vsub.f32 %v13925_v47, %v7227_v16  ;;  %7536 = vadd.xlane.f32.xlu0 %v14166_v6 }
 0x700   :  { %10046 = vpow2.f32 %v7416_v32  ;;  %v7418_v21 = vmul.f32 1.442695, %v7323_v17  ;;  %7538 = vadd.xlane.f32.xlu1 %v14170_v54 }
 0x702   :  { %v14173_v5 = vpop.eup %10042  ;;  %10048 = vpow2.f32 %v7418_v21 }
 0x703   :  { %7540 = vadd.xlane.f32.xlu0 %v14173_v5  ;;  %v7229_v38 = vpop.xlane.xlu0 %7228 }
 0x704   :  { %v14176_v43 = vpop.eup %10044  ;;  %v7324_v51 = vsub.f32 %v13930_v39, %v7229_v38 }
 0x705   :  { %v7231_v50 = vpop.xlane.xlu1 %7230  ;;  %7542 = vadd.xlane.f32.xlu1 %v14176_v43 }
 0x706   :  { %v7420_v47 = vmul.f32 1.442695, %v7324_v51  ;;  %v7325_v20 = vsub.f32 %v13933_v11, %v7231_v50 }
 0x708   :  { %10050 = vpow2.f32 %v7420_v47  ;;  %v7422_v52 = vmul.f32 1.442695, %v7325_v20 }
 0x70a   :  { %v14181_v34 = vpop.eup %10046  ;;  %10052 = vpow2.f32 %v7422_v52 }
 0x70b   :  { %7544 = vadd.xlane.f32.xlu0 %v14181_v34  ;;  %v7233_v49 = vpop.xlane.xlu0 %7232 }
 0x70c   :  { %v14184_v24 = vpop.eup %10048  ;;  %v7326_v16 = vsub.f32 %v13938_v33, %v7233_v49 }
 0x70d   :  { %v7235_v32 = vpop.xlane.xlu1 %7234  ;;  %7546 = vadd.xlane.f32.xlu1 %v14184_v24 }
 0x70e   :  { %v7424_v39 = vmul.f32 1.442695, %v7326_v16  ;;  %v7327_v17 = vsub.f32 %v13941_v22, %v7235_v32 }
 0x710   :  { %10054 = vpow2.f32 %v7424_v39  ;;  %v7426_v11 = vmul.f32 1.442695, %v7327_v17 }
 0x712   :  { %v14189_v21 = vpop.eup %10050  ;;  %10056 = vpow2.f32 %v7426_v11 }
 0x713   :  { %7548 = vadd.xlane.f32.xlu0 %v14189_v21  ;;  %v7237_v38 = vpop.xlane.xlu0 %7236 }
 0x714   :  { %v14192_v51 = vpop.eup %10052  ;;  %v7328_v50 = vsub.f32 %v13946_v25, %v7237_v38 }
 0x715   :  { %v7239_v47 = vpop.xlane.xlu1 %7238  ;;  %7550 = vadd.xlane.f32.xlu1 %v14192_v51 }
 0x716   :  { %v7428_v33 = vmul.f32 1.442695, %v7328_v50  ;;  %v7329_v20 = vsub.f32 %v13950_v1, %v7239_v47 }
 0x718   :  { %10058 = vpow2.f32 %v7428_v33  ;;  %v7430_v22 = vmul.f32 1.442695, %v7329_v20 }
 0x71a   :  { %v14197_v52 = vpop.eup %10054  ;;  %10060 = vpow2.f32 %v7430_v22 }
 0x71b   :  { %7552 = vadd.xlane.f32.xlu0 %v14197_v52  ;;  %v7241_v49 = vpop.xlane.xlu0 %7240 }
 0x71c   :  { %v14200_v16 = vpop.eup %10056  ;;  %v7330_v32 = vsub.f32 %v13956_v57, %v7241_v49 }
 0x71d   :  { %v7243_v39 = vpop.xlane.xlu1 %7242  ;;  %7554 = vadd.xlane.f32.xlu1 %v14200_v16 }
 0x71e   :  { %v7432_v25 = vmul.f32 1.442695, %v7330_v32  ;;  %v7331_v17 = vsub.f32 %v13960_v61, %v7243_v39 }
 0x720   :  { %10062 = vpow2.f32 %v7432_v25  ;;  %v7434_v1 = vmul.f32 1.442695, %v7331_v17  ;;  %v7485_v11 = vpop.xlane.xlu0 %7484 }
 0x721   :  { %10064 = vrcp.f32 %v7485_v11 }
 0x722   :  { %v14205_v38 = vpop.eup %10058  ;;  %10066 = vpow2.f32 %v7434_v1 }
 0x723   :  { %7556 = vadd.xlane.f32.xlu0 %v14205_v38 }
 0x724   :  { %v14208_v50 = vpop.eup %10060  ;;  %v7487_v47 = vpop.xlane.xlu1 %7486 }
 0x725   :  { %v7245_v33 = vpop.xlane.xlu0 %7244  ;;  %10068 = vrcp.f32 %v7487_v47  ;;  %7558 = vadd.xlane.f32.xlu1 %v14208_v50 }
 0x726   :  { %v7332_v57 = vsub.f32 %v13969_v27, %v7245_v33 }
 0x728   :  { %v7436_v20 = vmul.f32 1.442695, %v7332_v57  ;;  %v7247_v61 = vpop.xlane.xlu1 %7246 }
 0x729   :  { %v7489_v22 = vpop.xlane.xlu0 %7488  ;;  %v7333_v49 = vsub.f32 %v13978_v59, %v7247_v61 }
 0x72a   :  { %10070 = vpow2.f32 %v7436_v20  ;;  %v14213_v32 = vpop.eup %10062 }
 0x72b   :  { %10072 = vrcp.f32 %v7489_v22  ;;  %v10065_v39 = vpop.eup %10064  ;;  %v7438_v25 = vmul.f32 1.442695, %v7333_v49  ;;  %7560 = vadd.xlane.f32.xlu0 %v14213_v32 }
 0x72c   :  { %v14216_v17 = vpop.eup %10066  ;;  %v7676_v1 = vmul.f32 %v10065_v39, %v13965_v12  ;;  %v7491_v27 = vpop.xlane.xlu1 %7490 }
 0x72d   :  { %v7249_v11 = vpop.xlane.xlu0 %7248  ;;  %10074 = vpow2.f32 %v7438_v25  ;;  %7562 = vadd.xlane.f32.xlu1 %v14216_v17 }
 0x72e   :  { %v7334_v47 = vsub.f32 %v13985_v2, %v7249_v11  ;;  %7740 = vst [vmem:[%s14574_s5] sm:$0xff] %v7676_v1  ;;  %10076 = vrcp.f32 %v7491_v27 }
 0x72f   :  { %v10069_v59 = vpop.eup %10068 }
 0x730   :  { %v7440_v33 = vmul.f32 1.442695, %v7334_v47  ;;  %v7677_v57 = vmul.f32 %v10069_v59, %v13972_v63  ;;  %v7251_v20 = vpop.xlane.xlu1 %7250 }
 0x731   :  { %v7493_v61 = vpop.xlane.xlu0 %7492  ;;  %v7335_v12 = vsub.f32 %v13994_v45, %v7251_v20 }
 0x732   :  { %10078 = vpow2.f32 %v7440_v33  ;;  %7741 = vst [vmem:[%s14574_s5 + $0x8] sm:$0xff] %v7677_v57 }
 0x733   :  { %10080 = vrcp.f32 %v7493_v61  ;;  %v7442_v22 = vmul.f32 1.442695, %v7335_v12 }
 0x734   :  { %v14229_v2 = vpop.eup %10070  ;;  %v7495_v39 = vpop.xlane.xlu1 %7494 }
 0x735   :  { %v10073_v49 = vpop.eup %10072  ;;  %7564 = vadd.xlane.f32.xlu0 %v14229_v2  ;;  %v7253_v25 = vpop.xlane.xlu0 %7252  ;;  %10082 = vpow2.f32 %v7442_v22 }
 0x736   :  { %v7678_v63 = vmul.f32 %v10073_v49, %v13980_v48  ;;  %v7336_v1 = vsub.f32 %v14001_v30, %v7253_v25  ;;  %10084 = vrcp.f32 %v7495_v39 }
 0x737   :  { %v14234_v45 = vpop.eup %10074 }
 0x738   :  { %7742 = vst [vmem:[%s14574_s5 + $0x10] sm:$0xff] %v7678_v63  ;;  %v7444_v27 = vmul.f32 1.442695, %v7336_v1  ;;  %v10077_v11 = vpop.eup %10076  ;;  %7566 = vadd.xlane.f32.xlu1 %v14234_v45  ;;  %v7255_v47 = vpop.xlane.xlu1 %7254 }
 0x739   :  { %v7497_v59 = vpop.xlane.xlu0 %7496  ;;  %v7679_v33 = vmul.f32 %v10077_v11, %v13988_v55  ;;  %v7337_v48 = vsub.f32 %v14010_v3, %v7255_v47 }
 0x73a   :  { %10086 = vpow2.f32 %v7444_v27 }
 0x73b   :  { %10088 = vrcp.f32 %v7497_v59  ;;  %7743 = vst [vmem:[%s14574_s5 + $0x18] sm:$0xff] %v7679_v33  ;;  %v7446_v57 = vmul.f32 1.442695, %v7337_v48 }
 0x73c   :  { %v14242_v30 = vpop.eup %10078  ;;  %v7499_v61 = vpop.xlane.xlu1 %7498 }
 0x73d   :  { %v10081_v20 = vpop.eup %10080  ;;  %7568 = vadd.xlane.f32.xlu0 %v14242_v30  ;;  %v7257_v12 = vpop.xlane.xlu0 %7256  ;;  %10090 = vpow2.f32 %v7446_v57 }
 0x73e   :  { %v7680_v22 = vmul.f32 %v10081_v20, %v13996_v40  ;;  %v7338_v55 = vsub.f32 %v14017_v0, %v7257_v12  ;;  %10092 = vrcp.f32 %v7499_v61 }
 0x73f   :  { %v14250_v3 = vpop.eup %10082 }
 0x740   :  { %7744 = vst [vmem:[%s14574_s5 + $0x20] sm:$0xff] %v7680_v22  ;;  %v7448_v49 = vmul.f32 1.442695, %v7338_v55  ;;  %v10085_v39 = vpop.eup %10084  ;;  %7570 = vadd.xlane.f32.xlu1 %v14250_v3  ;;  %v7259_v25 = vpop.xlane.xlu1 %7258 }
 0x741   :  { %v7501_v63 = vpop.xlane.xlu0 %7500  ;;  %v7681_v1 = vmul.f32 %v10085_v39, %v14004_v46  ;;  %v7339_v40 = vsub.f32 %v14026_v56, %v7259_v25 }
 0x742   :  { %10094 = vpow2.f32 %v7448_v49 }
 0x743   :  { %10096 = vrcp.f32 %v7501_v63  ;;  %7745 = vst [vmem:[%s14574_s5 + $0x28] sm:$0xff] %v7681_v1  ;;  %v7450_v27 = vmul.f32 1.442695, %v7339_v40 }
 0x744   :  { %v14258_v0 = vpop.eup %10086  ;;  %v7503_v47 = vpop.xlane.xlu1 %7502 }
 0x745   :  { %v10089_v11 = vpop.eup %10088  ;;  %7572 = vadd.xlane.f32.xlu0 %v14258_v0  ;;  %v7261_v59 = vpop.xlane.xlu0 %7260  ;;  %10098 = vpow2.f32 %v7450_v27 }
 0x746   :  { %v7682_v33 = vmul.f32 %v10089_v11, %v14012_v53  ;;  %v7340_v46 = vsub.f32 %v14033_v26, %v7261_v59  ;;  %10100 = vrcp.f32 %v7503_v47 }
 0x747   :  { %v14266_v56 = vpop.eup %10090 }
 0x748   :  { %7746 = vst [vmem:[%s14574_s5 + $0x30] sm:$0xff] %v7682_v33  ;;  %v7452_v48 = vmul.f32 1.442695, %v7340_v46  ;;  %v10093_v57 = vpop.eup %10092  ;;  %7574 = vadd.xlane.f32.xlu1 %v14266_v56  ;;  %v7263_v20 = vpop.xlane.xlu1 %7262 }
 0x749   :  { %v7505_v61 = vpop.xlane.xlu0 %7504  ;;  %v7683_v12 = vmul.f32 %v10093_v57, %v14020_v31  ;;  %v7341_v53 = vsub.f32 %v14042_v13, %v7263_v20 }
 0x74a   :  { %10102 = vpow2.f32 %v7452_v48 }
 0x74b   :  { %10104 = vrcp.f32 %v7505_v61  ;;  %7747 = vst [vmem:[%s14574_s5 + $0x38] sm:$0xff] %v7683_v12  ;;  %v7454_v22 = vmul.f32 1.442695, %v7341_v53 }
 0x74c   :  { %v14274_v26 = vpop.eup %10094  ;;  %v7507_v49 = vpop.xlane.xlu1 %7506 }
 0x74d   :  { %v10097_v55 = vpop.eup %10096  ;;  %7576 = vadd.xlane.f32.xlu0 %v14274_v26  ;;  %v7265_v39 = vpop.xlane.xlu0 %7264  ;;  %10106 = vpow2.f32 %v7454_v22 }
 0x74e   :  { %v7684_v25 = vmul.f32 %v10097_v55, %v14028_v23  ;;  %v7342_v31 = vsub.f32 %v14049_v9, %v7265_v39  ;;  %10108 = vrcp.f32 %v7507_v49 }
 0x74f   :  { %v14282_v13 = vpop.eup %10098 }
 0x750   :  { %7748 = vst [vmem:[%s14574_s5 + $0x40] sm:$0xff] %v7684_v25  ;;  %v7456_v63 = vmul.f32 1.442695, %v7342_v31  ;;  %v10101_v1 = vpop.eup %10100  ;;  %7578 = vadd.xlane.f32.xlu1 %v14282_v13  ;;  %v7267_v40 = vpop.xlane.xlu1 %7266 }
 0x751   :  { %v7509_v27 = vpop.xlane.xlu0 %7508  ;;  %v7685_v11 = vmul.f32 %v10101_v1, %v14036_v29  ;;  %v7343_v23 = vsub.f32 %v14058_v42, %v7267_v40 }
 0x752   :  { %10110 = vpow2.f32 %v7456_v63 }
 0x753   :  { %10112 = vrcp.f32 %v7509_v27  ;;  %7749 = vst [vmem:[%s14574_s5 + $0x48] sm:$0xff] %v7685_v11  ;;  %v7458_v47 = vmul.f32 1.442695, %v7343_v23  ;;  %v15400_v27 = vld [vmem:[#allocation70_spill] sm:$0xff] }
 0x754   :  { %v14290_v9 = vpop.eup %10102  ;;  %v7511_v33 = vpop.xlane.xlu1 %7510 }
 0x755   :  { %v10105_v59 = vpop.eup %10104  ;;  %7580 = vadd.xlane.f32.xlu0 %v14290_v9  ;;  %v7269_v46 = vpop.xlane.xlu0 %7268  ;;  %10114 = vpow2.f32 %v7458_v47 }
 0x756   :  { %v7686_v48 = vmul.f32 %v10105_v59, %v14044_v4  ;;  %v7344_v29 = vsub.f32 %v14065_v15, %v7269_v46  ;;  %10116 = vrcp.f32 %v7511_v33 }
 0x757   :  { %v14298_v42 = vpop.eup %10106 }
 0x758   :  { %7750 = vst [vmem:[%s14574_s5 + $0x50] sm:$0xff] %v7686_v48  ;;  %v7460_v57 = vmul.f32 1.442695, %v7344_v29  ;;  %v10109_v20 = vpop.eup %10108  ;;  %7582 = vadd.xlane.f32.xlu1 %v14298_v42  ;;  %v7271_v61 = vpop.xlane.xlu1 %7270  ;;  %v15402_v48 = vld [vmem:[#allocation72_spill] sm:$0xff] }
 0x759   :  { %v7513_v12 = vpop.xlane.xlu0 %7512  ;;  %v7687_v53 = vmul.f32 %v10109_v20, %v14052_v44  ;;  %v7345_v4 = vsub.f32 %v14074_v41, %v7271_v61 }
 0x75a   :  { %10118 = vpow2.f32 %v7460_v57  ;;  %v15403_v57 = vld [vmem:[#allocation75_spill] sm:$0xff] }
 0x75b   :  { %10120 = vrcp.f32 %v7513_v12  ;;  %7751 = vst [vmem:[%s14574_s5 + $0x58] sm:$0xff] %v7687_v53  ;;  %v7462_v22 = vmul.f32 1.442695, %v7345_v4 }
 0x75c   :  { %v14306_v15 = vpop.eup %10110  ;;  %v7515_v49 = vpop.xlane.xlu1 %7514 }
 0x75d   :  { %v10113_v55 = vpop.eup %10112  ;;  %7584 = vadd.xlane.f32.xlu0 %v14306_v15  ;;  %v7273_v39 = vpop.xlane.xlu0 %7272  ;;  %10122 = vpow2.f32 %v7462_v22 }
 0x75e   :  { %v7688_v25 = vmul.f32 %v10113_v55, %v14060_v18  ;;  %v7346_v44 = vsub.f32 %v14081_v58, %v7273_v39  ;;  %10124 = vrcp.f32 %v7515_v49  ;;  %v15401_v18 = vld [vmem:[#allocation76_spill] sm:$0xff]  ;;  %v15404_v55 = vld [vmem:[#allocation73_spill] sm:$0xff] }
 0x75f   :  { %v14314_v41 = vpop.eup %10114  ;;  %v15405_v39 = vld [vmem:[#allocation80_spill] sm:$0xff] }
 0x760   :  { %7752 = vst [vmem:[%s14574_s5 + $0x60] sm:$0xff] %v7688_v25  ;;  %v7464_v31 = vmul.f32 1.442695, %v7346_v44  ;;  %v10117_v63 = vpop.eup %10116  ;;  %7586 = vadd.xlane.f32.xlu1 %v14314_v41  ;;  %v7275_v1 = vpop.xlane.xlu1 %7274 }
 0x761   :  { %v7517_v40 = vpop.xlane.xlu0 %7516  ;;  %v7689_v11 = vmul.f32 %v10117_v63, %v15400_v27  ;;  %v7347_v23 = vsub.f32 %v15401_v18, %v7275_v1  ;;  %v15406_v27 = vld [vmem:[#allocation79_spill] sm:$0xff]  ;;  %v15407_v18 = vld [vmem:[#allocation84_spill] sm:$0xff] }
 0x762   :  { %10126 = vpow2.f32 %v7464_v31 }
 0x763   :  { %10128 = vrcp.f32 %v7517_v40  ;;  %7753 = vst [vmem:[%s14574_s5 + $0x68] sm:$0xff] %v7689_v11  ;;  %v7466_v47 = vmul.f32 1.442695, %v7347_v23 }
 0x764   :  { %v14322_v58 = vpop.eup %10118  ;;  %v7519_v33 = vpop.xlane.xlu1 %7518 }
 0x765   :  { %v10121_v59 = vpop.eup %10120  ;;  %7588 = vadd.xlane.f32.xlu0 %v14322_v58  ;;  %v7277_v46 = vpop.xlane.xlu0 %7276  ;;  %10130 = vpow2.f32 %v7466_v47 }
 0x766   :  { %v7690_v29 = vmul.f32 %v10121_v59, %v15402_v48  ;;  %v7348_v20 = vsub.f32 %v15403_v57, %v7277_v46  ;;  %10132 = vrcp.f32 %v7519_v33  ;;  %v15408_v48 = vld [vmem:[#allocation78_spill] sm:$0xff] }
 0x767   :  { %v14330_v61 = vpop.eup %10122 }
 0x768   :  { %7754 = vst [vmem:[%s14574_s5 + $0x70] sm:$0xff] %v7690_v29  ;;  %v7468_v12 = vmul.f32 1.442695, %v7348_v20  ;;  %v10125_v53 = vpop.eup %10124  ;;  %7590 = vadd.xlane.f32.xlu1 %v14330_v61  ;;  %v7279_v4 = vpop.xlane.xlu1 %7278 }
 0x769   :  { %v7521_v22 = vpop.xlane.xlu0 %7520  ;;  %v7691_v49 = vmul.f32 %v10125_v53, %v15404_v55  ;;  %v7349_v25 = vsub.f32 %v15405_v39, %v7279_v4  ;;  %v15409_v55 = vld [vmem:[#allocation81_spill] sm:$0xff] }
 0x76a   :  { %10134 = vpow2.f32 %v7468_v12 }
 0x76b   :  { %10136 = vrcp.f32 %v7521_v22  ;;  %7755 = vst [vmem:[%s14574_s5 + $0x78] sm:$0xff] %v7691_v49  ;;  %v7470_v31 = vmul.f32 1.442695, %v7349_v25 }
 0x76c   :  { %v14338_v44 = vpop.eup %10126  ;;  %v7523_v1 = vpop.xlane.xlu1 %7522 }
 0x76d   :  { %v10129_v63 = vpop.eup %10128  ;;  %7592 = vadd.xlane.f32.xlu0 %v14338_v44  ;;  %v7281_v40 = vpop.xlane.xlu0 %7280  ;;  %10138 = vpow2.f32 %v7470_v31 }
 0x76e   :  { %v7692_v11 = vmul.f32 %v10129_v63, %v15406_v27  ;;  %v7350_v23 = vsub.f32 %v15407_v18, %v7281_v40  ;;  %10140 = vrcp.f32 %v7523_v1 }
 0x76f   :  { %v14346_v47 = vpop.eup %10130 }
 0x770   :  { %7756 = vst [vmem:[%s14574_s5 + $0x80] sm:$0xff] %v7692_v11  ;;  %v7472_v59 = vmul.f32 1.442695, %v7350_v23  ;;  %v10133_v33 = vpop.eup %10132  ;;  %7594 = vadd.xlane.f32.xlu1 %v14346_v47  ;;  %v7283_v46 = vpop.xlane.xlu1 %7282 }
 0x771   :  { %v7693_v29 = vmul.f32 %v10133_v33, %v15408_v48  ;;  %v7351_v57 = vsub.f32 %v14120_v60, %v7283_v46 }
 0x772   :  { %10142 = vpow2.f32 %v7472_v59 }
 0x773   :  { %7757 = vst [vmem:[%s14574_s5 + $0x88] sm:$0xff] %v7693_v29  ;;  %v7474_v12 = vmul.f32 1.442695, %v7351_v57  ;;  %v7285_v53 = vpop.xlane.xlu0 %7284 }
 0x774   :  { %v14354_v20 = vpop.eup %10134  ;;  %v7352_v22 = vsub.f32 %v14125_v37, %v7285_v53  ;;  %v15410_v37 = vld [vmem:[#allocation87_spill] sm:$0xff] }
 0x775   :  { %v10137_v4 = vpop.eup %10136  ;;  %7596 = vadd.xlane.f32.xlu0 %v14354_v20  ;;  %10144 = vpow2.f32 %v7474_v12  ;;  %v7287_v39 = vpop.xlane.xlu1 %7286 }
 0x776   :  { %v7694_v49 = vmul.f32 %v10137_v4, %v15409_v55  ;;  %v7476_v25 = vmul.f32 1.442695, %v7352_v22  ;;  %v7353_v60 = vsub.f32 %v14129_v7, %v7287_v39 }
 0x777   :  { %v14363_v31 = vpop.eup %10138 }
 0x778   :  { %7758 = vst [vmem:[%s14574_s5 + $0x90] sm:$0xff] %v7694_v49  ;;  %v10141_v63 = vpop.eup %10140  ;;  %10146 = vpow2.f32 %v7476_v25  ;;  %v7478_v1 = vmul.f32 1.442695, %v7353_v60  ;;  %7598 = vadd.xlane.f32.xlu1 %v14363_v31 }
 0x779   :  { %v7695_v40 = vmul.f32 %v10141_v63, %v15410_v37 }
 0x77a   :  { %10148 = vpow2.f32 %v7478_v1 }
 0x77b   :  { %7759 = vst [vmem:[%s14574_s5 + $0x98] sm:$0xff] %v7695_v40  ;;  %v7289_v7 = vpop.xlane.xlu0 %7288 }
 0x77c   :  { %v14370_v27 = vpop.eup %10142  ;;  %v7354_v11 = vsub.f32 %v14136_v62, %v7289_v7 }
 0x77d   :  { %7600 = vadd.xlane.f32.xlu0 %v14370_v27  ;;  %v7291_v18 = vpop.xlane.xlu1 %7290 }
 0x77e   :  { %v7480_v23 = vmul.f32 1.442695, %v7354_v11  ;;  %v7355_v59 = vsub.f32 %v14140_v14, %v7291_v18 }
 0x77f   :  { %v14378_v33 = vpop.eup %10144  ;;  %v7525_v46 = vpop.xlane.xlu0 %7524 }
 0x780   :  { %10150 = vpow2.f32 %v7480_v23  ;;  %v7482_v48 = vmul.f32 1.442695, %v7355_v59  ;;  %7602 = vadd.xlane.f32.xlu1 %v14378_v33 }
 0x781   :  { %10152 = vrcp.f32 %v7525_v46  ;;  %v7527_v29 = vpop.xlane.xlu1 %7526 }
 0x782   :  { %v14381_v57 = vpop.eup %10146  ;;  %10154 = vpow2.f32 %v7482_v48 }
 0x783   :  { %10156 = vrcp.f32 %v7527_v29  ;;  %7604 = vadd.xlane.f32.xlu0 %v14381_v57  ;;  %v7529_v62 = vpop.xlane.xlu0 %7528 }
 0x784   :  { %v14384_v12 = vpop.eup %10148  ;;  %10158 = vrcp.f32 %v7529_v62 }
 0x785   :  { %7606 = vadd.xlane.f32.xlu1 %v14384_v12  ;;  %v7531_v14 = vpop.xlane.xlu1 %7530 }
 0x786   :  { %10160 = vrcp.f32 %v7531_v14 }
 0x787   :  { %v7533_v53 = vpop.xlane.xlu0 %7532 }
 0x788   :  { %10162 = vrcp.f32 %v7533_v53 }
 0x789   :  { %v7535_v4 = vpop.xlane.xlu1 %7534 }
 0x78a   :  { %v14387_v22 = vpop.eup %10150  ;;  %10164 = vrcp.f32 %v7535_v4 }
 0x78b   :  { %v10153_v55 = vpop.eup %10152  ;;  %7608 = vadd.xlane.f32.xlu0 %v14387_v22  ;;  %v7537_v49 = vpop.xlane.xlu0 %7536 }
 0x78c   :  { %v14390_v39 = vpop.eup %10154  ;;  %v7696_v25 = vmul.f32 %v10153_v55, %v14145_v28  ;;  %10166 = vrcp.f32 %v7537_v49 }
 0x78d   :  { %v10157_v60 = vpop.eup %10156  ;;  %7610 = vadd.xlane.f32.xlu1 %v14390_v39  ;;  %v7539_v63 = vpop.xlane.xlu1 %7538 }
 0x78e   :  { %v10159_v1 = vpop.eup %10158  ;;  %7760 = vst [vmem:[%s14574_s5 + $0xa0] sm:$0xff] %v7696_v25  ;;  %v7697_v37 = vmul.f32 %v10157_v60, %v14148_v35  ;;  %10168 = vrcp.f32 %v7539_v63 }
 0x78f   :  { %v7698_v40 = vmul.f32 %v10159_v1, %v14152_v8 }
 0x790   :  { %v10161_v7 = vpop.eup %10160  ;;  %7761 = vst [vmem:[%s14574_s5 + $0xa8] sm:$0xff] %v7697_v37  ;;  %v7541_v28 = vpop.xlane.xlu0 %7540 }
 0x791   :  { %7762 = vst [vmem:[%s14574_s5 + $0xb0] sm:$0xff] %v7698_v40  ;;  %v7699_v11 = vmul.f32 %v10161_v7, %v14156_v10  ;;  %10170 = vrcp.f32 %v7541_v28 }
 0x792   :  { %v10163_v18 = vpop.eup %10162  ;;  %v7543_v23 = vpop.xlane.xlu1 %7542 }
 0x793   :  { %7763 = vst [vmem:[%s14574_s5 + $0xb8] sm:$0xff] %v7699_v11  ;;  %v7700_v35 = vmul.f32 %v10163_v18, %v14159_v19  ;;  %10172 = vrcp.f32 %v7543_v23 }
 0x794   :  { %v10165_v8 = vpop.eup %10164 }
 0x795   :  { %7764 = vst [vmem:[%s14574_s5 + $0xc0] sm:$0xff] %v7700_v35  ;;  %v7701_v59 = vmul.f32 %v10165_v8, %v14162_v36 }
 0x796   :  { %v10167_v46 = vpop.eup %10166 }
 0x797   :  { %7765 = vst [vmem:[%s14574_s5 + $0xc8] sm:$0xff] %v7701_v59  ;;  %v7702_v10 = vmul.f32 %v10167_v46, %v14166_v6 }
 0x798   :  { %v10169_v48 = vpop.eup %10168  ;;  %v7545_v29 = vpop.xlane.xlu0 %7544 }
 0x799   :  { %7766 = vst [vmem:[%s14574_s5 + $0xd0] sm:$0xff] %v7702_v10  ;;  %v7703_v19 = vmul.f32 %v10169_v48, %v14170_v54  ;;  %10174 = vrcp.f32 %v7545_v29 }
 0x79a   :  { %v7547_v62 = vpop.xlane.xlu1 %7546 }
 0x79b   :  { %v10171_v14 = vpop.eup %10170  ;;  %7767 = vst [vmem:[%s14574_s5 + $0xd8] sm:$0xff] %v7703_v19  ;;  %10176 = vrcp.f32 %v7547_v62 }
 0x79c   :  { %v7704_v36 = vmul.f32 %v10171_v14, %v14173_v5 }
 0x79d   :  { %v10173_v53 = vpop.eup %10172 }
 0x79e   :  { %7768 = vst [vmem:[%s14574_s5 + $0xe0] sm:$0xff] %v7704_v36  ;;  %v7705_v6 = vmul.f32 %v10173_v53, %v14176_v43 }
 0x7a0   :  { %7769 = vst [vmem:[%s14574_s5 + $0xe8] sm:$0xff] %v7705_v6  ;;  %v7549_v54 = vpop.xlane.xlu0 %7548 }
 0x7a1   :  { %10178 = vrcp.f32 %v7549_v54 }
 0x7a2   :  { %v7551_v4 = vpop.xlane.xlu1 %7550 }
 0x7a3   :  { %v10175_v55 = vpop.eup %10174  ;;  %10180 = vrcp.f32 %v7551_v4 }
 0x7a4   :  { %v7706_v49 = vmul.f32 %v10175_v55, %v14181_v34 }
 0x7a5   :  { %v10177_v25 = vpop.eup %10176 }
 0x7a6   :  { %7770 = vst [vmem:[%s14574_s5 + $0xf0] sm:$0xff] %v7706_v49  ;;  %v7707_v5 = vmul.f32 %v10177_v25, %v14184_v24 }
 0x7a8   :  { %7771 = vst [vmem:[%s14574_s5 + $0xf8] sm:$0xff] %v7707_v5  ;;  %v7553_v43 = vpop.xlane.xlu0 %7552 }
 0x7a9   :  { %10182 = vrcp.f32 %v7553_v43 }
 0x7aa   :  { %v7555_v60 = vpop.xlane.xlu1 %7554 }
 0x7ab   :  { %v10179_v63 = vpop.eup %10178  ;;  %10184 = vrcp.f32 %v7555_v60 }
 0x7ac   :  { %v7708_v1 = vmul.f32 %v10179_v63, %v14189_v21 }
 0x7ad   :  { %v10181_v37 = vpop.eup %10180 }
 0x7ae   :  { %7772 = vst [vmem:[%s14574_s5 + $0x100] sm:$0xff] %v7708_v1  ;;  %v7709_v34 = vmul.f32 %v10181_v37, %v14192_v51 }
 0x7b0   :  { %7773 = vst [vmem:[%s14574_s5 + $0x108] sm:$0xff] %v7709_v34  ;;  %v7557_v24 = vpop.xlane.xlu0 %7556 }
 0x7b1   :  { %10186 = vrcp.f32 %v7557_v24 }
 0x7b2   :  { %v7559_v40 = vpop.xlane.xlu1 %7558 }
 0x7b3   :  { %v10183_v7 = vpop.eup %10182  ;;  %10188 = vrcp.f32 %v7559_v40 }
 0x7b4   :  { %v7710_v28 = vmul.f32 %v10183_v7, %v14197_v52 }
 0x7b5   :  { %v10185_v11 = vpop.eup %10184 }
 0x7b6   :  { %7774 = vst [vmem:[%s14574_s5 + $0x110] sm:$0xff] %v7710_v28  ;;  %v7711_v21 = vmul.f32 %v10185_v11, %v14200_v16 }
 0x7b8   :  { %7775 = vst [vmem:[%s14574_s5 + $0x118] sm:$0xff] %v7711_v21  ;;  %v7561_v51 = vpop.xlane.xlu0 %7560 }
 0x7b9   :  { %10190 = vrcp.f32 %v7561_v51 }
 0x7ba   :  { %v7563_v18 = vpop.xlane.xlu1 %7562 }
 0x7bb   :  { %v10187_v23 = vpop.eup %10186  ;;  %10192 = vrcp.f32 %v7563_v18 }
 0x7bc   :  { %v7712_v35 = vmul.f32 %v10187_v23, %v14205_v38 }
 0x7bd   :  { %v10189_v8 = vpop.eup %10188 }
 0x7be   :  { %7776 = vst [vmem:[%s14574_s5 + $0x120] sm:$0xff] %v7712_v35  ;;  %v7713_v52 = vmul.f32 %v10189_v8, %v14208_v50 }
 0x7c0   :  { %7777 = vst [vmem:[%s14574_s5 + $0x128] sm:$0xff] %v7713_v52 }
 0x7c2   :  { %v7565_v16 = vpop.xlane.xlu0 %7564 }
 0x7c3   :  { %10194 = vrcp.f32 %v7565_v16  ;;  %v10191_v59 = vpop.eup %10190 }
 0x7c4   :  { %v7714_v46 = vmul.f32 %v10191_v59, %v14213_v32 }
 0x7c5   :  { %v10193_v10 = vpop.eup %10192  ;;  %v7567_v48 = vpop.xlane.xlu1 %7566 }
 0x7c6   :  { %7778 = vst [vmem:[%s14574_s5 + $0x130] sm:$0xff] %v7714_v46  ;;  %v7715_v38 = vmul.f32 %v10193_v10, %v14216_v17  ;;  %10196 = vrcp.f32 %v7567_v48 }
 0x7c8   :  { %7779 = vst [vmem:[%s14574_s5 + $0x138] sm:$0xff] %v7715_v38 }
 0x7ca   :  { %v7569_v50 = vpop.xlane.xlu0 %7568 }
 0x7cb   :  { %10198 = vrcp.f32 %v7569_v50 }
 0x7cd   :  { %v10195_v29 = vpop.eup %10194  ;;  %v7571_v62 = vpop.xlane.xlu1 %7570 }
 0x7ce   :  { %v7716_v19 = vmul.f32 %v10195_v29, %v14229_v2  ;;  %10200 = vrcp.f32 %v7571_v62 }
 0x7d0   :  { %7780 = vst [vmem:[%s14574_s5 + $0x140] sm:$0xff] %v7716_v19  ;;  %v10197_v32 = vpop.eup %10196 }
 0x7d1   :  { %v7717_v14 = vmul.f32 %v10197_v32, %v14234_v45 }
 0x7d2   :  { %v7573_v17 = vpop.xlane.xlu0 %7572 }
 0x7d3   :  { %10202 = vrcp.f32 %v7573_v17  ;;  %7781 = vst [vmem:[%s14574_s5 + $0x148] sm:$0xff] %v7717_v14 }
 0x7d5   :  { %v10199_v36 = vpop.eup %10198  ;;  %v7575_v6 = vpop.xlane.xlu1 %7574 }
 0x7d6   :  { %v7718_v53 = vmul.f32 %v10199_v36, %v14242_v30  ;;  %10204 = vrcp.f32 %v7575_v6 }
 0x7d8   :  { %7782 = vst [vmem:[%s14574_s5 + $0x150] sm:$0xff] %v7718_v53  ;;  %v10201_v2 = vpop.eup %10200 }
 0x7d9   :  { %v7719_v54 = vmul.f32 %v10201_v2, %v14250_v3 }
 0x7da   :  { %v7577_v4 = vpop.xlane.xlu0 %7576 }
 0x7db   :  { %10206 = vrcp.f32 %v7577_v4  ;;  %7783 = vst [vmem:[%s14574_s5 + $0x158] sm:$0xff] %v7719_v54 }
 0x7dd   :  { %v10203_v45 = vpop.eup %10202  ;;  %v7579_v49 = vpop.xlane.xlu1 %7578 }
 0x7de   :  { %v7720_v55 = vmul.f32 %v10203_v45, %v14258_v0  ;;  %10208 = vrcp.f32 %v7579_v49 }
 0x7e0   :  { %7784 = vst [vmem:[%s14574_s5 + $0x160] sm:$0xff] %v7720_v55  ;;  %v10205_v30 = vpop.eup %10204 }
 0x7e1   :  { %v7721_v25 = vmul.f32 %v10205_v30, %v14266_v56 }
 0x7e2   :  { %v7581_v5 = vpop.xlane.xlu0 %7580 }
 0x7e3   :  { %10210 = vrcp.f32 %v7581_v5  ;;  %7785 = vst [vmem:[%s14574_s5 + $0x168] sm:$0xff] %v7721_v25 }
 0x7e5   :  { %v10207_v3 = vpop.eup %10206  ;;  %v7583_v60 = vpop.xlane.xlu1 %7582 }
 0x7e6   :  { %v7722_v43 = vmul.f32 %v10207_v3, %v14274_v26  ;;  %10212 = vrcp.f32 %v7583_v60 }
 0x7e8   :  { %7786 = vst [vmem:[%s14574_s5 + $0x170] sm:$0xff] %v7722_v43  ;;  %v10209_v0 = vpop.eup %10208 }
 0x7e9   :  { %v7723_v63 = vmul.f32 %v10209_v0, %v14282_v13 }
 0x7ea   :  { %v7585_v1 = vpop.xlane.xlu0 %7584 }
 0x7eb   :  { %10214 = vrcp.f32 %v7585_v1  ;;  %7787 = vst [vmem:[%s14574_s5 + $0x178] sm:$0xff] %v7723_v63 }
 0x7ed   :  { %v10211_v56 = vpop.eup %10210  ;;  %v7587_v34 = vpop.xlane.xlu1 %7586 }
 0x7ee   :  { %v7724_v37 = vmul.f32 %v10211_v56, %v14290_v9  ;;  %10216 = vrcp.f32 %v7587_v34 }
 0x7f0   :  { %7788 = vst [vmem:[%s14574_s5 + $0x180] sm:$0xff] %v7724_v37  ;;  %v10213_v26 = vpop.eup %10212 }
 0x7f1   :  { %v7725_v24 = vmul.f32 %v10213_v26, %v14298_v42 }
 0x7f2   :  { %v7589_v40 = vpop.xlane.xlu0 %7588 }
 0x7f3   :  { %10218 = vrcp.f32 %v7589_v40  ;;  %7789 = vst [vmem:[%s14574_s5 + $0x188] sm:$0xff] %v7725_v24 }
 0x7f5   :  { %v10215_v13 = vpop.eup %10214  ;;  %v7591_v28 = vpop.xlane.xlu1 %7590 }
 0x7f6   :  { %v7726_v7 = vmul.f32 %v10215_v13, %v14306_v15  ;;  %10220 = vrcp.f32 %v7591_v28 }
 0x7f8   :  { %7790 = vst [vmem:[%s14574_s5 + $0x190] sm:$0xff] %v7726_v7  ;;  %v10217_v9 = vpop.eup %10216 }
 0x7f9   :  { %v7727_v11 = vmul.f32 %v10217_v9, %v14314_v41 }
 0x7fa   :  { %v7593_v21 = vpop.xlane.xlu0 %7592 }
 0x7fb   :  { %10222 = vrcp.f32 %v7593_v21  ;;  %7791 = vst [vmem:[%s14574_s5 + $0x198] sm:$0xff] %v7727_v11 }
 0x7fd   :  { %v10219_v42 = vpop.eup %10218  ;;  %v7595_v18 = vpop.xlane.xlu1 %7594 }
 0x7fe   :  { %v7728_v51 = vmul.f32 %v10219_v42, %v14322_v58  ;;  %10224 = vrcp.f32 %v7595_v18 }
 0x800   :  { %7792 = vst [vmem:[%s14574_s5 + $0x1a0] sm:$0xff] %v7728_v51  ;;  %v10221_v15 = vpop.eup %10220 }
 0x801   :  { %v7729_v23 = vmul.f32 %v10221_v15, %v14330_v61 }
 0x802   :  { %v7597_v35 = vpop.xlane.xlu0 %7596 }
 0x803   :  { %10226 = vrcp.f32 %v7597_v35  ;;  %7793 = vst [vmem:[%s14574_s5 + $0x1a8] sm:$0xff] %v7729_v23 }
 0x805   :  { %v10223_v41 = vpop.eup %10222  ;;  %v7599_v52 = vpop.xlane.xlu1 %7598 }
 0x806   :  { %v7730_v8 = vmul.f32 %v10223_v41, %v14338_v44  ;;  %10228 = vrcp.f32 %v7599_v52 }
 0x808   :  { %7794 = vst [vmem:[%s14574_s5 + $0x1b0] sm:$0xff] %v7730_v8  ;;  %v10225_v58 = vpop.eup %10224 }
 0x809   :  { %v7731_v16 = vmul.f32 %v10225_v58, %v14346_v47 }
 0x80a   :  { %v7601_v59 = vpop.xlane.xlu0 %7600 }
 0x80b   :  { %10230 = vrcp.f32 %v7601_v59  ;;  %7795 = vst [vmem:[%s14574_s5 + $0x1b8] sm:$0xff] %v7731_v16 }
 0x80d   :  { %v10227_v61 = vpop.eup %10226  ;;  %v7603_v10 = vpop.xlane.xlu1 %7602 }
 0x80e   :  { %v7732_v46 = vmul.f32 %v10227_v61, %v14354_v20  ;;  %10232 = vrcp.f32 %v7603_v10 }
 0x810   :  { %7796 = vst [vmem:[%s14574_s5 + $0x1c0] sm:$0xff] %v7732_v46  ;;  %v10229_v44 = vpop.eup %10228  ;;  %v7605_v48 = vpop.xlane.xlu0 %7604 }
 0x811   :  { %v7733_v38 = vmul.f32 %v10229_v44, %v14363_v31  ;;  %10234 = vrcp.f32 %v7605_v48 }
 0x812   :  { %v7607_v47 = vpop.xlane.xlu1 %7606 }
 0x813   :  { %7797 = vst [vmem:[%s14574_s5 + $0x1c8] sm:$0xff] %v7733_v38  ;;  %10236 = vrcp.f32 %v7607_v47 }
 0x815   :  { %v10231_v50 = vpop.eup %10230 }
 0x816   :  { %v7734_v20 = vmul.f32 %v10231_v50, %v14370_v27 }
 0x818   :  { %7798 = vst [vmem:[%s14574_s5 + $0x1d0] sm:$0xff] %v7734_v20  ;;  %v10233_v29 = vpop.eup %10232  ;;  %v7609_v19 = vpop.xlane.xlu0 %7608 }
 0x819   :  { %v7735_v62 = vmul.f32 %v10233_v29, %v14378_v33  ;;  %10238 = vrcp.f32 %v7609_v19 }
 0x81a   :  { %v7611_v31 = vpop.xlane.xlu1 %7610 }
 0x81b   :  { %v10235_v32 = vpop.eup %10234  ;;  %7799 = vst [vmem:[%s14574_s5 + $0x1d8] sm:$0xff] %v7735_v62  ;;  %10240 = vrcp.f32 %v7611_v31 }
 0x81c   :  { %v7736_v14 = vmul.f32 %v10235_v32, %v14381_v57 }
 0x81d   :  { %v10237_v17 = vpop.eup %10236 }
 0x81e   :  { %7800 = vst [vmem:[%s14574_s5 + $0x1e0] sm:$0xff] %v7736_v14  ;;  %v7737_v27 = vmul.f32 %v10237_v17, %v14384_v12 }
 0x820   :  { %7801 = vst [vmem:[%s14574_s5 + $0x1e8] sm:$0xff] %v7737_v27 }
 0x823   :  { %v10239_v33 = vpop.eup %10238 }
 0x824   :  { %v7738_v36 = vmul.f32 %v10239_v33, %v14387_v22 }
 0x825   :  { %v10241_v53 = vpop.eup %10240 }
 0x826   :  { %7802 = vst [vmem:[%s14574_s5 + $0x1f0] sm:$0xff] %v7738_v36  ;;  %v7739_v57 = vmul.f32 %v10241_v53, %v14390_v39 }
 0x828   :  { %7803 = vst [vmem:[%s14574_s5 + $0x1f8] sm:$0xff] %v7739_v57 }

</bundles_post_ra>
